<compile_context>
chip_gen: v5e
topology: v5e:2x2
jax: 0.10.0
libtpu: 0.0.40
codegen_flags: <defaults>
</compile_context>

<pallas_src>
import jax
import jax.numpy as jnp
from jax import lax
from jax.experimental import pallas as pl
from jax.experimental.pallas import tpu as pltpu

BN_EPS = 1e-5
LANE = 128


def basic_block_kernel(x_ref, w1_ref, w2_ref, alpha_ref, o_ref):
    # x_ref     : (N, H, W, Cin)        un-padded NHWC input (VMEM)
    # w1_ref    : (9*Cin, C)            conv1 im2col weights, C = lane-padded Cout (VMEM)
    # w2_ref    : (9*C,   C)            conv2 im2col weights (VMEM)
    # alpha_ref : (1, 1)                shared PReLU slope (SMEM scalar)
    # o_ref     : (N, H, W, C)          lane-dense output (channels >= Cout are zero)
    n, h, w, _ = x_ref.shape
    c = o_ref.shape[-1]
    n_px = n * h * w
    inv_n = 1.0 / float(n_px)
    alpha = alpha_ref[0, 0]  # scalar PReLU slope (nn.PReLU() default: one parameter)

    def pad_hw(t):
        """(n, h, w, ch) -> (n, h+2, w+2, ch) with a zero halo, built functionally
        (no scratch memset / partial store / reload)."""
        ch = t.shape[-1]
        zrow = jnp.zeros((n, 1, w, ch), t.dtype)
        t = jnp.concatenate([zrow, t, zrow], axis=1)
        zcol = jnp.zeros((n, h + 2, 1, ch), t.dtype)
        return jnp.concatenate([zcol, t, zcol], axis=2)

    def im2col_3x3(t):
        """(n, h, w, ch) -> (n*h*w, 9*ch); tap-major, channel-minor (matches weights)."""
        ch = t.shape[-1]
        tp = pad_hw(t)
        cols = [tp[:, dy:dy + h, dx:dx + w, :].reshape(n_px, ch)
                for dy in range(3) for dx in range(3)]
        return jnp.concatenate(cols, axis=1)

    def bn_prelu(acc):
        # Training-mode BN (biased variance, gamma=1, beta=0) with single-pass stats,
        # then PReLU with the shared scalar slope.
        # var = E[x^2] - E[x]^2: mild cancellation for large |x| (fine in f32 here).
        s = jnp.sum(acc, axis=0, keepdims=True)
        ss = jnp.sum(acc * acc, axis=0, keepdims=True)
        mean = s * inv_n
        var = ss * inv_n - mean * mean
        y = (acc - mean) * lax.rsqrt(var + BN_EPS)
        return jnp.where(y >= 0.0, y, alpha * y)

    x = x_ref[...]

    # conv1 as one MXU matmul: (n_px, 9*Cin) x (9*Cin, C)
    acc1 = jnp.dot(im2col_3x3(x), w1_ref[...], preferred_element_type=jnp.float32)
    y1 = bn_prelu(acc1)                                   # (n_px, C) lane-dense

    # conv2 as one MXU matmul: (n_px, 9*C) x (9*C, C)
    acc2 = jnp.dot(im2col_3x3(y1.reshape(n, h, w, c)), w2_ref[...],
                   preferred_element_type=jnp.float32)
    y2 = bn_prelu(acc2)                                   # (n_px, C) lane-dense

    o_ref[...] = y2.reshape(n, h, w, c)                   # unmasked, lane-dense store


def _pack_conv_weight(w_oihw, cin_pad, cout_pad):
    """OIHW (O, I, 3, 3) -> im2col matrix (9*cin_pad, cout_pad), tap-major /
    channel-minor, zero-padded so the kernel activations stay lane-dense."""
    o, i, kh, kw = w_oihw.shape
    wt = jnp.transpose(w_oihw, (2, 3, 1, 0))                       # (kh, kw, I, O)
    wt = jnp.pad(wt, ((0, 0), (0, 0), (0, cin_pad - i), (0, cout_pad - o)))
    return wt.reshape(kh * kw * cin_pad, cout_pad).astype(jnp.float32)


def basic_block(x_nchw, w1_oihw, w2_oihw, alpha):
    """BasicBlock forward.  x: (N, Cin, H, W) f32; weights OIHW; alpha: scalar/(1,).
    Returns (N, Cout, H, W) f32."""
    n, cin, h, w = x_nchw.shape
    cout = w1_oihw.shape[0]
    c_pad = -(-cout // LANE) * LANE                                # lane-dense channel width

    # Layout glue (would disappear with an NHWC end-to-end model).
    x_nhwc = jnp.transpose(x_nchw, (0, 2, 3, 1))                   # (N, H, W, Cin)
    w1p = _pack_conv_weight(w1_oihw, cin_pad=cin, cout_pad=c_pad)  # (9*Cin, c_pad)
    w2p = _pack_conv_weight(w2_oihw, cin_pad=c_pad, cout_pad=c_pad)  # (9*c_pad, c_pad)
    alpha_smem = jnp.asarray(alpha, jnp.float32).reshape(1, 1)

    vmem = pltpu.MemorySpace.VMEM
    smem = pltpu.MemorySpace.SMEM
    out_padded = pl.pallas_call(
        basic_block_kernel,
        out_shape=jax.ShapeDtypeStruct((n, h, w, c_pad), jnp.float32),
        in_specs=[pl.BlockSpec(memory_space=vmem),
                  pl.BlockSpec(memory_space=vmem),
                  pl.BlockSpec(memory_space=vmem),
                  pl.BlockSpec(memory_space=smem)],
        out_specs=pl.BlockSpec(memory_space=vmem),
        compiler_params=pltpu.CompilerParams(vmem_limit_bytes=32 * 1024 * 1024),
    )(x_nhwc, w1p, w2p, alpha_smem)

    out_nhwc = out_padded[..., :cout]                              # drop lane padding
    return jnp.transpose(out_nhwc, (0, 3, 1, 2))


def _reference(x_nchw, w1, w2, alpha):
    """Pure-JAX reference replicating the PyTorch forward (training-mode BN,
    shared scalar PReLU)."""
    def conv(x, wt):
        return lax.conv_general_dilated(
            x, wt, window_strides=(1, 1), padding=((1, 1), (1, 1)),
            dimension_numbers=("NCHW", "OIHW", "NCHW"))

    def bn(x):
        mean = jnp.mean(x, axis=(0, 2, 3), keepdims=True)
        var = jnp.mean((x - mean) ** 2, axis=(0, 2, 3), keepdims=True)
        return (x - mean) * lax.rsqrt(var + BN_EPS)

    def prelu(x):
        return jnp.where(x >= 0.0, x, alpha * x)

    y = prelu(bn(conv(x_nchw, w1)))
    return prelu(bn(conv(y, w2)))


if __name__ == "__main__":
    key = jax.random.PRNGKey(0)
    k_x, k_w1, k_w2 = jax.random.split(key, 3)

    N, Cin, H, W = 2, 4, 16, 16
    planes = 8  # Cout

    x = jax.random.normal(k_x, (N, Cin, H, W), jnp.float32)

    # kaiming_normal_(a=1): gain = sqrt(2/(1+1^2)) = 1, std = 1/sqrt(fan_in)
    std1 = 1.0 / float(Cin * 9) ** 0.5
    std2 = 1.0 / float(planes * 9) ** 0.5
    w1 = jax.random.normal(k_w1, (planes, Cin, 3, 3), jnp.float32) * std1
    w2 = jax.random.normal(k_w2, (planes, planes, 3, 3), jnp.float32) * std2
    alpha = jnp.full((1,), 0.25, jnp.float32)  # nn.PReLU() default: one shared slope

    out = jax.block_until_ready(basic_block(x, w1, w2, alpha))
    ref = _reference(x, w1, w2, alpha)
    if not bool(jnp.allclose(out, ref, atol=1e-4, rtol=1e-4)):
        raise AssertionError("Pallas output mismatch vs JAX reference")
    print("KERNEL_OK")
</pallas_src>

<mosaic_0001>
module attributes {stable_mosaic.version = 11 : i64} {
  func.func @basic_block_kernel(%arg0: memref<2x16x16x4xf32, #tpu.memory_space<vmem>>, %arg1: memref<36x128xf32, #tpu.memory_space<vmem>>, %arg2: memref<1152x128xf32, #tpu.memory_space<vmem>>, %arg3: memref<1x1xf32, #tpu.memory_space<smem>>, %arg4: memref<2x16x16x128xf32, #tpu.memory_space<vmem>>) attributes {dimension_semantics = [], scalar_prefetch = 0 : i64, scratch_operands = 0 : i64, tpu.core_type = #tpu.core_type<tc>} {
    %c0 = arith.constant 0 : index
    %c0_0 = arith.constant 0 : index
    %0 = memref.load %arg3[%c0, %c0_0] : memref<1x1xf32, #tpu.memory_space<smem>>
    %c0_1 = arith.constant 0 : index
    %c0_2 = arith.constant 0 : index
    %c0_3 = arith.constant 0 : index
    %c0_4 = arith.constant 0 : index
    %1 = vector.load %arg0[%c0_1, %c0_2, %c0_3, %c0_4] : memref<2x16x16x4xf32, #tpu.memory_space<vmem>>, vector<2x16x16x4xf32>
    %cst = arith.constant 0.000000e+00 : f32
    %2 = vector.broadcast %cst : f32 to vector<2x1x16x4xf32>
    %3 = tpu.concatenate %2, %1, %2 in 1 : vector<2x1x16x4xf32>, vector<2x16x16x4xf32>, vector<2x1x16x4xf32> -> vector<2x18x16x4xf32>
    %cst_5 = arith.constant 0.000000e+00 : f32
    %4 = vector.broadcast %cst_5 : f32 to vector<2x18x1x4xf32>
    %5 = tpu.concatenate %4, %3, %4 in 2 : vector<2x18x1x4xf32>, vector<2x18x16x4xf32>, vector<2x18x1x4xf32> -> vector<2x18x18x4xf32>
    %6 = vector.extract_strided_slice %5 {offsets = [0, 0, 0, 0], sizes = [2, 16, 16, 4], strides = [1, 1, 1, 1]} : vector<2x18x18x4xf32> to vector<2x16x16x4xf32>
    %7 = vector.shape_cast %6 : vector<2x16x16x4xf32> to vector<512x4xf32>
    %8 = vector.extract_strided_slice %5 {offsets = [0, 0, 1, 0], sizes = [2, 16, 16, 4], strides = [1, 1, 1, 1]} : vector<2x18x18x4xf32> to vector<2x16x16x4xf32>
    %9 = vector.shape_cast %8 : vector<2x16x16x4xf32> to vector<512x4xf32>
    %10 = vector.extract_strided_slice %5 {offsets = [0, 0, 2, 0], sizes = [2, 16, 16, 4], strides = [1, 1, 1, 1]} : vector<2x18x18x4xf32> to vector<2x16x16x4xf32>
    %11 = vector.shape_cast %10 : vector<2x16x16x4xf32> to vector<512x4xf32>
    %12 = vector.extract_strided_slice %5 {offsets = [0, 1, 0, 0], sizes = [2, 16, 16, 4], strides = [1, 1, 1, 1]} : vector<2x18x18x4xf32> to vector<2x16x16x4xf32>
    %13 = vector.shape_cast %12 : vector<2x16x16x4xf32> to vector<512x4xf32>
    %14 = vector.extract_strided_slice %5 {offsets = [0, 1, 1, 0], sizes = [2, 16, 16, 4], strides = [1, 1, 1, 1]} : vector<2x18x18x4xf32> to vector<2x16x16x4xf32>
    %15 = vector.shape_cast %14 : vector<2x16x16x4xf32> to vector<512x4xf32>
    %16 = vector.extract_strided_slice %5 {offsets = [0, 1, 2, 0], sizes = [2, 16, 16, 4], strides = [1, 1, 1, 1]} : vector<2x18x18x4xf32> to vector<2x16x16x4xf32>
    %17 = vector.shape_cast %16 : vector<2x16x16x4xf32> to vector<512x4xf32>
    %18 = vector.extract_strided_slice %5 {offsets = [0, 2, 0, 0], sizes = [2, 16, 16, 4], strides = [1, 1, 1, 1]} : vector<2x18x18x4xf32> to vector<2x16x16x4xf32>
    %19 = vector.shape_cast %18 : vector<2x16x16x4xf32> to vector<512x4xf32>
    %20 = vector.extract_strided_slice %5 {offsets = [0, 2, 1, 0], sizes = [2, 16, 16, 4], strides = [1, 1, 1, 1]} : vector<2x18x18x4xf32> to vector<2x16x16x4xf32>
    %21 = vector.shape_cast %20 : vector<2x16x16x4xf32> to vector<512x4xf32>
    %22 = vector.extract_strided_slice %5 {offsets = [0, 2, 2, 0], sizes = [2, 16, 16, 4], strides = [1, 1, 1, 1]} : vector<2x18x18x4xf32> to vector<2x16x16x4xf32>
    %23 = vector.shape_cast %22 : vector<2x16x16x4xf32> to vector<512x4xf32>
    %24 = tpu.concatenate %7, %9, %11, %13, %15, %17, %19, %21, %23 in 1 : vector<512x4xf32>, vector<512x4xf32>, vector<512x4xf32>, vector<512x4xf32>, vector<512x4xf32>, vector<512x4xf32>, vector<512x4xf32>, vector<512x4xf32>, vector<512x4xf32> -> vector<512x36xf32>
    %c0_6 = arith.constant 0 : index
    %c0_7 = arith.constant 0 : index
    %25 = vector.load %arg1[%c0_6, %c0_7] : memref<36x128xf32, #tpu.memory_space<vmem>>, vector<36x128xf32>
    %cst_8 = arith.constant dense<0.000000e+00> : vector<512x128xf32>
    %26 = tpu.matmul %24, %25, %cst_8 {dimension_numbers = #tpu.dot_dimension_numbers<[1], [0], [0], [1], [0, 0, 1, 1], [], []>} : vector<512x36xf32>, vector<36x128xf32>, vector<512x128xf32> -> vector<512x128xf32>
    %cst_9 = arith.constant dense<0.000000e+00> : vector<128xf32>
    %27 = vector.multi_reduction <add>, %26, %cst_9 [0] : vector<512x128xf32> to vector<128xf32>
    %28 = vector.shape_cast %27 : vector<128xf32> to vector<1x128xf32>
    %29 = arith.mulf %26, %26 : vector<512x128xf32>
    %cst_10 = arith.constant dense<0.000000e+00> : vector<128xf32>
    %30 = vector.multi_reduction <add>, %29, %cst_10 [0] : vector<512x128xf32> to vector<128xf32>
    %31 = vector.shape_cast %30 : vector<128xf32> to vector<1x128xf32>
    %cst_11 = arith.constant 0.001953125 : f32
    %32 = vector.broadcast %cst_11 : f32 to vector<1x128xf32>
    %33 = arith.mulf %28, %32 : vector<1x128xf32>
    %cst_12 = arith.constant 0.001953125 : f32
    %34 = vector.broadcast %cst_12 : f32 to vector<1x128xf32>
    %35 = arith.mulf %31, %34 : vector<1x128xf32>
    %36 = arith.mulf %33, %33 : vector<1x128xf32>
    %37 = arith.subf %35, %36 : vector<1x128xf32>
    %38 = vector.broadcast %33 : vector<1x128xf32> to vector<512x128xf32>
    %39 = arith.subf %26, %38 : vector<512x128xf32>
    %cst_13 = arith.constant 9.99999974E-6 : f32
    %40 = vector.broadcast %cst_13 : f32 to vector<1x128xf32>
    %41 = arith.addf %37, %40 : vector<1x128xf32>
    %42 = math.rsqrt %41 : vector<1x128xf32>
    %43 = vector.broadcast %42 : vector<1x128xf32> to vector<512x128xf32>
    %44 = arith.mulf %39, %43 : vector<512x128xf32>
    %cst_14 = arith.constant 0.000000e+00 : f32
    %45 = vector.broadcast %cst_14 : f32 to vector<512x128xf32>
    %46 = arith.cmpf oge, %44, %45 : vector<512x128xf32>
    %47 = vector.broadcast %0 : f32 to vector<512x128xf32>
    %48 = arith.mulf %47, %44 : vector<512x128xf32>
    %49 = arith.select %46, %44, %48 : vector<512x128xi1>, vector<512x128xf32>
    %50 = vector.shape_cast %49 : vector<512x128xf32> to vector<2x16x16x128xf32>
    %cst_15 = arith.constant 0.000000e+00 : f32
    %51 = vector.broadcast %cst_15 : f32 to vector<2x1x16x128xf32>
    %52 = tpu.concatenate %51, %50, %51 in 1 : vector<2x1x16x128xf32>, vector<2x16x16x128xf32>, vector<2x1x16x128xf32> -> vector<2x18x16x128xf32>
    %cst_16 = arith.constant 0.000000e+00 : f32
    %53 = vector.broadcast %cst_16 : f32 to vector<2x18x1x128xf32>
    %54 = tpu.concatenate %53, %52, %53 in 2 : vector<2x18x1x128xf32>, vector<2x18x16x128xf32>, vector<2x18x1x128xf32> -> vector<2x18x18x128xf32>
    %55 = vector.extract_strided_slice %54 {offsets = [0, 0, 0, 0], sizes = [2, 16, 16, 128], strides = [1, 1, 1, 1]} : vector<2x18x18x128xf32> to vector<2x16x16x128xf32>
    %56 = vector.shape_cast %55 : vector<2x16x16x128xf32> to vector<512x128xf32>
    %57 = vector.extract_strided_slice %54 {offsets = [0, 0, 1, 0], sizes = [2, 16, 16, 128], strides = [1, 1, 1, 1]} : vector<2x18x18x128xf32> to vector<2x16x16x128xf32>
    %58 = vector.shape_cast %57 : vector<2x16x16x128xf32> to vector<512x128xf32>
    %59 = vector.extract_strided_slice %54 {offsets = [0, 0, 2, 0], sizes = [2, 16, 16, 128], strides = [1, 1, 1, 1]} : vector<2x18x18x128xf32> to vector<2x16x16x128xf32>
    %60 = vector.shape_cast %59 : vector<2x16x16x128xf32> to vector<512x128xf32>
    %61 = vector.extract_strided_slice %54 {offsets = [0, 1, 0, 0], sizes = [2, 16, 16, 128], strides = [1, 1, 1, 1]} : vector<2x18x18x128xf32> to vector<2x16x16x128xf32>
    %62 = vector.shape_cast %61 : vector<2x16x16x128xf32> to vector<512x128xf32>
    %63 = vector.extract_strided_slice %54 {offsets = [0, 1, 1, 0], sizes = [2, 16, 16, 128], strides = [1, 1, 1, 1]} : vector<2x18x18x128xf32> to vector<2x16x16x128xf32>
    %64 = vector.shape_cast %63 : vector<2x16x16x128xf32> to vector<512x128xf32>
    %65 = vector.extract_strided_slice %54 {offsets = [0, 1, 2, 0], sizes = [2, 16, 16, 128], strides = [1, 1, 1, 1]} : vector<2x18x18x128xf32> to vector<2x16x16x128xf32>
    %66 = vector.shape_cast %65 : vector<2x16x16x128xf32> to vector<512x128xf32>
    %67 = vector.extract_strided_slice %54 {offsets = [0, 2, 0, 0], sizes = [2, 16, 16, 128], strides = [1, 1, 1, 1]} : vector<2x18x18x128xf32> to vector<2x16x16x128xf32>
    %68 = vector.shape_cast %67 : vector<2x16x16x128xf32> to vector<512x128xf32>
    %69 = vector.extract_strided_slice %54 {offsets = [0, 2, 1, 0], sizes = [2, 16, 16, 128], strides = [1, 1, 1, 1]} : vector<2x18x18x128xf32> to vector<2x16x16x128xf32>
    %70 = vector.shape_cast %69 : vector<2x16x16x128xf32> to vector<512x128xf32>
    %71 = vector.extract_strided_slice %54 {offsets = [0, 2, 2, 0], sizes = [2, 16, 16, 128], strides = [1, 1, 1, 1]} : vector<2x18x18x128xf32> to vector<2x16x16x128xf32>
    %72 = vector.shape_cast %71 : vector<2x16x16x128xf32> to vector<512x128xf32>
    %73 = tpu.concatenate %56, %58, %60, %62, %64, %66, %68, %70, %72 in 1 : vector<512x128xf32>, vector<512x128xf32>, vector<512x128xf32>, vector<512x128xf32>, vector<512x128xf32>, vector<512x128xf32>, vector<512x128xf32>, vector<512x128xf32>, vector<512x128xf32> -> vector<512x1152xf32>
    %c0_17 = arith.constant 0 : index
    %c0_18 = arith.constant 0 : index
    %74 = vector.load %arg2[%c0_17, %c0_18] : memref<1152x128xf32, #tpu.memory_space<vmem>>, vector<1152x128xf32>
    %cst_19 = arith.constant dense<0.000000e+00> : vector<512x128xf32>
    %75 = tpu.matmul %73, %74, %cst_19 {dimension_numbers = #tpu.dot_dimension_numbers<[1], [0], [0], [1], [0, 0, 1, 1], [], []>} : vector<512x1152xf32>, vector<1152x128xf32>, vector<512x128xf32> -> vector<512x128xf32>
    %cst_20 = arith.constant dense<0.000000e+00> : vector<128xf32>
    %76 = vector.multi_reduction <add>, %75, %cst_20 [0] : vector<512x128xf32> to vector<128xf32>
    %77 = vector.shape_cast %76 : vector<128xf32> to vector<1x128xf32>
    %78 = arith.mulf %75, %75 : vector<512x128xf32>
    %cst_21 = arith.constant dense<0.000000e+00> : vector<128xf32>
    %79 = vector.multi_reduction <add>, %78, %cst_21 [0] : vector<512x128xf32> to vector<128xf32>
    %80 = vector.shape_cast %79 : vector<128xf32> to vector<1x128xf32>
    %cst_22 = arith.constant 0.001953125 : f32
    %81 = vector.broadcast %cst_22 : f32 to vector<1x128xf32>
    %82 = arith.mulf %77, %81 : vector<1x128xf32>
    %cst_23 = arith.constant 0.001953125 : f32
    %83 = vector.broadcast %cst_23 : f32 to vector<1x128xf32>
    %84 = arith.mulf %80, %83 : vector<1x128xf32>
    %85 = arith.mulf %82, %82 : vector<1x128xf32>
    %86 = arith.subf %84, %85 : vector<1x128xf32>
    %87 = vector.broadcast %82 : vector<1x128xf32> to vector<512x128xf32>
    %88 = arith.subf %75, %87 : vector<512x128xf32>
    %cst_24 = arith.constant 9.99999974E-6 : f32
    %89 = vector.broadcast %cst_24 : f32 to vector<1x128xf32>
    %90 = arith.addf %86, %89 : vector<1x128xf32>
    %91 = math.rsqrt %90 : vector<1x128xf32>
    %92 = vector.broadcast %91 : vector<1x128xf32> to vector<512x128xf32>
    %93 = arith.mulf %88, %92 : vector<512x128xf32>
    %cst_25 = arith.constant 0.000000e+00 : f32
    %94 = vector.broadcast %cst_25 : f32 to vector<512x128xf32>
    %95 = arith.cmpf oge, %93, %94 : vector<512x128xf32>
    %96 = vector.broadcast %0 : f32 to vector<512x128xf32>
    %97 = arith.mulf %96, %93 : vector<512x128xf32>
    %98 = arith.select %95, %93, %97 : vector<512x128xi1>, vector<512x128xf32>
    %99 = vector.shape_cast %98 : vector<512x128xf32> to vector<2x16x16x128xf32>
    %c0_26 = arith.constant 0 : index
    %c0_27 = arith.constant 0 : index
    %c0_28 = arith.constant 0 : index
    %c0_29 = arith.constant 0 : index
    %100 = vector.load %arg4[%c0_26, %c0_27, %c0_28, %c0_29] : memref<2x16x16x128xf32, #tpu.memory_space<vmem>>, vector<2x16x16x128xf32>
    tpu.vector_store %arg4[%c0_26, %c0_27, %c0_28, %c0_29], %99 {strides = array<i32>} : memref<2x16x16x128xf32, #tpu.memory_space<vmem>>, vector<2x16x16x128xf32>,
    return
  }
}

</mosaic_0001>

<bundles_post_ra>
// kernel: tpu_custom_call.1
= control target key start
LH: loop header
LB: loop body
LE: loop exit
PB: predicated region body
PF: predicated region fallthrough
CT: control target
= control target key end

     0   :  { %10 = vsyncpa [#allocation4], 0  ;;  %s16165_s0 = inlined_call_operand.vmem [shape: f32[2,16,16,4], index: 0, kind: input, shape index: {}]   ;;  %s16166_s1 = inlined_call_operand.vmem [shape: f32[36,128], index: 1, kind: input, shape index: {}]   ;;  %s16167_s2 = inlined_call_operand.hbm [shape: f32[1152,128], index: 2, kind: input, shape index: {}]   ;;  %s16168_s3 = inlined_call_operand.<no memory space> [shape: f32[1,1], index: 3, kind: input, shape index: {}]   ;;  %s16169_s4 = inlined_call_operand.hbm [shape: f32[2,16,16,128], index: 4, kind: output, shape index: {}]  }
   0x1   :  { %11 = vsyncpa [#allocation5], 0  ;;  %s20_s17 = sshll.u32 %s16167_s2, 4  ;;  %s7664_s18 = smov [#allocation3]   ;;  %s21_s17 = int_to_ptr.hbm [resolvable:$true] %s20_s17 }
   0x2   :  { %s22_s19 = sshll.u32 %s7664_s18, 4  ;;  %s7665_s20 = smov 128   ;;  %s23_s19 = int_to_ptr.vmem [resolvable:$true] %s22_s19 }
   0x3   :  { %s7666_s21 = smov 8  }
   0x4   :  { %28 = dma.hbm_to_vmem [thread:$0]  %s21_s17, 18432, %s23_s19, [#allocation4], %s7665_s20, %s7665_s20, %s7666_s21  }
   0x5   :  { %7660 = dma.done.wait [#allocation4], 18432  }
   0x6   :  { %7661 = vsyncadd [#allocation4], 4294948864  ;;  %vm165_vm0 = vcmask 1040384   ;;  %v7667_v0 = vmov 0.0   ;;  %vm488_vm1 = vcmask 1046528   ;;  %v38_v13 = vld [vmem:[%s16165_s0 + $0x10] sm:$0xff] }
   0x7   :  { %v7707_v1 = vrot.slane %v7667_v0, 7  ;;  %v36_v14 = vld [vmem:[%s16165_s0] sm:$0xff]  ;;  %vm644_vm2 = vcmask 1045504   ;;  %v39_v15 = vld [vmem:[%s16165_s0 + $0x18] sm:$0xff]  ;;  %v171_v16 = vrot.slane %v38_v13, 7  ;;  %v37_v17 = vld [vmem:[%s16165_s0 + $0x8] sm:$0xff] }
   0x8   :  { %v168_v18 = vrot.slane %v36_v14, 7  ;;  %s7668_s29 = smov 4   ;;  %v169_v19 = vrot.slane %v37_v17, 7  ;;  %v172_v24 = vrot.slane %v39_v15, 7  ;;  %s7669_s30 = smov 24   ;;  %v40_v50 = vld [vmem:[%s16165_s0 + $0x20] sm:$0xff] }
   0x9   :  { %16644 = vst [vmem:[#allocation9_spill] sm:$0xff] %v7707_v1  ;;  %v7711_v2 = vsel %vm165_vm0, 0.0, %v7707_v1  ;;  %v393_v3 = vsel %vm165_vm0, %v7707_v1, 0.0  ;;  %v490_v4 = vrot.slane %v7707_v1, 1  ;;  %v646_v7 = vrot.slane %v7707_v1, 2  ;;  %s7670_s5 = smov 12  }
   0xa   :  { %v489_v5 = vrot.slane %v7711_v2, 1  ;;  %v492_v6 = vrot.slane %v393_v3, 1  ;;  %v645_v10 = vrot.slane %v7711_v2, 2  ;;  %v648_v11 = vrot.slane %v393_v3, 2  ;;  %s7671_s6 = smov 20   ;;  %s7672_s7 = smov 16  }
   0xb   :  { %v7744_v20 = vsel %vm165_vm0, 0.0, %v171_v16  ;;  %v7747_v21 = vsel %vm165_vm0, 0.0, %v168_v18  ;;  %v7760_v25 = vsel %vm165_vm0, %v168_v18, %v169_v19  ;;  %v7771_v31 = vsel %vm165_vm0, %v171_v16, %v172_v24  ;;  %s7673_s8 = smov 28   ;;  %s7674_s9 = smov 32   ;;  %v41_v51 = vld [vmem:[%s16165_s0 + $0x28] sm:$0xff] }
   0xc   :  { %v7719_v8 = vsel %vm488_vm1, %v489_v5, %v490_v4  ;;  %v7722_v9 = vsel %vm488_vm1, %v490_v4, %v492_v6  ;;  %v7750_v22 = vsel %vm644_vm2, %v645_v10, %v646_v7  ;;  %v7753_v23 = vsel %vm644_vm2, %v646_v7, %v648_v11  ;;  %1772 = vrot.lane.b32.xlu2 %v7744_v20, %s7669_s30  ;;  %v43_v5 = vld [vmem:[%s16165_s0 + $0x38] sm:$0xff]  ;;  %v42_v6 = vld [vmem:[%s16165_s0 + $0x30] sm:$0xff] }
   0xd   :  { %16645 = vst [vmem:[#allocation10_spill] sm:$0xff] %v7719_v8  ;;  %v7727_v12 = vpack.i.bf16 %v7722_v9, %v7719_v8  ;;  %1196 = vrot.lane.b32.xlu1 %v7747_v21, %s7670_s5  ;;  %v650_v26 = vrot.slane %v7747_v21, 2  ;;  %v651_v27 = vrot.slane %v7760_v25, 2  ;;  %v494_v28 = vrot.slane %v7747_v21, 1 }
   0xe   :  { %16646 = vst [vmem:[#allocation11_spill] sm:$0xff] %v7722_v9  ;;  %v495_v29 = vrot.slane %v7760_v25, 1  ;;  %v7768_v30 = vpack.i.bf16 %v7753_v23, %v7750_v22  ;;  %v499_v34 = vrot.slane %v7744_v20, 1  ;;  %v500_v35 = vrot.slane %v7771_v31, 1 }
   0xf   :  { %7583 = vrot.lane.b32.xlu0 %v7727_v12, %s7668_s29  ;;  %16647 = vst [vmem:[#allocation12_spill] sm:$0xff] %v7750_v22  ;;  %v652_v32 = vsel %vm644_vm2, %v650_v26, %v651_v27  ;;  %v655_v36 = vrot.slane %v7744_v20, 2  ;;  %v656_v37 = vrot.slane %v7771_v31, 2  ;;  %v394_v39 = vsel %vm165_vm0, %v169_v19, 0.0  ;;  %v2850_v19 = vld [vmem:[%s16166_s1 + $0x20] sm:$0xf] }
  0x10   :  { %16648 = vst [vmem:[#allocation13_spill] sm:$0xff] %v7753_v23  ;;  %v496_v33 = vsel %vm488_vm1, %v494_v28, %v495_v29  ;;  %v501_v38 = vsel %vm488_vm1, %v499_v34, %v500_v35  ;;  %v497_v41 = vrot.slane %v394_v39, 1  ;;  %v653_v42 = vrot.slane %v394_v39, 2  ;;  %v2849_v26 = vld [vmem:[%s16166_s1 + $0x18] sm:$0xff]  ;;  %v2848_v28 = vld [vmem:[%s16166_s1 + $0x10] sm:$0xff] }
  0x11   :  { %v657_v40 = vsel %vm644_vm2, %v655_v36, %v656_v37  ;;  %v395_v44 = vsel %vm165_vm0, %v172_v24, 0.0  ;;  %v174_v52 = vrot.slane %v40_v50, 7  ;;  %v175_v53 = vrot.slane %v41_v51, 7 }
  0x12   :  { %v498_v43 = vsel %vm488_vm1, %v495_v29, %v497_v41  ;;  %v654_v45 = vsel %vm644_vm2, %v651_v27, %v653_v42  ;;  %v502_v46 = vrot.slane %v395_v44, 1  ;;  %v658_v47 = vrot.slane %v395_v44, 2  ;;  %v2847_v29 = vld [vmem:[%s16166_s1 + $0x8] sm:$0xff]  ;;  %v44_v44 = vld [vmem:[%s16165_s0 + $0x40] sm:$0xff] }
  0x13   :  { %v7816_v54 = vsel %vm165_vm0, %v174_v52, %v175_v53  ;;  %v7819_v55 = vsel %vm165_vm0, 0.0, %v174_v52  ;;  %v396_v62 = vsel %vm165_vm0, %v175_v53, 0.0  ;;  %v178_v7 = vrot.slane %v43_v5, 7 }
  0x14   :  { %1580 = vrot.lane.b32.xlu2 %v652_v32, %s7671_s6  ;;  %v7798_v48 = vsel %vm488_vm1, %v500_v35, %v502_v46  ;;  %v7801_v49 = vsel %vm644_vm2, %v656_v37, %v658_v47  ;;  %v504_v56 = vrot.slane %v7819_v55, 1  ;;  %v505_v57 = vrot.slane %v7816_v54, 1 }
  0x15   :  { %1388 = vrot.lane.b32.xlu1 %v496_v33, %s7672_s7  ;;  %v660_v59 = vrot.slane %v7819_v55, 2  ;;  %v661_v60 = vrot.slane %v7816_v54, 2  ;;  %v663_v63 = vrot.slane %v396_v62, 2  ;;  %v507_v0 = vrot.slane %v396_v62, 1 }
  0x16   :  { %v7827_v58 = vsel %vm488_vm1, %v504_v56, %v505_v57  ;;  %v177_v10 = vrot.slane %v42_v6, 7  ;;  %vm3044_vm3 = vcmask 1043456   ;;  %v397_v34 = vsel %vm165_vm0, %v178_v7, 0.0 }
  0x17   :  { %7588 = vrot.lane.b32.xlu0 %v7768_v30, %s7666_s21  ;;  %v7837_v61 = vsel %vm644_vm2, %v660_v59, %v661_v60  ;;  %v7851_v3 = vsel %vm644_vm2, %v661_v60, %v663_v63  ;;  %v7854_v4 = vsel %vm488_vm1, %v505_v57, %v507_v0  ;;  %7276 = vmatpush.msk.msra.mxu0 %vm3044_vm3, %v2850_v19  ;;  %v512_v35 = vrot.slane %v397_v34, 1 }
  0x18   :  { %v7873_v11 = vsel %vm165_vm0, %v177_v10, %v178_v7  ;;  %v7876_v13 = vsel %vm165_vm0, 0.0, %v177_v10  ;;  %7533 = vmatpush.msk.msra.mxu3 %vm3044_vm3, %v2850_v19  ;;  %vm2330_vm4 = vcmask 31744   ;;  %vm2393_vm5 = vcmask 64512   ;;  %vm11548_vm3 = vmneg %vm165_vm0 }
  0x19   :  { %v509_v14 = vrot.slane %v7876_v13, 1  ;;  %v510_v15 = vrot.slane %v7873_v11, 1  ;;  %v665_v16 = vrot.slane %v7876_v13, 2  ;;  %v666_v17 = vrot.slane %v7873_v11, 2  ;;  %3060 = vmatpush.msra.mxu0 %v2849_v26 }
  0x1a   :  { %7534 = vmatpush.msra.mxu3 %v2849_v26  ;;  %vm2456_vm6 = vcmask 97280   ;;  %vm2521_vm7 = vcmask 130048   ;;  %vm2586_vm8 = vcmask 162816   ;;  %vm2651_vm9 = vcmask 195584  }
  0x1b   :  { %v7894_v24 = vsel %vm488_vm1, %v509_v14, %v510_v15  ;;  %v7900_v27 = vsel %vm644_vm2, %v665_v16, %v666_v17  ;;  %3061 = vmatpush.msra.mxu0 %v2848_v28  ;;  %v7927_v37 = vsel %vm488_vm1, %v510_v15, %v512_v35  ;;  %vm2716_vm10 = vcmask 228352  }
  0x1c   :  { %1198 = vrot.lane.b32.xlu2 %v7760_v25, %s7670_s5  ;;  %7535 = vmatpush.msra.mxu3 %v2848_v28  ;;  %vm2781_vm11 = vcmask 261120   ;;  %vm2851_vm12 = vcmask 293888  }
  0x1d   :  { %2144 = vrot.lane.b32.xlu1 %v657_v40, %s7674_s9  ;;  %3062 = vmatpush.msra.mxu0 %v2847_v29 }
  0x1e   :  { %7536 = vmatpush.msra.mxu3 %v2847_v29 }
  0x1f   :  { %1958 = vrot.lane.b32.xlu0 %v501_v38, %s7673_s8 }
  0x24   :  { %1774 = vrot.lane.b32.xlu2 %v7771_v31, %s7669_s30 }
  0x25   :  { %1582 = vrot.lane.b32.xlu1 %v654_v45, %s7671_s6 }
  0x27   :  { %1390 = vrot.lane.b32.xlu0 %v498_v43, %s7672_s7 }
  0x2c   :  { %828 = vrot.lane.b32.xlu2 %v496_v33, %s7668_s29  ;;  %v2846_v33 = vld [vmem:[%s16166_s1] sm:$0xff] }
  0x2d   :  { %2146 = vrot.lane.b32.xlu1 %v7801_v49, %s7674_s9  ;;  %3063 = vmatpush.msra.mxu0 %v2846_v33 }
  0x2e   :  { %7537 = vmatpush.msra.mxu3 %v2846_v33 }
  0x2f   :  { %1960 = vrot.lane.b32.xlu0 %v7798_v48, %s7673_s8 }
  0x34   :  { %1392 = vrot.lane.b32.xlu2 %v501_v38, %s7672_s7 }
  0x35   :  { %1200 = vrot.lane.b32.xlu1 %v7744_v20, %s7670_s5 }
  0x37   :  { %1014 = vrot.lane.b32.xlu0 %v652_v32, %s7666_s21 }
  0x3c   :  { %1962 = vrot.lane.b32.xlu2 %v7827_v58, %s7673_s8 }
  0x3d   :  { %1776 = vrot.lane.b32.xlu1 %v7819_v55, %s7669_s30 }
  0x3f   :  { %1584 = vrot.lane.b32.xlu0 %v657_v40, %s7671_s6 }
  0x44   :  { %1016 = vrot.lane.b32.xlu2 %v654_v45, %s7666_s21  ;;  %v7946_v45 = vld [vmem:[%s16165_s0 + $0x48] sm:$0xff] }
  0x45   :  { %830 = vrot.lane.b32.xlu1 %v498_v43, %s7668_s29 }
  0x47   :  { %2148 = vrot.lane.b32.xlu0 %v7837_v61, %s7674_s9 }
  0x4c   :  { %1586 = vrot.lane.b32.xlu2 %v7801_v49, %s7671_s6 }
  0x4d   :  { %1394 = vrot.lane.b32.xlu1 %v7798_v48, %s7672_s7 }
  0x4f   :  { %1202 = vrot.lane.b32.xlu0 %v7771_v31, %s7670_s5 }
  0x54   :  { %2150 = vrot.lane.b32.xlu2 %v7851_v3, %s7674_s9 }
  0x55   :  { %1964 = vrot.lane.b32.xlu1 %v7854_v4, %s7673_s8 }
  0x57   :  { %1778 = vrot.lane.b32.xlu0 %v7816_v54, %s7669_s30 }
  0x5c   :  { %1204 = vrot.lane.b32.xlu2 %v7819_v55, %s7670_s5 }
  0x5d   :  { %1018 = vrot.lane.b32.xlu1 %v657_v40, %s7666_s21 }
  0x5f   :  { %832 = vrot.lane.b32.xlu0 %v501_v38, %s7668_s29  ;;  %v668_v38 = vrot.slane %v397_v34, 2 }
  0x61   :  { %v7936_v42 = vsel %vm644_vm2, %v666_v17, %v668_v38 }
  0x64   :  { %1780 = vrot.lane.b32.xlu2 %v7876_v13, %s7669_s30 }
  0x65   :  { %1588 = vrot.lane.b32.xlu1 %v7837_v61, %s7671_s6 }
  0x66   :  { %v7888_v18 = vpop.permute.xlu2 %1772 }
  0x67   :  { %1396 = vrot.lane.b32.xlu0 %v7827_v58, %s7672_s7 }
  0x6c   :  { %834 = vrot.lane.b32.xlu2 %v7798_v48, %s7668_s29  ;;  %v180_v48 = vrot.slane %v44_v44, 7 }
  0x6d   :  { %2152 = vrot.lane.b32.xlu1 %v7900_v27, %s7674_s9 }
  0x6e   :  { %v1581_v32 = vpop.permute.xlu2 %1580  ;;  %v7965_v59 = vsel %vm165_vm0, 0.0, %v180_v48 }
  0x6f   :  { %1966 = vrot.lane.b32.xlu0 %v7894_v24, %s7673_s8  ;;  %v670_v63 = vrot.slane %v7965_v59, 2  ;;  %v514_v7 = vrot.slane %v7965_v59, 1 }
  0x74   :  { %1398 = vrot.lane.b32.xlu2 %v7854_v4, %s7672_s7 }
  0x75   :  { %1206 = vrot.lane.b32.xlu1 %v7816_v54, %s7670_s5 }
  0x76   :  { %v7924_v36 = vpop.permute.xlu2 %1198 }
  0x77   :  { %1020 = vrot.lane.b32.xlu0 %v7801_v49, %s7666_s21  ;;  %v181_v49 = vrot.slane %v7946_v45, 7 }
  0x7c   :  { %1968 = vrot.lane.b32.xlu2 %v7927_v37, %s7673_s8 }
  0x7d   :  { %1782 = vrot.lane.b32.xlu1 %v7873_v11, %s7669_s30 }
  0x7e   :  { %v1775_v41 = vpop.permute.xlu2 %1774 }
  0x7f   :  { %1590 = vrot.lane.b32.xlu0 %v7851_v3, %s7671_s6  ;;  %v1197_v40 = vpop.permute.xlu1 %1196 }
  0x81   :  { %v7584_v39 = vpop.permute.xlu0 %7583 }
  0x82   :  { %v7585_v43 = vunpack.i.l.bf16 %v7584_v39  ;;  %v7586_v5 = vunpack.i.h.bf16 %v7584_v39 }
  0x84   :  { %1022 = vrot.lane.b32.xlu2 %v7837_v61, %s7666_s21  ;;  %v2331_v50 = vsel %vm2330_vm4, %v7711_v2, %v7585_v43 }
  0x85   :  { %836 = vrot.lane.b32.xlu1 %v7827_v58, %s7668_s29  ;;  %v7962_v58 = vsel %vm165_vm0, %v180_v48, %v181_v49 }
  0x86   :  { %v829_v51 = vpop.permute.xlu2 %828  ;;  %v671_v0 = vrot.slane %v7962_v58, 2  ;;  %v515_v10 = vrot.slane %v7962_v58, 1 }
  0x87   :  { %2154 = vrot.lane.b32.xlu0 %v7936_v42, %s7674_s9  ;;  %v1389_v52 = vpop.permute.xlu1 %1388 }
  0x88   :  { %v7986_v19 = vsel %vm644_vm2, %v670_v63, %v671_v0  ;;  %v7989_v26 = vsel %vm488_vm1, %v514_v7, %v515_v10 }
  0x89   :  { %v7589_v46 = vpop.permute.xlu0 %7588 }
  0x8a   :  { %v7590_v47 = vunpack.i.l.bf16 %v7589_v46  ;;  %v7591_v14 = vunpack.i.h.bf16 %v7589_v46  ;;  %v398_v46 = vsel %vm165_vm0, %v181_v49, 0.0 }
  0x8c   :  { %v7956_v53 = vsel %vm2393_vm5, %v2331_v50, %v7590_v47  ;;  %1592 = vrot.lane.b32.xlu2 %v7900_v27, %s7671_s6 }
  0x8d   :  { %16649 = vst [vmem:[#allocation14_spill] sm:$0xff] %v7956_v53  ;;  %v2457_v56 = vsel %vm2456_vm6, %v7956_v53, %v1197_v40  ;;  %1400 = vrot.lane.b32.xlu1 %v7894_v24, %s7672_s7 }
  0x8e   :  { %v2522_v57 = vsel %vm2521_vm7, %v2457_v56, %v1389_v52  ;;  %v1393_v15 = vpop.permute.xlu2 %1392 }
  0x8f   :  { %v2587_v60 = vsel %vm2586_vm8, %v2522_v57, %v1581_v32  ;;  %1208 = vrot.lane.b32.xlu0 %v7876_v13, %s7670_s5  ;;  %v2145_v16 = vpop.permute.xlu1 %2144  ;;  %v47_v57 = vld [vmem:[%s16165_s0 + $0x58] sm:$0xff] }
  0x90   :  { %v2652_v61 = vsel %vm2651_vm9, %v2587_v60, %v7888_v18  ;;  %v2332_v18 = vsel %vm2330_vm4, %v7707_v1, %v7586_v5 }
  0x91   :  { %v1959_v62 = vpop.permute.xlu0 %1958  ;;  %v7994_v28 = vsel %vm2393_vm5, %v2332_v18, %v7591_v14 }
  0x92   :  { %v2717_v6 = vsel %vm2716_vm10, %v2652_v61, %v1959_v62  ;;  %16650 = vst [vmem:[#allocation15_spill] sm:$0xff] %v7994_v28  ;;  %v2458_v32 = vsel %vm2456_vm6, %v7994_v28, %v7924_v36 }
  0x93   :  { %v2782_v17 = vsel %vm2781_vm11, %v2717_v6, %v2145_v16  ;;  %v184_v6 = vrot.slane %v47_v57, 7 }
  0x94   :  { %7277 = vmatmul.msk.f32.vlgmr.msra.gmra.mxu0 %vm2851_vm12, %v2782_v17  ;;  %2156 = vrot.lane.b32.xlu2 %v7986_v19, %s7674_s9 }
  0x95   :  { %1970 = vrot.lane.b32.xlu1 %v7989_v26, %s7673_s8 }
  0x96   :  { %v1963_v34 = vpop.permute.xlu2 %1962 }
  0x97   :  { %1784 = vrot.lane.b32.xlu0 %v7965_v59, %s7669_s30  ;;  %v1583_v35 = vpop.permute.xlu1 %1582 }
  0x99   :  { %v1391_v29 = vpop.permute.xlu0 %1390 }
  0x9a   :  { %v2523_v33 = vsel %vm2521_vm7, %v2458_v32, %v1391_v29 }
  0x9b   :  { %v2588_v38 = vsel %vm2586_vm8, %v2523_v33, %v1583_v35 }
  0x9c   :  { %v2653_v40 = vsel %vm2651_vm9, %v2588_v38, %v1775_v41  ;;  %1210 = vrot.lane.b32.xlu2 %v7873_v11, %s7670_s5  ;;  %v2333_v41 = vsel %vm2330_vm4, %v7747_v21, %v829_v51  ;;  %v46_v51 = vld [vmem:[%s16165_s0 + $0x50] sm:$0xff] }
  0x9d   :  { %1024 = vrot.lane.b32.xlu1 %v7851_v3, %s7666_s21  ;;  %v673_v3 = vrot.slane %v398_v46, 2  ;;  %v183_v5 = vrot.slane %v46_v51, 7 }
  0x9e   :  { %v1017_v43 = vpop.permute.xlu2 %1016 }
  0x9f   :  { %838 = vrot.lane.b32.xlu0 %v7854_v4, %s7668_s29  ;;  %v2147_v44 = vpop.permute.xlu1 %2146  ;;  %v517_v4 = vrot.slane %v398_v46, 1  ;;  %v8029_v56 = vsel %vm644_vm2, %v671_v0, %v673_v3 }
  0xa1   :  { %v1961_v39 = vpop.permute.xlu0 %1960  ;;  %v8026_v49 = vsel %vm488_vm1, %v515_v10, %v517_v4  ;;  %v8050_v10 = vsel %vm165_vm0, %v183_v5, %v184_v6 }
  0xa2   :  { %v2718_v36 = vsel %vm2716_vm10, %v2653_v40, %v1961_v39  ;;  %v676_v35 = vrot.slane %v8050_v10, 2 }
  0xa3   :  { %v2783_v45 = vsel %vm2781_vm11, %v2718_v36, %v2147_v44 }
  0xa4   :  { %7278 = vmatmul.msk.f32.gmra.mxu0 %vm2851_vm12, %v2783_v45  ;;  %1786 = vrot.lane.b32.xlu2 %v7962_v58, %s7669_s30 }
  0xa5   :  { %1594 = vrot.lane.b32.xlu1 %v7936_v42, %s7671_s6 }
  0xa6   :  { %v1587_v48 = vpop.permute.xlu2 %1586 }
  0xa7   :  { %1402 = vrot.lane.b32.xlu0 %v7927_v37, %s7672_s7  ;;  %v1201_v50 = vpop.permute.xlu1 %1200 }
  0xa9   :  { %v1015_v47 = vpop.permute.xlu0 %1014 }
  0xaa   :  { %v2396_v52 = vsel %vm2393_vm5, %v2333_v41, %v1015_v47 }
  0xab   :  { %v2459_v21 = vsel %vm2456_vm6, %v2396_v52, %v1201_v50 }
  0xac   :  { %840 = vrot.lane.b32.xlu2 %v7894_v24, %s7668_s29  ;;  %v2524_v61 = vsel %vm2521_vm7, %v2459_v21, %v1393_v15  ;;  %v8053_v24 = vsel %vm165_vm0, 0.0, %v183_v5 }
  0xad   :  { %2158 = vrot.lane.b32.xlu1 %v8029_v56, %s7674_s9  ;;  %v519_v17 = vrot.slane %v8053_v24, 1 }
  0xae   :  { %v2151_v63 = vpop.permute.xlu2 %2150 }
  0xaf   :  { %1972 = vrot.lane.b32.xlu0 %v8026_v49, %s7673_s8  ;;  %v1777_v0 = vpop.permute.xlu1 %1776 }
  0xb1   :  { %v1585_v60 = vpop.permute.xlu0 %1584 }
  0xb2   :  { %v2589_v62 = vsel %vm2586_vm8, %v2524_v61, %v1585_v60 }
  0xb3   :  { %v2654_v7 = vsel %vm2651_vm9, %v2589_v62, %v1777_v0 }
  0xb4   :  { %1404 = vrot.lane.b32.xlu2 %v7989_v26, %s7672_s7  ;;  %v2719_v15 = vsel %vm2716_vm10, %v2654_v7, %v1963_v34  ;;  %v675_v34 = vrot.slane %v8053_v24, 2 }
  0xb5   :  { %1212 = vrot.lane.b32.xlu1 %v7965_v59, %s7670_s5 }
  0xb6   :  { %v1205_v18 = vpop.permute.xlu2 %1204  ;;  %v8080_v44 = vsel %vm644_vm2, %v675_v34, %v676_v35 }
  0xb7   :  { %1026 = vrot.lane.b32.xlu0 %v7900_v27, %s7666_s21  ;;  %v520_v27 = vrot.slane %v8050_v10, 1  ;;  %v831_v29 = vpop.permute.xlu1 %830 }
  0xb8   :  { %v2334_v33 = vsel %vm2330_vm4, %v7760_v25, %v831_v29 }
  0xb9   :  { %v2149_v14 = vpop.permute.xlu0 %2148  ;;  %v8065_v32 = vsel %vm488_vm1, %v519_v17, %v520_v27  ;;  %v2397_v39 = vsel %vm2393_vm5, %v2334_v33, %v1017_v43  ;;  %v8139_v17 = vld [vmem:[%s16165_s0 + $0x68] sm:$0xff] }
  0xba   :  { %v2784_v16 = vsel %vm2781_vm11, %v2719_v15, %v2149_v14  ;;  %v68_v14 = vld [vmem:[%s16165_s0 + $0x100] sm:$0xff]  ;;  %v8129_v15 = vld [vmem:[%s16165_s0 + $0x108] sm:$0xff] }
  0xbb   :  { %7279 = vmatmul.msk.f32.gmra.mxu0 %vm2851_vm12, %v2784_v16  ;;  %v48_v16 = vld [vmem:[%s16165_s0 + $0x60] sm:$0xff]  ;;  %v216_v29 = vrot.slane %v68_v14, 7 }
  0xbc   :  { %1974 = vrot.lane.b32.xlu2 %v8065_v32, %s7673_s8  ;;  %v186_v34 = vrot.slane %v48_v16, 7 }
  0xbd   :  { %1788 = vrot.lane.b32.xlu1 %v8053_v24, %s7669_s30 }
  0xbe   :  { %v1781_v36 = vpop.permute.xlu2 %1780 }
  0xbf   :  { %1596 = vrot.lane.b32.xlu0 %v7986_v19, %s7671_s6  ;;  %v1395_v25 = vpop.permute.xlu1 %1394 }
  0xc1   :  { %v1203_v38 = vpop.permute.xlu0 %1202 }
  0xc2   :  { %v2460_v40 = vsel %vm2456_vm6, %v2397_v39, %v1203_v38  ;;  %v187_v39 = vrot.slane %v8139_v17, 7 }
  0xc3   :  { %v2525_v45 = vsel %vm2521_vm7, %v2460_v40, %v1395_v25  ;;  %v8162_v25 = vsel %vm165_vm0, 0.0, %v186_v34 }
  0xc4   :  { %v2590_v4 = vsel %vm2586_vm8, %v2525_v45, %v1587_v48  ;;  %1028 = vrot.lane.b32.xlu2 %v7936_v42, %s7666_s21  ;;  %v399_v48 = vsel %vm165_vm0, %v184_v6, 0.0  ;;  %v8169_v45 = vsel %vm165_vm0, %v186_v34, %v187_v39 }
  0xc5   :  { %842 = vrot.lane.b32.xlu1 %v7927_v37, %s7668_s29  ;;  %v678_v37 = vrot.slane %v399_v48, 2  ;;  %v522_v42 = vrot.slane %v399_v48, 1  ;;  %v524_v48 = vrot.slane %v8162_v25, 1 }
  0xc6   :  { %v835_v41 = vpop.permute.xlu2 %834 }
  0xc7   :  { %2160 = vrot.lane.b32.xlu0 %v8080_v44, %s7674_s9  ;;  %v1965_v47 = vpop.permute.xlu1 %1964  ;;  %v8106_v60 = vsel %vm644_vm2, %v676_v35, %v678_v37  ;;  %v8109_v61 = vsel %vm488_vm1, %v520_v27, %v522_v42 }
  0xc9   :  { %v1779_v46 = vpop.permute.xlu0 %1778 }
  0xca   :  { %v2655_v43 = vsel %vm2651_vm9, %v2590_v4, %v1779_v46 }
  0xcb   :  { %v2720_v3 = vsel %vm2716_vm10, %v2655_v43, %v1965_v47  ;;  %v2336_v43 = vsel %vm2330_vm4, %v7771_v31, %v835_v41 }
  0xcc   :  { %v2785_v50 = vsel %vm2781_vm11, %v2720_v3, %v2151_v63  ;;  %1598 = vrot.lane.b32.xlu2 %v8029_v56, %s7671_s6 }
  0xcd   :  { %7280 = vmatmul.msk.f32.gmra.mxu0 %vm2851_vm12, %v2785_v50  ;;  %1406 = vrot.lane.b32.xlu1 %v8026_v49, %s7672_s7 }
  0xce   :  { %v8101_v21 = vpop.permute.xlu2 %1398 }
  0xcf   :  { %1214 = vrot.lane.b32.xlu0 %v7962_v58, %s7670_s5  ;;  %v1019_v51 = vpop.permute.xlu1 %1018 }
  0xd1   :  { %v833_v52 = vpop.permute.xlu0 %832 }
  0xd2   :  { %v2335_v57 = vsel %vm2330_vm4, %v7744_v20, %v833_v52  ;;  %v525_v52 = vrot.slane %v8169_v45, 1 }
  0xd3   :  { %v2398_v62 = vsel %vm2393_vm5, %v2335_v57, %v1019_v51 }
  0xd4   :  { %2162 = vrot.lane.b32.xlu2 %v8106_v60, %s7674_s9  ;;  %v2461_v20 = vsel %vm2456_vm6, %v2398_v62, %v1205_v18  ;;  %v8197_v57 = vsel %vm488_vm1, %v524_v48, %v525_v52 }
  0xd5   :  { %1976 = vrot.lane.b32.xlu1 %v8109_v61, %s7673_s8 }
  0xd6   :  { %v8120_v5 = vpop.permute.xlu2 %1968 }
  0xd7   :  { %1790 = vrot.lane.b32.xlu0 %v8050_v10, %s7669_s30  ;;  %v1589_v6 = vpop.permute.xlu1 %1588 }
  0xd9   :  { %v1397_v63 = vpop.permute.xlu0 %1396 }
  0xda   :  { %v2526_v0 = vsel %vm2521_vm7, %v2461_v20, %v1397_v63  ;;  %v70_v63 = vld [vmem:[%s16165_s0 + $0x110] sm:$0xff]  ;;  %v680_v20 = vrot.slane %v8162_v25, 2 }
  0xdb   :  { %v2591_v7 = vsel %vm2586_vm8, %v2526_v0, %v1589_v6  ;;  %v681_v0 = vrot.slane %v8169_v45, 2  ;;  %v8210_v6 = vld [vmem:[%s16165_s0 + $0x118] sm:$0xff]  ;;  %v219_v16 = vrot.slane %v70_v63, 7 }
  0xdc   :  { %v2656_v18 = vsel %vm2651_vm9, %v2591_v7, %v1781_v36  ;;  %1216 = vrot.lane.b32.xlu2 %v8053_v24, %s7670_s5 }
  0xdd   :  { %1030 = vrot.lane.b32.xlu1 %v7986_v19, %s7666_s21  ;;  %v8159_v19 = vsel %vm165_vm0, 0.0, %v216_v29  ;;  %v8223_v34 = vsel %vm644_vm2, %v680_v20, %v681_v0 }
  0xde   :  { %v8148_v35 = vpop.permute.xlu2 %1022  ;;  %v569_v46 = vrot.slane %v8159_v19, 1  ;;  %v725_v3 = vrot.slane %v8159_v19, 2 }
  0xdf   :  { %844 = vrot.lane.b32.xlu0 %v7989_v26, %s7668_s29  ;;  %v217_v26 = vrot.slane %v8129_v15, 7  ;;  %v2153_v38 = vpop.permute.xlu1 %2152 }
  0xe1   :  { %v1967_v27 = vpop.permute.xlu0 %1966  ;;  %v8156_v36 = vsel %vm165_vm0, %v216_v29, %v217_v26 }
  0xe2   :  { %v2721_v33 = vsel %vm2716_vm10, %v2656_v18, %v1967_v27  ;;  %v570_v4 = vrot.slane %v8156_v36, 1  ;;  %v726_v50 = vrot.slane %v8156_v36, 2 }
  0xe3   :  { %v2786_v40 = vsel %vm2781_vm11, %v2721_v33, %v2153_v38  ;;  %v220_v33 = vrot.slane %v8210_v6, 7 }
  0xe4   :  { %7281 = vmatmul.msk.f32.gmra.mxu0 %vm2851_vm12, %v2786_v40  ;;  %1792 = vrot.lane.b32.xlu2 %v8162_v25, %s7669_s30  ;;  %v8187_v31 = vsel %vm488_vm1, %v569_v46, %v570_v4  ;;  %v8192_v41 = vsel %vm644_vm2, %v725_v3, %v726_v50  ;;  %v8227_v40 = vsel %vm165_vm0, 0.0, %v219_v16 }
  0xe5   :  { %1600 = vrot.lane.b32.xlu1 %v8080_v44, %s7671_s6  ;;  %v574_v3 = vrot.slane %v8227_v40, 1  ;;  %v730_v63 = vrot.slane %v8227_v40, 2 }
  0xe6   :  { %v1593_v37 = vpop.permute.xlu2 %1592 }
  0xe7   :  { %1408 = vrot.lane.b32.xlu0 %v8065_v32, %s7672_s7  ;;  %v1207_v42 = vpop.permute.xlu1 %1206 }
  0xe9   :  { %v1021_v47 = vpop.permute.xlu0 %1020 }
  0xea   :  { %v2399_v51 = vsel %vm2393_vm5, %v2336_v43, %v1021_v47 }
  0xeb   :  { %v2462_v62 = vsel %vm2456_vm6, %v2399_v51, %v1207_v42 }
  0xec   :  { %1074 = vrot.lane.b32.xlu2 %v8192_v41, %s7666_s21  ;;  %v2527_v14 = vsel %vm2521_vm7, %v2462_v62, %v8101_v21  ;;  %v8234_v21 = vsel %vm165_vm0, %v219_v16, %v220_v33 }
  0xed   :  { %1978 = vrot.lane.b32.xlu1 %v8197_v57, %s7673_s8  ;;  %16651 = vst [vmem:[#allocation16_spill] sm:$0xff] %v8234_v21  ;;  %v575_v48 = vrot.slane %v8234_v21, 1  ;;  %v731_v20 = vrot.slane %v8234_v21, 2 }
  0xee   :  { %v2157_v18 = vpop.permute.xlu2 %2156 }
  0xef   :  { %888 = vrot.lane.b32.xlu0 %v8187_v31, %s7668_s29  ;;  %v1783_v29 = vpop.permute.xlu1 %1782  ;;  %v8249_v62 = vsel %vm488_vm1, %v574_v3, %v575_v48 }
  0xf1   :  { %v1591_v7 = vpop.permute.xlu0 %1590 }
  0xf2   :  { %v2592_v27 = vsel %vm2586_vm8, %v2527_v14, %v1591_v7  ;;  %v8263_v7 = vld [vmem:[%s16165_s0 + $0x128] sm:$0xff] }
  0xf3   :  { %v2657_v38 = vsel %vm2651_vm9, %v2592_v27, %v1783_v29 }
  0xf4   :  { %1264 = vrot.lane.b32.xlu2 %v8227_v40, %s7670_s5  ;;  %v2722_v43 = vsel %vm2716_vm10, %v2657_v38, %v8120_v5  ;;  %v72_v5 = vld [vmem:[%s16165_s0 + $0x120] sm:$0xff]  ;;  %v223_v38 = vrot.slane %v8263_v7, 7  ;;  %v50_v7 = vld [vmem:[%s16165_s0 + $0x70] sm:$0xff] }
  0xf5   :  { %846 = vrot.lane.b32.xlu1 %v8026_v49, %s7668_s29 }
  0xf6   :  { %v1211_v42 = vpop.permute.xlu2 %1210 }
  0xf7   :  { %2164 = vrot.lane.b32.xlu0 %v8223_v34, %s7674_s9  ;;  %v837_v51 = vpop.permute.xlu1 %836 }
  0xf8   :  { %v2337_v49 = vsel %vm2330_vm4, %v7819_v55, %v837_v51 }
  0xf9   :  { %v2155_v46 = vpop.permute.xlu0 %2154  ;;  %v2400_v55 = vsel %vm2393_vm5, %v2337_v49, %v8148_v35 }
  0xfa   :  { %v2787_v47 = vsel %vm2781_vm11, %v2722_v43, %v2155_v46  ;;  %v8276_v46 = vsel %vm644_vm2, %v730_v63, %v731_v20 }
  0xfb   :  { %7282 = vmatmul.msk.f32.gmra.mxu0 %vm2851_vm12, %v2787_v47 }
  0xfc   :  { %1218 = vrot.lane.b32.xlu2 %v8050_v10, %s7670_s5 }
  0xfd   :  { %1456 = vrot.lane.b32.xlu1 %v8249_v62, %s7672_s7 }
  0xfe   :  { %v1787_v27 = vpop.permute.xlu2 %1786 }
  0xff   :  { %1032 = vrot.lane.b32.xlu0 %v8029_v56, %s7666_s21  ;;  %v222_v56 = vrot.slane %v72_v5, 7  ;;  %v1401_v29 = vpop.permute.xlu1 %1400 }
 0x101   :  { %v1209_v14 = vpop.permute.xlu0 %1208  ;;  %v8280_v47 = vsel %vm165_vm0, 0.0, %v222_v56  ;;  %v8287_v35 = vsel %vm165_vm0, %v222_v56, %v223_v38 }
 0x102   :  { %v2463_v16 = vsel %vm2456_vm6, %v2400_v55, %v1209_v14  ;;  %v579_v5 = vrot.slane %v8280_v47, 1  ;;  %v580_v63 = vrot.slane %v8287_v35, 1 }
 0x103   :  { %v2528_v43 = vsel %vm2521_vm7, %v2463_v16, %v1401_v29  ;;  %v400_v29 = vsel %vm165_vm0, %v187_v39, 0.0 }
 0x104   :  { %v2593_v51 = vsel %vm2586_vm8, %v2528_v43, %v1593_v37  ;;  %1840 = vrot.lane.b32.xlu2 %v8280_v47, %s7669_s30  ;;  %v8303_v37 = vsel %vm488_vm1, %v579_v5, %v580_v63  ;;  %v410_v43 = vsel %vm165_vm0, %v217_v26, 0.0 }
 0x105   :  { %1410 = vrot.lane.b32.xlu1 %v8109_v61, %s7672_s7  ;;  %v572_v5 = vrot.slane %v410_v43, 1 }
 0x106   :  { %v841_v14 = vpop.permute.xlu2 %840 }
 0x107   :  { %1648 = vrot.lane.b32.xlu0 %v8276_v46, %s7671_s6  ;;  %v1971_v55 = vpop.permute.xlu1 %1970 }
 0x109   :  { %v1785_v3 = vpop.permute.xlu0 %1784 }
 0x10a   :  { %v2658_v49 = vsel %vm2651_vm9, %v2593_v51, %v1785_v3  ;;  %v736_v3 = vrot.slane %v8287_v35, 2 }
 0x10b   :  { %v2723_v56 = vsel %vm2716_vm10, %v2658_v49, %v1971_v55  ;;  %v527_v49 = vrot.slane %v400_v29, 1 }
 0x10c   :  { %v2788_v16 = vsel %vm2781_vm11, %v2723_v56, %v2157_v18  ;;  %v735_v18 = vrot.slane %v8280_v47, 2  ;;  %1794 = vrot.lane.b32.xlu2 %v8169_v45, %s7669_s30  ;;  %v8334_v56 = vsel %vm488_vm1, %v570_v4, %v572_v5 }
 0x10d   :  { %7283 = vmatmul.msk.f32.gmra.mxu0 %vm2851_vm12, %v2788_v16  ;;  %2026 = vrot.lane.b32.xlu1 %v8303_v37, %s7673_s8  ;;  %v8329_v39 = vsel %vm488_vm1, %v525_v52, %v527_v49 }
 0x10e   :  { %v1405_v17 = vpop.permute.xlu2 %1404  ;;  %v8324_v26 = vsel %vm644_vm2, %v735_v18, %v736_v3  ;;  %v683_v18 = vrot.slane %v400_v29, 2 }
 0x10f   :  { %1602 = vrot.lane.b32.xlu0 %v8106_v60, %s7671_s6  ;;  %v1025_v55 = vpop.permute.xlu1 %1024 }
 0x111   :  { %v839_v51 = vpop.permute.xlu0 %838 }
 0x112   :  { %v2338_v15 = vsel %vm2330_vm4, %v7816_v54, %v839_v51  ;;  %v728_v54 = vrot.slane %v410_v43, 2 }
 0x113   :  { %v2401_v16 = vsel %vm2393_vm5, %v2338_v15, %v1025_v55  ;;  %v8354_v15 = vsel %vm644_vm2, %v681_v0, %v683_v18 }
 0x114   :  { %1980 = vrot.lane.b32.xlu2 %v8329_v39, %s7673_s8  ;;  %v2464_v52 = vsel %vm2456_vm6, %v2401_v16, %v1211_v42  ;;  %v8348_v55 = vsel %vm644_vm2, %v726_v50, %v728_v54  ;;  %v411_v42 = vsel %vm165_vm0, %v220_v33, 0.0 }
 0x115   :  { %890 = vrot.lane.b32.xlu1 %v8334_v56, %s7668_s29  ;;  %16652 = vst [vmem:[#allocation17_spill] sm:$0xff] %v8348_v55  ;;  %v577_v0 = vrot.slane %v411_v42, 1 }
 0x116   :  { %v1975_v4 = vpop.permute.xlu2 %1974 }
 0x117   :  { %2212 = vrot.lane.b32.xlu0 %v8324_v26, %s7674_s9  ;;  %v1595_v5 = vpop.permute.xlu1 %1594  ;;  %v8372_v6 = vsel %vm488_vm1, %v575_v48, %v577_v0  ;;  %v189_v0 = vrot.slane %v50_v7, 7 }
 0x118   :  { %16653 = vst [vmem:[#allocation18_spill] sm:$0xff] %v8372_v6 }
 0x119   :  { %v1403_v51 = vpop.permute.xlu0 %1402 }
 0x11a   :  { %v2529_v49 = vsel %vm2521_vm7, %v2464_v52, %v1403_v51 }
 0x11b   :  { %v2594_v43 = vsel %vm2586_vm8, %v2529_v49, %v1595_v5 }
 0x11c   :  { %v2659_v16 = vsel %vm2651_vm9, %v2594_v43, %v1787_v27  ;;  %848 = vrot.lane.b32.xlu2 %v8065_v32, %s7668_s29  ;;  %v2339_v32 = vsel %vm2330_vm4, %v7876_v13, %v841_v14  ;;  %v733_v27 = vrot.slane %v411_v42, 2  ;;  %v412_v13 = vsel %vm165_vm0, %v223_v38, 0.0 }
 0x11d   :  { %2166 = vrot.lane.b32.xlu1 %v8354_v15, %s7674_s9 }
 0x11e   :  { %v1029_v54 = vpop.permute.xlu2 %1028  ;;  %v8386_v48 = vsel %vm644_vm2, %v731_v20, %v733_v27  ;;  %v582_v20 = vrot.slane %v412_v13, 1 }
 0x11f   :  { %1076 = vrot.lane.b32.xlu0 %v8348_v55, %s7666_s21  ;;  %v2159_v51 = vpop.permute.xlu1 %2158  ;;  %16654 = vst [vmem:[#allocation19_spill] sm:$0xff] %v8386_v48 }
 0x121   :  { %v1973_v29 = vpop.permute.xlu0 %1972 }
 0x122   :  { %v2724_v50 = vsel %vm2716_vm10, %v2659_v16, %v1973_v29 }
 0x123   :  { %v2789_v52 = vsel %vm2781_vm11, %v2724_v50, %v2159_v51  ;;  %v8407_v50 = vsel %vm488_vm1, %v580_v63, %v582_v20 }
 0x124   :  { %7284 = vmatmul.msk.f32.gmra.mxu0 %vm2851_vm12, %v2789_v52  ;;  %1458 = vrot.lane.b32.xlu2 %v8372_v6, %s7672_s7 }
 0x125   :  { %1034 = vrot.lane.b32.xlu1 %v8080_v44, %s7666_s21 }
 0x126   :  { %v1599_v18 = vpop.permute.xlu2 %1598 }
 0x127   :  { %1266 = vrot.lane.b32.xlu0 %v8234_v21, %s7670_s5  ;;  %v1213_v49 = vpop.permute.xlu1 %1212 }
 0x129   :  { %v1027_v33 = vpop.permute.xlu0 %1026 }
 0x12a   :  { %v2402_v5 = vsel %vm2393_vm5, %v2339_v32, %v1027_v33  ;;  %v738_v33 = vrot.slane %v412_v13, 2 }
 0x12b   :  { %v2465_v43 = vsel %vm2456_vm6, %v2402_v5, %v1213_v49  ;;  %v8425_v5 = vsel %vm165_vm0, 0.0, %v189_v0 }
 0x12c   :  { %1412 = vrot.lane.b32.xlu2 %v8197_v57, %s7672_s7  ;;  %v2530_v14 = vsel %vm2521_vm7, %v2465_v43, %v1405_v17  ;;  %v8412_v17 = vld [vmem:[%s16165_s0 + $0x78] sm:$0xff] }
 0x12d   :  { %1650 = vrot.lane.b32.xlu1 %v8386_v48, %s7671_s6  ;;  %v190_v63 = vrot.slane %v8412_v17, 7 }
 0x12e   :  { %v2163_v29 = vpop.permute.xlu2 %2162 }
 0x12f   :  { %1220 = vrot.lane.b32.xlu0 %v8162_v25, %s7670_s5  ;;  %v1789_v16 = vpop.permute.xlu1 %1788  ;;  %v8430_v43 = vsel %vm165_vm0, %v189_v0, %v190_v63 }
 0x131   :  { %v1597_v44 = vpop.permute.xlu0 %1596 }
 0x132   :  { %v2595_v42 = vsel %vm2586_vm8, %v2530_v14, %v1597_v44  ;;  %v529_v44 = vrot.slane %v8425_v5, 1  ;;  %v16172_v14 = vrot.slane %v8430_v43, 1 }
 0x133   :  { %v2660_v38 = vsel %vm2651_vm9, %v2595_v42, %v1789_v16  ;;  %v685_v42 = vrot.slane %v8425_v5, 2 }
 0x134   :  { %2028 = vrot.lane.b32.xlu2 %v8407_v50, %s7673_s8  ;;  %v2725_v52 = vsel %vm2716_vm10, %v2660_v38, %v1975_v4  ;;  %v8435_v4 = vsel %vm644_vm2, %v736_v3, %v738_v33  ;;  %v8454_v0 = vsel %vm488_vm1, %v529_v44, %v16172_v14 }
 0x135   :  { %1604 = vrot.lane.b32.xlu1 %v8223_v34, %s7671_s6 }
 0x136   :  { %v1217_v27 = vpop.permute.xlu2 %1216 }
 0x137   :  { %1842 = vrot.lane.b32.xlu0 %v8287_v35, %s7669_s30  ;;  %v843_v49 = vpop.permute.xlu1 %842 }
 0x138   :  { %v2340_v13 = vsel %vm2330_vm4, %v7873_v11, %v843_v49  ;;  %v16171_v11 = vrot.slane %v8430_v43, 2 }
 0x139   :  { %v2161_v51 = vpop.permute.xlu0 %2160  ;;  %v2403_v3 = vsel %vm2393_vm5, %v2340_v13, %v1029_v54 }
 0x13a   :  { %v2790_v32 = vsel %vm2781_vm11, %v2725_v52, %v2161_v51  ;;  %v8460_v52 = vsel %vm644_vm2, %v685_v42, %v16171_v11 }
 0x13b   :  { %7285 = vmatmul.msk.f32.gmra.mxu0 %vm2851_vm12, %v2790_v32 }
 0x13c   :  { %892 = vrot.lane.b32.xlu2 %v8249_v62, %s7668_s29 }
 0x13d   :  { %2214 = vrot.lane.b32.xlu1 %v8435_v4, %s7674_s9 }
 0x13e   :  { %v1793_v7 = vpop.permute.xlu2 %1792 }
 0x13f   :  { %1796 = vrot.lane.b32.xlu0 %v8425_v5, %s7669_s30  ;;  %v1407_v38 = vpop.permute.xlu1 %1406 }
 0x141   :  { %v1215_v20 = vpop.permute.xlu0 %1214 }
 0x142   :  { %v2466_v16 = vsel %vm2456_vm6, %v2403_v3, %v1215_v20 }
 0x143   :  { %v2531_v51 = vsel %vm2521_vm7, %v2466_v16, %v1407_v38  ;;  %v8486_v16 = vld [vmem:[%s16165_s0 + $0x138] sm:$0xff] }
 0x144   :  { %v2596_v32 = vsel %vm2586_vm8, %v2531_v51, %v1599_v18  ;;  %2168 = vrot.lane.b32.xlu2 %v8460_v52, %s7674_s9 }
 0x145   :  { %1078 = vrot.lane.b32.xlu1 %v8276_v46, %s7666_s21 }
 0x146   :  { %v8470_v49 = vpop.permute.xlu2 %1074 }
 0x147   :  { %1982 = vrot.lane.b32.xlu0 %v8454_v0, %s7673_s8  ;;  %v1977_v13 = vpop.permute.xlu1 %1976 }
 0x149   :  { %v1791_v54 = vpop.permute.xlu0 %1790 }
 0x14a   :  { %v2661_v33 = vsel %vm2651_vm9, %v2596_v32, %v1791_v54 }
 0x14b   :  { %v2726_v44 = vsel %vm2716_vm10, %v2661_v33, %v1977_v13 }
 0x14c   :  { %v2791_v20 = vsel %vm2781_vm11, %v2726_v44, %v2163_v29  ;;  %1036 = vrot.lane.b32.xlu2 %v8106_v60, %s7666_s21  ;;  %v16170_v60 = vrot.slane %v8486_v16, 7 }
 0x14d   :  { %7286 = vmatmul.msk.f32.gmra.mxu0 %vm2851_vm12, %v2791_v20  ;;  %1268 = vrot.lane.b32.xlu1 %v8280_v47, %s7670_s5 }
 0x14e   :  { %v8481_v3 = vpop.permute.xlu2 %1264 }
 0x14f   :  { %850 = vrot.lane.b32.xlu0 %v8109_v61, %s7668_s29  ;;  %v1031_v42 = vpop.permute.xlu1 %1030  ;;  %v74_v61 = vld [vmem:[%s16165_s0 + $0x130] sm:$0xff] }
 0x150   :  { %v225_v38 = vrot.slane %v74_v61, 7 }
 0x151   :  { %v845_v18 = vpop.permute.xlu0 %844 }
 0x152   :  { %v2341_v51 = vsel %vm2330_vm4, %v7965_v59, %v845_v18  ;;  %v8505_v33 = vsel %vm165_vm0, %v225_v38, %v16170_v60  ;;  %v8509_v44 = vsel %vm165_vm0, 0.0, %v225_v38 }
 0x153   :  { %v2404_v13 = vsel %vm2393_vm5, %v2341_v51, %v1031_v42  ;;  %v584_v20 = vrot.slane %v8509_v44, 1  ;;  %v16176_v59 = vrot.slane %v8505_v33, 1  ;;  %v740_v38 = vrot.slane %v8509_v44, 2 }
 0x154   :  { %1652 = vrot.lane.b32.xlu2 %v8324_v26, %s7671_s6  ;;  %v2467_v18 = vsel %vm2456_vm6, %v2404_v13, %v1217_v27  ;;  %v16175_v51 = vrot.slane %v8505_v33, 2 }
 0x155   :  { %1222 = vrot.lane.b32.xlu1 %v8169_v45, %s7670_s5  ;;  %v8526_v14 = vsel %vm488_vm1, %v584_v20, %v16176_v59 }
 0x156   :  { %v8500_v54 = vpop.permute.xlu2 %1218  ;;  %v8532_v13 = vsel %vm644_vm2, %v740_v38, %v16175_v51 }
 0x157   :  { %1460 = vrot.lane.b32.xlu0 %v8303_v37, %s7672_s7  ;;  %v1601_v32 = vpop.permute.xlu1 %1600 }
 0x159   :  { %v1409_v29 = vpop.permute.xlu0 %1408 }
 0x15a   :  { %v2532_v42 = vsel %vm2521_vm7, %v2467_v18, %v1409_v29  ;;  %v401_v29 = vsel %vm165_vm0, %v190_v63, 0.0  ;;  %v16655_v63 = vrot.slane %v8430_v43, 1 }
 0x15b   :  { %v2597_v27 = vsel %vm2586_vm8, %v2532_v42, %v1601_v32  ;;  %v532_v42 = vrot.slane %v401_v29, 1 }
 0x15c   :  { %1606 = vrot.lane.b32.xlu2 %v8354_v15, %s7671_s6  ;;  %v2662_v18 = vsel %vm2651_vm9, %v2597_v27, %v1793_v7 }
 0x15d   :  { %1844 = vrot.lane.b32.xlu1 %v8509_v44, %s7669_s30  ;;  %v8550_v7 = vsel %vm488_vm1, %v16655_v63, %v532_v42 }
 0x15e   :  { %v1841_v60 = vpop.permute.xlu2 %1840 }
 0x15f   :  { %1414 = vrot.lane.b32.xlu0 %v8329_v39, %s7672_s7  ;;  %v1979_v11 = vpop.permute.xlu1 %1978 }
 0x160   :  { %v2727_v9 = vsel %vm2716_vm10, %v2662_v18, %v1979_v11  ;;  %v688_v11 = vrot.slane %v401_v29, 2 }
 0x161   :  { %v889_v61 = vpop.permute.xlu0 %888 }
 0x162   :  { %v2363_v51 = vsel %vm2330_vm4, %v8159_v19, %v889_v61 }
 0x164   :  { %2216 = vrot.lane.b32.xlu2 %v8532_v13, %s7674_s9 }
 0x165   :  { %1798 = vrot.lane.b32.xlu1 %v8430_v43, %s7669_s30 }
 0x166   :  { %v1795_v38 = vpop.permute.xlu2 %1794 }
 0x167   :  { %2030 = vrot.lane.b32.xlu0 %v8526_v14, %s7673_s8  ;;  %v847_v17 = vpop.permute.xlu1 %846 }
 0x169   :  { %v2165_v20 = vpop.permute.xlu0 %2164 }
 0x16a   :  { %v2792_v32 = vsel %vm2781_vm11, %v2727_v9, %v2165_v20  ;;  %v16656_v20 = vrot.slane %v8430_v43, 2 }
 0x16b   :  { %7287 = vmatmul.msk.f32.gmra.mxu0 %vm2851_vm12, %v2792_v32 }
 0x16c   :  { %1080 = vrot.lane.b32.xlu2 %v8386_v48, %s7666_s21  ;;  %v8561_v32 = vsel %vm644_vm2, %v16656_v20, %v688_v11  ;;  %v2426_v11 = vsel %vm2393_vm5, %v2363_v51, %v8470_v49  ;;  %v52_v49 = vld [vmem:[%s16165_s0 + $0x80] sm:$0xff]  ;;  %v16657_v51 = vrot.slane %v8486_v16, 7 }
 0x16d   :  { %1984 = vrot.lane.b32.xlu1 %v8550_v7, %s7673_s8  ;;  %v192_v16 = vrot.slane %v52_v49, 7  ;;  %v16658_v49 = vrot.slane %v8505_v33, 1 }
 0x16e   :  { %v1981_v9 = vpop.permute.xlu2 %1980  ;;  %v413_v23 = vsel %vm165_vm0, %v16657_v51, 0.0 }
 0x16f   :  { %894 = vrot.lane.b32.xlu0 %v8372_v6, %s7668_s29  ;;  %v1457_v18 = vpop.permute.xlu1 %1456 }
 0x171   :  { %v1033_v27 = vpop.permute.xlu0 %1032 }
 0x174   :  { %1270 = vrot.lane.b32.xlu2 %v8287_v35, %s7670_s5 }
 0x175   :  { %852 = vrot.lane.b32.xlu1 %v8197_v57, %s7668_s29  ;;  %v2491_v57 = vsel %vm2456_vm6, %v2426_v11, %v8481_v3  ;;  %v2342_v3 = vsel %vm2330_vm4, %v7962_v58, %v847_v17 }
 0x176   :  { %v8569_v29 = vpop.permute.xlu2 %848  ;;  %v2556_v61 = vsel %vm2521_vm7, %v2491_v57, %v1457_v18  ;;  %v8601_v18 = vld [vmem:[%s16165_s0 + $0x88] sm:$0xff] }
 0x177   :  { %2170 = vrot.lane.b32.xlu0 %v8561_v32, %s7674_s9  ;;  %v1411_v63 = vpop.permute.xlu1 %1410 }
 0x179   :  { %v1649_v42 = vpop.permute.xlu0 %1648 }
 0x17c   :  { %1224 = vrot.lane.b32.xlu2 %v8425_v5, %s7670_s5 }
 0x17d   :  { %1462 = vrot.lane.b32.xlu1 %v8407_v50, %s7672_s7 }
 0x17e   :  { %v8583_v59 = vpop.permute.xlu2 %1458 }
 0x17f   :  { %1038 = vrot.lane.b32.xlu0 %v8223_v34, %s7666_s21  ;;  %v2027_v8 = vpop.permute.xlu1 %2026  ;;  %v2621_v34 = vsel %vm2586_vm8, %v2556_v61, %v1649_v42  ;;  %v2405_v42 = vsel %vm2393_vm5, %v2342_v3, %v1033_v27 }
 0x180   :  { %v2686_v11 = vsel %vm2651_vm9, %v2621_v34, %v1841_v60  ;;  %v587_v60 = vrot.slane %v413_v23, 1  ;;  %v16183_v34 = vrot.slane %v8601_v18, 7 }
 0x181   :  { %v1603_v20 = vpop.permute.xlu0 %1602  ;;  %v2751_v57 = vsel %vm2716_vm10, %v2686_v11, %v2027_v8  ;;  %v2468_v8 = vsel %vm2456_vm6, %v2405_v42, %v8500_v54  ;;  %v8619_v11 = vsel %vm165_vm0, 0.0, %v192_v16  ;;  %v743_v42 = vrot.slane %v413_v23, 2 }
 0x182   :  { %v2533_v51 = vsel %vm2521_vm7, %v2468_v8, %v1411_v63  ;;  %v8631_v54 = vsel %vm165_vm0, %v192_v16, %v16183_v34  ;;  %v16659_v16 = vrot.slane %v8505_v33, 2 }
 0x183   :  { %v2598_v3 = vsel %vm2586_vm8, %v2533_v51, %v1603_v20 }
 0x184   :  { %1846 = vrot.lane.b32.xlu2 %v8505_v33, %s7669_s30  ;;  %v2663_v63 = vsel %vm2651_vm9, %v2598_v3, %v1795_v38  ;;  %v8644_v23 = vsel %vm644_vm2, %v16659_v16, %v743_v42  ;;  %v16181_v42 = vrot.slane %v8631_v54, 2 }
 0x185   :  { %1416 = vrot.lane.b32.xlu1 %v8454_v0, %s7672_s7  ;;  %v2728_v51 = vsel %vm2716_vm10, %v2663_v63, %v1981_v9  ;;  %v690_v9 = vrot.slane %v8619_v11, 2 }
 0x186   :  { %v8610_v17 = vpop.permute.xlu2 %1412 }
 0x187   :  { %1654 = vrot.lane.b32.xlu0 %v8435_v4, %s7671_s6  ;;  %v891_v27 = vpop.permute.xlu1 %890 }
 0x189   :  { %v2213_v61 = vpop.permute.xlu0 %2212 }
 0x18a   :  { %v2816_v58 = vsel %vm2781_vm11, %v2751_v57, %v2213_v61  ;;  %v8624_v57 = vsel %vm488_vm1, %v16658_v49, %v587_v60  ;;  %v534_v61 = vrot.slane %v8619_v11, 1 }
 0x18b   :  { %7311 = vmatmul.msk.f32.vlgmr.msra.gmra.mxu3 %vm2851_vm12, %v2816_v58  ;;  %v16182_v58 = vrot.slane %v8631_v54, 1 }
 0x18c   :  { %1800 = vrot.lane.b32.xlu2 %v8619_v11, %s7669_s30 }
 0x18d   :  { %2032 = vrot.lane.b32.xlu1 %v8624_v57, %s7673_s8  ;;  %v8651_v3 = vsel %vm488_vm1, %v534_v61, %v16182_v58  ;;  %v8666_v61 = vsel %vm644_vm2, %v690_v9, %v16181_v42 }
 0x18e   :  { %v2029_v60 = vpop.permute.xlu2 %2028 }
 0x18f   :  { %1608 = vrot.lane.b32.xlu0 %v8460_v52, %s7671_s6  ;;  %v2167_v8 = vpop.permute.xlu1 %2166 }
 0x190   :  { %v2793_v38 = vsel %vm2781_vm11, %v2728_v51, %v2167_v8 }
 0x191   :  { %v1077_v20 = vpop.permute.xlu0 %1076  ;;  %7288 = vmatmul.msk.f32.gmra.mxu0 %vm2851_vm12, %v2793_v38  ;;  %v76_v38 = vld [vmem:[%s16165_s0 + $0x140] sm:$0xff] }
 0x192   :  { %v228_v34 = vrot.slane %v76_v38, 7 }
 0x194   :  { %1986 = vrot.lane.b32.xlu2 %v8651_v3, %s7673_s8 }
 0x195   :  { %896 = vrot.lane.b32.xlu1 %v8303_v37, %s7668_s29 }
 0x196   :  { %v8661_v63 = vpop.permute.xlu2 %892 }
 0x197   :  { %2218 = vrot.lane.b32.xlu0 %v8644_v23, %s7674_s9  ;;  %v1035_v8 = vpop.permute.xlu1 %1034 }
 0x199   :  { %v1267_v49 = vpop.permute.xlu0 %1266 }
 0x19c   :  { %854 = vrot.lane.b32.xlu2 %v8329_v39, %s7668_s29  ;;  %v2364_v39 = vsel %vm2330_vm4, %v8156_v36, %v891_v27  ;;  %v8705_v27 = vsel %vm165_vm0, 0.0, %v228_v34 }
 0x19d   :  { %2172 = vrot.lane.b32.xlu1 %v8666_v61, %s7674_s9  ;;  %v2427_v42 = vsel %vm2393_vm5, %v2364_v39, %v1077_v20  ;;  %v2343_v20 = vsel %vm2330_vm4, %v8053_v24, %v8569_v29 }
 0x19e   :  { %v2169_v37 = vpop.permute.xlu2 %2168  ;;  %v2492_v28 = vsel %vm2456_vm6, %v2427_v42, %v1267_v49  ;;  %v2406_v38 = vsel %vm2393_vm5, %v2343_v20, %v1035_v8 }
 0x19f   :  { %1082 = vrot.lane.b32.xlu0 %v8324_v26, %s7666_s21  ;;  %v1651_v16 = vpop.permute.xlu1 %1650  ;;  %v8682_v26 = vld [vmem:[%s16165_s0 + $0x148] sm:$0xff]  ;;  %v2557_v48 = vsel %vm2521_vm7, %v2492_v28, %v8583_v59  ;;  %v589_v59 = vrot.slane %v8705_v27, 1 }
 0x1a0   :  { %v229_v22 = vrot.slane %v8682_v26, 7  ;;  %v2622_v49 = vsel %vm2586_vm8, %v2557_v48, %v1651_v16 }
 0x1a1   :  { %v1221_v51 = vpop.permute.xlu0 %1220 }
 0x1a2   :  { %v2469_v24 = vsel %vm2456_vm6, %v2406_v38, %v1221_v51 }
 0x1a4   :  { %1464 = vrot.lane.b32.xlu2 %v8526_v14, %s7672_s7 }
 0x1a5   :  { %1040 = vrot.lane.b32.xlu1 %v8354_v15, %s7666_s21  ;;  %v8702_v15 = vsel %vm165_vm0, %v228_v34, %v229_v22 }
 0x1a6   :  { %v8691_v58 = vpop.permute.xlu2 %1036  ;;  %v590_v34 = vrot.slane %v8702_v15, 1 }
 0x1a7   :  { %1272 = vrot.lane.b32.xlu0 %v8509_v44, %s7670_s5  ;;  %v1605_v53 = vpop.permute.xlu1 %1604 }
 0x1a9   :  { %v1843_v9 = vpop.permute.xlu0 %1842 }
 0x1aa   :  { %v2687_v42 = vsel %vm2651_vm9, %v2622_v49, %v1843_v9  ;;  %v8726_v9 = vsel %vm488_vm1, %v589_v59, %v590_v34  ;;  %v2534_v49 = vsel %vm2521_vm7, %v2469_v24, %v8610_v17  ;;  %v746_v17 = vrot.slane %v8702_v15, 2 }
 0x1ab   :  { %v2752_v48 = vsel %vm2716_vm10, %v2687_v42, %v2029_v60  ;;  %v2599_v8 = vsel %vm2586_vm8, %v2534_v49, %v1605_v53  ;;  %v745_v42 = vrot.slane %v8705_v27, 2 }
 0x1ac   :  { %1418 = vrot.lane.b32.xlu2 %v8550_v7, %s7672_s7 }
 0x1ad   :  { %1656 = vrot.lane.b32.xlu1 %v8532_v13, %s7671_s6 }
 0x1ae   :  { %v1653_v39 = vpop.permute.xlu2 %1652 }
 0x1af   :  { %1226 = vrot.lane.b32.xlu0 %v8430_v43, %s7670_s5  ;;  %v2215_v29 = vpop.permute.xlu1 %2214 }
 0x1b0   :  { %v2817_v16 = vsel %vm2781_vm11, %v2752_v48, %v2215_v29  ;;  %v8751_v29 = vsel %vm644_vm2, %v745_v42, %v746_v17 }
 0x1b1   :  { %v1797_v28 = vpop.permute.xlu0 %1796  ;;  %7312 = vmatmul.msk.f32.gmra.mxu3 %vm2851_vm12, %v2817_v16 }
 0x1b2   :  { %v2664_v51 = vsel %vm2651_vm9, %v2599_v8, %v1797_v28  ;;  %v16660_v28 = vrot.slane %v8601_v18, 7  ;;  %v16661_v8 = vrot.slane %v8631_v54, 1 }
 0x1b4   :  { %2034 = vrot.lane.b32.xlu2 %v8726_v9, %s7673_s8  ;;  %v402_v24 = vsel %vm165_vm0, %v16660_v28, 0.0  ;;  %v2365_v28 = vsel %vm2330_vm4, %v8227_v40, %v8661_v63 }
 0x1b5   :  { %1610 = vrot.lane.b32.xlu1 %v8561_v32, %s7671_s6  ;;  %v537_v48 = vrot.slane %v402_v24, 1 }
 0x1b6   :  { %v8741_v59 = vpop.permute.xlu2 %1606 }
 0x1b7   :  { %1848 = vrot.lane.b32.xlu0 %v8705_v27, %s7669_s30  ;;  %v1079_v53 = vpop.permute.xlu1 %1078 }
 0x1b9   :  { %v1983_v60 = vpop.permute.xlu0 %1982 }
 0x1ba   :  { %v2729_v20 = vsel %vm2716_vm10, %v2664_v51, %v1983_v60  ;;  %v8762_v51 = vsel %vm488_vm1, %v16661_v8, %v537_v48  ;;  %v16662_v60 = vrot.slane %v8631_v54, 2  ;;  %v2428_v48 = vsel %vm2393_vm5, %v2365_v28, %v1079_v53 }
 0x1bb   :  { %v2794_v38 = vsel %vm2781_vm11, %v2729_v20, %v2169_v37  ;;  %v693_v37 = vrot.slane %v402_v24, 2 }
 0x1bc   :  { %7289 = vmatmul.msk.f32.gmra.mxu0 %vm2851_vm12, %v2794_v38  ;;  %898 = vrot.lane.b32.xlu2 %v8407_v50, %s7668_s29 }
 0x1bd   :  { %2220 = vrot.lane.b32.xlu1 %v8751_v29, %s7674_s9  ;;  %v8767_v20 = vsel %vm644_vm2, %v16662_v60, %v693_v37 }
 0x1be   :  { %v2217_v18 = vpop.permute.xlu2 %2216 }
 0x1bf   :  { %1802 = vrot.lane.b32.xlu0 %v8631_v54, %s7669_s30  ;;  %v1269_v49 = vpop.permute.xlu1 %1268 }
 0x1c0   :  { %v2493_v37 = vsel %vm2456_vm6, %v2428_v48, %v1269_v49 }
 0x1c1   :  { %v851_v16 = vpop.permute.xlu0 %850 }
 0x1c2   :  { %v2344_v48 = vsel %vm2330_vm4, %v8050_v10, %v851_v16 }
 0x1c4   :  { %2174 = vrot.lane.b32.xlu2 %v8767_v20, %s7674_s9 }
 0x1c5   :  { %1084 = vrot.lane.b32.xlu1 %v8435_v4, %s7666_s21 }
 0x1c6   :  { %v8775_v42 = vpop.permute.xlu2 %1080 }
 0x1c7   :  { %1988 = vrot.lane.b32.xlu0 %v8762_v51, %s7673_s8  ;;  %v1223_v38 = vpop.permute.xlu1 %1222 }
 0x1c9   :  { %v1461_v50 = vpop.permute.xlu0 %1460 }
 0x1cc   :  { %1042 = vrot.lane.b32.xlu2 %v8460_v52, %s7666_s21 }
 0x1cd   :  { %1274 = vrot.lane.b32.xlu1 %v8505_v33, %s7670_s5 }
 0x1ce   :  { %v8787_v4 = vpop.permute.xlu2 %1270 }
 0x1cf   :  { %856 = vrot.lane.b32.xlu0 %v8454_v0, %s7668_s29  ;;  %v1845_v8 = vpop.permute.xlu1 %1844  ;;  %v2558_v0 = vsel %vm2521_vm7, %v2493_v37, %v1461_v50  ;;  %v54_v37 = vld [vmem:[%s16165_s0 + $0x90] sm:$0xff] }
 0x1d0   :  { %v2623_v63 = vsel %vm2586_vm8, %v2558_v0, %v1653_v39  ;;  %v414_v39 = vsel %vm165_vm0, %v229_v22, 0.0  ;;  %v2407_v22 = vsel %vm2393_vm5, %v2344_v48, %v8691_v58  ;;  %v195_v26 = vrot.slane %v54_v37, 7 }
 0x1d1   :  { %v1415_v24 = vpop.permute.xlu0 %1414  ;;  %v2688_v60 = vsel %vm2651_vm9, %v2623_v63, %v1845_v8  ;;  %v592_v8 = vrot.slane %v414_v39, 1  ;;  %v748_v10 = vrot.slane %v414_v39, 2  ;;  %v2470_v16 = vsel %vm2456_vm6, %v2407_v22, %v1223_v38 }
 0x1d2   :  { %v8839_v58 = vsel %vm165_vm0, 0.0, %v195_v26 }
 0x1d3   :  { %v8836_v6 = vsel %vm644_vm2, %v746_v17, %v748_v10  ;;  %v539_v48 = vrot.slane %v8839_v58, 1  ;;  %v695_v10 = vrot.slane %v8839_v58, 2 }
 0x1d4   :  { %1658 = vrot.lane.b32.xlu2 %v8644_v23, %s7671_s6 }
 0x1d5   :  { %1228 = vrot.lane.b32.xlu1 %v8619_v11, %s7670_s5 }
 0x1d6   :  { %v8800_v49 = vpop.permute.xlu2 %1224 }
 0x1d7   :  { %1466 = vrot.lane.b32.xlu0 %v8624_v57, %s7672_s7  ;;  %v1799_v28 = vpop.permute.xlu1 %1798 }
 0x1d9   :  { %v2031_v52 = vpop.permute.xlu0 %2030 }
 0x1da   :  { %v2753_v53 = vsel %vm2716_vm10, %v2688_v60, %v2031_v52  ;;  %v2535_v52 = vsel %vm2521_vm7, %v2470_v16, %v1415_v24 }
 0x1db   :  { %v2818_v50 = vsel %vm2781_vm11, %v2753_v53, %v2217_v18  ;;  %v8817_v18 = vld [vmem:[%s16165_s0 + $0x98] sm:$0xff]  ;;  %v2600_v38 = vsel %vm2586_vm8, %v2535_v52, %v8741_v59 }
 0x1dc   :  { %7313 = vmatmul.msk.f32.gmra.mxu3 %vm2851_vm12, %v2818_v50  ;;  %1612 = vrot.lane.b32.xlu2 %v8666_v61, %s7671_s6  ;;  %v16192_v60 = vrot.slane %v8817_v18, 7  ;;  %v8831_v50 = vsel %vm488_vm1, %v590_v34, %v592_v8  ;;  %v2665_v34 = vsel %vm2651_vm9, %v2600_v38, %v1799_v28 }
 0x1dd   :  { %1850 = vrot.lane.b32.xlu1 %v8702_v15, %s7669_s30 }
 0x1de   :  { %v1847_v63 = vpop.permute.xlu2 %1846  ;;  %v8848_v24 = vsel %vm165_vm0, %v195_v26, %v16192_v60 }
 0x1df   :  { %1420 = vrot.lane.b32.xlu0 %v8651_v3, %s7672_s7  ;;  %v1985_v53 = vpop.permute.xlu1 %1984  ;;  %v16191_v37 = vrot.slane %v8848_v24, 1  ;;  %v16190_v26 = vrot.slane %v8848_v24, 2 }
 0x1e0   :  { %v2730_v39 = vsel %vm2716_vm10, %v2665_v34, %v1985_v53 }
 0x1e1   :  { %v895_v0 = vpop.permute.xlu0 %894  ;;  %v8863_v28 = vsel %vm488_vm1, %v539_v48, %v16191_v37  ;;  %v8876_v38 = vsel %vm644_vm2, %v695_v10, %v16190_v26 }
 0x1e4   :  { %2222 = vrot.lane.b32.xlu2 %v8836_v6, %s7674_s9 }
 0x1e5   :  { %1804 = vrot.lane.b32.xlu1 %v8839_v58, %s7669_s30 }
 0x1e6   :  { %v1801_v8 = vpop.permute.xlu2 %1800 }
 0x1e7   :  { %2036 = vrot.lane.b32.xlu0 %v8831_v50, %s7673_s8  ;;  %v853_v22 = vpop.permute.xlu1 %852 }
 0x1e9   :  { %v2171_v17 = vpop.permute.xlu0 %2170 }
 0x1ea   :  { %v2795_v59 = vsel %vm2781_vm11, %v2730_v39, %v2171_v17  ;;  %v2366_v39 = vsel %vm2330_vm4, %v8234_v21, %v895_v0  ;;  %v78_v17 = vld [vmem:[%s16165_s0 + $0x150] sm:$0xff] }
 0x1eb   :  { %7290 = vmatmul.msk.f32.gmra.mxu0 %vm2851_vm12, %v2795_v59  ;;  %v2429_v59 = vsel %vm2393_vm5, %v2366_v39, %v8775_v42 }
 0x1ec   :  { %1086 = vrot.lane.b32.xlu2 %v8532_v13, %s7666_s21  ;;  %v2494_v0 = vsel %vm2456_vm6, %v2429_v59, %v8787_v4  ;;  %v2345_v4 = vsel %vm2330_vm4, %v8162_v25, %v853_v22 }
 0x1ed   :  { %1990 = vrot.lane.b32.xlu1 %v8863_v28, %s7673_s8 }
 0x1ee   :  { %v1987_v52 = vpop.permute.xlu2 %1986 }
 0x1ef   :  { %900 = vrot.lane.b32.xlu0 %v8526_v14, %s7668_s29  ;;  %v1463_v53 = vpop.permute.xlu1 %1462 }
 0x1f0   :  { %v2559_v39 = vsel %vm2521_vm7, %v2494_v0, %v1463_v53 }
 0x1f1   :  { %v1039_v16 = vpop.permute.xlu0 %1038 }
 0x1f2   :  { %v2408_v53 = vsel %vm2393_vm5, %v2345_v4, %v1039_v16  ;;  %v16663_v4 = vrot.slane %v8817_v18, 7 }
 0x1f4   :  { %1276 = vrot.lane.b32.xlu2 %v8705_v27, %s7670_s5 }
 0x1f5   :  { %858 = vrot.lane.b32.xlu1 %v8550_v7, %s7668_s29  ;;  %v8898_v7 = vld [vmem:[%s16165_s0 + $0x158] sm:$0xff] }
 0x1f6   :  { %v8884_v13 = vpop.permute.xlu2 %854  ;;  %v16193_v42 = vrot.slane %v8898_v7, 7 }
 0x1f7   :  { %2176 = vrot.lane.b32.xlu0 %v8876_v38, %s7674_s9  ;;  %v1417_v34 = vpop.permute.xlu1 %1416 }
 0x1f9   :  { %v1655_v14 = vpop.permute.xlu0 %1654 }
 0x1fa   :  { %v2624_v37 = vsel %vm2586_vm8, %v2559_v39, %v1655_v14 }
 0x1fb   :  { %v2689_v59 = vsel %vm2651_vm9, %v2624_v37, %v1847_v63  ;;  %v2471_v63 = vsel %vm2456_vm6, %v2408_v53, %v8800_v49 }
 0x1fc   :  { %1230 = vrot.lane.b32.xlu2 %v8631_v54, %s7670_s5  ;;  %v2536_v22 = vsel %vm2521_vm7, %v2471_v63, %v1417_v34 }
 0x1fd   :  { %1468 = vrot.lane.b32.xlu1 %v8726_v9, %s7672_s7 }
 0x1fe   :  { %v8906_v10 = vpop.permute.xlu2 %1464 }
 0x1ff   :  { %1044 = vrot.lane.b32.xlu0 %v8561_v32, %s7666_s21  ;;  %v231_v32 = vrot.slane %v78_v17, 7  ;;  %v2033_v26 = vpop.permute.xlu1 %2032 }
 0x200   :  { %v2754_v14 = vsel %vm2716_vm10, %v2689_v59, %v2033_v26  ;;  %v403_v59 = vsel %vm165_vm0, %v16663_v4, 0.0 }
 0x201   :  { %v1609_v48 = vpop.permute.xlu0 %1608  ;;  %v8912_v60 = vsel %vm165_vm0, 0.0, %v231_v32  ;;  %v8919_v17 = vsel %vm165_vm0, %v231_v32, %v16193_v42 }
 0x202   :  { %v594_v32 = vrot.slane %v8912_v60, 1  ;;  %v595_v42 = vrot.slane %v8919_v17, 1  ;;  %v2601_v26 = vsel %vm2586_vm8, %v2536_v22, %v1609_v48  ;;  %v16194_v49 = vrot.slane %v8919_v17, 2 }
 0x203   :  { %v2666_v34 = vsel %vm2651_vm9, %v2601_v26, %v1801_v8  ;;  %v542_v48 = vrot.slane %v403_v59, 1  ;;  %v16664_v8 = vrot.slane %v8848_v24, 1 }
 0x204   :  { %1852 = vrot.lane.b32.xlu2 %v8912_v60, %s7669_s30  ;;  %v8943_v16 = vsel %vm488_vm1, %v594_v32, %v595_v42  ;;  %v2731_v18 = vsel %vm2716_vm10, %v2666_v34, %v1987_v52  ;;  %v698_v52 = vrot.slane %v403_v59, 2  ;;  %v16665_v34 = vrot.slane %v8848_v24, 2 }
 0x205   :  { %1422 = vrot.lane.b32.xlu1 %v8762_v51, %s7672_s7  ;;  %v8968_v22 = vsel %vm488_vm1, %v16664_v8, %v542_v48 }
 0x206   :  { %v8933_v25 = vpop.permute.xlu2 %1418 }
 0x207   :  { %1660 = vrot.lane.b32.xlu0 %v8751_v29, %s7671_s6  ;;  %v897_v37 = vpop.permute.xlu1 %896 }
 0x209   :  { %v2219_v0 = vpop.permute.xlu0 %2218 }
 0x20a   :  { %v2819_v39 = vsel %vm2781_vm11, %v2754_v14, %v2219_v0  ;;  %v750_v14 = vrot.slane %v8912_v60, 2 }
 0x20b   :  { %7314 = vmatmul.msk.f32.gmra.mxu3 %vm2851_vm12, %v2819_v39 }
 0x20c   :  { %1806 = vrot.lane.b32.xlu2 %v8848_v24, %s7669_s30  ;;  %v8961_v32 = vsel %vm644_vm2, %v750_v14, %v16194_v49  ;;  %v16666_v49 = vrot.slane %v8898_v7, 7 }
 0x20d   :  { %2038 = vrot.lane.b32.xlu1 %v8943_v16, %s7673_s8 }
 0x20e   :  { %v2035_v0 = vpop.permute.xlu2 %2034 }
 0x20f   :  { %1614 = vrot.lane.b32.xlu0 %v8767_v20, %s7671_s6  ;;  %v2173_v39 = vpop.permute.xlu1 %2172 }
 0x210   :  { %v2796_v63 = vsel %vm2781_vm11, %v2731_v18, %v2173_v39  ;;  %v8981_v39 = vsel %vm644_vm2, %v16665_v34, %v698_v52 }
 0x211   :  { %v1083_v53 = vpop.permute.xlu0 %1082  ;;  %7291 = vmatmul.msk.f32.gmra.mxu0 %vm2851_vm12, %v2796_v63 }
 0x214   :  { %1992 = vrot.lane.b32.xlu2 %v8968_v22, %s7673_s8 }
 0x215   :  { %902 = vrot.lane.b32.xlu1 %v8624_v57, %s7668_s29 }
 0x216   :  { %v8976_v4 = vpop.permute.xlu2 %898 }
 0x217   :  { %2224 = vrot.lane.b32.xlu0 %v8961_v32, %s7674_s9  ;;  %v1041_v14 = vpop.permute.xlu1 %1040 }
 0x219   :  { %v1273_v26 = vpop.permute.xlu0 %1272 }
 0x21c   :  { %860 = vrot.lane.b32.xlu2 %v8651_v3, %s7668_s29 }
 0x21d   :  { %2178 = vrot.lane.b32.xlu1 %v8981_v39, %s7674_s9 }
 0x21e   :  { %v2175_v57 = vpop.permute.xlu2 %2174 }
 0x21f   :  { %1088 = vrot.lane.b32.xlu0 %v8644_v23, %s7666_s21  ;;  %v1657_v59 = vpop.permute.xlu1 %1656  ;;  %v2367_v23 = vsel %vm2330_vm4, %v8280_v47, %v897_v37  ;;  %v2346_v47 = vsel %vm2330_vm4, %v8169_v45, %v8884_v13 }
 0x220   :  { %v2430_v3 = vsel %vm2393_vm5, %v2367_v23, %v1083_v53  ;;  %v2409_v7 = vsel %vm2393_vm5, %v2346_v47, %v1041_v14  ;;  %v9033_v14 = vld [vmem:[%s16165_s0 + $0xa8] sm:$0xff] }
 0x221   :  { %v1227_v48 = vpop.permute.xlu0 %1226  ;;  %v2495_v8 = vsel %vm2456_vm6, %v2430_v3, %v1273_v26 }
 0x222   :  { %v2560_v34 = vsel %vm2521_vm7, %v2495_v8, %v8906_v10 }
 0x223   :  { %v2625_v37 = vsel %vm2586_vm8, %v2560_v34, %v1657_v59  ;;  %v56_v59 = vld [vmem:[%s16165_s0 + $0xa0] sm:$0xff] }
 0x224   :  { %1470 = vrot.lane.b32.xlu2 %v8831_v50, %s7672_s7  ;;  %v198_v8 = vrot.slane %v56_v59, 7 }
 0x225   :  { %1046 = vrot.lane.b32.xlu1 %v8666_v61, %s7666_s21  ;;  %v415_v61 = vsel %vm165_vm0, %v16666_v49, 0.0  ;;  %v2472_v49 = vsel %vm2456_vm6, %v2409_v7, %v1227_v48 }
 0x226   :  { %v8998_v63 = vpop.permute.xlu2 %1042  ;;  %v597_v10 = vrot.slane %v415_v61, 1 }
 0x227   :  { %1278 = vrot.lane.b32.xlu0 %v8702_v15, %s7670_s5  ;;  %v1611_v52 = vpop.permute.xlu1 %1610 }
 0x229   :  { %v1849_v18 = vpop.permute.xlu0 %1848 }
 0x22a   :  { %v2690_v53 = vsel %vm2651_vm9, %v2625_v37, %v1849_v18  ;;  %v9028_v18 = vsel %vm488_vm1, %v595_v42, %v597_v10  ;;  %v16198_v42 = vrot.slane %v9033_v14, 7 }
 0x22b   :  { %v2755_v45 = vsel %vm2716_vm10, %v2690_v53, %v2035_v0  ;;  %v2537_v0 = vsel %vm2521_vm7, %v2472_v49, %v8933_v25  ;;  %v753_v25 = vrot.slane %v415_v61, 2  ;;  %v16667_v49 = vrot.slane %v8919_v17, 2 }
 0x22c   :  { %1424 = vrot.lane.b32.xlu2 %v8863_v28, %s7672_s7  ;;  %v2602_v48 = vsel %vm2586_vm8, %v2537_v0, %v1611_v52  ;;  %v9057_v7 = vsel %vm165_vm0, %v198_v8, %v16198_v42 }
 0x22d   :  { %1662 = vrot.lane.b32.xlu1 %v8836_v6, %s7671_s6  ;;  %v16196_v61 = vrot.slane %v9057_v7, 1  ;;  %v16195_v59 = vrot.slane %v9057_v7, 2 }
 0x22e   :  { %v1659_v23 = vpop.permute.xlu2 %1658 }
 0x22f   :  { %1232 = vrot.lane.b32.xlu0 %v8839_v58, %s7670_s5  ;;  %v2221_v3 = vpop.permute.xlu1 %2220 }
 0x230   :  { %v2820_v13 = vsel %vm2781_vm11, %v2755_v45, %v2221_v3  ;;  %v9062_v3 = vsel %vm644_vm2, %v16667_v49, %v753_v25  ;;  %v2368_v25 = vsel %vm2330_vm4, %v8287_v35, %v8976_v4  ;;  %v9109_v35 = vld [vmem:[%s16165_s0 + $0x168] sm:$0xff] }
 0x231   :  { %v1803_v26 = vpop.permute.xlu0 %1802  ;;  %7315 = vmatmul.msk.f32.gmra.mxu3 %vm2851_vm12, %v2820_v13 }
 0x232   :  { %v2667_v34 = vsel %vm2651_vm9, %v2602_v48, %v1803_v26  ;;  %v9052_v26 = vsel %vm165_vm0, 0.0, %v198_v8 }
 0x233   :  { %v700_v13 = vrot.slane %v9052_v26, 2 }
 0x234   :  { %2040 = vrot.lane.b32.xlu2 %v9028_v18, %s7673_s8 }
 0x235   :  { %1616 = vrot.lane.b32.xlu1 %v8876_v38, %s7671_s6 }
 0x236   :  { %v9047_v53 = vpop.permute.xlu2 %1612 }
 0x237   :  { %1854 = vrot.lane.b32.xlu0 %v8919_v17, %s7669_s30  ;;  %v1085_v52 = vpop.permute.xlu1 %1084 }
 0x238   :  { %v2431_v49 = vsel %vm2393_vm5, %v2368_v25, %v1085_v52 }
 0x239   :  { %v1989_v47 = vpop.permute.xlu0 %1988 }
 0x23a   :  { %v2732_v37 = vsel %vm2716_vm10, %v2667_v34, %v1989_v47  ;;  %v9082_v34 = vsel %vm644_vm2, %v700_v13, %v16195_v59 }
 0x23b   :  { %v2797_v10 = vsel %vm2781_vm11, %v2732_v37, %v2175_v57  ;;  %v544_v57 = vrot.slane %v9052_v26, 1 }
 0x23c   :  { %7292 = vmatmul.msk.f32.gmra.mxu0 %vm2851_vm12, %v2797_v10  ;;  %904 = vrot.lane.b32.xlu2 %v8726_v9, %s7668_s29 }
 0x23d   :  { %2226 = vrot.lane.b32.xlu1 %v9062_v3, %s7674_s9  ;;  %v9077_v8 = vsel %vm488_vm1, %v544_v57, %v16196_v61 }
 0x23e   :  { %v2223_v0 = vpop.permute.xlu2 %2222 }
 0x23f   :  { %1808 = vrot.lane.b32.xlu0 %v9052_v26, %s7669_s30  ;;  %v1275_v48 = vpop.permute.xlu1 %1274 }
 0x240   :  { %v2496_v57 = vsel %vm2456_vm6, %v2431_v49, %v1275_v48 }
 0x241   :  { %v857_v45 = vpop.permute.xlu0 %856 }
 0x244   :  { %2180 = vrot.lane.b32.xlu2 %v9082_v34, %s7674_s9 }
 0x245   :  { %1090 = vrot.lane.b32.xlu1 %v8751_v29, %s7666_s21 }
 0x246   :  { %v9090_v47 = vpop.permute.xlu2 %1086 }
 0x247   :  { %1994 = vrot.lane.b32.xlu0 %v9077_v8, %s7673_s8  ;;  %v1229_v37 = vpop.permute.xlu1 %1228 }
 0x249   :  { %v1467_v9 = vpop.permute.xlu0 %1466 }
 0x24c   :  { %1048 = vrot.lane.b32.xlu2 %v8767_v20, %s7666_s21  ;;  %v80_v20 = vld [vmem:[%s16165_s0 + $0x160] sm:$0xff] }
 0x24d   :  { %1280 = vrot.lane.b32.xlu1 %v8912_v60, %s7670_s5  ;;  %v234_v49 = vrot.slane %v80_v20, 7 }
 0x24e   :  { %v9102_v29 = vpop.permute.xlu2 %1276 }
 0x24f   :  { %862 = vrot.lane.b32.xlu0 %v8762_v51, %s7668_s29  ;;  %v1851_v13 = vpop.permute.xlu1 %1850  ;;  %v2561_v51 = vsel %vm2521_vm7, %v2496_v57, %v1467_v9  ;;  %v16197_v9 = vrot.slane %v9109_v35, 7 }
 0x250   :  { %v2626_v4 = vsel %vm2586_vm8, %v2561_v51, %v1659_v23  ;;  %v2347_v51 = vsel %vm2330_vm4, %v8425_v5, %v857_v45 }
 0x251   :  { %v1421_v10 = vpop.permute.xlu0 %1420  ;;  %v2691_v52 = vsel %vm2651_vm9, %v2626_v4, %v1851_v13  ;;  %v9131_v23 = vsel %vm165_vm0, %v234_v49, %v16197_v9  ;;  %v9134_v13 = vsel %vm165_vm0, 0.0, %v234_v49 }
 0x252   :  { %v599_v20 = vrot.slane %v9134_v13, 1  ;;  %v756_v5 = vrot.slane %v9131_v23, 2 }
 0x254   :  { %1664 = vrot.lane.b32.xlu2 %v8961_v32, %s7671_s6 }
 0x255   :  { %1234 = vrot.lane.b32.xlu1 %v8848_v24, %s7670_s5 }
 0x256   :  { %v9124_v57 = vpop.permute.xlu2 %1230 }
 0x257   :  { %1472 = vrot.lane.b32.xlu0 %v8943_v16, %s7672_s7  ;;  %v1805_v61 = vpop.permute.xlu1 %1804 }
 0x259   :  { %v2037_v48 = vpop.permute.xlu0 %2036 }
 0x25a   :  { %v2756_v25 = vsel %vm2716_vm10, %v2691_v52, %v2037_v48  ;;  %v755_v52 = vrot.slane %v9134_v13, 2 }
 0x25b   :  { %v2821_v59 = vsel %vm2781_vm11, %v2756_v25, %v2223_v0  ;;  %v600_v0 = vrot.slane %v9131_v23, 1 }
 0x25c   :  { %7316 = vmatmul.msk.f32.gmra.mxu3 %vm2851_vm12, %v2821_v59  ;;  %1618 = vrot.lane.b32.xlu2 %v8981_v39, %s7671_s6  ;;  %v2410_v59 = vsel %vm2393_vm5, %v2347_v51, %v8998_v63  ;;  %v9160_v42 = vsel %vm644_vm2, %v755_v52, %v756_v5 }
 0x25d   :  { %1856 = vrot.lane.b32.xlu1 %v9134_v13, %s7669_s30  ;;  %v2473_v45 = vsel %vm2456_vm6, %v2410_v59, %v1229_v37  ;;  %v9155_v9 = vsel %vm488_vm1, %v599_v20, %v600_v0  ;;  %v16668_v37 = vrot.slane %v9033_v14, 7 }
 0x25e   :  { %v1853_v48 = vpop.permute.xlu2 %1852  ;;  %v2538_v25 = vsel %vm2521_vm7, %v2473_v45, %v1421_v10 }
 0x25f   :  { %1426 = vrot.lane.b32.xlu0 %v8968_v22, %s7672_s7  ;;  %v1991_v49 = vpop.permute.xlu1 %1990  ;;  %v2603_v63 = vsel %vm2586_vm8, %v2538_v25, %v9047_v53  ;;  %v404_v10 = vsel %vm165_vm0, %v16668_v37, 0.0  ;;  %v16669_v25 = vrot.slane %v9057_v7, 1 }
 0x260   :  { %v2668_v51 = vsel %vm2651_vm9, %v2603_v63, %v1805_v61  ;;  %v547_v52 = vrot.slane %v404_v10, 1 }
 0x261   :  { %v901_v4 = vpop.permute.xlu0 %900  ;;  %v2733_v20 = vsel %vm2716_vm10, %v2668_v51, %v1991_v49  ;;  %v703_v49 = vrot.slane %v404_v10, 2 }
 0x262   :  { %v9180_v61 = vsel %vm488_vm1, %v16669_v25, %v547_v52  ;;  %v2369_v10 = vsel %vm2330_vm4, %v8509_v44, %v901_v4 }
 0x263   :  { %v2432_v52 = vsel %vm2393_vm5, %v2369_v10, %v9090_v47  ;;  %v58_v47 = vld [vmem:[%s16165_s0 + $0xb0] sm:$0xff] }
 0x264   :  { %2228 = vrot.lane.b32.xlu2 %v9160_v42, %s7674_s9 }
 0x265   :  { %1810 = vrot.lane.b32.xlu1 %v9057_v7, %s7669_s30 }
 0x266   :  { %v1807_v45 = vpop.permute.xlu2 %1806 }
 0x267   :  { %2042 = vrot.lane.b32.xlu0 %v9155_v9, %s7673_s8  ;;  %v859_v14 = vpop.permute.xlu1 %858 }
 0x269   :  { %v2177_v59 = vpop.permute.xlu0 %2176 }
 0x26a   :  { %v2798_v53 = vsel %vm2781_vm11, %v2733_v20, %v2177_v59  ;;  %v16670_v20 = vrot.slane %v9057_v7, 2 }
 0x26b   :  { %7293 = vmatmul.msk.f32.gmra.mxu0 %vm2851_vm12, %v2798_v53 }
 0x26c   :  { %1092 = vrot.lane.b32.xlu2 %v8836_v6, %s7666_s21  ;;  %v9191_v59 = vsel %vm644_vm2, %v16670_v20, %v703_v49  ;;  %v16671_v20 = vrot.slane %v9109_v35, 7  ;;  %v201_v35 = vrot.slane %v58_v47, 7 }
 0x26d   :  { %1996 = vrot.lane.b32.xlu1 %v9180_v61, %s7673_s8 }
 0x26e   :  { %v1993_v37 = vpop.permute.xlu2 %1992  ;;  %v416_v10 = vsel %vm165_vm0, %v16671_v20, 0.0 }
 0x26f   :  { %906 = vrot.lane.b32.xlu0 %v8831_v50, %s7668_s29  ;;  %v1469_v51 = vpop.permute.xlu1 %1468 }
 0x271   :  { %v1045_v63 = vpop.permute.xlu0 %1044 }
 0x274   :  { %1282 = vrot.lane.b32.xlu2 %v8919_v17, %s7670_s5 }
 0x275   :  { %864 = vrot.lane.b32.xlu1 %v8863_v28, %s7668_s29  ;;  %v2497_v28 = vsel %vm2456_vm6, %v2432_v52, %v9102_v29  ;;  %v2348_v29 = vsel %vm2330_vm4, %v8430_v43, %v859_v14 }
 0x276   :  { %v9199_v6 = vpop.permute.xlu2 %860  ;;  %v2562_v44 = vsel %vm2521_vm7, %v2497_v28, %v1469_v51  ;;  %v9231_v51 = vld [vmem:[%s16165_s0 + $0xb8] sm:$0xff] }
 0x277   :  { %2182 = vrot.lane.b32.xlu0 %v9191_v59, %s7674_s9  ;;  %v1423_v50 = vpop.permute.xlu1 %1422 }
 0x279   :  { %v1661_v53 = vpop.permute.xlu0 %1660 }
 0x27c   :  { %1236 = vrot.lane.b32.xlu2 %v9052_v26, %s7670_s5 }
 0x27d   :  { %1474 = vrot.lane.b32.xlu1 %v9028_v18, %s7672_s7 }
 0x27e   :  { %v9213_v49 = vpop.permute.xlu2 %1470 }
 0x27f   :  { %1050 = vrot.lane.b32.xlu0 %v8876_v38, %s7666_s21  ;;  %v2039_v4 = vpop.permute.xlu1 %2038  ;;  %v2627_v38 = vsel %vm2586_vm8, %v2562_v44, %v1661_v53  ;;  %v2411_v53 = vsel %vm2393_vm5, %v2348_v29, %v1045_v63 }
 0x280   :  { %v2692_v52 = vsel %vm2651_vm9, %v2627_v38, %v1853_v48  ;;  %v602_v48 = vrot.slane %v416_v10, 1  ;;  %v16201_v38 = vrot.slane %v9231_v51, 7  ;;  %v2474_v63 = vsel %vm2456_vm6, %v2411_v53, %v9124_v57 }
 0x281   :  { %v1615_v25 = vpop.permute.xlu0 %1614  ;;  %v2757_v28 = vsel %vm2716_vm10, %v2692_v52, %v2039_v4  ;;  %v2539_v20 = vsel %vm2521_vm7, %v2474_v63, %v1423_v50  ;;  %v9249_v52 = vsel %vm165_vm0, 0.0, %v201_v35  ;;  %v758_v53 = vrot.slane %v416_v10, 2 }
 0x282   :  { %v2604_v29 = vsel %vm2586_vm8, %v2539_v20, %v1615_v25  ;;  %v9254_v47 = vsel %vm488_vm1, %v600_v0, %v602_v48  ;;  %v9261_v57 = vsel %vm165_vm0, %v201_v35, %v16201_v38  ;;  %v549_v0 = vrot.slane %v9249_v52, 1 }
 0x283   :  { %v2669_v50 = vsel %vm2651_vm9, %v2604_v29, %v1807_v45  ;;  %v9274_v10 = vsel %vm644_vm2, %v756_v5, %v758_v53  ;;  %v705_v5 = vrot.slane %v9249_v52, 2 }
 0x284   :  { %1858 = vrot.lane.b32.xlu2 %v9131_v23, %s7669_s30  ;;  %v2734_v48 = vsel %vm2716_vm10, %v2669_v50, %v1993_v37  ;;  %v16199_v37 = vrot.slane %v9261_v57, 2 }
 0x285   :  { %1428 = vrot.lane.b32.xlu1 %v9077_v8, %s7672_s7 }
 0x286   :  { %v9240_v14 = vpop.permute.xlu2 %1424  ;;  %v9296_v53 = vsel %vm644_vm2, %v705_v5, %v16199_v37 }
 0x287   :  { %1666 = vrot.lane.b32.xlu0 %v9062_v3, %s7671_s6  ;;  %v903_v4 = vpop.permute.xlu1 %902 }
 0x289   :  { %v2225_v44 = vpop.permute.xlu0 %2224 }
 0x28a   :  { %v2822_v43 = vsel %vm2781_vm11, %v2757_v28, %v2225_v44  ;;  %v16200_v28 = vrot.slane %v9261_v57, 1 }
 0x28b   :  { %7317 = vmatmul.msk.f32.gmra.mxu3 %vm2851_vm12, %v2822_v43 }
 0x28c   :  { %1812 = vrot.lane.b32.xlu2 %v9249_v52, %s7669_s30  ;;  %v9281_v35 = vsel %vm488_vm1, %v549_v0, %v16200_v28 }
 0x28d   :  { %2044 = vrot.lane.b32.xlu1 %v9254_v47, %s7673_s8 }
 0x28e   :  { %v2041_v44 = vpop.permute.xlu2 %2040 }
 0x28f   :  { %1620 = vrot.lane.b32.xlu0 %v9082_v34, %s7671_s6  ;;  %v2179_v43 = vpop.permute.xlu1 %2178 }
 0x290   :  { %v2799_v45 = vsel %vm2781_vm11, %v2734_v48, %v2179_v43  ;;  %v82_v43 = vld [vmem:[%s16165_s0 + $0x170] sm:$0xff] }
 0x291   :  { %v1089_v25 = vpop.permute.xlu0 %1088  ;;  %7294 = vmatmul.msk.f32.gmra.mxu0 %vm2851_vm12, %v2799_v45  ;;  %v237_v37 = vrot.slane %v82_v43, 7 }
 0x294   :  { %1998 = vrot.lane.b32.xlu2 %v9281_v35, %s7673_s8 }
 0x295   :  { %908 = vrot.lane.b32.xlu1 %v8943_v16, %s7668_s29 }
 0x296   :  { %v9291_v20 = vpop.permute.xlu2 %904 }
 0x297   :  { %2230 = vrot.lane.b32.xlu0 %v9274_v10, %s7674_s9  ;;  %v1047_v29 = vpop.permute.xlu1 %1046 }
 0x299   :  { %v1279_v63 = vpop.permute.xlu0 %1278 }
 0x29c   :  { %866 = vrot.lane.b32.xlu2 %v8968_v22, %s7668_s29  ;;  %v2370_v22 = vsel %vm2330_vm4, %v8505_v33, %v903_v4  ;;  %v2349_v4 = vsel %vm2330_vm4, %v8619_v11, %v9199_v6 }
 0x29d   :  { %2184 = vrot.lane.b32.xlu1 %v9296_v53, %s7674_s9  ;;  %v2433_v45 = vsel %vm2393_vm5, %v2370_v22, %v1089_v25  ;;  %v2412_v43 = vsel %vm2393_vm5, %v2349_v4, %v1047_v29 }
 0x29e   :  { %v2181_v16 = vpop.permute.xlu2 %2180  ;;  %v2498_v38 = vsel %vm2456_vm6, %v2433_v45, %v1279_v63 }
 0x29f   :  { %1094 = vrot.lane.b32.xlu0 %v8961_v32, %s7666_s21  ;;  %v1663_v0 = vpop.permute.xlu1 %1662  ;;  %v9312_v32 = vld [vmem:[%s16165_s0 + $0x178] sm:$0xff]  ;;  %v2563_v55 = vsel %vm2521_vm7, %v2498_v38, %v9213_v49 }
 0x2a0   :  { %v238_v28 = vrot.slane %v9312_v32, 7  ;;  %v2628_v25 = vsel %vm2586_vm8, %v2563_v55, %v1663_v0 }
 0x2a1   :  { %v1233_v50 = vpop.permute.xlu0 %1232 }
 0x2a2   :  { %v9332_v33 = vsel %vm165_vm0, %v237_v37, %v238_v28  ;;  %v2475_v11 = vsel %vm2456_vm6, %v2412_v43, %v1233_v50 }
 0x2a3   :  { %v2540_v45 = vsel %vm2521_vm7, %v2475_v11, %v9240_v14  ;;  %v761_v14 = vrot.slane %v9332_v33, 2 }
 0x2a4   :  { %1476 = vrot.lane.b32.xlu2 %v9155_v9, %s7672_s7 }
 0x2a5   :  { %1052 = vrot.lane.b32.xlu1 %v8981_v39, %s7666_s21  ;;  %v9335_v39 = vsel %vm165_vm0, 0.0, %v237_v37  ;;  %v605_v37 = vrot.slane %v9332_v33, 1 }
 0x2a6   :  { %v9321_v5 = vpop.permute.xlu2 %1048  ;;  %v604_v38 = vrot.slane %v9335_v39, 1 }
 0x2a7   :  { %1284 = vrot.lane.b32.xlu0 %v9134_v13, %s7670_s5  ;;  %v1617_v21 = vpop.permute.xlu1 %1616 }
 0x2a8   :  { %v2605_v29 = vsel %vm2586_vm8, %v2540_v45, %v1617_v21  ;;  %v16673_v45 = vrot.slane %v9261_v57, 1 }
 0x2a9   :  { %v1855_v48 = vpop.permute.xlu0 %1854 }
 0x2aa   :  { %v2693_v63 = vsel %vm2651_vm9, %v2628_v25, %v1855_v48  ;;  %v9356_v48 = vsel %vm488_vm1, %v604_v38, %v605_v37  ;;  %v760_v25 = vrot.slane %v9335_v39, 2 }
 0x2ab   :  { %v2758_v55 = vsel %vm2716_vm10, %v2693_v63, %v2041_v44 }
 0x2ac   :  { %1430 = vrot.lane.b32.xlu2 %v9180_v61, %s7672_s7  ;;  %v9381_v11 = vsel %vm644_vm2, %v760_v25, %v761_v14 }
 0x2ad   :  { %1668 = vrot.lane.b32.xlu1 %v9160_v42, %s7671_s6 }
 0x2ae   :  { %v1665_v22 = vpop.permute.xlu2 %1664 }
 0x2af   :  { %1238 = vrot.lane.b32.xlu0 %v9057_v7, %s7670_s5  ;;  %v2227_v6 = vpop.permute.xlu1 %2226 }
 0x2b0   :  { %v2823_v0 = vsel %vm2781_vm11, %v2758_v55, %v2227_v6 }
 0x2b1   :  { %v1809_v49 = vpop.permute.xlu0 %1808  ;;  %7318 = vmatmul.msk.f32.gmra.mxu3 %vm2851_vm12, %v2823_v0 }
 0x2b2   :  { %v2670_v50 = vsel %vm2651_vm9, %v2605_v29, %v1809_v49  ;;  %v16672_v49 = vrot.slane %v9231_v51, 7 }
 0x2b4   :  { %2046 = vrot.lane.b32.xlu2 %v9356_v48, %s7673_s8  ;;  %v405_v43 = vsel %vm165_vm0, %v16672_v49, 0.0 }
 0x2b5   :  { %1622 = vrot.lane.b32.xlu1 %v9191_v59, %s7671_s6  ;;  %v552_v6 = vrot.slane %v405_v43, 1 }
 0x2b6   :  { %v9371_v63 = vpop.permute.xlu2 %1618 }
 0x2b7   :  { %1860 = vrot.lane.b32.xlu0 %v9335_v39, %s7669_s30  ;;  %v1091_v21 = vpop.permute.xlu1 %1090  ;;  %v9392_v29 = vsel %vm488_vm1, %v16673_v45, %v552_v6 }
 0x2b9   :  { %v1995_v44 = vpop.permute.xlu0 %1994 }
 0x2ba   :  { %v2735_v4 = vsel %vm2716_vm10, %v2670_v50, %v1995_v44  ;;  %v16674_v50 = vrot.slane %v9261_v57, 2 }
 0x2bb   :  { %v2800_v38 = vsel %vm2781_vm11, %v2735_v4, %v2181_v16  ;;  %v708_v16 = vrot.slane %v405_v43, 2 }
 0x2bc   :  { %7295 = vmatmul.msk.f32.gmra.mxu0 %vm2851_vm12, %v2800_v38  ;;  %910 = vrot.lane.b32.xlu2 %v9028_v18, %s7668_s29  ;;  %v2371_v38 = vsel %vm2330_vm4, %v8705_v27, %v9291_v20 }
 0x2bd   :  { %2232 = vrot.lane.b32.xlu1 %v9381_v11, %s7674_s9  ;;  %v9397_v44 = vsel %vm644_vm2, %v16674_v50, %v708_v16  ;;  %v2434_v43 = vsel %vm2393_vm5, %v2371_v38, %v1091_v21  ;;  %v60_v38 = vld [vmem:[%s16165_s0 + $0xc0] sm:$0xff] }
 0x2be   :  { %v2229_v51 = vpop.permute.xlu2 %2228  ;;  %v204_v32 = vrot.slane %v60_v38, 7 }
 0x2bf   :  { %1814 = vrot.lane.b32.xlu0 %v9261_v57, %s7669_s30  ;;  %v1281_v0 = vpop.permute.xlu1 %1280 }
 0x2c0   :  { %v2499_v6 = vsel %vm2456_vm6, %v2434_v43, %v1281_v0 }
 0x2c1   :  { %v863_v55 = vpop.permute.xlu0 %862 }
 0x2c4   :  { %2186 = vrot.lane.b32.xlu2 %v9397_v44, %s7674_s9 }
 0x2c5   :  { %1096 = vrot.lane.b32.xlu1 %v9062_v3, %s7666_s21 }
 0x2c6   :  { %v9405_v4 = vpop.permute.xlu2 %1092 }
 0x2c7   :  { %2000 = vrot.lane.b32.xlu0 %v9392_v29, %s7673_s8  ;;  %v1235_v25 = vpop.permute.xlu1 %1234 }
 0x2c9   :  { %v1473_v18 = vpop.permute.xlu0 %1472 }
 0x2cc   :  { %1054 = vrot.lane.b32.xlu2 %v9082_v34, %s7666_s21 }
 0x2cd   :  { %1286 = vrot.lane.b32.xlu1 %v9131_v23, %s7670_s5 }
 0x2ce   :  { %v9417_v3 = vpop.permute.xlu2 %1282 }
 0x2cf   :  { %868 = vrot.lane.b32.xlu0 %v9077_v8, %s7668_s29  ;;  %v1857_v16 = vpop.permute.xlu1 %1856  ;;  %v2564_v8 = vsel %vm2521_vm7, %v2499_v6, %v1473_v18  ;;  %v2350_v18 = vsel %vm2330_vm4, %v8631_v54, %v863_v55 }
 0x2d0   :  { %v2629_v27 = vsel %vm2586_vm8, %v2564_v8, %v1665_v22  ;;  %v417_v22 = vsel %vm165_vm0, %v238_v28, 0.0  ;;  %v2413_v54 = vsel %vm2393_vm5, %v2350_v18, %v9321_v5  ;;  %v9469_v5 = vsel %vm165_vm0, 0.0, %v204_v32 }
 0x2d1   :  { %v1427_v49 = vpop.permute.xlu0 %1426  ;;  %v2694_v20 = vsel %vm2651_vm9, %v2629_v27, %v1857_v16  ;;  %v607_v43 = vrot.slane %v417_v22, 1  ;;  %v763_v28 = vrot.slane %v417_v22, 2  ;;  %v2476_v55 = vsel %vm2456_vm6, %v2413_v54, %v1235_v25 }
 0x2d2   :  { %v2541_v27 = vsel %vm2521_vm7, %v2476_v55, %v1427_v49  ;;  %v554_v22 = vrot.slane %v9469_v5, 1  ;;  %v710_v54 = vrot.slane %v9469_v5, 2 }
 0x2d3   :  { %v2606_v25 = vsel %vm2586_vm8, %v2541_v27, %v9371_v63 }
 0x2d4   :  { %1670 = vrot.lane.b32.xlu2 %v9274_v10, %s7671_s6 }
 0x2d5   :  { %1240 = vrot.lane.b32.xlu1 %v9249_v52, %s7670_s5 }
 0x2d6   :  { %v9430_v0 = vpop.permute.xlu2 %1236 }
 0x2d7   :  { %1478 = vrot.lane.b32.xlu0 %v9254_v47, %s7672_s7  ;;  %v1811_v50 = vpop.permute.xlu1 %1810 }
 0x2d9   :  { %v2043_v34 = vpop.permute.xlu0 %2042 }
 0x2da   :  { %v2759_v21 = vsel %vm2716_vm10, %v2694_v20, %v2043_v34  ;;  %v9461_v34 = vsel %vm488_vm1, %v605_v37, %v607_v43  ;;  %v2671_v37 = vsel %vm2651_vm9, %v2606_v25, %v1811_v50 }
 0x2db   :  { %v2824_v45 = vsel %vm2781_vm11, %v2759_v21, %v2229_v51  ;;  %v9447_v51 = vld [vmem:[%s16165_s0 + $0xc8] sm:$0xff]  ;;  %v9466_v21 = vsel %vm644_vm2, %v761_v14, %v763_v28 }
 0x2dc   :  { %7319 = vmatmul.msk.f32.gmra.mxu3 %vm2851_vm12, %v2824_v45  ;;  %1624 = vrot.lane.b32.xlu2 %v9296_v53, %s7671_s6  ;;  %v205_v8 = vrot.slane %v9447_v51, 7 }
 0x2dd   :  { %1862 = vrot.lane.b32.xlu1 %v9332_v33, %s7669_s30 }
 0x2de   :  { %v1859_v16 = vpop.permute.xlu2 %1858  ;;  %v9478_v49 = vsel %vm165_vm0, %v204_v32, %v205_v8 }
 0x2df   :  { %1432 = vrot.lane.b32.xlu0 %v9281_v35, %s7672_s7  ;;  %v1997_v20 = vpop.permute.xlu1 %1996  ;;  %v555_v18 = vrot.slane %v9478_v49, 1  ;;  %v16204_v28 = vrot.slane %v9478_v49, 2 }
 0x2e0   :  { %v2736_v45 = vsel %vm2716_vm10, %v2671_v37, %v1997_v20 }
 0x2e1   :  { %v907_v6 = vpop.permute.xlu0 %906  ;;  %v9493_v50 = vsel %vm488_vm1, %v554_v22, %v555_v18  ;;  %v9506_v20 = vsel %vm644_vm2, %v710_v54, %v16204_v28 }
 0x2e2   :  { %v2372_v37 = vsel %vm2330_vm4, %v8702_v15, %v907_v6 }
 0x2e4   :  { %2234 = vrot.lane.b32.xlu2 %v9466_v21, %s7674_s9 }
 0x2e5   :  { %1816 = vrot.lane.b32.xlu1 %v9469_v5, %s7669_s30 }
 0x2e6   :  { %v1813_v38 = vpop.permute.xlu2 %1812 }
 0x2e7   :  { %2048 = vrot.lane.b32.xlu0 %v9461_v34, %s7673_s8  ;;  %v865_v43 = vpop.permute.xlu1 %864 }
 0x2e9   :  { %v2183_v14 = vpop.permute.xlu0 %2182 }
 0x2ea   :  { %v2801_v63 = vsel %vm2781_vm11, %v2736_v45, %v2183_v14  ;;  %v84_v45 = vld [vmem:[%s16165_s0 + $0x180] sm:$0xff]  ;;  %v2435_v14 = vsel %vm2393_vm5, %v2372_v37, %v9405_v4 }
 0x2eb   :  { %7296 = vmatmul.msk.f32.gmra.mxu0 %vm2851_vm12, %v2801_v63  ;;  %v240_v15 = vrot.slane %v84_v45, 7 }
 0x2ec   :  { %1098 = vrot.lane.b32.xlu2 %v9160_v42, %s7666_s21 }
 0x2ed   :  { %2002 = vrot.lane.b32.xlu1 %v9493_v50, %s7673_s8  ;;  %v9542_v28 = vsel %vm165_vm0, 0.0, %v240_v15 }
 0x2ee   :  { %v1999_v55 = vpop.permute.xlu2 %1998 }
 0x2ef   :  { %912 = vrot.lane.b32.xlu0 %v9155_v9, %s7668_s29  ;;  %v1475_v27 = vpop.permute.xlu1 %1474 }
 0x2f1   :  { %v1051_v32 = vpop.permute.xlu0 %1050 }
 0x2f4   :  { %1288 = vrot.lane.b32.xlu2 %v9335_v39, %s7670_s5 }
 0x2f5   :  { %870 = vrot.lane.b32.xlu1 %v9180_v61, %s7668_s29  ;;  %v9528_v61 = vld [vmem:[%s16165_s0 + $0x188] sm:$0xff] }
 0x2f6   :  { %v9514_v42 = vpop.permute.xlu2 %866  ;;  %v16205_v4 = vrot.slane %v9528_v61, 7 }
 0x2f7   :  { %2188 = vrot.lane.b32.xlu0 %v9506_v20, %s7674_s9  ;;  %v1429_v25 = vpop.permute.xlu1 %1428 }
 0x2f8   :  { %v9549_v45 = vsel %vm165_vm0, %v240_v15, %v16205_v4  ;;  %v609_v15 = vrot.slane %v9542_v28, 1 }
 0x2f9   :  { %v1667_v9 = vpop.permute.xlu0 %1666  ;;  %v610_v4 = vrot.slane %v9549_v45, 1 }
 0x2fc   :  { %1242 = vrot.lane.b32.xlu2 %v9261_v57, %s7670_s5 }
 0x2fd   :  { %1480 = vrot.lane.b32.xlu1 %v9356_v48, %s7672_s7 }
 0x2fe   :  { %v9536_v6 = vpop.permute.xlu2 %1476 }
 0x2ff   :  { %1056 = vrot.lane.b32.xlu0 %v9191_v59, %s7666_s21  ;;  %v2500_v59 = vsel %vm2456_vm6, %v2435_v14, %v9417_v3  ;;  %v2045_v54 = vpop.permute.xlu1 %2044  ;;  %v2351_v3 = vsel %vm2330_vm4, %v8839_v58, %v865_v43 }
 0x300   :  { %v2565_v22 = vsel %vm2521_vm7, %v2500_v59, %v1475_v27  ;;  %v2414_v27 = vsel %vm2393_vm5, %v2351_v3, %v1051_v32  ;;  %v406_v3 = vsel %vm165_vm0, %v205_v8, 0.0 }
 0x301   :  { %v1621_v63 = vpop.permute.xlu0 %1620  ;;  %v2630_v37 = vsel %vm2586_vm8, %v2565_v22, %v1667_v9 }
 0x302   :  { %v2695_v14 = vsel %vm2651_vm9, %v2630_v37, %v1859_v16  ;;  %v2477_v16 = vsel %vm2456_vm6, %v2414_v27, %v9430_v0  ;;  %v9573_v37 = vsel %vm488_vm1, %v609_v15, %v610_v4  ;;  %v766_v0 = vrot.slane %v9549_v45, 2 }
 0x303   :  { %v2760_v9 = vsel %vm2716_vm10, %v2695_v14, %v2045_v54  ;;  %v2542_v32 = vsel %vm2521_vm7, %v2477_v16, %v1429_v25  ;;  %v765_v14 = vrot.slane %v9542_v28, 2 }
 0x304   :  { %1864 = vrot.lane.b32.xlu2 %v9542_v28, %s7669_s30  ;;  %v2607_v54 = vsel %vm2586_vm8, %v2542_v32, %v1621_v63  ;;  %v557_v63 = vrot.slane %v406_v3, 1 }
 0x305   :  { %1434 = vrot.lane.b32.xlu1 %v9392_v29, %s7672_s7  ;;  %v2672_v25 = vsel %vm2651_vm9, %v2607_v54, %v1813_v38  ;;  %v9591_v8 = vsel %vm644_vm2, %v765_v14, %v766_v0  ;;  %v16675_v54 = vrot.slane %v9478_v49, 2 }
 0x306   :  { %v9563_v58 = vpop.permute.xlu2 %1430  ;;  %v2737_v51 = vsel %vm2716_vm10, %v2672_v25, %v1999_v55  ;;  %v9598_v38 = vsel %vm488_vm1, %v555_v18, %v557_v63  ;;  %v713_v55 = vrot.slane %v406_v3, 2 }
 0x307   :  { %1672 = vrot.lane.b32.xlu0 %v9381_v11, %s7671_s6  ;;  %v909_v43 = vpop.permute.xlu1 %908 }
 0x308   :  { %v9611_v14 = vsel %vm644_vm2, %v16675_v54, %v713_v55  ;;  %v16676_v55 = vrot.slane %v9528_v61, 7 }
 0x309   :  { %v2231_v59 = vpop.permute.xlu0 %2230 }
 0x30a   :  { %v2825_v22 = vsel %vm2781_vm11, %v2760_v9, %v2231_v59 }
 0x30b   :  { %7320 = vmatmul.msk.f32.gmra.mxu3 %vm2851_vm12, %v2825_v22 }
 0x30c   :  { %1818 = vrot.lane.b32.xlu2 %v9478_v49, %s7669_s30 }
 0x30d   :  { %2050 = vrot.lane.b32.xlu1 %v9573_v37, %s7673_s8 }
 0x30e   :  { %v2047_v9 = vpop.permute.xlu2 %2046 }
 0x30f   :  { %1626 = vrot.lane.b32.xlu0 %v9397_v44, %s7671_s6  ;;  %v2185_v59 = vpop.permute.xlu1 %2184 }
 0x310   :  { %v2802_v22 = vsel %vm2781_vm11, %v2737_v51, %v2185_v59 }
 0x311   :  { %v1095_v27 = vpop.permute.xlu0 %1094  ;;  %7297 = vmatmul.msk.f32.gmra.mxu0 %vm2851_vm12, %v2802_v22 }
 0x314   :  { %2004 = vrot.lane.b32.xlu2 %v9598_v38, %s7673_s8 }
 0x315   :  { %914 = vrot.lane.b32.xlu1 %v9254_v47, %s7668_s29 }
 0x316   :  { %v9606_v16 = vpop.permute.xlu2 %910 }
 0x317   :  { %2236 = vrot.lane.b32.xlu0 %v9591_v8, %s7674_s9  ;;  %v1053_v32 = vpop.permute.xlu1 %1052 }
 0x319   :  { %v1285_v15 = vpop.permute.xlu0 %1284 }
 0x31c   :  { %872 = vrot.lane.b32.xlu2 %v9281_v35, %s7668_s29 }
 0x31d   :  { %2190 = vrot.lane.b32.xlu1 %v9611_v14, %s7674_s9 }
 0x31e   :  { %v2187_v47 = vpop.permute.xlu2 %2186 }
 0x31f   :  { %1100 = vrot.lane.b32.xlu0 %v9274_v10, %s7666_s21  ;;  %v1669_v3 = vpop.permute.xlu1 %1668  ;;  %v2373_v10 = vsel %vm2330_vm4, %v8912_v60, %v909_v43  ;;  %v2352_v60 = vsel %vm2330_vm4, %v8848_v24, %v9514_v42 }
 0x320   :  { %v2436_v35 = vsel %vm2393_vm5, %v2373_v10, %v1095_v27  ;;  %v2415_v61 = vsel %vm2393_vm5, %v2352_v60, %v1053_v32  ;;  %v9663_v32 = vld [vmem:[%s16165_s0 + $0xd8] sm:$0xff] }
 0x321   :  { %v1239_v18 = vpop.permute.xlu0 %1238  ;;  %v2501_v59 = vsel %vm2456_vm6, %v2436_v35, %v1285_v15 }
 0x322   :  { %v2566_v22 = vsel %vm2521_vm7, %v2501_v59, %v9536_v6  ;;  %v2478_v10 = vsel %vm2456_vm6, %v2415_v61, %v1239_v18 }
 0x323   :  { %v2631_v43 = vsel %vm2586_vm8, %v2566_v22, %v1669_v3  ;;  %v62_v3 = vld [vmem:[%s16165_s0 + $0xd0] sm:$0xff] }
 0x324   :  { %1482 = vrot.lane.b32.xlu2 %v9461_v34, %s7672_s7  ;;  %v207_v59 = vrot.slane %v62_v3, 7 }
 0x325   :  { %1058 = vrot.lane.b32.xlu1 %v9296_v53, %s7666_s21  ;;  %v418_v53 = vsel %vm165_vm0, %v16676_v55, 0.0 }
 0x326   :  { %v9628_v63 = vpop.permute.xlu2 %1054  ;;  %v612_v6 = vrot.slane %v418_v53, 1 }
 0x327   :  { %1290 = vrot.lane.b32.xlu0 %v9332_v33, %s7670_s5  ;;  %v1623_v51 = vpop.permute.xlu1 %1622 }
 0x329   :  { %v1861_v25 = vpop.permute.xlu0 %1860 }
 0x32a   :  { %v2696_v27 = vsel %vm2651_vm9, %v2631_v43, %v1861_v25  ;;  %v9658_v25 = vsel %vm488_vm1, %v610_v4, %v612_v6  ;;  %v208_v4 = vrot.slane %v9663_v32, 7 }
 0x32b   :  { %v2761_v24 = vsel %vm2716_vm10, %v2696_v27, %v2047_v9  ;;  %v2543_v9 = vsel %vm2521_vm7, %v2478_v10, %v9563_v58  ;;  %v768_v58 = vrot.slane %v418_v53, 2 }
 0x32c   :  { %1436 = vrot.lane.b32.xlu2 %v9493_v50, %s7672_s7  ;;  %v2608_v18 = vsel %vm2586_vm8, %v2543_v9, %v1623_v51  ;;  %v9687_v6 = vsel %vm165_vm0, %v207_v59, %v208_v4 }
 0x32d   :  { %1674 = vrot.lane.b32.xlu1 %v9466_v21, %s7671_s6  ;;  %v9692_v61 = vsel %vm644_vm2, %v766_v0, %v768_v58  ;;  %v560_v53 = vrot.slane %v9687_v6, 1 }
 0x32e   :  { %v1671_v54 = vpop.permute.xlu2 %1670 }
 0x32f   :  { %1244 = vrot.lane.b32.xlu0 %v9469_v5, %s7670_s5  ;;  %v2233_v35 = vpop.permute.xlu1 %2232 }
 0x330   :  { %v2826_v42 = vsel %vm2781_vm11, %v2761_v24, %v2233_v35  ;;  %v16207_v24 = vrot.slane %v9687_v6, 2 }
 0x331   :  { %v1815_v15 = vpop.permute.xlu0 %1814  ;;  %7321 = vmatmul.msk.f32.gmra.mxu3 %vm2851_vm12, %v2826_v42 }
 0x332   :  { %v2673_v22 = vsel %vm2651_vm9, %v2608_v18, %v1815_v15  ;;  %v9682_v15 = vsel %vm165_vm0, 0.0, %v207_v59 }
 0x333   :  { %v715_v35 = vrot.slane %v9682_v15, 2 }
 0x334   :  { %2052 = vrot.lane.b32.xlu2 %v9658_v25, %s7673_s8 }
 0x335   :  { %1628 = vrot.lane.b32.xlu1 %v9506_v20, %s7671_s6  ;;  %v9712_v9 = vsel %vm644_vm2, %v715_v35, %v16207_v24 }
 0x336   :  { %v9677_v43 = vpop.permute.xlu2 %1624 }
 0x337   :  { %1866 = vrot.lane.b32.xlu0 %v9549_v45, %s7669_s30  ;;  %v1097_v51 = vpop.permute.xlu1 %1096 }
 0x339   :  { %v2001_v55 = vpop.permute.xlu0 %2000 }
 0x33a   :  { %v2738_v60 = vsel %vm2716_vm10, %v2673_v22, %v2001_v55  ;;  %v2374_v22 = vsel %vm2330_vm4, %v8919_v17, %v9606_v16  ;;  %v9739_v17 = vld [vmem:[%s16165_s0 + $0x198] sm:$0xff] }
 0x33b   :  { %v2803_v27 = vsel %vm2781_vm11, %v2738_v60, %v2187_v47  ;;  %v559_v47 = vrot.slane %v9682_v15, 1  ;;  %v2437_v60 = vsel %vm2393_vm5, %v2374_v22, %v1097_v51  ;;  %v16206_v35 = vrot.slane %v9739_v17, 7 }
 0x33c   :  { %7298 = vmatmul.msk.f32.gmra.mxu0 %vm2851_vm12, %v2803_v27  ;;  %916 = vrot.lane.b32.xlu2 %v9356_v48, %s7668_s29 }
 0x33d   :  { %2238 = vrot.lane.b32.xlu1 %v9692_v61, %s7674_s9  ;;  %v9707_v3 = vsel %vm488_vm1, %v559_v47, %v560_v53 }
 0x33e   :  { %v2235_v0 = vpop.permute.xlu2 %2234 }
 0x33f   :  { %1820 = vrot.lane.b32.xlu0 %v9682_v15, %s7669_s30  ;;  %v1287_v42 = vpop.permute.xlu1 %1286 }
 0x340   :  { %v2502_v58 = vsel %vm2456_vm6, %v2437_v60, %v1287_v42 }
 0x341   :  { %v869_v10 = vpop.permute.xlu0 %868 }
 0x344   :  { %2192 = vrot.lane.b32.xlu2 %v9712_v9, %s7674_s9 }
 0x345   :  { %1102 = vrot.lane.b32.xlu1 %v9381_v11, %s7666_s21 }
 0x346   :  { %v9720_v18 = vpop.permute.xlu2 %1098 }
 0x347   :  { %2006 = vrot.lane.b32.xlu0 %v9707_v3, %s7673_s8  ;;  %v1241_v59 = vpop.permute.xlu1 %1240 }
 0x349   :  { %v1479_v48 = vpop.permute.xlu0 %1478 }
 0x34c   :  { %1060 = vrot.lane.b32.xlu2 %v9397_v44, %s7666_s21  ;;  %v86_v44 = vld [vmem:[%s16165_s0 + $0x190] sm:$0xff] }
 0x34d   :  { %1292 = vrot.lane.b32.xlu1 %v9542_v28, %s7670_s5 }
 0x34e   :  { %v9732_v11 = vpop.permute.xlu2 %1288 }
 0x34f   :  { %874 = vrot.lane.b32.xlu0 %v9392_v29, %s7668_s29  ;;  %v1863_v27 = vpop.permute.xlu1 %1862  ;;  %v2567_v29 = vsel %vm2521_vm7, %v2502_v58, %v1479_v48  ;;  %v243_v48 = vrot.slane %v86_v44, 7 }
 0x350   :  { %v2632_v16 = vsel %vm2586_vm8, %v2567_v29, %v1671_v54  ;;  %v2353_v29 = vsel %vm2330_vm4, %v9052_v26, %v869_v10 }
 0x351   :  { %v1433_v55 = vpop.permute.xlu0 %1432  ;;  %v2697_v51 = vsel %vm2651_vm9, %v2632_v16, %v1863_v27  ;;  %v9761_v54 = vsel %vm165_vm0, %v243_v48, %v16206_v35  ;;  %v9764_v27 = vsel %vm165_vm0, 0.0, %v243_v48 }
 0x352   :  { %v614_v44 = vrot.slane %v9764_v27, 1  ;;  %v771_v26 = vrot.slane %v9761_v54, 2 }
 0x354   :  { %1676 = vrot.lane.b32.xlu2 %v9591_v8, %s7671_s6 }
 0x355   :  { %1246 = vrot.lane.b32.xlu1 %v9478_v49, %s7670_s5 }
 0x356   :  { %v9754_v22 = vpop.permute.xlu2 %1242 }
 0x357   :  { %1484 = vrot.lane.b32.xlu0 %v9573_v37, %s7672_s7  ;;  %v1817_v58 = vpop.permute.xlu1 %1816 }
 0x359   :  { %v2049_v47 = vpop.permute.xlu0 %2048 }
 0x35a   :  { %v2762_v42 = vsel %vm2716_vm10, %v2697_v51, %v2049_v47  ;;  %v2416_v51 = vsel %vm2393_vm5, %v2353_v29, %v9628_v63  ;;  %v770_v47 = vrot.slane %v9764_v27, 2 }
 0x35b   :  { %v2827_v60 = vsel %vm2781_vm11, %v2762_v42, %v2235_v0  ;;  %v615_v0 = vrot.slane %v9761_v54, 1  ;;  %v2479_v10 = vsel %vm2456_vm6, %v2416_v51, %v1241_v59  ;;  %v407_v59 = vsel %vm165_vm0, %v208_v4, 0.0 }
 0x35c   :  { %7322 = vmatmul.msk.f32.gmra.mxu3 %vm2851_vm12, %v2827_v60  ;;  %1630 = vrot.lane.b32.xlu2 %v9611_v14, %s7671_s6  ;;  %v2544_v48 = vsel %vm2521_vm7, %v2479_v10, %v1433_v55  ;;  %v9790_v24 = vsel %vm644_vm2, %v770_v47, %v771_v26  ;;  %v562_v51 = vrot.slane %v407_v59, 1 }
 0x35d   :  { %1868 = vrot.lane.b32.xlu1 %v9764_v27, %s7669_s30  ;;  %v9785_v35 = vsel %vm488_vm1, %v614_v44, %v615_v0  ;;  %v2609_v63 = vsel %vm2586_vm8, %v2544_v48, %v9677_v43 }
 0x35e   :  { %v1865_v42 = vpop.permute.xlu2 %1864  ;;  %v2674_v55 = vsel %vm2651_vm9, %v2609_v63, %v1817_v58  ;;  %v9810_v4 = vsel %vm488_vm1, %v560_v53, %v562_v51  ;;  %v718_v58 = vrot.slane %v407_v59, 2  ;;  %v16677_v63 = vrot.slane %v9687_v6, 2 }
 0x35f   :  { %1438 = vrot.lane.b32.xlu0 %v9598_v38, %s7672_s7  ;;  %v2003_v60 = vpop.permute.xlu1 %2002  ;;  %v16678_v51 = vrot.slane %v9739_v17, 7 }
 0x360   :  { %v2739_v29 = vsel %vm2716_vm10, %v2674_v55, %v2003_v60  ;;  %v9821_v55 = vsel %vm644_vm2, %v16677_v63, %v718_v58 }
 0x361   :  { %v913_v16 = vpop.permute.xlu0 %912  ;;  %v419_v58 = vsel %vm165_vm0, %v16678_v51, 0.0 }
 0x362   :  { %v2375_v59 = vsel %vm2330_vm4, %v9134_v13, %v913_v16 }
 0x364   :  { %2240 = vrot.lane.b32.xlu2 %v9790_v24, %s7674_s9 }
 0x365   :  { %1822 = vrot.lane.b32.xlu1 %v9687_v6, %s7669_s30 }
 0x366   :  { %v1819_v47 = vpop.permute.xlu2 %1818 }
 0x367   :  { %2054 = vrot.lane.b32.xlu0 %v9785_v35, %s7673_s8  ;;  %v871_v32 = vpop.permute.xlu1 %870 }
 0x369   :  { %v2189_v44 = vpop.permute.xlu0 %2188 }
 0x36a   :  { %v2804_v43 = vsel %vm2781_vm11, %v2739_v29, %v2189_v44  ;;  %v2438_v29 = vsel %vm2393_vm5, %v2375_v59, %v9720_v18  ;;  %v64_v18 = vld [vmem:[%s16165_s0 + $0xe0] sm:$0xff] }
 0x36b   :  { %7299 = vmatmul.msk.f32.gmra.mxu0 %vm2851_vm12, %v2804_v43  ;;  %v210_v17 = vrot.slane %v64_v18, 7 }
 0x36c   :  { %1104 = vrot.lane.b32.xlu2 %v9466_v21, %s7666_s21 }
 0x36d   :  { %2008 = vrot.lane.b32.xlu1 %v9810_v4, %s7673_s8  ;;  %v9879_v51 = vsel %vm165_vm0, 0.0, %v210_v17 }
 0x36e   :  { %v2005_v48 = vpop.permute.xlu2 %2004 }
 0x36f   :  { %918 = vrot.lane.b32.xlu0 %v9461_v34, %s7668_s29  ;;  %v1481_v60 = vpop.permute.xlu1 %1480 }
 0x371   :  { %v1057_v10 = vpop.permute.xlu0 %1056 }
 0x374   :  { %1294 = vrot.lane.b32.xlu2 %v9549_v45, %s7670_s5 }
 0x375   :  { %876 = vrot.lane.b32.xlu1 %v9493_v50, %s7668_s29  ;;  %v2503_v50 = vsel %vm2456_vm6, %v2438_v29, %v9732_v11  ;;  %v2354_v11 = vsel %vm2330_vm4, %v9057_v7, %v871_v32 }
 0x376   :  { %v9829_v34 = vpop.permute.xlu2 %872  ;;  %v2568_v13 = vsel %vm2521_vm7, %v2503_v50, %v1481_v60  ;;  %v9861_v60 = vld [vmem:[%s16165_s0 + $0xe8] sm:$0xff] }
 0x377   :  { %2194 = vrot.lane.b32.xlu0 %v9821_v55, %s7674_s9  ;;  %v1435_v21 = vpop.permute.xlu1 %1434  ;;  %v16210_v50 = vrot.slane %v9861_v60, 7 }
 0x379   :  { %v1673_v53 = vpop.permute.xlu0 %1672 }
 0x37c   :  { %1248 = vrot.lane.b32.xlu2 %v9682_v15, %s7670_s5 }
 0x37d   :  { %1486 = vrot.lane.b32.xlu1 %v9658_v25, %s7672_s7 }
 0x37e   :  { %v9843_v43 = vpop.permute.xlu2 %1482 }
 0x37f   :  { %1062 = vrot.lane.b32.xlu0 %v9506_v20, %s7666_s21  ;;  %v2051_v16 = vpop.permute.xlu1 %2050  ;;  %v2633_v20 = vsel %vm2586_vm8, %v2568_v13, %v1673_v53  ;;  %v2417_v53 = vsel %vm2393_vm5, %v2354_v11, %v1057_v10  ;;  %v773_v11 = vrot.slane %v419_v58, 2 }
 0x380   :  { %v2698_v63 = vsel %vm2651_vm9, %v2633_v20, %v1865_v42  ;;  %v617_v42 = vrot.slane %v419_v58, 1  ;;  %v2480_v10 = vsel %vm2456_vm6, %v2417_v53, %v9754_v22  ;;  %v9891_v22 = vsel %vm165_vm0, %v210_v17, %v16210_v50 }
 0x381   :  { %v1627_v44 = vpop.permute.xlu0 %1626  ;;  %v2763_v59 = vsel %vm2716_vm10, %v2698_v63, %v2051_v16  ;;  %v2545_v16 = vsel %vm2521_vm7, %v2480_v10, %v1435_v21  ;;  %v16209_v63 = vrot.slane %v9891_v22, 1  ;;  %v9904_v58 = vsel %vm644_vm2, %v771_v26, %v773_v11 }
 0x382   :  { %v2610_v20 = vsel %vm2586_vm8, %v2545_v16, %v1627_v44  ;;  %v9884_v18 = vsel %vm488_vm1, %v615_v0, %v617_v42  ;;  %v564_v0 = vrot.slane %v9879_v51, 1  ;;  %v720_v26 = vrot.slane %v9879_v51, 2 }
 0x383   :  { %v2675_v21 = vsel %vm2651_vm9, %v2610_v20, %v1819_v47 }
 0x384   :  { %1870 = vrot.lane.b32.xlu2 %v9761_v54, %s7669_s30 }
 0x385   :  { %1440 = vrot.lane.b32.xlu1 %v9707_v3, %s7672_s7 }
 0x386   :  { %v9870_v32 = vpop.permute.xlu2 %1436 }
 0x387   :  { %1678 = vrot.lane.b32.xlu0 %v9692_v61, %s7671_s6  ;;  %v915_v13 = vpop.permute.xlu1 %914 }
 0x389   :  { %v2237_v29 = vpop.permute.xlu0 %2236 }
 0x38a   :  { %v2828_v7 = vsel %vm2781_vm11, %v2763_v59, %v2237_v29  ;;  %v2740_v29 = vsel %vm2716_vm10, %v2675_v21, %v2005_v48  ;;  %v16208_v48 = vrot.slane %v9891_v22, 2  ;;  %v88_v21 = vld [vmem:[%s16165_s0 + $0x1a0] sm:$0xff] }
 0x38b   :  { %7323 = vmatmul.msk.f32.gmra.mxu3 %vm2851_vm12, %v2828_v7  ;;  %v9911_v7 = vsel %vm488_vm1, %v564_v0, %v16209_v63 }
 0x38c   :  { %1824 = vrot.lane.b32.xlu2 %v9879_v51, %s7669_s30  ;;  %v9926_v16 = vsel %vm644_vm2, %v720_v26, %v16208_v48 }
 0x38d   :  { %2056 = vrot.lane.b32.xlu1 %v9884_v18, %s7673_s8 }
 0x38e   :  { %v2053_v53 = vpop.permute.xlu2 %2052 }
 0x38f   :  { %1632 = vrot.lane.b32.xlu0 %v9712_v9, %s7671_s6  ;;  %v2191_v59 = vpop.permute.xlu1 %2190 }
 0x390   :  { %v2805_v47 = vsel %vm2781_vm11, %v2740_v29, %v2191_v59 }
 0x391   :  { %v1101_v44 = vpop.permute.xlu0 %1100  ;;  %7300 = vmatmul.msk.f32.gmra.mxu0 %vm2851_vm12, %v2805_v47  ;;  %v246_v47 = vrot.slane %v88_v21, 7 }
 0x394   :  { %2010 = vrot.lane.b32.xlu2 %v9911_v7, %s7673_s8 }
 0x395   :  { %920 = vrot.lane.b32.xlu1 %v9573_v37, %s7668_s29 }
 0x396   :  { %v9921_v42 = vpop.permute.xlu2 %916 }
 0x397   :  { %2242 = vrot.lane.b32.xlu0 %v9904_v58, %s7674_s9  ;;  %v1059_v10 = vpop.permute.xlu1 %1058 }
 0x399   :  { %v1291_v17 = vpop.permute.xlu0 %1290 }
 0x39c   :  { %878 = vrot.lane.b32.xlu2 %v9598_v38, %s7668_s29  ;;  %v2376_v38 = vsel %vm2330_vm4, %v9131_v23, %v915_v13  ;;  %v2355_v13 = vsel %vm2330_vm4, %v9249_v52, %v9829_v34 }
 0x39d   :  { %2196 = vrot.lane.b32.xlu1 %v9926_v16, %s7674_s9  ;;  %v2439_v59 = vsel %vm2393_vm5, %v2376_v38, %v1101_v44  ;;  %v2418_v38 = vsel %vm2393_vm5, %v2355_v13, %v1059_v10 }
 0x39e   :  { %v2193_v37 = vpop.permute.xlu2 %2192  ;;  %v2504_v48 = vsel %vm2456_vm6, %v2439_v59, %v1291_v17 }
 0x39f   :  { %1106 = vrot.lane.b32.xlu0 %v9591_v8, %s7666_s21  ;;  %v1675_v11 = vpop.permute.xlu1 %1674  ;;  %v9942_v8 = vld [vmem:[%s16165_s0 + $0x1a8] sm:$0xff]  ;;  %v2569_v50 = vsel %vm2521_vm7, %v2504_v48, %v9843_v43 }
 0x3a0   :  { %v247_v26 = vrot.slane %v9942_v8, 7  ;;  %v2634_v44 = vsel %vm2586_vm8, %v2569_v50, %v1675_v11 }
 0x3a1   :  { %v1245_v20 = vpop.permute.xlu0 %1244 }
 0x3a2   :  { %v9962_v23 = vsel %vm165_vm0, %v246_v47, %v247_v26  ;;  %v2481_v52 = vsel %vm2456_vm6, %v2418_v38, %v1245_v20  ;;  %v16680_v38 = vrot.slane %v9861_v60, 7 }
 0x3a3   :  { %v620_v21 = vrot.slane %v9962_v23, 1 }
 0x3a4   :  { %1488 = vrot.lane.b32.xlu2 %v9785_v35, %s7672_s7 }
 0x3a5   :  { %1064 = vrot.lane.b32.xlu1 %v9611_v14, %s7666_s21  ;;  %v9965_v14 = vsel %vm165_vm0, 0.0, %v246_v47  ;;  %v2546_v47 = vsel %vm2521_vm7, %v2481_v52, %v9870_v32  ;;  %v776_v32 = vrot.slane %v9962_v23, 2  ;;  %v408_v52 = vsel %vm165_vm0, %v16680_v38, 0.0 }
 0x3a6   :  { %v9951_v29 = vpop.permute.xlu2 %1060  ;;  %v619_v48 = vrot.slane %v9965_v14, 1  ;;  %v2377_v38 = vsel %vm2330_vm4, %v9335_v39, %v9921_v42 }
 0x3a7   :  { %1296 = vrot.lane.b32.xlu0 %v9764_v27, %s7670_s5  ;;  %v1629_v63 = vpop.permute.xlu1 %1628 }
 0x3a8   :  { %v2611_v10 = vsel %vm2586_vm8, %v2546_v47, %v1629_v63  ;;  %v10004_v63 = vpop.f32.mrf.mxu0 }
 0x3a9   :  { %v1867_v0 = vpop.permute.xlu0 %1866  ;;  %16679 = vst [vmem:[#allocation20_spill] sm:$0xff] %v10004_v63 }
 0x3aa   :  { %v2699_v17 = vsel %vm2651_vm9, %v2634_v44, %v1867_v0  ;;  %v9986_v0 = vsel %vm488_vm1, %v619_v48, %v620_v21  ;;  %v775_v44 = vrot.slane %v9965_v14, 2 }
 0x3ab   :  { %v2764_v50 = vsel %vm2716_vm10, %v2699_v17, %v2053_v53 }
 0x3ac   :  { %1442 = vrot.lane.b32.xlu2 %v9810_v4, %s7672_s7 }
 0x3ad   :  { %1680 = vrot.lane.b32.xlu1 %v9790_v24, %s7671_s6 }
 0x3ae   :  { %v1677_v59 = vpop.permute.xlu2 %1676 }
 0x3af   :  { %1250 = vrot.lane.b32.xlu0 %v9687_v6, %s7670_s5  ;;  %v2239_v34 = vpop.permute.xlu1 %2238 }
 0x3b0   :  { %v2829_v11 = vsel %vm2781_vm11, %v2764_v50, %v2239_v34  ;;  %v10013_v34 = vsel %vm644_vm2, %v775_v44, %v776_v32  ;;  %v567_v50 = vrot.slane %v408_v52, 1 }
 0x3b1   :  { %v1821_v43 = vpop.permute.xlu0 %1820  ;;  %7324 = vmatmul.msk.f32.gmra.mxu3 %vm2851_vm12, %v2829_v11 }
 0x3b2   :  { %v2676_v20 = vsel %vm2651_vm9, %v2611_v10, %v1821_v43  ;;  %v16681_v10 = vrot.slane %v9891_v22, 1 }
 0x3b4   :  { %2058 = vrot.lane.b32.xlu2 %v9986_v0, %s7673_s8 }
 0x3b5   :  { %1634 = vrot.lane.b32.xlu1 %v9821_v55, %s7671_s6 }
 0x3b6   :  { %v10001_v17 = vpop.permute.xlu2 %1630 }
 0x3b7   :  { %1872 = vrot.lane.b32.xlu0 %v9965_v14, %s7669_s30  ;;  %v1103_v43 = vpop.permute.xlu1 %1102 }
 0x3b9   :  { %v2007_v53 = vpop.permute.xlu0 %2006 }
 0x3ba   :  { %v2741_v13 = vsel %vm2716_vm10, %v2676_v20, %v2007_v53  ;;  %v10024_v20 = vsel %vm488_vm1, %v16681_v10, %v567_v50  ;;  %v16682_v53 = vrot.slane %v9891_v22, 2  ;;  %v2440_v50 = vsel %vm2393_vm5, %v2377_v38, %v1103_v43 }
 0x3bb   :  { %v2806_v48 = vsel %vm2781_vm11, %v2741_v13, %v2193_v37  ;;  %v723_v37 = vrot.slane %v408_v52, 2 }
 0x3bc   :  { %7301 = vmatmul.msk.f32.gmra.mxu0 %vm2851_vm12, %v2806_v48  ;;  %922 = vrot.lane.b32.xlu2 %v9658_v25, %s7668_s29 }
 0x3bd   :  { %2244 = vrot.lane.b32.xlu1 %v10013_v34, %s7674_s9  ;;  %v10029_v13 = vsel %vm644_vm2, %v16682_v53, %v723_v37 }
 0x3be   :  { %v2241_v60 = vpop.permute.xlu2 %2240 }
 0x3bf   :  { %1826 = vrot.lane.b32.xlu0 %v9891_v22, %s7669_s30  ;;  %v1293_v47 = vpop.permute.xlu1 %1292 }
 0x3c0   :  { %v2505_v37 = vsel %vm2456_vm6, %v2440_v50, %v1293_v47  ;;  %v66_v50 = vld [vmem:[%s16165_s0 + $0xf0] sm:$0xff] }
 0x3c1   :  { %v875_v11 = vpop.permute.xlu0 %874 }
 0x3c2   :  { %v2356_v38 = vsel %vm2330_vm4, %v9261_v57, %v875_v11 }
 0x3c3   :  { %v2419_v57 = vsel %vm2393_vm5, %v2356_v38, %v9951_v29 }
 0x3c4   :  { %2198 = vrot.lane.b32.xlu2 %v10029_v13, %s7674_s9 }
 0x3c5   :  { %1108 = vrot.lane.b32.xlu1 %v9692_v61, %s7666_s21 }
 0x3c6   :  { %v10037_v44 = vpop.permute.xlu2 %1104 }
 0x3c7   :  { %2012 = vrot.lane.b32.xlu0 %v10024_v20, %s7673_s8  ;;  %v1247_v48 = vpop.permute.xlu1 %1246 }
 0x3c8   :  { %v2482_v11 = vsel %vm2456_vm6, %v2419_v57, %v1247_v48 }
 0x3c9   :  { %v1485_v25 = vpop.permute.xlu0 %1484 }
 0x3cc   :  { %1066 = vrot.lane.b32.xlu2 %v9712_v9, %s7666_s21 }
 0x3cd   :  { %1298 = vrot.lane.b32.xlu1 %v9761_v54, %s7670_s5 }
 0x3ce   :  { %v10049_v61 = vpop.permute.xlu2 %1294 }
 0x3cf   :  { %880 = vrot.lane.b32.xlu0 %v9707_v3, %s7668_s29  ;;  %v1869_v10 = vpop.permute.xlu1 %1868  ;;  %v2570_v3 = vsel %vm2521_vm7, %v2505_v37, %v1485_v25 }
 0x3d0   :  { %v2635_v39 = vsel %vm2586_vm8, %v2570_v3, %v1677_v59  ;;  %v420_v59 = vsel %vm165_vm0, %v247_v26, 0.0  ;;  %v213_v26 = vrot.slane %v66_v50, 7 }
 0x3d1   :  { %v1439_v52 = vpop.permute.xlu0 %1438  ;;  %v2700_v42 = vsel %vm2651_vm9, %v2635_v39, %v1869_v10  ;;  %v622_v37 = vrot.slane %v420_v59, 1  ;;  %v778_v8 = vrot.slane %v420_v59, 2 }
 0x3d2   :  { %v10101_v29 = vsel %vm165_vm0, 0.0, %v213_v26 }
 0x3d3   :  { %v804_v38 = vrot.slane %v10101_v29, 1 }
 0x3d4   :  { %1682 = vrot.lane.b32.xlu2 %v9904_v58, %s7671_s6 }
 0x3d5   :  { %1252 = vrot.lane.b32.xlu1 %v9879_v51, %s7670_s5 }
 0x3d6   :  { %v10062_v47 = vpop.permute.xlu2 %1248 }
 0x3d7   :  { %1490 = vrot.lane.b32.xlu0 %v9884_v18, %s7672_s7  ;;  %v1823_v25 = vpop.permute.xlu1 %1822 }
 0x3d9   :  { %v2055_v9 = vpop.permute.xlu0 %2054 }
 0x3da   :  { %v2765_v43 = vsel %vm2716_vm10, %v2700_v42, %v2055_v9  ;;  %v2547_v42 = vsel %vm2521_vm7, %v2482_v11, %v1439_v52 }
 0x3db   :  { %v2830_v53 = vsel %vm2781_vm11, %v2765_v43, %v2241_v60  ;;  %v10079_v60 = vld [vmem:[%s16165_s0 + $0xf8] sm:$0xff]  ;;  %v10093_v43 = vsel %vm488_vm1, %v620_v21, %v622_v37  ;;  %v2612_v48 = vsel %vm2586_vm8, %v2547_v42, %v10001_v17  ;;  %v10121_v37 = vpop.f32.mrf.mxu0 }
 0x3dc   :  { %7325 = vmatmul.msk.f32.gmra.mxu3 %vm2851_vm12, %v2830_v53  ;;  %1636 = vrot.lane.b32.xlu2 %v9926_v16, %s7671_s6  ;;  %v16213_v39 = vrot.slane %v10079_v60, 7  ;;  %v10098_v53 = vsel %vm644_vm2, %v776_v32, %v778_v8  ;;  %v2677_v21 = vsel %vm2651_vm9, %v2612_v48, %v1823_v25  ;;  %16683 = vst [vmem:[#allocation21_spill] sm:$0xff] %v10121_v37 }
 0x3dd   :  { %1874 = vrot.lane.b32.xlu1 %v9962_v23, %s7669_s30 }
 0x3de   :  { %v1871_v3 = vpop.permute.xlu2 %1870  ;;  %v10110_v52 = vsel %vm165_vm0, %v213_v26, %v16213_v39  ;;  %v814_v26 = vrot.slane %v10101_v29, 2 }
 0x3df   :  { %1444 = vrot.lane.b32.xlu0 %v9911_v7, %s7672_s7  ;;  %v2009_v9 = vpop.permute.xlu1 %2008  ;;  %v16212_v50 = vrot.slane %v10110_v52, 1  ;;  %v16211_v11 = vrot.slane %v10110_v52, 2 }
 0x3e0   :  { %v2742_v59 = vsel %vm2716_vm10, %v2677_v21, %v2009_v9 }
 0x3e1   :  { %v919_v10 = vpop.permute.xlu0 %918  ;;  %v10127_v8 = vsel %vm488_vm1, %v804_v38, %v16212_v50  ;;  %v10140_v21 = vsel %vm644_vm2, %v814_v26, %v16211_v11 }
 0x3e4   :  { %2246 = vrot.lane.b32.xlu2 %v10098_v53, %s7674_s9 }
 0x3e5   :  { %1828 = vrot.lane.b32.xlu1 %v10101_v29, %s7669_s30 }
 0x3e6   :  { %v1825_v57 = vpop.permute.xlu2 %1824 }
 0x3e7   :  { %2060 = vrot.lane.b32.xlu0 %v10093_v43, %s7673_s8  ;;  %v877_v25 = vpop.permute.xlu1 %876 }
 0x3e9   :  { %v2195_v32 = vpop.permute.xlu0 %2194 }
 0x3ea   :  { %v2807_v17 = vsel %vm2781_vm11, %v2742_v59, %v2195_v32  ;;  %v2378_v32 = vsel %vm2330_vm4, %v9332_v33, %v919_v10 }
 0x3eb   :  { %7302 = vmatmul.msk.f32.gmra.mxu0 %vm2851_vm12, %v2807_v17  ;;  %v90_v17 = vld [vmem:[%s16165_s0 + $0x1b0] sm:$0xff]  ;;  %v2441_v38 = vsel %vm2393_vm5, %v2378_v32, %v10037_v44 }
 0x3ec   :  { %1110 = vrot.lane.b32.xlu2 %v9790_v24, %s7666_s21  ;;  %v249_v33 = vrot.slane %v90_v17, 7 }
 0x3ed   :  { %2014 = vrot.lane.b32.xlu1 %v10127_v8, %s7673_s8 }
 0x3ee   :  { %v2011_v9 = vpop.permute.xlu2 %2010  ;;  %v10176_v39 = vsel %vm165_vm0, 0.0, %v249_v33 }
 0x3ef   :  { %924 = vrot.lane.b32.xlu0 %v9785_v35, %s7668_s29  ;;  %v1487_v48 = vpop.permute.xlu1 %1486 }
 0x3f1   :  { %v1063_v42 = vpop.permute.xlu0 %1062 }
 0x3f4   :  { %1300 = vrot.lane.b32.xlu2 %v9965_v14, %s7670_s5 }
 0x3f5   :  { %882 = vrot.lane.b32.xlu1 %v9810_v4, %s7668_s29  ;;  %v10162_v4 = vld [vmem:[%s16165_s0 + $0x1b8] sm:$0xff] }
 0x3f6   :  { %v10148_v24 = vpop.permute.xlu2 %878  ;;  %v16214_v44 = vrot.slane %v10162_v4, 7 }
 0x3f7   :  { %2200 = vrot.lane.b32.xlu0 %v10140_v21, %s7674_s9  ;;  %v1441_v59 = vpop.permute.xlu1 %1440 }
 0x3f8   :  { %v10183_v17 = vsel %vm165_vm0, %v249_v33, %v16214_v44  ;;  %v624_v33 = vrot.slane %v10176_v39, 1 }
 0x3f9   :  { %v1679_v35 = vpop.permute.xlu0 %1678  ;;  %v16216_v44 = vrot.slane %v10183_v17, 1 }
 0x3fc   :  { %1254 = vrot.lane.b32.xlu2 %v9891_v22, %s7670_s5 }
 0x3fd   :  { %1492 = vrot.lane.b32.xlu1 %v9986_v0, %s7672_s7 }
 0x3fe   :  { %v10170_v10 = vpop.permute.xlu2 %1488 }
 0x3ff   :  { %1068 = vrot.lane.b32.xlu0 %v9821_v55, %s7666_s21  ;;  %v2506_v55 = vsel %vm2456_vm6, %v2441_v38, %v10049_v61  ;;  %v2057_v11 = vpop.permute.xlu1 %2056  ;;  %v2357_v61 = vsel %vm2330_vm4, %v9469_v5, %v877_v25 }
 0x400   :  { %v2571_v32 = vsel %vm2521_vm7, %v2506_v55, %v1487_v48  ;;  %v2420_v48 = vsel %vm2393_vm5, %v2357_v61, %v1063_v42  ;;  %v10207_v42 = vsel %vm488_vm1, %v624_v33, %v16216_v44  ;;  %v16684_v61 = vrot.slane %v10079_v60, 7 }
 0x401   :  { %v1633_v26 = vpop.permute.xlu0 %1632  ;;  %v2636_v50 = vsel %vm2586_vm8, %v2571_v32, %v1679_v35  ;;  %v16688_v44 = vrot.slane %v10162_v4, 7 }
 0x402   :  { %v2701_v38 = vsel %vm2651_vm9, %v2636_v50, %v1871_v3  ;;  %v2483_v3 = vsel %vm2456_vm6, %v2420_v48, %v10062_v47  ;;  %v16215_v47 = vrot.slane %v10183_v17, 2 }
 0x403   :  { %v2766_v35 = vsel %vm2716_vm10, %v2701_v38, %v2057_v11  ;;  %v2548_v25 = vsel %vm2521_vm7, %v2483_v3, %v1441_v59  ;;  %v409_v38 = vsel %vm165_vm0, %v16684_v61, 0.0 }
 0x404   :  { %1876 = vrot.lane.b32.xlu2 %v10176_v39, %s7669_s30  ;;  %v2613_v11 = vsel %vm2586_vm8, %v2548_v25, %v1633_v26  ;;  %v807_v26 = vrot.slane %v409_v38, 1  ;;  %v16686_v25 = vrot.slane %v10110_v52, 1  ;;  %v817_v61 = vrot.slane %v409_v38, 2 }
 0x405   :  { %1446 = vrot.lane.b32.xlu1 %v10024_v20, %s7672_s7  ;;  %v2678_v59 = vsel %vm2651_vm9, %v2613_v11, %v1825_v57  ;;  %v10228_v57 = vpop.f32.mrf.mxu0 }
 0x406   :  { %v10197_v5 = vpop.permute.xlu2 %1442  ;;  %16685 = vst [vmem:[#allocation22_spill] sm:$0xff] %v10228_v57  ;;  %v10234_v11 = vsel %vm488_vm1, %v16686_v25, %v807_v26 }
 0x407   :  { %1684 = vrot.lane.b32.xlu0 %v10013_v34, %s7671_s6  ;;  %v921_v50 = vpop.permute.xlu1 %920 }
 0x409   :  { %v2243_v55 = vpop.permute.xlu0 %2242 }
 0x40a   :  { %v2831_v32 = vsel %vm2781_vm11, %v2766_v35, %v2243_v55  ;;  %v780_v35 = vrot.slane %v10176_v39, 2 }
 0x40b   :  { %7326 = vmatmul.msk.f32.gmra.mxu3 %vm2851_vm12, %v2831_v32  ;;  %v2743_v32 = vsel %vm2716_vm10, %v2678_v59, %v2011_v9 }
 0x40c   :  { %1830 = vrot.lane.b32.xlu2 %v10110_v52, %s7669_s30  ;;  %v10225_v33 = vsel %vm644_vm2, %v780_v35, %v16215_v47 }
 0x40d   :  { %2062 = vrot.lane.b32.xlu1 %v10207_v42, %s7673_s8 }
 0x40e   :  { %v2059_v55 = vpop.permute.xlu2 %2058 }
 0x40f   :  { %1638 = vrot.lane.b32.xlu0 %v10029_v13, %s7671_s6  ;;  %v2197_v60 = vpop.permute.xlu1 %2196 }
 0x410   :  { %v2808_v3 = vsel %vm2781_vm11, %v2743_v32, %v2197_v60  ;;  %v16687_v32 = vrot.slane %v10110_v52, 2 }
 0x411   :  { %v1107_v48 = vpop.permute.xlu0 %1106  ;;  %7303 = vmatmul.msk.f32.gmra.mxu0 %vm2851_vm12, %v2808_v3 }
 0x412   :  { %v10247_v60 = vsel %vm644_vm2, %v16687_v32, %v817_v61 }
 0x414   :  { %2016 = vrot.lane.b32.xlu2 %v10234_v11, %s7673_s8 }
 0x415   :  { %926 = vrot.lane.b32.xlu1 %v9884_v18, %s7668_s29 }
 0x416   :  { %v10242_v35 = vpop.permute.xlu2 %922 }
 0x417   :  { %2248 = vrot.lane.b32.xlu0 %v10225_v33, %s7674_s9  ;;  %v1065_v59 = vpop.permute.xlu1 %1064 }
 0x419   :  { %v1297_v9 = vpop.permute.xlu0 %1296 }
 0x41c   :  { %884 = vrot.lane.b32.xlu2 %v9911_v7, %s7668_s29 }
 0x41d   :  { %2202 = vrot.lane.b32.xlu1 %v10247_v60, %s7674_s9 }
 0x41e   :  { %v2199_v18 = vpop.permute.xlu2 %2198 }
 0x41f   :  { %1112 = vrot.lane.b32.xlu0 %v9904_v58, %s7666_s21  ;;  %v1681_v38 = vpop.permute.xlu1 %1680  ;;  %v2379_v58 = vsel %vm2330_vm4, %v9542_v28, %v921_v50  ;;  %v2358_v28 = vsel %vm2330_vm4, %v9478_v49, %v10148_v24 }
 0x420   :  { %v2442_v7 = vsel %vm2393_vm5, %v2379_v58, %v1107_v48  ;;  %v2421_v4 = vsel %vm2393_vm5, %v2358_v28, %v1065_v59  ;;  %v7592_v28 = vpack.i.bf16 %v7707_v1, %v7711_v2 }
 0x421   :  { %v1251_v26 = vpop.permute.xlu0 %1250  ;;  %v2507_v61 = vsel %vm2456_vm6, %v2442_v7, %v1297_v9 }
 0x422   :  { %v2572_v47 = vsel %vm2521_vm7, %v2507_v61, %v10170_v10 }
 0x423   :  { %v2637_v50 = vsel %vm2586_vm8, %v2572_v47, %v1681_v38  ;;  %v16689_v47 = vrot.slane %v10183_v17, 1 }
 0x424   :  { %1494 = vrot.lane.b32.xlu2 %v10093_v43, %s7672_s7 }
 0x425   :  { %1070 = vrot.lane.b32.xlu1 %v9926_v16, %s7666_s21  ;;  %v421_v16 = vsel %vm165_vm0, %v16688_v44, 0.0  ;;  %v2484_v44 = vsel %vm2456_vm6, %v2421_v4, %v1251_v26 }
 0x426   :  { %v10264_v25 = vpop.permute.xlu2 %1066  ;;  %v2549_v38 = vsel %vm2521_vm7, %v2484_v44, %v10197_v5  ;;  %v783_v7 = vrot.slane %v421_v16, 2 }
 0x427   :  { %1302 = vrot.lane.b32.xlu0 %v9962_v23, %s7670_s5  ;;  %v1635_v32 = vpop.permute.xlu1 %1634 }
 0x428   :  { %v2614_v59 = vsel %vm2586_vm8, %v2549_v38, %v1635_v32  ;;  %v10309_v32 = vpop.f32.mrf.mxu0 }
 0x429   :  { %v1873_v3 = vpop.permute.xlu0 %1872  ;;  %16690 = vst [vmem:[#allocation23_spill] sm:$0xff] %v10309_v32 }
 0x42a   :  { %v2702_v48 = vsel %vm2651_vm9, %v2637_v50, %v1873_v3 }
 0x42b   :  { %v2767_v49 = vsel %vm2716_vm10, %v2702_v48, %v2059_v55  ;;  %v16691_v48 = vrot.slane %v10183_v17, 2 }
 0x42c   :  { %1448 = vrot.lane.b32.xlu2 %v10127_v8, %s7672_s7 }
 0x42d   :  { %1686 = vrot.lane.b32.xlu1 %v10098_v53, %s7671_s6 }
 0x42e   :  { %v1683_v10 = vpop.permute.xlu2 %1682 }
 0x42f   :  { %1256 = vrot.lane.b32.xlu0 %v10101_v29, %s7670_s5  ;;  %v627_v29 = vrot.slane %v421_v16, 1  ;;  %v2245_v58 = vpop.permute.xlu1 %2244 }
 0x430   :  { %v2832_v24 = vsel %vm2781_vm11, %v2767_v49, %v2245_v58 }
 0x431   :  { %v1827_v9 = vpop.permute.xlu0 %1826  ;;  %7327 = vmatmul.msk.f32.gmra.mxu3 %vm2851_vm12, %v2832_v24  ;;  %v10291_v8 = vsel %vm488_vm1, %v16689_v47, %v627_v29 }
 0x432   :  { %v2679_v26 = vsel %vm2651_vm9, %v2614_v59, %v1827_v9  ;;  %v10315_v9 = vsel %vm644_vm2, %v16691_v48, %v783_v7 }
 0x434   :  { %2064 = vrot.lane.b32.xlu2 %v10291_v8, %s7673_s8 }
 0x435   :  { %1640 = vrot.lane.b32.xlu1 %v10140_v21, %s7671_s6 }
 0x436   :  { %v10304_v61 = vpop.permute.xlu2 %1636 }
 0x437   :  { %1878 = vrot.lane.b32.xlu0 %v10183_v17, %s7669_s30  ;;  %v1109_v50 = vpop.permute.xlu1 %1108 }
 0x439   :  { %v2013_v55 = vpop.permute.xlu0 %2012 }
 0x43a   :  { %v2744_v3 = vsel %vm2716_vm10, %v2679_v26, %v2013_v55 }
 0x43b   :  { %v2809_v5 = vsel %vm2781_vm11, %v2744_v3, %v2199_v18 }
 0x43c   :  { %7304 = vmatmul.msk.f32.gmra.mxu0 %vm2851_vm12, %v2809_v5  ;;  %928 = vrot.lane.b32.xlu2 %v9986_v0, %s7668_s29  ;;  %v2380_v0 = vsel %vm2330_vm4, %v9549_v45, %v10242_v35  ;;  %v93_v45 = vld [vmem:[%s16165_s0 + $0x1c8] sm:$0xff] }
 0x43d   :  { %2250 = vrot.lane.b32.xlu1 %v10315_v9, %s7674_s9  ;;  %v253_v47 = vrot.slane %v93_v45, 7 }
 0x43e   :  { %v2247_v2 = vpop.permute.xlu2 %2246 }
 0x43f   :  { %7593 = vrot.lane.b32.xlu0 %v7592_v28, %s7669_s30  ;;  %v1299_v18 = vpop.permute.xlu1 %1298 }
 0x441   :  { %v881_v21 = vpop.permute.xlu0 %880 }
 0x444   :  { %7603 = vrot.lane.b32.xlu2 %v7768_v30, %s7674_s9 }
 0x445   :  { %1114 = vrot.lane.b32.xlu1 %v10013_v34, %s7666_s21 }
 0x446   :  { %v10328_v29 = vpop.permute.xlu2 %1110 }
 0x447   :  { %7598 = vrot.lane.b32.xlu0 %v7727_v12, %s7673_s8  ;;  %v1253_v4 = vpop.permute.xlu1 %1252  ;;  %v2443_v12 = vsel %vm2393_vm5, %v2380_v0, %v1109_v50 }
 0x448   :  { %v2508_v34 = vsel %vm2456_vm6, %v2443_v12, %v1299_v18 }
 0x449   :  { %v1491_v16 = vpop.permute.xlu0 %1490 }
 0x44c   :  { %1072 = vrot.lane.b32.xlu2 %v10029_v13, %s7666_s21  ;;  %v92_v13 = vld [vmem:[%s16165_s0 + $0x1c0] sm:$0xff] }
 0x44d   :  { %1304 = vrot.lane.b32.xlu1 %v10176_v39, %s7670_s5  ;;  %v252_v59 = vrot.slane %v92_v13, 7 }
 0x44e   :  { %v10340_v30 = vpop.permute.xlu2 %1300 }
 0x44f   :  { %886 = vrot.lane.b32.xlu0 %v10024_v20, %s7668_s29  ;;  %v1875_v58 = vpop.permute.xlu1 %1874  ;;  %v2573_v20 = vsel %vm2521_vm7, %v2508_v34, %v1491_v16  ;;  %v10367_v7 = vsel %vm165_vm0, 0.0, %v252_v59 }
 0x450   :  { %v2638_v35 = vsel %vm2586_vm8, %v2573_v20, %v1683_v10  ;;  %v10364_v10 = vsel %vm165_vm0, %v252_v59, %v253_v47  ;;  %v629_v5 = vrot.slane %v10367_v7, 1 }
 0x451   :  { %v1445_v44 = vpop.permute.xlu0 %1444  ;;  %v2703_v49 = vsel %vm2651_vm9, %v2638_v35, %v1875_v58  ;;  %v630_v28 = vrot.slane %v10364_v10, 1  ;;  %v10402_v58 = vpop.f32.mrf.mxu0  ;;  %v422_v35 = vsel %vm165_vm0, %v253_v47, 0.0 }
 0x452   :  { %16692 = vst [vmem:[#allocation24_spill] sm:$0xff] %v10402_v58  ;;  %v788_v47 = vrot.slane %v422_v35, 2 }
 0x453   :  { %v10386_v0 = vsel %vm488_vm1, %v629_v5, %v630_v28 }
 0x454   :  { %1688 = vrot.lane.b32.xlu2 %v10225_v33, %s7671_s6 }
 0x455   :  { %1258 = vrot.lane.b32.xlu1 %v10110_v52, %s7670_s5  ;;  %v2359_v52 = vsel %vm2330_vm4, %v9682_v15, %v881_v21  ;;  %v786_v15 = vrot.slane %v10364_v10, 2 }
 0x456   :  { %v10359_v26 = vpop.permute.xlu2 %1254  ;;  %v2422_v48 = vsel %vm2393_vm5, %v2359_v52, %v10264_v25 }
 0x457   :  { %1496 = vrot.lane.b32.xlu0 %v10207_v42, %s7672_s7  ;;  %v1829_v3 = vpop.permute.xlu1 %1828 }
 0x459   :  { %v2061_v24 = vpop.permute.xlu0 %2060 }
 0x45a   :  { %v2768_v38 = vsel %vm2716_vm10, %v2703_v49, %v2061_v24 }
 0x45b   :  { %v2833_v55 = vsel %vm2781_vm11, %v2768_v38, %v2247_v2  ;;  %v785_v2 = vrot.slane %v10367_v7, 2 }
 0x45c   :  { %7328 = vmatmul.msk.f32.gmra.mxu3 %vm2851_vm12, %v2833_v55  ;;  %1642 = vrot.lane.b32.xlu2 %v10247_v60, %s7671_s6 }
 0x45d   :  { %1880 = vrot.lane.b32.xlu1 %v10367_v7, %s7669_s30  ;;  %v10389_v60 = vsel %vm644_vm2, %v785_v2, %v786_v15 }
 0x45e   :  { %v1877_v21 = vpop.permute.xlu2 %1876 }
 0x45f   :  { %1450 = vrot.lane.b32.xlu0 %v10234_v11, %s7672_s7  ;;  %v2485_v11 = vsel %vm2456_vm6, %v2422_v48, %v1253_v4  ;;  %v2015_v16 = vpop.permute.xlu1 %2014 }
 0x460   :  { %v2550_v18 = vsel %vm2521_vm7, %v2485_v11, %v1445_v44 }
 0x461   :  { %v925_v50 = vpop.permute.xlu0 %924  ;;  %v2615_v12 = vsel %vm2586_vm8, %v2550_v18, %v10304_v61 }
 0x462   :  { %v2680_v25 = vsel %vm2651_vm9, %v2615_v12, %v1829_v3  ;;  %v2381_v59 = vsel %vm2330_vm4, %v9764_v27, %v925_v50 }
 0x463   :  { %v2745_v4 = vsel %vm2716_vm10, %v2680_v25, %v2015_v16 }
 0x464   :  { %930 = vrot.lane.b32.xlu2 %v10093_v43, %s7668_s29 }
 0x465   :  { %2252 = vrot.lane.b32.xlu1 %v10389_v60, %s7674_s9 }
 0x466   :  { %v1831_v20 = vpop.permute.xlu2 %1830 }
 0x467   :  { %2066 = vrot.lane.b32.xlu0 %v10386_v0, %s7673_s8  ;;  %v883_v61 = vpop.permute.xlu1 %882 }
 0x469   :  { %v2201_v34 = vpop.permute.xlu0 %2200 }
 0x46a   :  { %v2810_v44 = vsel %vm2781_vm11, %v2745_v4, %v2201_v34  ;;  %v10470_v34 = vpop.f32.mrf.mxu0 }
 0x46b   :  { %7305 = vmatmul.msk.f32.gmra.mxu0 %vm2851_vm12, %v2810_v44  ;;  %16693 = vst [vmem:[#allocation25_spill] sm:$0xff] %v10470_v34 }
 0x46c   :  { %1498 = vrot.lane.b32.xlu2 %v10291_v8, %s7672_s7 }
 0x46d   :  { %1306 = vrot.lane.b32.xlu1 %v10183_v17, %s7670_s5 }
 0x46e   :  { %v2017_v43 = vpop.permute.xlu2 %2016 }
 0x46f   :  { %1116 = vrot.lane.b32.xlu0 %v10098_v53, %s7666_s21  ;;  %v1493_v13 = vpop.permute.xlu1 %1492  ;;  %v632_v53 = vrot.slane %v422_v35, 1 }
 0x471   :  { %v1069_v45 = vpop.permute.xlu0 %1068  ;;  %v10423_v55 = vsel %vm488_vm1, %v630_v28, %v632_v53 }
 0x474   :  { %1452 = vrot.lane.b32.xlu2 %v8187_v31, %s7672_s7 }
 0x475   :  { %1690 = vrot.lane.b32.xlu1 %v10315_v9, %s7671_s6 }
 0x476   :  { %v10418_v24 = vpop.permute.xlu2 %884 }
 0x477   :  { %1260 = vrot.lane.b32.xlu0 %v8159_v19, %s7670_s5  ;;  %v1447_v38 = vpop.permute.xlu1 %1446  ;;  %v2444_v19 = vsel %vm2393_vm5, %v2381_v59, %v10328_v29  ;;  %v10440_v29 = vsel %vm644_vm2, %v786_v15, %v788_v47 }
 0x478   :  { %v2509_v27 = vsel %vm2456_vm6, %v2444_v19, %v10340_v30  ;;  %v16694_v19 = vld [vmem:[#allocation17_spill] sm:$0xff] }
 0x479   :  { %v1685_v49 = vpop.permute.xlu0 %1684  ;;  %v2574_v52 = vsel %vm2521_vm7, %v2509_v27, %v1493_v13  ;;  %v16695_v27 = vld [vmem:[#allocation16_spill] sm:$0xff] }
 0x47a   :  { %v2639_v28 = vsel %vm2586_vm8, %v2574_v52, %v1685_v49 }
 0x47b   :  { %v2704_v50 = vsel %vm2651_vm9, %v2639_v28, %v1877_v21 }
 0x47c   :  { %2068 = vrot.lane.b32.xlu2 %v10423_v55, %s7673_s8 }
 0x47d   :  { %1644 = vrot.lane.b32.xlu1 %v8192_v41, %s7671_s6  ;;  %v2360_v41 = vsel %vm2330_vm4, %v9687_v6, %v883_v61 }
 0x47e   :  { %v10435_v3 = vpop.permute.xlu2 %1494  ;;  %v2423_v30 = vsel %vm2393_vm5, %v2360_v41, %v1069_v45 }
 0x47f   :  { %1882 = vrot.lane.b32.xlu0 %v10364_v10, %s7669_s30  ;;  %v2063_v5 = vpop.permute.xlu1 %2062 }
 0x480   :  { %v2769_v48 = vsel %vm2716_vm10, %v2704_v50, %v2063_v5 }
 0x481   :  { %v1639_v31 = vpop.permute.xlu0 %1638 }
 0x484   :  { %932 = vrot.lane.b32.xlu2 %v10207_v42, %s7668_s29 }
 0x485   :  { %2254 = vrot.lane.b32.xlu1 %v10440_v29, %s7674_s9 }
 0x486   :  { %v10454_v11 = vpop.permute.xlu2 %1448 }
 0x487   :  { %1836 = vrot.lane.b32.xlu0 %v8227_v40, %s7669_s30  ;;  %v2486_v40 = vsel %vm2456_vm6, %v2423_v30, %v10359_v26  ;;  %v927_v6 = vpop.permute.xlu1 %926 }
 0x488   :  { %v2551_v21 = vsel %vm2521_vm7, %v2486_v40, %v1447_v38  ;;  %v2382_v52 = vsel %vm2330_vm4, %v9761_v54, %v927_v6  ;;  %v16696_v40 = vld [vmem:[#allocation18_spill] sm:$0xff]  ;;  %v2361_v6 = vsel %vm2330_vm4, %v9879_v51, %v10418_v24 }
 0x489   :  { %v2249_v2 = vpop.permute.xlu0 %2248  ;;  %v2616_v18 = vsel %vm2586_vm8, %v2551_v21, %v1639_v31 }
 0x48a   :  { %v2834_v15 = vsel %vm2781_vm11, %v2769_v48, %v2249_v2  ;;  %v2681_v42 = vsel %vm2651_vm9, %v2616_v18, %v1831_v20 }
 0x48b   :  { %7329 = vmatmul.msk.f32.gmra.mxu3 %vm2851_vm12, %v2834_v15  ;;  %v2746_v26 = vsel %vm2716_vm10, %v2681_v42, %v2017_v43 }
 0x48c   :  { %2208 = vrot.lane.b32.xlu2 %v8276_v46, %s7674_s9  ;;  %v95_v46 = vld [vmem:[%s16165_s0 + $0x1d8] sm:$0xff] }
 0x48d   :  { %1118 = vrot.lane.b32.xlu1 %v10225_v33, %s7666_s21  ;;  %v256_v61 = vrot.slane %v95_v46, 7 }
 0x48e   :  { %v2065_v12 = vpop.permute.xlu2 %2064 }
 0x48f   :  { %2022 = vrot.lane.b32.xlu0 %v8249_v62, %s7673_s8  ;;  %v2203_v25 = vpop.permute.xlu1 %2202  ;;  %v94_v62 = vld [vmem:[%s16165_s0 + $0x1d0] sm:$0xff] }
 0x490   :  { %v2811_v4 = vsel %vm2781_vm11, %v2746_v26, %v2203_v25  ;;  %v255_v20 = vrot.slane %v94_v62, 7 }
 0x491   :  { %v1113_v16 = vpop.permute.xlu0 %1112  ;;  %7306 = vmatmul.msk.f32.gmra.mxu0 %vm2851_vm12, %v2811_v4 }
 0x492   :  { %v10490_v43 = vsel %vm165_vm0, %v255_v20, %v256_v61  ;;  %v10493_v13 = vsel %vm165_vm0, 0.0, %v255_v20  ;;  %v2445_v5 = vsel %vm2393_vm5, %v2382_v52, %v1113_v16 }
 0x493   :  { %v635_v49 = vrot.slane %v10490_v43, 1  ;;  %v790_v31 = vrot.slane %v10493_v13, 2 }
 0x494   :  { %1262 = vrot.lane.b32.xlu2 %v8156_v36, %s7670_s5  ;;  %v634_v36 = vrot.slane %v10493_v13, 1 }
 0x495   :  { %1500 = vrot.lane.b32.xlu1 %v10386_v0, %s7672_s7 }
 0x496   :  { %v10485_v44 = vpop.permute.xlu2 %928  ;;  %v10504_v59 = vsel %vm488_vm1, %v634_v36, %v635_v49 }
 0x497   :  { %1308 = vrot.lane.b32.xlu0 %v10367_v7, %s7670_s5  ;;  %v1071_v45 = vpop.permute.xlu1 %1070 }
 0x498   :  { %v2424_v42 = vsel %vm2393_vm5, %v2361_v6, %v1071_v45  ;;  %v423_v45 = vsel %vm165_vm0, %v256_v61, 0.0 }
 0x499   :  { %v1303_v33 = vpop.permute.xlu0 %1302  ;;  %v637_v36 = vrot.slane %v423_v45, 1 }
 0x49a   :  { %v2510_v41 = vsel %vm2456_vm6, %v2445_v5, %v1303_v33  ;;  %v96_v5 = vld [vmem:[%s16165_s0 + $0x1e0] sm:$0xff] }
 0x49b   :  { %v2575_v48 = vsel %vm2521_vm7, %v2510_v41, %v10435_v3  ;;  %v10579_v61 = vsel %vm488_vm1, %v635_v49, %v637_v36  ;;  %v97_v49 = vld [vmem:[%s16165_s0 + $0x1e8] sm:$0xff] }
 0x49c   :  { %1884 = vrot.lane.b32.xlu2 %v10493_v13, %s7669_s30 }
 0x49d   :  { %1454 = vrot.lane.b32.xlu1 %v8334_v56, %s7672_s7  ;;  %v791_v56 = vrot.slane %v10490_v43, 2 }
 0x49e   :  { %v10501_v53 = vpop.permute.xlu2 %7603 }
 0x49f   :  { %1692 = vrot.lane.b32.xlu0 %v10389_v60, %s7671_s6  ;;  %v1687_v38 = vpop.permute.xlu1 %1686  ;;  %v10519_v30 = vsel %vm644_vm2, %v790_v31, %v791_v56  ;;  %v7605_v51 = vunpack.i.l.bf16 %v10501_v53 }
 0x4a0   :  { %v2640_v2 = vsel %vm2586_vm8, %v2575_v48, %v1687_v38  ;;  %v258_v48 = vrot.slane %v96_v5, 7 }
 0x4a1   :  { %v1257_v35 = vpop.permute.xlu0 %1256 }
 0x4a2   :  { %v2487_v26 = vsel %vm2456_vm6, %v2424_v42, %v1257_v35  ;;  %v10567_v35 = vpop.f32.mrf.mxu0 }
 0x4a3   :  { %v2552_v24 = vsel %vm2521_vm7, %v2487_v26, %v10454_v11  ;;  %16698 = vst [vmem:[#allocation17_spill] sm:$0xff] %v10567_v35 }
 0x4a4   :  { %1838 = vrot.lane.b32.xlu2 %v16695_v27, %s7669_s30 }
 0x4a5   :  { %2070 = vrot.lane.b32.xlu1 %v10504_v59, %s7673_s8 }
 0x4a6   :  { %v1073_v28 = vpop.permute.xlu2 %1072 }
 0x4a7   :  { %1646 = vrot.lane.b32.xlu0 %v16694_v19, %s7671_s6  ;;  %v1641_v50 = vpop.permute.xlu1 %1640  ;;  %v793_v19 = vrot.slane %v423_v45, 2 }
 0x4a8   :  { %v2617_v4 = vsel %vm2586_vm8, %v2552_v24, %v1641_v50  ;;  %v16217_v24 = vunpack.i.h.bf16 %v10501_v53 }
 0x4a9   :  { %v1879_v47 = vpop.permute.xlu0 %1878  ;;  %v10582_v27 = vsel %vm644_vm2, %v791_v56, %v793_v19 }
 0x4aa   :  { %v2705_v15 = vsel %vm2651_vm9, %v2640_v2, %v1879_v47  ;;  %v259_v2 = vrot.slane %v97_v49, 7  ;;  %v10641_v45 = vpop.f32.mrf.mxu0 }
 0x4ab   :  { %v2770_v18 = vsel %vm2716_vm10, %v2705_v15, %v2065_v12  ;;  %v16697_v12 = vld [vmem:[#allocation19_spill] sm:$0xff]  ;;  %16699 = vst [vmem:[#allocation16_spill] sm:$0xff] %v10641_v45 }
 0x4ac   :  { %2024 = vrot.lane.b32.xlu2 %v16696_v40, %s7673_s8 }
 0x4ad   :  { %934 = vrot.lane.b32.xlu1 %v10291_v8, %s7668_s29 }
 0x4ae   :  { %v10536_v3 = vpop.permute.xlu2 %1688 }
 0x4af   :  { %2256 = vrot.lane.b32.xlu0 %v10519_v30, %s7674_s9  ;;  %v2251_v21 = vpop.permute.xlu1 %2250 }
 0x4b0   :  { %v2835_v16 = vsel %vm2781_vm11, %v2770_v18, %v2251_v21  ;;  %v10610_v21 = vsel %vm165_vm0, %v258_v48, %v259_v2 }
 0x4b1   :  { %v10527_v54 = vpop.permute.xlu0 %7593  ;;  %7330 = vmatmul.msk.f32.gmra.mxu3 %vm2851_vm12, %v2835_v16  ;;  %v796_v19 = vrot.slane %v10610_v21, 2 }
 0x4b2   :  { %v7595_v8 = vunpack.i.l.bf16 %v10527_v54 }
 0x4b4   :  { %1310 = vrot.lane.b32.xlu2 %v10364_v10, %s7670_s5 }
 0x4b5   :  { %2210 = vrot.lane.b32.xlu1 %v16697_v12, %s7674_s9 }
 0x4b6   :  { %v1643_v46 = vpop.permute.xlu2 %1642 }
 0x4b7   :  { %1120 = vrot.lane.b32.xlu0 %v10315_v9, %s7666_s21  ;;  %v2682_v9 = vsel %vm2651_vm9, %v2617_v4, %v7595_v8  ;;  %v1115_v33 = vpop.permute.xlu1 %1114 }
 0x4b9   :  { %v10549_v25 = vpop.permute.xlu0 %7598 }
 0x4ba   :  { %v7600_v62 = vunpack.i.l.bf16 %v10549_v25  ;;  %v16218_v18 = vunpack.i.h.bf16 %v10549_v25 }
 0x4bc   :  { %v2747_v11 = vsel %vm2716_vm10, %v2682_v9, %v7600_v62  ;;  %1886 = vrot.lane.b32.xlu2 %v10490_v43, %s7669_s30 }
 0x4bd   :  { %v2812_v20 = vsel %vm2781_vm11, %v2747_v11, %v7605_v51  ;;  %1694 = vrot.lane.b32.xlu1 %v10440_v29, %s7671_s6 }
 0x4be   :  { %7307 = vmatmul.msk.f32.gmra.mxu0 %vm2851_vm12, %v2812_v20  ;;  %v10576_v31 = vpop.permute.xlu2 %930 }
 0x4bf   :  { %1502 = vrot.lane.b32.xlu0 %v10423_v55, %s7672_s7  ;;  %v1305_v47 = vpop.permute.xlu1 %1304 }
 0x4c1   :  { %v887_v38 = vpop.permute.xlu0 %886 }
 0x4c2   :  { %v2362_v50 = vsel %vm2330_vm4, %v9891_v22, %v887_v38  ;;  %v10613_v22 = vsel %vm165_vm0, 0.0, %v258_v48 }
 0x4c3   :  { %v2425_v15 = vsel %vm2393_vm5, %v2362_v50, %v1073_v28  ;;  %v639_v28 = vrot.slane %v10613_v22, 1  ;;  %v795_v38 = vrot.slane %v10613_v22, 2 }
 0x4c4   :  { %936 = vrot.lane.b32.xlu2 %v10386_v0, %s7668_s29  ;;  %v2383_v0 = vsel %vm2330_vm4, %v9965_v14, %v10485_v44  ;;  %v640_v44 = vrot.slane %v10610_v21, 1 }
 0x4c5   :  { %2258 = vrot.lane.b32.xlu1 %v10582_v27, %s7674_s9  ;;  %v2446_v42 = vsel %vm2393_vm5, %v2383_v0, %v1115_v33  ;;  %v10657_v50 = vsel %vm644_vm2, %v795_v38, %v796_v19 }
 0x4c6   :  { %v10596_v56 = vpop.permute.xlu2 %1498  ;;  %v2511_v12 = vsel %vm2456_vm6, %v2446_v42, %v1305_v47  ;;  %v10639_v33 = vsel %vm488_vm1, %v639_v28, %v640_v44 }
 0x4c7   :  { %2072 = vrot.lane.b32.xlu0 %v10579_v61, %s7673_s8  ;;  %v1259_v41 = vpop.permute.xlu1 %1258 }
 0x4c8   :  { %v2488_v40 = vsel %vm2456_vm6, %v2425_v15, %v1259_v41 }
 0x4c9   :  { %v1497_v52 = vpop.permute.xlu0 %1496 }
 0x4ca   :  { %v2576_v11 = vsel %vm2521_vm7, %v2511_v12, %v1497_v52 }
 0x4cb   :  { %v2641_v36 = vsel %vm2586_vm8, %v2576_v11, %v10536_v3  ;;  %v99_v11 = vld [vmem:[%s16165_s0 + $0x1f8] sm:$0xff] }
 0x4cc   :  { %1504 = vrot.lane.b32.xlu2 %v10504_v59, %s7672_s7 }
 0x4cd   :  { %1312 = vrot.lane.b32.xlu1 %v10493_v13, %s7670_s5 }
 0x4ce   :  { %v10624_v26 = vpop.permute.xlu2 %1452 }
 0x4cf   :  { %1122 = vrot.lane.b32.xlu0 %v10389_v60, %s7666_s21  ;;  %v16219_v60 = vunpack.i.h.bf16 %v10527_v54  ;;  %v1881_v9 = vpop.permute.xlu1 %1880 }
 0x4d0   :  { %v2706_v47 = vsel %vm2651_vm9, %v2641_v36, %v1881_v9 }
 0x4d1   :  { %v1451_v6 = vpop.permute.xlu0 %1450 }
 0x4d2   :  { %v2553_v14 = vsel %vm2521_vm7, %v2488_v40, %v1451_v6  ;;  %v424_v40 = vsel %vm165_vm0, %v259_v2, 0.0 }
 0x4d3   :  { %v2618_v16 = vsel %vm2586_vm8, %v2553_v14, %v1643_v46  ;;  %v642_v14 = vrot.slane %v424_v40, 1 }
 0x4d4   :  { %v2683_v4 = vsel %vm2651_vm9, %v2618_v16, %v16219_v60  ;;  %2074 = vrot.lane.b32.xlu2 %v10639_v33, %s7673_s8 }
 0x4d5   :  { %v2748_v20 = vsel %vm2716_vm10, %v2683_v4, %v16218_v18  ;;  %1888 = vrot.lane.b32.xlu1 %v10613_v22, %s7669_s30  ;;  %v10680_v16 = vsel %vm488_vm1, %v640_v44, %v642_v14  ;;  %v98_v44 = vld [vmem:[%s16165_s0 + $0x1f0] sm:$0xff] }
 0x4d6   :  { %v2813_v46 = vsel %vm2781_vm11, %v2748_v20, %v16217_v24  ;;  %v2069_v49 = vpop.permute.xlu2 %2068  ;;  %v3331_v24 = vmul.f32 %v10470_v34, %v10470_v34 }
 0x4d7   :  { %1696 = vrot.lane.b32.xlu0 %v10519_v30, %s7671_s6  ;;  %7308 = vmatmul.msk.f32.gmra.mxu0 %vm2851_vm12, %v2813_v46  ;;  %v2253_v41 = vpop.permute.xlu1 %2252 }
 0x4d9   :  { %v2067_v52 = vpop.permute.xlu0 %2066 }
 0x4da   :  { %v2771_v5 = vsel %vm2716_vm10, %v2706_v47, %v2067_v52  ;;  %v262_v47 = vrot.slane %v99_v11, 7  ;;  %v10711_v52 = vpop.f32.mrf.mxu0 }
 0x4db   :  { %v2836_v3 = vsel %vm2781_vm11, %v2771_v5, %v2253_v41 }
 0x4dc   :  { %7331 = vmatmul.msk.f32.gmra.mxu3 %vm2851_vm12, %v2836_v3  ;;  %1124 = vrot.lane.b32.xlu2 %v10440_v29, %s7666_s21  ;;  %v2384_v29 = vsel %vm2330_vm4, %v9962_v23, %v10576_v31 }
 0x4dd   :  { %938 = vrot.lane.b32.xlu1 %v10423_v55, %s7668_s29  ;;  %v798_v55 = vrot.slane %v424_v40, 2 }
 0x4de   :  { %v10667_v0 = vpop.permute.xlu2 %932 }
 0x4df   :  { %2260 = vrot.lane.b32.xlu0 %v10657_v50, %s7674_s9  ;;  %v1307_v15 = vpop.permute.xlu1 %1306  ;;  %v10683_v2 = vsel %vm644_vm2, %v796_v19, %v798_v55  ;;  %v261_v19 = vrot.slane %v98_v44, 7 }
 0x4e1   :  { %v1117_v48 = vpop.permute.xlu0 %1116 }
 0x4e2   :  { %v2447_v12 = vsel %vm2393_vm5, %v2384_v29, %v1117_v48  ;;  %v10736_v29 = vpop.f32.mrf.mxu0 }
 0x4e3   :  { %v2512_v23 = vsel %vm2456_vm6, %v2447_v12, %v1307_v15  ;;  %v10718_v15 = vsel %vm165_vm0, %v261_v19, %v262_v47 }
 0x4e4   :  { %1698 = vrot.lane.b32.xlu2 %v10582_v27, %s7671_s6  ;;  %v2577_v20 = vsel %vm2521_vm7, %v2512_v23, %v10596_v56  ;;  %v16700_v56 = vld [vmem:[#allocation14_spill] sm:$0xff]  ;;  %v810_v14 = vrot.slane %v10718_v15, 1 }
 0x4e5   :  { %1506 = vrot.lane.b32.xlu1 %v10579_v61, %s7672_s7 }
 0x4e6   :  { %v2209_v28 = vpop.permute.xlu2 %2208 }
 0x4e7   :  { %1314 = vrot.lane.b32.xlu0 %v10490_v43, %s7670_s5  ;;  %v1691_v42 = vpop.permute.xlu1 %1690 }
 0x4e8   :  { %v2642_v46 = vsel %vm2586_vm8, %v2577_v20, %v1691_v42 }
 0x4e9   :  { %v1261_v6 = vpop.permute.xlu0 %1260 }
 0x4ea   :  { %v2489_v41 = vsel %vm2456_vm6, %v16700_v56, %v1261_v6  ;;  %v425_v56 = vsel %vm165_vm0, %v262_v47, 0.0 }
 0x4eb   :  { %v2554_v40 = vsel %vm2521_vm7, %v2489_v41, %v10624_v26  ;;  %v822_v47 = vrot.slane %v425_v56, 2 }
 0x4ec   :  { %2262 = vrot.lane.b32.xlu2 %v10683_v2, %s7674_s9 }
 0x4ed   :  { %2076 = vrot.lane.b32.xlu1 %v10680_v16, %s7673_s8 }
 0x4ee   :  { %v10692_v9 = vpop.permute.xlu2 %1262 }
 0x4ef   :  { %1890 = vrot.lane.b32.xlu0 %v10610_v21, %s7669_s30  ;;  %v1645_v31 = vpop.permute.xlu1 %1644 }
 0x4f0   :  { %v2619_v6 = vsel %vm2586_vm8, %v2554_v40, %v1645_v31 }
 0x4f1   :  { %v1883_v4 = vpop.permute.xlu0 %1882 }
 0x4f2   :  { %v2707_v36 = vsel %vm2651_vm9, %v2642_v46, %v1883_v4  ;;  %v820_v4 = vrot.slane %v10718_v15, 2 }
 0x4f3   :  { %v2772_v3 = vsel %vm2716_vm10, %v2707_v36, %v2069_v49  ;;  %v10749_v36 = vpop.f32.mrf.mxu0 }
 0x4f4   :  { %1316 = vrot.lane.b32.xlu2 %v10613_v22, %s7670_s5 }
 0x4f5   :  { %1126 = vrot.lane.b32.xlu1 %v10519_v30, %s7666_s21  ;;  %v10721_v30 = vsel %vm165_vm0, 0.0, %v261_v19 }
 0x4f6   :  { %v1885_v5 = vpop.permute.xlu2 %1884  ;;  %v809_v49 = vrot.slane %v10721_v30, 1  ;;  %v819_v12 = vrot.slane %v10721_v30, 2 }
 0x4f7   :  { %940 = vrot.lane.b32.xlu0 %v10504_v59, %s7668_s29  ;;  %v2255_v59 = vpop.permute.xlu1 %2254 }
 0x4f8   :  { %v2837_v48 = vsel %vm2781_vm11, %v2772_v3, %v2255_v59  ;;  %v811_v11 = vsel %vm488_vm1, %v809_v49, %v810_v14  ;;  %v821_v20 = vsel %vm644_vm2, %v819_v12, %v820_v4  ;;  %v812_v59 = vrot.slane %v425_v56, 1 }
 0x4f9   :  { %v1837_v38 = vpop.permute.xlu0 %1836  ;;  %7332 = vmatmul.msk.f32.gmra.mxu3 %vm2851_vm12, %v2837_v48  ;;  %v2385_v48 = vsel %vm2330_vm4, %v10176_v39, %v10667_v0 }
 0x4fa   :  { %v2684_v55 = vsel %vm2651_vm9, %v2619_v6, %v1837_v38 }
 0x4fb   :  { %v10758_v41 = vpop.f32.mrf.mxu0 }
 0x4fc   :  { %1892 = vrot.lane.b32.xlu2 %v10721_v30, %s7669_s30 }
 0x4fd   :  { %1700 = vrot.lane.b32.xlu1 %v10657_v50, %s7671_s6 }
 0x4fe   :  { %v1839_v31 = vpop.permute.xlu2 %1838 }
 0x4ff   :  { %1508 = vrot.lane.b32.xlu0 %v10639_v33, %s7672_s7  ;;  %v1119_v44 = vpop.permute.xlu1 %1118 }
 0x500   :  { %v2448_v40 = vsel %vm2393_vm5, %v2385_v48, %v1119_v44 }
 0x501   :  { %v2023_v42 = vpop.permute.xlu0 %2022 }
 0x502   :  { %v2749_v26 = vsel %vm2716_vm10, %v2684_v55, %v2023_v42 }
 0x503   :  { %v2814_v23 = vsel %vm2781_vm11, %v2749_v26, %v2209_v28  ;;  %v10771_v55 = vpop.f32.mrf.mxu0 }
 0x504   :  { %7309 = vmatmul.msk.f32.gmra.mxu0 %vm2851_vm12, %v2814_v23  ;;  %942 = vrot.lane.b32.xlu2 %v10579_v61, %s7668_s29 }
 0x505   :  { %2264 = vrot.lane.b32.xlu1 %v821_v20, %s7674_s9 }
 0x506   :  { %v2025_v38 = vpop.permute.xlu2 %2024 }
 0x507   :  { %2078 = vrot.lane.b32.xlu0 %v811_v11, %s7673_s8  ;;  %v1501_v28 = vpop.permute.xlu1 %1500 }
 0x509   :  { %v1309_v46 = vpop.permute.xlu0 %1308 }
 0x50a   :  { %v2513_v6 = vsel %vm2456_vm6, %v2448_v40, %v1309_v46 }
 0x50b   :  { %v2578_v39 = vsel %vm2521_vm7, %v2513_v6, %v1501_v28  ;;  %v10783_v46 = vpop.f32.mrf.mxu0 }
 0x50c   :  { %1510 = vrot.lane.b32.xlu2 %v10680_v16, %s7672_s7 }
 0x50d   :  { %1318 = vrot.lane.b32.xlu1 %v10610_v21, %s7670_s5 }
 0x50e   :  { %v1311_v61 = vpop.permute.xlu2 %1310 }
 0x50f   :  { %1128 = vrot.lane.b32.xlu0 %v10582_v27, %s7666_s21  ;;  %v1455_v3 = vpop.permute.xlu1 %1454  ;;  %v813_v27 = vsel %vm488_vm1, %v810_v14, %v812_v59  ;;  %v823_v14 = vsel %vm644_vm2, %v820_v4, %v822_v47 }
 0x511   :  { %v1693_v19 = vpop.permute.xlu0 %1692 }
 0x512   :  { %v2643_v26 = vsel %vm2586_vm8, %v2578_v39, %v1693_v19  ;;  %v16701_v19 = vld [vmem:[#allocation15_spill] sm:$0xff] }
 0x513   :  { %v2708_v12 = vsel %vm2651_vm9, %v2643_v26, %v1885_v5  ;;  %v2490_v5 = vsel %vm2456_vm6, %v16701_v19, %v10692_v9  ;;  %v10797_v40 = vpop.f32.mrf.mxu0 }
 0x514   :  { %2080 = vrot.lane.b32.xlu2 %v813_v27, %s7673_s8  ;;  %v2555_v59 = vsel %vm2521_vm7, %v2490_v5, %v1455_v3 }
 0x515   :  { %1894 = vrot.lane.b32.xlu1 %v10718_v15, %s7669_s30 }
 0x516   :  { %v1887_v42 = vpop.permute.xlu2 %1886 }
 0x517   :  { %1702 = vrot.lane.b32.xlu0 %v10683_v2, %s7671_s6  ;;  %v2071_v0 = vpop.permute.xlu1 %2070 }
 0x518   :  { %v2773_v23 = vsel %vm2716_vm10, %v2708_v12, %v2071_v0 }
 0x519   :  { %v1647_v49 = vpop.permute.xlu0 %1646 }
 0x51a   :  { %v2620_v48 = vsel %vm2586_vm8, %v2555_v59, %v1647_v49 }
 0x51c   :  { %1130 = vrot.lane.b32.xlu2 %v10657_v50, %s7666_s21 }
 0x51d   :  { %944 = vrot.lane.b32.xlu1 %v10639_v33, %s7668_s29  ;;  %v2685_v33 = vsel %vm2651_vm9, %v2620_v48, %v1839_v31 }
 0x51e   :  { %v937_v4 = vpop.permute.xlu2 %936  ;;  %v2750_v47 = vsel %vm2716_vm10, %v2685_v33, %v2025_v38 }
 0x51f   :  { %2266 = vrot.lane.b32.xlu0 %v823_v14, %s7674_s9  ;;  %v935_v56 = vpop.permute.xlu1 %934 }
 0x520   :  { %v2386_v49 = vsel %vm2330_vm4, %v10183_v17, %v935_v56 }
 0x521   :  { %v2257_v44 = vpop.permute.xlu0 %2256 }
 0x522   :  { %v2838_v28 = vsel %vm2781_vm11, %v2773_v23, %v2257_v44  ;;  %v2387_v23 = vsel %vm2330_vm4, %v10367_v7, %v937_v4 }
 0x523   :  { %7333 = vmatmul.msk.f32.gmra.mxu3 %vm2851_vm12, %v2838_v28 }
 0x524   :  { %1704 = vrot.lane.b32.xlu2 %v821_v20, %s7671_s6 }
 0x525   :  { %1512 = vrot.lane.b32.xlu1 %v811_v11, %s7672_s7  ;;  %v10811_v11 = vpop.f32.mrf.mxu0 }
 0x526   :  { %v1505_v3 = vpop.permute.xlu2 %1504 }
 0x527   :  { %1320 = vrot.lane.b32.xlu0 %v10721_v30, %s7670_s5  ;;  %v2211_v9 = vpop.permute.xlu1 %2210 }
 0x528   :  { %v2815_v6 = vsel %vm2781_vm11, %v2750_v47, %v2211_v9 }
 0x529   :  { %v1121_v50 = vpop.permute.xlu0 %1120  ;;  %7310 = vmatmul.msk.f32.gmra.mxu0 %vm2851_vm12, %v2815_v6 }
 0x52a   :  { %v2449_v30 = vsel %vm2393_vm5, %v2386_v49, %v1121_v50  ;;  %v10834_v50 = vpop.f32.mrf.mxu3 }
 0x52b   :  { %v2514_v20 = vsel %vm2456_vm6, %v2449_v30, %v1311_v61  ;;  %16702 = vst [vmem:[#allocation18_spill] sm:$0xff] %v10834_v50 }
 0x52c   :  { %1322 = vrot.lane.b32.xlu2 %v10718_v15, %s7670_s5 }
 0x52d   :  { %1132 = vrot.lane.b32.xlu1 %v10683_v2, %s7666_s21  ;;  %v10819_v2 = vpop.f32.mrf.mxu0 }
 0x52e   :  { %v2075_v0 = vpop.permute.xlu2 %2074 }
 0x52f   :  { %946 = vrot.lane.b32.xlu0 %v10680_v16, %s7668_s29  ;;  %v1695_v38 = vpop.permute.xlu1 %1694 }
 0x531   :  { %v1503_v31 = vpop.permute.xlu0 %1502 }
 0x532   :  { %v2579_v17 = vsel %vm2521_vm7, %v2514_v20, %v1503_v31  ;;  %v10842_v30 = vpop.f32.mrf.mxu3 }
 0x533   :  { %v2644_v39 = vsel %vm2586_vm8, %v2579_v17, %v1695_v38  ;;  %16703 = vst [vmem:[#allocation19_spill] sm:$0xff] %v10842_v30 }
 0x534   :  { %v2709_v16 = vsel %vm2651_vm9, %v2644_v39, %v1887_v42 }
 0x535   :  { %1706 = vrot.lane.b32.xlu1 %v823_v14, %s7671_s6  ;;  %v10826_v28 = vpop.f32.mrf.mxu0 }
 0x537   :  { %1514 = vrot.lane.b32.xlu0 %v813_v27, %s7672_s7  ;;  %v2259_v12 = vpop.permute.xlu1 %2258  ;;  %v1125_v27 = vpop.permute.xlu2 %1124  ;;  %s7263_s7 = sshll.u32 %s16169_s4, 4  ;;  %s7264_s7 = int_to_ptr.hbm [resolvable:$true] %s7263_s7 }
 0x539   :  { %v2073_v26 = vpop.permute.xlu0 %2072 }
 0x53a   :  { %v2774_v15 = vsel %vm2716_vm10, %v2709_v16, %v2073_v26  ;;  %v10850_v16 = vpop.f32.mrf.mxu3 }
 0x53b   :  { %v2839_v61 = vsel %vm2781_vm11, %v2774_v15, %v2259_v12  ;;  %16704 = vst [vmem:[#allocation14_spill] sm:$0xff] %v10850_v16 }
 0x53c   :  { %7334 = vmatmul.msk.f32.gmra.mxu3 %vm2851_vm12, %v2839_v61 }
 0x53d   :  { %v10830_v56 = vpop.f32.mrf.mxu0 }
 0x53f   :  { %v1313_v19 = vpop.permute.xlu1 %1312  ;;  %v1699_v33 = vpop.permute.xlu2 %1698 }
 0x541   :  { %v1123_v44 = vpop.permute.xlu0 %1122 }
 0x542   :  { %v2450_v42 = vsel %vm2393_vm5, %v2387_v23, %v1123_v44 }
 0x543   :  { %v2515_v14 = vsel %vm2456_vm6, %v2450_v42, %v1313_v19  ;;  %v10857_v42 = vpop.f32.mrf.mxu3 }
 0x544   :  { %v2580_v59 = vsel %vm2521_vm7, %v2515_v14, %v1505_v3  ;;  %16705 = vst [vmem:[#allocation15_spill] sm:$0xff] %v10857_v42 }
 0x545   :  { %v10838_v6 = vpop.f32.mrf.mxu0 }
 0x547   :  { %v1889_v7 = vpop.permute.xlu1 %1888  ;;  %v2263_v31 = vpop.permute.xlu2 %2262 }
 0x549   :  { %v1697_v5 = vpop.permute.xlu0 %1696 }
 0x54a   :  { %v2645_v48 = vsel %vm2586_vm8, %v2580_v59, %v1697_v5 }
 0x54b   :  { %v2710_v4 = vsel %vm2651_vm9, %v2645_v48, %v1889_v7  ;;  %v10864_v7 = vpop.f32.mrf.mxu3 }
 0x54c   :  { %v2775_v47 = vsel %vm2716_vm10, %v2710_v4, %v2075_v0  ;;  %16706 = vst [vmem:[#allocation26_spill] sm:$0xff] %v10864_v7 }
 0x54d   :  { %v10846_v38 = vpop.f32.mrf.mxu0 }
 0x54f   :  { %v939_v3 = vpop.permute.xlu1 %938  ;;  %v1317_v12 = vpop.permute.xlu2 %1316 }
 0x550   :  { %v2388_v20 = vsel %vm2330_vm4, %v10364_v10, %v939_v3 }
 0x551   :  { %v2261_v9 = vpop.permute.xlu0 %2260  ;;  %v2451_v39 = vsel %vm2393_vm5, %v2388_v20, %v1125_v27 }
 0x552   :  { %v2840_v49 = vsel %vm2781_vm11, %v2775_v47, %v2261_v9 }
 0x553   :  { %7335 = vmatmul.msk.f32.gmra.mxu3 %vm2851_vm12, %v2840_v49 }
 0x555   :  { %v10854_v44 = vpop.f32.mrf.mxu0 }
 0x557   :  { %v1507_v26 = vpop.permute.xlu1 %1506  ;;  %v1893_v59 = vpop.permute.xlu2 %1892 }
 0x559   :  { %v1315_v17 = vpop.permute.xlu0 %1314 }
 0x55a   :  { %v2516_v0 = vsel %vm2456_vm6, %v2451_v39, %v1315_v17  ;;  %v10873_v17 = vpop.f32.mrf.mxu3 }
 0x55b   :  { %v2581_v15 = vsel %vm2521_vm7, %v2516_v0, %v1507_v26  ;;  %16707 = vst [vmem:[#allocation27_spill] sm:$0xff] %v10873_v17 }
 0x55c   :  { %v2646_v61 = vsel %vm2586_vm8, %v2581_v15, %v1699_v33 }
 0x55d   :  { %v10862_v48 = vpop.f32.mrf.mxu0 }
 0x55f   :  { %v2077_v19 = vpop.permute.xlu1 %2076  ;;  %v943_v20 = vpop.permute.xlu2 %942 }
 0x561   :  { %v1891_v23 = vpop.permute.xlu0 %1890 }
 0x562   :  { %v2711_v10 = vsel %vm2651_vm9, %v2646_v61, %v1891_v23  ;;  %v10880_v23 = vpop.f32.mrf.mxu3 }
 0x563   :  { %v2776_v27 = vsel %vm2716_vm10, %v2711_v10, %v2077_v19 }
 0x564   :  { %v2841_v14 = vsel %vm2781_vm11, %v2776_v27, %v2263_v31  ;;  %v2390_v27 = vsel %vm2330_vm4, %v10490_v43, %v943_v20  ;;  %v3328_v43 = vmul.f32 %v10228_v57, %v10228_v57 }
 0x565   :  { %7336 = vmatmul.msk.f32.gmra.mxu3 %vm2851_vm12, %v2841_v14  ;;  %v10869_v49 = vpop.f32.mrf.mxu0 }
 0x567   :  { %v1127_v4 = vpop.permute.xlu1 %1126  ;;  %v1511_v19 = vpop.permute.xlu2 %1510 }
 0x569   :  { %v941_v5 = vpop.permute.xlu0 %940 }
 0x56a   :  { %v2389_v33 = vsel %vm2330_vm4, %v10493_v13, %v941_v5 }
 0x56b   :  { %v2452_v47 = vsel %vm2393_vm5, %v2389_v33, %v1127_v4 }
 0x56c   :  { %v2517_v3 = vsel %vm2456_vm6, %v2452_v47, %v1317_v12  ;;  %v3327_v47 = vmul.f32 %v10121_v37, %v10121_v37 }
 0x56d   :  { %v10877_v13 = vpop.f32.mrf.mxu0 }
 0x56f   :  { %v1701_v39 = vpop.permute.xlu1 %1700  ;;  %v2081_v20 = vpop.permute.xlu2 %2080 }
 0x571   :  { %v1509_v9 = vpop.permute.xlu0 %1508 }
 0x572   :  { %v2582_v31 = vsel %vm2521_vm7, %v2517_v3, %v1509_v9  ;;  %v3326_v9 = vmul.f32 %v10004_v63, %v10004_v63  ;;  %v3257_v3 = vadd.f32 %v10121_v37, %v10004_v63 }
 0x573   :  { %v2647_v0 = vsel %vm2586_vm8, %v2582_v31, %v1701_v39 }
 0x574   :  { %v2712_v26 = vsel %vm2651_vm9, %v2647_v0, %v1893_v59  ;;  %v10888_v59 = vpop.f32.mrf.mxu3  ;;  %v3390_v39 = vadd.f32 %v3327_v47, %v3326_v9  ;;  %v3258_v0 = vadd.f32 %v3257_v3, %v10228_v57 }
 0x575   :  { %v10886_v5 = vpop.f32.mrf.mxu0 }
 0x577   :  { %v2265_v10 = vpop.permute.xlu1 %2264 }
 0x579   :  { %v2079_v15 = vpop.permute.xlu0 %2078 }
 0x57a   :  { %v2777_v61 = vsel %vm2716_vm10, %v2712_v26, %v2079_v15  ;;  %v3329_v26 = vmul.f32 %v10309_v32, %v10309_v32 }
 0x57b   :  { %v2842_v12 = vsel %vm2781_vm11, %v2777_v61, %v2265_v10 }
 0x57c   :  { %7337 = vmatmul.msk.f32.gmra.mxu3 %vm2851_vm12, %v2842_v12  ;;  %v3391_v12 = vadd.f32 %v3390_v39, %v3328_v43 }
 0x57d   :  { %v10903_v61 = vpop.f32.mrf.mxu0 }
 0x57e   :  { %v3392_v9 = vadd.f32 %v3391_v12, %v3329_v26  ;;  %v1131_v12 = vpop.permute.xlu2 %1130 }
 0x57f   :  { %v1319_v4 = vpop.permute.xlu1 %1318 }
 0x581   :  { %v1129_v14 = vpop.permute.xlu0 %1128 }
 0x582   :  { %v2453_v33 = vsel %vm2393_vm5, %v2390_v27, %v1129_v14  ;;  %v3259_v27 = vadd.f32 %v3258_v0, %v10309_v32  ;;  %v3330_v14 = vmul.f32 %v10402_v58, %v10402_v58 }
 0x583   :  { %v2518_v31 = vsel %vm2456_vm6, %v2453_v33, %v1319_v4  ;;  %v10910_v4 = vpop.f32.mrf.mxu3 }
 0x584   :  { %v2583_v10 = vsel %vm2521_vm7, %v2518_v31, %v1511_v19  ;;  %v3260_v3 = vadd.f32 %v3259_v27, %v10402_v58  ;;  %v3393_v19 = vadd.f32 %v3392_v9, %v3330_v14  ;;  %v3332_v31 = vmul.f32 %v10567_v35, %v10567_v35 }
 0x585   :  { %v10923_v27 = vpop.f32.mrf.mxu0  ;;  %v3334_v9 = vmul.f32 %v10711_v52, %v10711_v52 }
 0x586   :  { %v3261_v43 = vadd.f32 %v3260_v3, %v10470_v34  ;;  %v3394_v39 = vadd.f32 %v3393_v19, %v3331_v24 }
 0x587   :  { %v1895_v47 = vpop.permute.xlu1 %1894 }
 0x588   :  { %v3262_v0 = vadd.f32 %v3261_v43, %v10567_v35  ;;  %v3395_v14 = vadd.f32 %v3394_v39, %v3332_v31 }
 0x589   :  { %v1703_v15 = vpop.permute.xlu0 %1702 }
 0x58a   :  { %v2648_v33 = vsel %vm2586_vm8, %v2583_v10, %v1703_v15  ;;  %v3333_v15 = vmul.f32 %v10641_v45, %v10641_v45 }
 0x58b   :  { %v2713_v18 = vsel %vm2651_vm9, %v2648_v33, %v1895_v47  ;;  %v3263_v47 = vadd.f32 %v3262_v0, %v10641_v45  ;;  %v10930_v24 = vpop.f32.mrf.mxu3  ;;  %v3336_v0 = vmul.f32 %v10749_v36, %v10749_v36 }
 0x58c   :  { %v2778_v26 = vsel %vm2716_vm10, %v2713_v18, %v2081_v20  ;;  %v3396_v19 = vadd.f32 %v3395_v14, %v3333_v15  ;;  %v3335_v20 = vmul.f32 %v10736_v29, %v10736_v29  ;;  %v3337_v15 = vmul.f32 %v10758_v41, %v10758_v41 }
 0x58d   :  { %v3264_v18 = vadd.f32 %v3263_v47, %v10711_v52  ;;  %v10944_v47 = vpop.f32.mrf.mxu0 }
 0x58e   :  { %v3397_v31 = vadd.f32 %v3396_v19, %v3334_v9  ;;  %v1705_v19 = vpop.permute.xlu2 %1704 }
 0x58f   :  { %v945_v3 = vpop.permute.xlu1 %944  ;;  %v3265_v39 = vadd.f32 %v3264_v18, %v10736_v29 }
 0x590   :  { %v2391_v43 = vsel %vm2330_vm4, %v10613_v22, %v945_v3  ;;  %v3338_v3 = vmul.f32 %v10771_v55, %v10771_v55 }
 0x591   :  { %v2267_v10 = vpop.permute.xlu0 %2266 }
 0x592   :  { %v2843_v33 = vsel %vm2781_vm11, %v2778_v26, %v2267_v10  ;;  %v3398_v26 = vadd.f32 %v3397_v31, %v3335_v20  ;;  %v3266_v10 = vadd.f32 %v3265_v39, %v10749_v36 }
 0x593   :  { %7338 = vmatmul.msk.f32.gmra.mxu3 %vm2851_vm12, %v2843_v33  ;;  %v2454_v33 = vsel %vm2393_vm5, %v2391_v43, %v1131_v12  ;;  %v10950_v18 = vpop.f32.mrf.mxu3  ;;  %v3339_v12 = vmul.f32 %v10783_v46, %v10783_v46 }
 0x594   :  { %v3399_v22 = vadd.f32 %v3398_v26, %v3336_v0  ;;  %v3267_v9 = vadd.f32 %v3266_v10, %v10758_v41  ;;  %v3340_v10 = vmul.f32 %v10797_v40, %v10797_v40 }
 0x596   :  { %v3400_v31 = vadd.f32 %v3399_v22, %v3337_v15  ;;  %v3268_v39 = vadd.f32 %v3267_v9, %v10771_v55 }
 0x597   :  { %v1513_v20 = vpop.permute.xlu1 %1512 }
 0x598   :  { %v3401_v0 = vadd.f32 %v3400_v31, %v3338_v3  ;;  %v3269_v26 = vadd.f32 %v3268_v39, %v10783_v46 }
 0x599   :  { %v1321_v14 = vpop.permute.xlu0 %1320 }
 0x59a   :  { %v2519_v60 = vsel %vm2456_vm6, %v2454_v33, %v1321_v14  ;;  %v3402_v22 = vadd.f32 %v3401_v0, %v3339_v12  ;;  %v3270_v9 = vadd.f32 %v3269_v26, %v10797_v40 }
 0x59b   :  { %v2584_v43 = vsel %vm2521_vm7, %v2519_v60, %v1513_v20  ;;  %v3341_v60 = vmul.f32 %v10811_v11, %v10811_v11  ;;  %v10972_v20 = vpop.f32.mrf.mxu0  ;;  %v10980_v12 = vpop.f32.mrf.mxu3 }
 0x59c   :  { %v2649_v33 = vsel %vm2586_vm8, %v2584_v43, %v1705_v19  ;;  %v3271_v31 = vadd.f32 %v3270_v9, %v10811_v11 }
 0x59d   :  { %v2714_v14 = vsel %vm2651_vm9, %v2649_v33, %v7595_v8  ;;  %v3403_v8 = vadd.f32 %v3402_v22, %v3340_v10  ;;  %v1323_v10 = vpop.permute.xlu2 %1322  ;;  %v3344_v22 = vmul.f32 %v10830_v56, %v10830_v56 }
 0x59e   :  { %v2779_v15 = vsel %vm2716_vm10, %v2714_v14, %v7600_v62  ;;  %v3342_v62 = vmul.f32 %v10819_v2, %v10819_v2  ;;  %v3272_v0 = vadd.f32 %v3271_v31, %v10819_v2 }
 0x59f   :  { %v2844_v19 = vsel %vm2781_vm11, %v2779_v15, %v7605_v51  ;;  %v1133_v43 = vpop.permute.xlu1 %1132  ;;  %v3404_v33 = vadd.f32 %v3403_v8, %v3341_v60  ;;  %v3343_v51 = vmul.f32 %v10826_v28, %v10826_v28  ;;  %v3345_v60 = vmul.f32 %v10838_v6, %v10838_v6 }
 0x5a0   :  { %7339 = vmatmul.msk.f32.gmra.mxu3 %vm2851_vm12, %v2844_v19  ;;  %v3273_v15 = vadd.f32 %v3272_v0, %v10826_v28 }
 0x5a1   :  { %v947_v3 = vpop.permute.xlu0 %946  ;;  %v3405_v14 = vadd.f32 %v3404_v33, %v3342_v62 }
 0x5a2   :  { %v2392_v39 = vsel %vm2330_vm4, %v10610_v21, %v947_v3  ;;  %v3274_v21 = vadd.f32 %v3273_v15, %v10830_v56  ;;  %v16708_v15 = vunpack.i.h.bf16 %v10527_v54  ;;  %v3349_v54 = vmul.f32 %v10869_v49, %v10869_v49 }
 0x5a3   :  { %v2455_v26 = vsel %vm2393_vm5, %v2392_v39, %v1133_v43  ;;  %v3406_v9 = vadd.f32 %v3405_v14, %v3343_v51  ;;  %v10993_v8 = vpop.f32.mrf.mxu0  ;;  %v3346_v43 = vmul.f32 %v10846_v38, %v10846_v38  ;;  %v10999_v33 = vpop.f32.mrf.mxu3 }
 0x5a4   :  { %v2520_v3 = vsel %vm2456_vm6, %v2455_v26, %v1323_v10  ;;  %v3275_v62 = vadd.f32 %v3274_v21, %v10838_v6  ;;  %v3347_v26 = vmul.f32 %v10854_v44, %v10854_v44 }
 0x5a5   :  { %v3407_v39 = vadd.f32 %v3406_v9, %v3344_v22 }
 0x5a6   :  { %v3276_v14 = vadd.f32 %v3275_v62, %v10846_v38 }
 0x5a7   :  { %v1707_v0 = vpop.permute.xlu1 %1706  ;;  %v3408_v51 = vadd.f32 %v3407_v39, %v3345_v60  ;;  %v16710_v39 = vunpack.i.h.bf16 %v10501_v53 }
 0x5a8   :  { %v3277_v21 = vadd.f32 %v3276_v14, %v10854_v44 }
 0x5a9   :  { %v1515_v19 = vpop.permute.xlu0 %1514  ;;  %v3409_v9 = vadd.f32 %v3408_v51, %v3346_v43 }
 0x5aa   :  { %v2585_v31 = vsel %vm2521_vm7, %v2520_v3, %v1515_v19  ;;  %v3348_v3 = vmul.f32 %v10862_v48, %v10862_v48  ;;  %v16709_v19 = vunpack.i.h.bf16 %v10549_v25  ;;  %v3350_v25 = vmul.f32 %v10877_v13, %v10877_v13 }
 0x5ab   :  { %v2650_v10 = vsel %vm2586_vm8, %v2585_v31, %v1707_v0  ;;  %v3410_v45 = vadd.f32 %v3409_v9, %v3347_v26  ;;  %v3278_v31 = vadd.f32 %v3277_v21, %v10862_v48  ;;  %v11021_v43 = vpop.f32.mrf.mxu0  ;;  %v11026_v14 = vpop.f32.mrf.mxu3  ;;  %v3352_v9 = vmul.f32 %v10903_v61, %v10903_v61 }
 0x5ac   :  { %v2715_v22 = vsel %vm2651_vm9, %v2650_v10, %v16708_v15  ;;  %v3351_v10 = vmul.f32 %v10886_v5, %v10886_v5 }
 0x5ad   :  { %v2780_v60 = vsel %vm2716_vm10, %v2715_v22, %v16709_v19  ;;  %v3411_v0 = vadd.f32 %v3410_v45, %v3348_v3  ;;  %v3279_v51 = vadd.f32 %v3278_v31, %v10869_v49  ;;  %v3353_v3 = vmul.f32 %v10923_v27, %v10923_v27 }
 0x5ae   :  { %v2845_v62 = vsel %vm2781_vm11, %v2780_v60, %v16710_v39 }
 0x5af   :  { %7340 = vmatmul.msk.f32.gmra.mxu3 %vm2851_vm12, %v2845_v62  ;;  %v3412_v53 = vadd.f32 %v3411_v0, %v3349_v54  ;;  %v3280_v26 = vadd.f32 %v3279_v51, %v10877_v13  ;;  %v3354_v62 = vmul.f32 %v10944_v47, %v10944_v47  ;;  %v3355_v51 = vmul.f32 %v10972_v20, %v10972_v20 }
 0x5b1   :  { %v3413_v15 = vadd.f32 %v3412_v53, %v3350_v25  ;;  %v3281_v22 = vadd.f32 %v3280_v26, %v10886_v5  ;;  %v3356_v26 = vmul.f32 %v10993_v8, %v10993_v8 }
 0x5b3   :  { %v3414_v45 = vadd.f32 %v3413_v15, %v3351_v10  ;;  %v3282_v21 = vadd.f32 %v3281_v22, %v10903_v61  ;;  %v11037_v19 = vpop.f32.mrf.mxu0  ;;  %v11042_v31 = vpop.f32.mrf.mxu3  ;;  %v3357_v22 = vmul.f32 %v11021_v43, %v11021_v43 }
 0x5b4   :  { %16711 = vst [vmem:[#allocation28_spill] sm:$0xff] %v11037_v19 }
 0x5b5   :  { %v3415_v60 = vadd.f32 %v3414_v45, %v3352_v9  ;;  %v3283_v39 = vadd.f32 %v3282_v21, %v10923_v27 }
 0x5b7   :  { %v3416_v54 = vadd.f32 %v3415_v60, %v3353_v3  ;;  %v3284_v0 = vadd.f32 %v3283_v39, %v10944_v47  ;;  %v3358_v3 = vmul.f32 %v11037_v19, %v11037_v19 }
 0x5b9   :  { %v3417_v25 = vadd.f32 %v3416_v54, %v3354_v62  ;;  %v3285_v53 = vadd.f32 %v3284_v0, %v10972_v20 }
 0x5bb   :  { %v3418_v10 = vadd.f32 %v3417_v25, %v3355_v51  ;;  %v3286_v15 = vadd.f32 %v3285_v53, %v10993_v8  ;;  %v11053_v9 = vpop.f32.mrf.mxu0  ;;  %v11058_v60 = vpop.f32.mrf.mxu3  ;;  %v3360_v53 = vmul.f32 %v10834_v50, %v10834_v50 }
 0x5bc   :  { %16712 = vst [vmem:[#allocation29_spill] sm:$0xff] %v11053_v9  ;;  %v3359_v54 = vmul.f32 %v11053_v9, %v11053_v9 }
 0x5bd   :  { %v3419_v45 = vadd.f32 %v3418_v10, %v3356_v26  ;;  %v3287_v21 = vadd.f32 %v3286_v15, %v11021_v43 }
 0x5bf   :  { %v3420_v39 = vadd.f32 %v3419_v45, %v3357_v22  ;;  %v3288_v62 = vadd.f32 %v3287_v21, %v11037_v19  ;;  %v3361_v22 = vmul.f32 %v10842_v30, %v10842_v30 }
 0x5c1   :  { %v3421_v0 = vadd.f32 %v3420_v39, %v3358_v3  ;;  %v3289_v51 = vadd.f32 %v3288_v62, %v11053_v9  ;;  %v3362_v3 = vmul.f32 %v10850_v16, %v10850_v16 }
 0x5c3   :  { %v3422_v25 = vadd.f32 %v3421_v0, %v3359_v54  ;;  %v3290_v26 = vadd.f32 %v3289_v51, %v10834_v50  ;;  %v11067_v10 = vpop.f32.mrf.mxu3  ;;  %v3363_v0 = vmul.f32 %v10857_v42, %v10857_v42 }
 0x5c5   :  { %v3423_v15 = vadd.f32 %v3422_v25, %v3360_v53  ;;  %v3291_v45 = vadd.f32 %v3290_v26, %v10842_v30  ;;  %v3364_v53 = vmul.f32 %v10864_v7, %v10864_v7 }
 0x5c7   :  { %v3424_v21 = vadd.f32 %v3423_v15, %v3361_v22  ;;  %v3292_v39 = vadd.f32 %v3291_v45, %v10850_v16  ;;  %v3365_v45 = vmul.f32 %v10873_v17, %v10873_v17 }
 0x5c9   :  { %v3425_v54 = vadd.f32 %v3424_v21, %v3362_v3  ;;  %v3293_v51 = vadd.f32 %v3292_v39, %v10857_v42  ;;  %v3366_v3 = vmul.f32 %v10880_v23, %v10880_v23 }
 0x5cb   :  { %v11075_v62 = vpop.f32.mrf.mxu3  ;;  %v3426_v25 = vadd.f32 %v3425_v54, %v3363_v0  ;;  %v3294_v26 = vadd.f32 %v3293_v51, %v10864_v7  ;;  %v3367_v51 = vmul.f32 %v10888_v59, %v10888_v59 }
 0x5cd   :  { %v3427_v22 = vadd.f32 %v3426_v25, %v3364_v53  ;;  %v3295_v35 = vadd.f32 %v3294_v26, %v10873_v17  ;;  %v3368_v53 = vmul.f32 %v10910_v4, %v10910_v4 }
 0x5cf   :  { %v3428_v21 = vadd.f32 %v3427_v22, %v3365_v45  ;;  %v3296_v39 = vadd.f32 %v3295_v35, %v10880_v23  ;;  %v3369_v35 = vmul.f32 %v10930_v24, %v10930_v24 }
 0x5d1   :  { %v3429_v0 = vadd.f32 %v3428_v21, %v3366_v3  ;;  %v3297_v7 = vadd.f32 %v3296_v39, %v10888_v59  ;;  %v3370_v3 = vmul.f32 %v10950_v18, %v10950_v18 }
 0x5d3   :  { %v11083_v15 = vpop.f32.mrf.mxu3  ;;  %v3430_v25 = vadd.f32 %v3429_v0, %v3367_v51  ;;  %v3298_v26 = vadd.f32 %v3297_v7, %v10910_v4  ;;  %v3371_v7 = vmul.f32 %v10980_v12, %v10980_v12 }
 0x5d5   :  { %v3431_v45 = vadd.f32 %v3430_v25, %v3368_v53  ;;  %v3299_v17 = vadd.f32 %v3298_v26, %v10930_v24  ;;  %v3372_v53 = vmul.f32 %v10999_v33, %v10999_v33 }
 0x5d7   :  { %v3432_v21 = vadd.f32 %v3431_v45, %v3369_v35  ;;  %v3300_v39 = vadd.f32 %v3299_v17, %v10950_v18  ;;  %v3373_v17 = vmul.f32 %v11026_v14, %v11026_v14 }
 0x5d9   :  { %v3433_v51 = vadd.f32 %v3432_v21, %v3370_v3  ;;  %v3301_v42 = vadd.f32 %v3300_v39, %v10980_v12  ;;  %v3374_v3 = vmul.f32 %v11042_v31, %v11042_v31 }
 0x5db   :  { %v11091_v54 = vpop.f32.mrf.mxu3  ;;  %v3434_v25 = vadd.f32 %v3433_v51, %v3371_v7  ;;  %v3302_v26 = vadd.f32 %v3301_v42, %v10999_v33  ;;  %v3375_v42 = vmul.f32 %v11058_v60, %v11058_v60 }
 0x5dd   :  { %v3435_v35 = vadd.f32 %v3434_v25, %v3372_v53  ;;  %v3303_v16 = vadd.f32 %v3302_v26, %v11026_v14  ;;  %v3376_v53 = vmul.f32 %v11067_v10, %v11067_v10 }
 0x5df   :  { %v3436_v21 = vadd.f32 %v3435_v35, %v3373_v17  ;;  %v3304_v39 = vadd.f32 %v3303_v16, %v11042_v31  ;;  %v3377_v16 = vmul.f32 %v11075_v62, %v11075_v62 }
 0x5e1   :  { %v3437_v7 = vadd.f32 %v3436_v21, %v3374_v3  ;;  %v3305_v34 = vadd.f32 %v3304_v39, %v11058_v60  ;;  %v3378_v3 = vmul.f32 %v11083_v15, %v11083_v15 }
 0x5e3   :  { %v11099_v22 = vpop.f32.mrf.mxu3  ;;  %v3438_v25 = vadd.f32 %v3437_v7, %v3375_v42  ;;  %v3306_v26 = vadd.f32 %v3305_v34, %v11067_v10  ;;  %v3379_v34 = vmul.f32 %v11091_v54, %v11091_v54 }
 0x5e5   :  { %v3439_v17 = vadd.f32 %v3438_v25, %v3376_v53  ;;  %v3307_v58 = vadd.f32 %v3306_v26, %v11075_v62  ;;  %v3380_v53 = vmul.f32 %v11099_v22, %v11099_v22 }
 0x5e7   :  { %v3440_v21 = vadd.f32 %v3439_v17, %v3377_v16  ;;  %v3308_v39 = vadd.f32 %v3307_v58, %v11083_v15 }
 0x5e9   :  { %v3441_v42 = vadd.f32 %v3440_v21, %v3378_v3  ;;  %v3309_v30 = vadd.f32 %v3308_v39, %v11091_v54 }
 0x5eb   :  { %v11107_v0 = vpop.f32.mrf.mxu3  ;;  %v3442_v25 = vadd.f32 %v3441_v42, %v3379_v34  ;;  %v3310_v26 = vadd.f32 %v3309_v30, %v11099_v22 }
 0x5ec   :  { %v3381_v58 = vmul.f32 %v11107_v0, %v11107_v0 }
 0x5ed   :  { %v3443_v16 = vadd.f32 %v3442_v25, %v3380_v53  ;;  %v3311_v50 = vadd.f32 %v3310_v26, %v11107_v0 }
 0x5ef   :  { %v3444_v21 = vadd.f32 %v3443_v16, %v3381_v58 }
 0x5f3   :  { %v11115_v45 = vpop.f32.mrf.mxu3 }
 0x5f4   :  { %v3382_v3 = vmul.f32 %v11115_v45, %v11115_v45  ;;  %v3312_v39 = vadd.f32 %v3311_v50, %v11115_v45 }
 0x5f6   :  { %v3445_v34 = vadd.f32 %v3444_v21, %v3382_v3 }
 0x5fb   :  { %v11123_v51 = vpop.f32.mrf.mxu3 }
 0x5fc   :  { %v3313_v32 = vadd.f32 %v3312_v39, %v11123_v51  ;;  %v3383_v30 = vmul.f32 %v11123_v51, %v11123_v51 }
 0x5fe   :  { %v3446_v25 = vadd.f32 %v3445_v34, %v3383_v30 }
 0x603   :  { %v11131_v35 = vpop.f32.mrf.mxu3 }
 0x604   :  { %v3314_v53 = vadd.f32 %v3313_v32, %v11131_v35  ;;  %v3384_v26 = vmul.f32 %v11131_v35, %v11131_v35 }
 0x606   :  { %v3447_v50 = vadd.f32 %v3446_v25, %v3384_v26 }
 0x60b   :  { %v11139_v7 = vpop.f32.mrf.mxu3 }
 0x60c   :  { %16713 = vst [vmem:[#allocation30_spill] sm:$0xff] %v11139_v7  ;;  %v3385_v16 = vmul.f32 %v11139_v7, %v11139_v7  ;;  %v3315_v57 = vadd.f32 %v3314_v53, %v11139_v7 }
 0x60e   :  { %v3448_v3 = vadd.f32 %v3447_v50, %v3385_v16 }
 0x613   :  { %v11147_v17 = vpop.f32.mrf.mxu3 }
 0x614   :  { %16714 = vst [vmem:[#allocation31_spill] sm:$0xff] %v11147_v17  ;;  %v3386_v21 = vmul.f32 %v11147_v17, %v11147_v17  ;;  %v3316_v39 = vadd.f32 %v3315_v57, %v11147_v17 }
 0x616   :  { %v3449_v34 = vadd.f32 %v3448_v3, %v3386_v21 }
 0x61b   :  { %v11155_v42 = vpop.f32.mrf.mxu3 }
 0x61c   :  { %16715 = vst [vmem:[#allocation32_spill] sm:$0xff] %v11155_v42  ;;  %v3387_v32 = vmul.f32 %v11155_v42, %v11155_v42  ;;  %v3317_v30 = vadd.f32 %v3316_v39, %v11155_v42 }
 0x61e   :  { %v3450_v19 = vadd.f32 %v3449_v34, %v3387_v32 }
 0x623   :  { %v11165_v58 = vpop.f32.mrf.mxu3 }
 0x624   :  { %16716 = vst [vmem:[#allocation33_spill] sm:$0xff] %v11165_v58  ;;  %v3388_v9 = vmul.f32 %v11165_v58, %v11165_v58  ;;  %v3318_v25 = vadd.f32 %v3317_v30, %v11165_v58 }
 0x626   :  { %v3451_v53 = vadd.f32 %v3450_v19, %v3388_v9  ;;  %v4646_v19 = vld [vmem:[#allocation3 + $0x78] sm:$0xff] }
 0x627   :  { %4775 = vmatpush.msra.mxu1 %v4646_v19  ;;  %7538 = vmatpush.msra.mxu2 %v4646_v19 }
 0x632   :  { %v11177_v26 = vpop.f32.mrf.mxu3 }
 0x633   :  { %v3319_v63 = vadd.f32 %v3318_v25, %v11177_v26  ;;  %v3389_v57 = vmul.f32 %v11177_v26, %v11177_v26 }
 0x635   :  { %v3320_v16 = vrot.slane %v3319_v63, 4  ;;  %v3452_v50 = vadd.f32 %v3451_v53, %v3389_v57  ;;  %v4678_v57 = vld [vmem:[#allocation3 + $0x178] sm:$0xff] }
 0x636   :  { %5193 = vmatpush.msrb.mxu3 %v4678_v57  ;;  %v4673_v57 = vld [vmem:[#allocation3 + $0x150] sm:$0xff] }
 0x637   :  { %v3321_v37 = vadd.f32 %v3320_v16, %v3319_v63  ;;  %v3453_v21 = vrot.slane %v3452_v50, 4  ;;  %v4645_v63 = vld [vmem:[#allocation3 + $0x70] sm:$0xff]  ;;  %v4676_v16 = vld [vmem:[#allocation3 + $0x168] sm:$0xff] }
 0x638   :  { %4776 = vmatpush.msra.mxu1 %v4645_v63  ;;  %7539 = vmatpush.msra.mxu2 %v4645_v63 }
 0x639   :  { %v3322_v3 = vrot.slane %v3321_v37, 2  ;;  %v3454_v39 = vadd.f32 %v3453_v21, %v3452_v50  ;;  %v4641_v50 = vld [vmem:[#allocation3 + $0x50] sm:$0xff]  ;;  %v4675_v21 = vld [vmem:[#allocation3 + $0x160] sm:$0xff] }
 0x63b   :  { %v3323_v1 = vadd.f32 %v3322_v3, %v3321_v37  ;;  %v3455_v42 = vrot.slane %v3454_v39, 2  ;;  %v4644_v37 = vld [vmem:[#allocation3 + $0x68] sm:$0xff] }
 0x63c   :  { %4777 = vmatpush.msra.mxu1 %v4644_v37  ;;  %7540 = vmatpush.msra.mxu2 %v4644_v37  ;;  %v4640_v3 = vld [vmem:[#allocation3 + $0x48] sm:$0xff] }
 0x63d   :  { %v3324_v17 = vrot.slane %v3323_v1, 1  ;;  %v3456_v32 = vadd.f32 %v3455_v42, %v3454_v39  ;;  %v4674_v39 = vld [vmem:[#allocation3 + $0x158] sm:$0xff]  ;;  %v4672_v37 = vld [vmem:[#allocation3 + $0x148] sm:$0xff] }
 0x63f   :  { %v3325_v34 = vadd.f32 %v3324_v17, %v3323_v1  ;;  %v3457_v30 = vrot.slane %v3456_v32, 1  ;;  %v4643_v1 = vld [vmem:[#allocation3 + $0x60] sm:$0xff]  ;;  %v4677_v17 = vld [vmem:[#allocation3 + $0x170] sm:$0xff] }
 0x640   :  { %4778 = vmatpush.msra.mxu1 %v4643_v1  ;;  %7541 = vmatpush.msra.mxu2 %v4643_v1  ;;  %v4638_v1 = vld [vmem:[#allocation3 + $0x38] sm:$0xff] }
 0x641   :  { %v3458_v58 = vadd.f32 %v3457_v30, %v3456_v32  ;;  %v11182_v7 = vmul.f32 0.001953125, %v3325_v34  ;;  %5194 = vmatpush.msrb.mxu3 %v4677_v17  ;;  %v4639_v34 = vld [vmem:[#allocation3 + $0x40] sm:$0xff] }
 0x643   :  { %v3460_v9 = vmul.f32 0.001953125, %v3458_v58  ;;  %v3461_v25 = vmul.f32 %v11182_v7, %v11182_v7  ;;  %v4642_v58 = vld [vmem:[#allocation3 + $0x58] sm:$0xff]  ;;  %5195 = vmatpush.msrb.mxu3 %v4676_v16  ;;  %v3526_v30 = vsub.f32 %v11177_v26, %v11182_v7  ;;  %v4637_v16 = vld [vmem:[#allocation3 + $0x30] sm:$0xff]  ;;  %v16747_v26 = vsub.f32 %v10880_v23, %v11182_v7 }
 0x644   :  { %4779 = vmatpush.msra.mxu1 %v4642_v58  ;;  %7542 = vmatpush.msra.mxu2 %v4642_v58  ;;  %v4636_v58 = vld [vmem:[#allocation3 + $0x28] sm:$0xff]  ;;  %v16749_v23 = vsub.f32 %v10930_v24, %v11182_v7  ;;  %v16750_v24 = vsub.f32 %v10999_v33, %v11182_v7 }
 0x645   :  { %v3462_v53 = vsub.f32 %v3460_v9, %v3461_v25  ;;  %5196 = vmatpush.msrb.mxu3 %v4675_v21  ;;  %v3471_v9 = vsub.f32 %v10711_v52, %v11182_v7  ;;  %v3472_v25 = vsub.f32 %v10736_v29, %v11182_v7  ;;  %v4694_v21 = vld [vmem:[#allocation3 + $0x1f8] sm:$0xff]  ;;  %v16719_v52 = vsub.f32 %v10758_v41, %v11182_v7 }
 0x646   :  { %4780 = vmatpush.msra.mxu1 %v4641_v50  ;;  %7543 = vmatpush.msra.mxu2 %v4641_v50  ;;  %v4671_v50 = vld [vmem:[#allocation3 + $0x140] sm:$0xff]  ;;  %v16720_v29 = vsub.f32 %v10771_v55, %v11182_v7  ;;  %v16722_v41 = vsub.f32 %v10797_v40, %v11182_v7  ;;  %v16723_v55 = vsub.f32 %v10811_v11, %v11182_v7 }
 0x647   :  { %v11186_v42 = vadd.f32 1e-05, %v3462_v53  ;;  %5197 = vmatpush.msrb.mxu3 %v4674_v39  ;;  %v4693_v39 = vld [vmem:[#allocation3 + $0x1f0] sm:$0xff]  ;;  %5402 = vmatpush.msrb.mxu0 %v4694_v21  ;;  %v4670_v21 = vld [vmem:[#allocation3 + $0x138] sm:$0xff]  ;;  %v16726_v11 = vsub.f32 %v10830_v56, %v11182_v7 }
 0x648   :  { %4781 = vmatpush.msra.mxu1 %v4640_v3  ;;  %7544 = vmatpush.msra.mxu2 %v4640_v3  ;;  %v3490_v3 = vsub.f32 %v10923_v27, %v11182_v7  ;;  %v3518_v27 = vsub.f32 %v11107_v0, %v11182_v7  ;;  %v3520_v0 = vsub.f32 %v11123_v51, %v11182_v7 }
 0x649   :  { %7607 = vrsqrt.f32 %v11186_v42  ;;  %5198 = vmatpush.msrb.mxu3 %v4673_v57  ;;  %5403 = vmatpush.msrb.mxu0 %v4693_v39  ;;  %vm3534_vm14 = vweird.f32 %v11186_v42  ;;  %v3505_v39 = vsub.f32 %v10910_v4, %v11182_v7 }
 0x64a   :  { %4782 = vmatpush.msra.mxu1 %v4639_v34  ;;  %7545 = vmatpush.msra.mxu2 %v4639_v34  ;;  %v3508_v34 = vsub.f32 %v10980_v12, %v11182_v7 }
 0x64b   :  { %5199 = vmatpush.msrb.mxu3 %v4672_v37 }
 0x64c   :  { %4783 = vmatpush.msra.mxu1 %v4638_v1  ;;  %7546 = vmatpush.msra.mxu2 %v4638_v1  ;;  %v3492_v1 = vsub.f32 %v10972_v20, %v11182_v7  ;;  %v16741_v20 = vsub.f32 %v11021_v43, %v11182_v7  ;;  %v16745_v43 = vld [vmem:[#allocation32_spill] sm:$0xff] }
 0x64d   :  { %5200 = vmatpush.msrb.mxu3 %v4671_v50  ;;  %v3507_v50 = vsub.f32 %v10950_v18, %v11182_v7  ;;  %v16751_v18 = vsub.f32 %v11026_v14, %v11182_v7  ;;  %v16753_v14 = vsub.f32 %v11067_v10, %v11182_v7 }
 0x64e   :  { %4784 = vmatpush.msra.mxu1 %v4637_v16  ;;  %7547 = vmatpush.msra.mxu2 %v4637_v16  ;;  %v4691_v16 = vld [vmem:[#allocation3 + $0x1e0] sm:$0xff] }
 0x64f   :  { %v11189_v32 = vpop.eup %7607  ;;  %5201 = vmatpush.msrb.mxu3 %v4670_v21 }
 0x650   :  { %v3529_v19 = vmul.f32 %v11189_v32, %v11186_v42  ;;  %vm3535_vm13 = vweird.f32 %v11189_v32  ;;  %4785 = vmatpush.msra.mxu1 %v4636_v58  ;;  %7548 = vmatpush.msra.mxu2 %v4636_v58 }
 0x651   :  { %vm3536_vm15 = vmor %vm3534_vm14, %vm3535_vm13 }
 0x652   :  { %v3530_v17 = vmul.f32 %v11189_v32, %v3529_v19  ;;  %v4692_v19 = vld [vmem:[#allocation3 + $0x1e8] sm:$0xff] }
 0x653   :  { %5404 = vmatpush.msrb.mxu0 %v4692_v19  ;;  %v3511_v19 = vsub.f32 %v11042_v31, %v11182_v7  ;;  %v16754_v31 = vsub.f32 %v11075_v62, %v11182_v7  ;;  %v16757_v62 = vsub.f32 %v11099_v22, %v11182_v7 }
 0x654   :  { %v3531_v53 = vmul.f32 0.5, %v3530_v17  ;;  %v4635_v17 = vld [vmem:[#allocation3 + $0x20] sm:$0xff] }
 0x655   :  { %4786 = vmatpush.msra.mxu1 %v4635_v17  ;;  %7549 = vmatpush.msra.mxu2 %v4635_v17  ;;  %v16725_v17 = vsub.f32 %v10826_v28, %v11182_v7  ;;  %v16728_v28 = vsub.f32 %v10846_v38, %v11182_v7 }
 0x656   :  { %v3532_v63 = vsub.f32 1.5, %v3531_v53  ;;  %v3493_v53 = vsub.f32 %v10993_v8, %v11182_v7  ;;  %5405 = vmatpush.msrb.mxu0 %v4691_v16  ;;  %v16721_v16 = vsub.f32 %v10783_v46, %v11182_v7  ;;  %v16724_v46 = vsub.f32 %v10819_v2, %v11182_v7 }
 0x657   :  { %v16727_v2 = vsub.f32 %v10838_v6, %v11182_v7 }
 0x658   :  { %v3533_v57 = vmul.f32 %v11189_v32, %v3532_v63  ;;  %v4669_v63 = vld [vmem:[#allocation3 + $0x130] sm:$0xff] }
 0x659   :  { %5202 = vmatpush.msrb.mxu3 %v4669_v63  ;;  %v4668_v63 = vld [vmem:[#allocation3 + $0x128] sm:$0xff] }
 0x65a   :  { %v11258_v37 = vsel %vm3536_vm15, %v11189_v32, %v3533_v57  ;;  %v4634_v57 = vld [vmem:[#allocation3 + $0x18] sm:$0xff]  ;;  %v16718_v32 = vsub.f32 %v10749_v36, %v11182_v7 }
 0x65b   :  { %v11268_v42 = vmul.f32 %v11258_v37, %v3526_v30  ;;  %v11292_v21 = vmul.f32 %v11258_v37, %v3471_v9  ;;  %v11298_v30 = vmul.f32 %v11258_v37, %v3472_v25  ;;  %v11310_v9 = vmul.f32 %v11258_v37, %v16719_v52  ;;  %4787 = vmatpush.msra.mxu1 %v4634_v57 }
 0x65c   :  { %v11304_v58 = vmul.f32 %v11258_v37, %v16718_v32  ;;  %v11316_v25 = vmul.f32 %v11258_v37, %v16720_v29  ;;  %v11322_v36 = vmul.f32 %v11258_v37, %v16721_v16  ;;  %v4690_v32 = vld [vmem:[#allocation3 + $0x1d8] sm:$0xff]  ;;  %v11328_v52 = vmul.f32 %v11258_v37, %v16722_v41  ;;  %7550 = vmatpush.msra.mxu2 %v4634_v57  ;;  %v4633_v41 = vld [vmem:[#allocation3 + $0x10] sm:$0xff] }
 0x65d   :  { %16717 = vst [vmem:[#allocation34_spill] sm:$0xff] %v11268_v42  ;;  %v11334_v29 = vmul.f32 %v11258_v37, %v16723_v55  ;;  %v11340_v16 = vmul.f32 %v11258_v37, %v16724_v46  ;;  %v11346_v40 = vmul.f32 %v11258_v37, %v16725_v17  ;;  %v11352_v55 = vmul.f32 %v11258_v37, %v16726_v11 }
 0x65e   :  { %v11358_v46 = vmul.f32 %v11258_v37, %v16727_v2  ;;  %v11364_v17 = vmul.f32 %v11258_v37, %v16728_v28  ;;  %v16729_v57 = vsub.f32 %v10854_v44, %v11182_v7  ;;  %5203 = vmatpush.msrb.mxu3 %v4668_v63  ;;  %v16730_v11 = vsub.f32 %v10862_v48, %v11182_v7 }
 0x65f   :  { %v16731_v2 = vsub.f32 %v10869_v49, %v11182_v7  ;;  %v16732_v28 = vsub.f32 %v10877_v13, %v11182_v7  ;;  %v16733_v63 = vsub.f32 %v10886_v5, %v11182_v7  ;;  %5406 = vmatpush.msrb.mxu0 %v4690_v32  ;;  %v16734_v49 = vsub.f32 %v10903_v61, %v11182_v7  ;;  %v4689_v32 = vld [vmem:[#allocation3 + $0x1d0] sm:$0xff] }
 0x660   :  { %v11370_v56 = vmul.f32 %v11258_v37, %v16729_v57  ;;  %v11376_v6 = vmul.f32 %v11258_v37, %v16730_v11  ;;  %v4667_v57 = vld [vmem:[#allocation3 + $0x120] sm:$0xff]  ;;  %v11406_v13 = vmul.f32 %v11258_v37, %v3490_v3  ;;  %v16737_v5 = vsub.f32 %v10944_v47, %v11182_v7  ;;  %4788 = vmatpush.msra.mxu1 %v4633_v41 }
 0x661   :  { %v11382_v38 = vmul.f32 %v11258_v37, %v16731_v2  ;;  %v11388_v44 = vmul.f32 %v11258_v37, %v16732_v28  ;;  %v11394_v48 = vmul.f32 %v11258_v37, %v16733_v63  ;;  %v11400_v11 = vmul.f32 %v11258_v37, %v16734_v49  ;;  %7551 = vmatpush.msra.mxu2 %v4633_v41  ;;  %v4632_v28 = vld [vmem:[#allocation3 + $0x8] sm:$0xff] }
 0x662   :  { %16736 = vst [vmem:[#allocation36_spill] sm:$0xff] %v11406_v13  ;;  %v11412_v2 = vmul.f32 %v11258_v37, %v16737_v5  ;;  %v11418_v61 = vmul.f32 %v11258_v37, %v3492_v1  ;;  %v3519_v3 = vsub.f32 %v11115_v45, %v11182_v7  ;;  %v11428_v47 = vmul.f32 %v11258_v37, %v3493_v53  ;;  %v16743_v63 = vld [vmem:[#allocation30_spill] sm:$0xff]  ;;  %v16744_v53 = vld [vmem:[#allocation31_spill] sm:$0xff] }
 0x663   :  { %16735 = vst [vmem:[#allocation35_spill] sm:$0xff] %v11400_v11  ;;  %v11434_v1 = vmul.f32 %v11258_v37, %v16741_v20  ;;  %v3521_v45 = vsub.f32 %v11131_v35, %v11182_v7  ;;  %v3522_v8 = vsub.f32 %v16743_v63, %v11182_v7  ;;  %v3523_v49 = vsub.f32 %v16744_v53, %v11182_v7  ;;  %v16746_v20 = vld [vmem:[#allocation33_spill] sm:$0xff] }
 0x664   :  { %16738 = vst [vmem:[#allocation37_spill] sm:$0xff] %v11412_v2  ;;  %5204 = vmatpush.msrb.mxu3 %v4667_v57  ;;  %v3524_v5 = vsub.f32 %v16745_v43, %v11182_v7  ;;  %v3525_v41 = vsub.f32 %v16746_v20, %v11182_v7  ;;  %v11452_v51 = vmul.f32 %v11258_v37, %v16747_v26  ;;  %v4666_v57 = vld [vmem:[#allocation3 + $0x118] sm:$0xff]  ;;  %v4631_v43 = vld [vmem:[#allocation3] sm:$0xff] }
 0x665   :  { %16739 = vst [vmem:[#allocation38_spill] sm:$0xff] %v11418_v61  ;;  %v16748_v35 = vsub.f32 %v10888_v59, %v11182_v7  ;;  %5407 = vmatpush.msrb.mxu0 %v4689_v32  ;;  %v11464_v53 = vmul.f32 %v11258_v37, %v3505_v39  ;;  %v11470_v26 = vmul.f32 %v11258_v37, %v16749_v23  ;;  %v4688_v39 = vld [vmem:[#allocation3 + $0x1c8] sm:$0xff]  ;;  %v4665_v23 = vld [vmem:[#allocation3 + $0x110] sm:$0xff] }
 0x666   :  { %16740 = vst [vmem:[#allocation39_spill] sm:$0xff] %v11428_v47  ;;  %v11476_v59 = vmul.f32 %v11258_v37, %v3507_v50  ;;  %v11482_v4 = vmul.f32 %v11258_v37, %v3508_v34  ;;  %4789 = vmatpush.msra.mxu1 %v4632_v28  ;;  %v11488_v32 = vmul.f32 %v11258_v37, %v16750_v24 }
 0x667   :  { %16742 = vst [vmem:[#allocation40_spill] sm:$0xff] %v11434_v1  ;;  %v11458_v63 = vmul.f32 %v11258_v37, %v16748_v35  ;;  %v11494_v50 = vmul.f32 %v11258_v37, %v16751_v18  ;;  %v11500_v12 = vmul.f32 %v11258_v37, %v3511_v19  ;;  %v16752_v34 = vsub.f32 %v11058_v60, %v11182_v7 }
 0x668   :  { %7552 = vmatpush.msra.mxu2 %v4632_v28  ;;  %v11512_v20 = vmul.f32 %v11258_v37, %v16753_v14  ;;  %v11518_v19 = vmul.f32 %v11258_v37, %v16754_v31  ;;  %v16755_v60 = vsub.f32 %v11083_v15, %v11182_v7  ;;  %v16756_v28 = vsub.f32 %v11091_v54, %v11182_v7  ;;  %v4687_v54 = vld [vmem:[#allocation3 + $0x1c0] sm:$0xff]  ;;  %v4686_v31 = vld [vmem:[#allocation3 + $0x1b8] sm:$0xff] }
 0x669   :  { %v11506_v33 = vmul.f32 %v11258_v37, %v16752_v34  ;;  %5205 = vmatpush.msrb.mxu3 %v4666_v57  ;;  %v11536_v24 = vmul.f32 %v11258_v37, %v16757_v62  ;;  %v11539_v18 = vmul.f32 %v11258_v37, %v3518_v27  ;;  %v11542_v15 = vmul.f32 %v11258_v37, %v3519_v3  ;;  %v4661_v62 = vld [vmem:[#allocation3 + $0xf0] sm:$0xff] }
 0x66a   :  { %v11524_v35 = vmul.f32 %v11258_v37, %v16755_v60  ;;  %v11530_v10 = vmul.f32 %v11258_v37, %v16756_v28  ;;  %v11545_v34 = vmul.f32 %v11258_v37, %v3520_v0  ;;  %5408 = vmatpush.msrb.mxu0 %v4688_v39  ;;  %v11553_v22 = vmul.f32 %v11258_v37, %v3521_v45  ;;  %v4664_v0 = vld [vmem:[#allocation3 + $0x108] sm:$0xff]  ;;  %v16765_v45 = vld [vmem:[#allocation9_spill] sm:$0xff]  ;;  %v4682_v28 = vld [vmem:[#allocation3 + $0x198] sm:$0xff] }
 0x66b   :  { %v11556_v14 = vmul.f32 %v11258_v37, %v3522_v8  ;;  %v11559_v27 = vmul.f32 %v11258_v37, %v3523_v49  ;;  %v11562_v3 = vmul.f32 %v11258_v37, %v3524_v5  ;;  %4790 = vmatpush.msra.mxu1 %v4631_v43  ;;  %v11565_v39 = vmul.f32 %v11258_v37, %v3525_v41  ;;  %v4663_v8 = vld [vmem:[#allocation3 + $0x100] sm:$0xff]  ;;  %v4685_v49 = vld [vmem:[#allocation3 + $0x1b0] sm:$0xff]  ;;  %v4662_v5 = vld [vmem:[#allocation3 + $0xf8] sm:$0xff] }
 0x66c   :  { %16760 = vst [vmem:[#allocation30_spill] sm:$0xff] %v11553_v22  ;;  %7553 = vmatpush.msra.mxu2 %v4631_v43  ;;  %5206 = vmatpush.msrb.mxu3 %v4665_v23  ;;  %v4684_v41 = vld [vmem:[#allocation3 + $0x1a8] sm:$0xff]  ;;  %v16766_v43 = vld [vmem:[#allocation12_spill] sm:$0xff]  ;;  %v4683_v60 = vld [vmem:[#allocation3 + $0x1a0] sm:$0xff] }
 0x66d   :  { %16761 = vst [vmem:[#allocation31_spill] sm:$0xff] %v11556_v14  ;;  %5409 = vmatpush.msrb.mxu0 %v4687_v54  ;;  %7342 = vmatmul.msk.f32.vlgmr.msra.gmra.mxu1 %vm11548_vm3, %v16765_v45  ;;  %v4681_v23 = vld [vmem:[#allocation3 + $0x190] sm:$0xff]  ;;  %v4710_v54 = vld [vmem:[#allocation3 + $0x278] sm:$0xff] }
 0x66e   :  { %16762 = vst [vmem:[#allocation32_spill] sm:$0xff] %v11559_v27  ;;  %7374 = vmatmul.msk.f32.vlgmr.msra.gmra.mxu2 %vm11548_vm3, %v16765_v45  ;;  %5207 = vmatpush.msrb.mxu3 %v4664_v0  ;;  %v4680_v0 = vld [vmem:[#allocation3 + $0x188] sm:$0xff] }
 0x66f   :  { %16763 = vst [vmem:[#allocation33_spill] sm:$0xff] %v11562_v3  ;;  %5410 = vmatpush.msrb.mxu0 %v4686_v31  ;;  %4984 = vmatpush.msrb.mxu2 %v4662_v5  ;;  %v16767_v31 = vld [vmem:[#allocation13_spill] sm:$0xff] }
 0x670   :  { %16764 = vst [vmem:[#allocation41_spill] sm:$0xff] %v11565_v39  ;;  %5208 = vmatpush.msrb.mxu3 %v4663_v8  ;;  %5611 = vmatpush.msrb.mxu1 %v4710_v54  ;;  %v4679_v8 = vld [vmem:[#allocation3 + $0x180] sm:$0xff]  ;;  %v16771_v54 = vld [vmem:[#allocation28_spill] sm:$0xff] }
 0x671   :  { %5411 = vmatpush.msrb.mxu0 %v4685_v49  ;;  %5209 = vmatmul.f32.vlgmr.msrb.gmra.mxu3 %v16766_v43  ;;  %v16768_v49 = vld [vmem:[#allocation21_spill] sm:$0xff] }
 0x672   :  { %4985 = vmatpush.msrb.mxu2 %v4661_v62  ;;  %v3464_v5 = vsub.f32 %v16768_v49, %v11182_v7  ;;  %v16772_v49 = vld [vmem:[#allocation29_spill] sm:$0xff] }
 0x673   :  { %5412 = vmatpush.msrb.mxu0 %v4684_v41  ;;  %v4660_v41 = vld [vmem:[#allocation3 + $0xe8] sm:$0xff]  ;;  %v3496_v42 = vsub.f32 %v16772_v49, %v11182_v7 }
 0x674   :  { %4986 = vmatpush.msrb.mxu2 %v4660_v41 }
 0x675   :  { %5413 = vmatpush.msrb.mxu0 %v4683_v60  ;;  %4794 = vmatmul.f32.gmra.mxu1 %v16765_v45  ;;  %v3539_v60 = vmul.f32 %v11258_v37, %v3464_v5  ;;  %v3571_v39 = vmul.f32 %v11258_v37, %v3496_v42 }
 0x676   :  { %4890 = vmatmul.f32.gmra.mxu2 %v16765_v45  ;;  %v4709_v45 = vld [vmem:[#allocation3 + $0x270] sm:$0xff] }
 0x677   :  { %5414 = vmatpush.msrb.mxu0 %v4682_v28  ;;  %v11583_v28 = vstv %s16168_s3  ;;  %5612 = vmatpush.msrb.mxu1 %v4709_v45  ;;  %vm3603_vm4 = vcmp.ge.f32.partialorder %v3539_v60, 0.0  ;;  %v16773_v45 = vld [vmem:[#allocation22_spill] sm:$0xff]  ;;  %vm3635_vm7 = vcmp.ge.f32.partialorder %v3571_v39, 0.0  ;;  %s7675_s3 = smov [#allocation6]  }
 0x678   :  { %16769 = vst [vmem:[#allocation21_spill] sm:$0xff] %v11583_v28  ;;  %v3465_v43 = vsub.f32 %v16773_v45, %v11182_v7  ;;  %v3700_v47 = vmul.f32 %v11583_v28, %v3571_v39  ;;  %s7261_s30 = sshll.u32 %s7675_s3, 4  ;;  %s7262_s30 = int_to_ptr.vmem [resolvable:$true] %s7261_s30 }
 0x679   :  { %5415 = vmatpush.msrb.mxu0 %v4681_v23  ;;  %5212 = vmatmul.f32.gmra.mxu3 %v16767_v31  ;;  %v16770_v23 = vld [vmem:[#allocation20_spill] sm:$0xff] }
 0x67a   :  { %v3463_v62 = vsub.f32 %v16770_v23, %v11182_v7  ;;  %v16774_v23 = vld [vmem:[#allocation23_spill] sm:$0xff] }
 0x67b   :  { %5416 = vmatpush.msrb.mxu0 %v4680_v0  ;;  %v3495_v0 = vsub.f32 %v16771_v54, %v11182_v7  ;;  %v3466_v54 = vsub.f32 %v16774_v23, %v11182_v7  ;;  %v16776_v23 = vld [vmem:[#allocation18_spill] sm:$0xff] }
 0x67c   :  { %v3538_v5 = vmul.f32 %v11258_v37, %v3463_v62  ;;  %v3540_v62 = vmul.f32 %v11258_v37, %v3465_v43  ;;  %v3497_v27 = vsub.f32 %v16776_v23, %v11182_v7 }
 0x67d   :  { %5417 = vmatpush.msrb.mxu0 %v4679_v8  ;;  %v3668_v8 = vmul.f32 %v11583_v28, %v3539_v60  ;;  %v3570_v41 = vmul.f32 %v11258_v37, %v3495_v0  ;;  %v3541_v42 = vmul.f32 %v11258_v37, %v3466_v54 }
 0x67e   :  { %vm3602_vm5 = vcmp.ge.f32.partialorder %v3538_v5, 0.0  ;;  %v3667_v1 = vmul.f32 %v11583_v28, %v3538_v5  ;;  %vm3604_vm8 = vcmp.ge.f32.partialorder %v3540_v62, 0.0 }
 0x67f   :  { %v3732_v31 = vsel %vm3603_vm4, %v3539_v60, %v3668_v8  ;;  %vm3634_vm6 = vcmp.ge.f32.partialorder %v3570_v41, 0.0  ;;  %v3699_v49 = vmul.f32 %v11583_v28, %v3570_v41  ;;  %v3670_v54 = vmul.f32 %v11583_v28, %v3541_v42 }
 0x680   :  { %v3860_v0 = vrot.slane %v3732_v31, 7  ;;  %v3731_v60 = vsel %vm3602_vm5, %v3538_v5, %v3667_v1  ;;  %v11619_v31 = vsel %vm3635_vm7, %v3571_v39, %v3700_v47  ;;  %v4659_v5 = vld [vmem:[#allocation3 + $0xe0] sm:$0xff]  ;;  %vm3605_vm9 = vcmp.ge.f32.partialorder %v3541_v42, 0.0 }
 0x681   :  { %v3763_v8 = vsel %vm3634_vm6, %v3570_v41, %v3699_v49  ;;  %v3859_v45 = vrot.slane %v3731_v60, 7  ;;  %16777 = vst [vmem:[#allocation28_spill] sm:$0xff] %v11619_v31  ;;  %v3669_v41 = vmul.f32 %v11583_v28, %v3540_v62  ;;  %4987 = vmatpush.msrb.mxu2 %v4659_v5  ;;  %v3572_v47 = vmul.f32 %v11258_v37, %v3497_v27  ;;  %v16779_v5 = vld [vmem:[#allocation19_spill] sm:$0xff] }
 0x682   :  { %v11604_v3 = vrot.slane %v3763_v8, 7  ;;  %v4708_v8 = vld [vmem:[#allocation3 + $0x268] sm:$0xff]  ;;  %v16253_v23 = vrot.slane %v11619_v31, 7  ;;  %v3734_v61 = vsel %vm3605_vm9, %v3541_v42, %v3670_v54  ;;  %v3498_v14 = vsub.f32 %v16779_v5, %v11182_v7  ;;  %v16782_v42 = vld [vmem:[#allocation24_spill] sm:$0xff]  ;;  %v16783_v54 = vld [vmem:[#allocation25_spill] sm:$0xff] }
 0x683   :  { %7344 = vmatmul.msk.f32.gmra.mxu1 %vm11548_vm3, %v3859_v45  ;;  %v11614_v43 = vsel %vm165_vm0, %v3859_v45, %v3860_v0  ;;  %v11617_v1 = vsel %vm165_vm0, 0.0, %v3859_v45  ;;  %7406 = vmatmul.msk.f32.vlgmr.msrb.gmra.mxu0 %vm11548_vm3, %v3859_v45  ;;  %v11634_v45 = vsel %vm165_vm0, %v3860_v0, 0.0  ;;  %v3733_v2 = vsel %vm3604_vm8, %v3540_v62, %v3669_v41 }
 0x684   :  { %16775 = vst [vmem:[#allocation20_spill] sm:$0xff] %v11604_v3  ;;  %7376 = vmatmul.msk.f32.gmra.mxu2 %vm11548_vm3, %v11604_v3  ;;  %v4387_v49 = vrot.slane %v11617_v1, 2  ;;  %v4388_v60 = vrot.slane %v11614_v43, 2  ;;  %5613 = vmatpush.msrb.mxu1 %v4708_v8  ;;  %v3701_v22 = vmul.f32 %v11583_v28, %v3572_v47  ;;  %v11643_v27 = vsel %vm165_vm0, %v11604_v3, %v16253_v23 }
 0x685   :  { %16780 = vst [vmem:[#allocation22_spill] sm:$0xff] %v11643_v27  ;;  %v3573_v8 = vmul.f32 %v11258_v37, %v3498_v14  ;;  %vm3636_vm10 = vcmp.ge.f32.partialorder %v3572_v47, 0.0  ;;  %v3863_v0 = vrot.slane %v3734_v61, 7  ;;  %v11649_v62 = vrot.slane %v3733_v2, 7 }
 0x686   :  { %v11629_v39 = vsel %vm644_vm2, %v4387_v49, %v4388_v60  ;;  %v4390_v49 = vrot.slane %v11634_v45, 2  ;;  %v3467_v41 = vsub.f32 %v16782_v42, %v11182_v7  ;;  %v3468_v5 = vsub.f32 %v16783_v54, %v11182_v7 }
 0x687   :  { %16778 = vst [vmem:[#allocation29_spill] sm:$0xff] %v11629_v39  ;;  %5215 = vmatmul.f32.gmra.mxu3 %v11629_v39  ;;  %v3765_v14 = vsel %vm3636_vm10, %v3572_v47, %v3701_v22  ;;  %v3702_v61 = vmul.f32 %v11583_v28, %v3573_v8  ;;  %v11663_v2 = vsel %vm165_vm0, %v11649_v62, %v3863_v0  ;;  %v11667_v39 = vsel %vm165_vm0, 0.0, %v11649_v62 }
 0x688   :  { %16781 = vst [vmem:[#allocation23_spill] sm:$0xff] %v11649_v62  ;;  %v11657_v23 = vsel %vm644_vm2, %v4388_v60, %v4390_v49  ;;  %v3542_v42 = vmul.f32 %v11258_v37, %v3467_v41  ;;  %v3543_v54 = vmul.f32 %v11258_v37, %v3468_v5  ;;  %vm3637_vm11 = vcmp.ge.f32.partialorder %v3573_v8, 0.0  ;;  %v4658_v41 = vld [vmem:[#allocation3 + $0xd8] sm:$0xff]  ;;  %v16789_v5 = vld [vmem:[#allocation14_spill] sm:$0xff] }
 0x689   :  { %16784 = vst [vmem:[#allocation18_spill] sm:$0xff] %v11657_v23  ;;  %v11671_v60 = vrot.slane %v3765_v14, 7  ;;  %v4392_v22 = vrot.slane %v11667_v39, 2  ;;  %v4393_v47 = vrot.slane %v11663_v2, 2  ;;  %v11681_v49 = vsel %vm3637_vm11, %v3573_v8, %v3702_v61  ;;  %4988 = vmatpush.msrb.mxu2 %v4658_v41  ;;  %v16792_v41 = vld [vmem:[#allocation15_spill] sm:$0xff] }
 0x68a   :  { %16785 = vst [vmem:[#allocation19_spill] sm:$0xff] %v11663_v2  ;;  %v3671_v14 = vmul.f32 %v11583_v28, %v3542_v42  ;;  %v3672_v31 = vmul.f32 %v11583_v28, %v3543_v54  ;;  %vm3606_vm12 = vcmp.ge.f32.partialorder %v3542_v42, 0.0  ;;  %vm3607_vm13 = vcmp.ge.f32.partialorder %v3543_v54, 0.0 }
 0x68b   :  { %4800 = vmatmul.f32.gmra.mxu1 %v11614_v43  ;;  %5421 = vmatmul.f32.gmra.mxu0 %v11614_v43  ;;  %16786 = vst [vmem:[#allocation24_spill] sm:$0xff] %v11667_v39  ;;  %v11692_v61 = vsel %vm644_vm2, %v4392_v22, %v4393_v47  ;;  %v11697_v3 = vsel %vm165_vm0, %v3863_v0, 0.0  ;;  %vm3610_vm8 = vcmp.ge.f32.partialorder %v11292_v21, 0.0  ;;  %vm3611_vm9 = vcmp.ge.f32.partialorder %v11298_v30, 0.0 }
 0x68c   :  { %4896 = vmatmul.f32.gmra.mxu2 %v11643_v27  ;;  %16787 = vst [vmem:[#allocation25_spill] sm:$0xff] %v11671_v60  ;;  %v4707_v27 = vld [vmem:[#allocation3 + $0x260] sm:$0xff]  ;;  %v3736_v39 = vsel %vm3607_vm13, %v3543_v54, %v3672_v31  ;;  %v3735_v13 = vsel %vm3606_vm12, %v3542_v42, %v3671_v14  ;;  %v16796_v14 = vld [vmem:[#allocation16_spill] sm:$0xff]  ;;  %vm3642_vm10 = vcmp.ge.f32.partialorder %v11452_v51, 0.0  ;;  %vm3643_vm11 = vcmp.ge.f32.partialorder %v11458_v63, 0.0 }
 0x68d   :  { %16788 = vst [vmem:[#allocation42_spill] sm:$0xff] %v11681_v49  ;;  %5614 = vmatpush.msrb.mxu1 %v4707_v27  ;;  %v4395_v27 = vrot.slane %v11697_v3, 2  ;;  %v3866_v0 = vrot.slane %v3736_v39, 7  ;;  %v11712_v31 = vrot.slane %v3735_v13, 7  ;;  %v16795_v42 = vld [vmem:[#allocation17_spill] sm:$0xff]  ;;  %vm3612_vm12 = vcmp.ge.f32.partialorder %v11304_v58, 0.0 }
 0x68e   :  { %16790 = vst [vmem:[#allocation14_spill] sm:$0xff] %v11692_v61  ;;  %v3469_v54 = vsub.f32 %v16795_v42, %v11182_v7  ;;  %vm3613_vm13 = vcmp.ge.f32.partialorder %v11310_v9, 0.0 }
 0x68f   :  { %5218 = vmatmul.f32.gmra.mxu3 %v11657_v23  ;;  %v3499_v23 = vsub.f32 %v16789_v5, %v11182_v7  ;;  %v16265_v5 = vrot.slane %v11681_v49, 7  ;;  %16791 = vst [vmem:[#allocation43_spill] sm:$0xff] %v11697_v3  ;;  %v11726_v13 = vsel %vm165_vm0, %v11712_v31, %v3866_v0 }
 0x690   :  { %16794 = vst [vmem:[#allocation44_spill] sm:$0xff] %v11712_v31  ;;  %v3544_v42 = vmul.f32 %v11258_v37, %v3469_v54  ;;  %v4657_v54 = vld [vmem:[#allocation3 + $0xd0] sm:$0xff] }
 0x691   :  { %v3574_v8 = vmul.f32 %v11258_v37, %v3499_v23  ;;  %v11706_v23 = vsel %vm165_vm0, %v11671_v60, %v16265_v5  ;;  %v11720_v5 = vsel %vm644_vm2, %v4393_v47, %v4395_v27  ;;  %16798 = vst [vmem:[#allocation16_spill] sm:$0xff] %v11726_v13  ;;  %4989 = vmatpush.msrb.mxu2 %v4657_v54  ;;  %v16803_v54 = vld [vmem:[#allocation27_spill] sm:$0xff] }
 0x692   :  { %16793 = vst [vmem:[#allocation15_spill] sm:$0xff] %v11706_v23  ;;  %vm3608_vm4 = vcmp.ge.f32.partialorder %v3544_v42, 0.0 }
 0x693   :  { %7346 = vmatmul.msk.f32.gmra.mxu1 %vm11548_vm3, %v11649_v62  ;;  %7408 = vmatmul.msk.f32.gmra.mxu0 %vm11548_vm3, %v11649_v62  ;;  %v3500_v62 = vsub.f32 %v16792_v41, %v11182_v7  ;;  %v3703_v11 = vmul.f32 %v11583_v28, %v3574_v8  ;;  %vm3638_vm14 = vcmp.ge.f32.partialorder %v3574_v8, 0.0  ;;  %v3470_v41 = vsub.f32 %v16796_v14, %v11182_v7 }
 0x694   :  { %7378 = vmatmul.msk.f32.gmra.mxu2 %vm11548_vm3, %v11671_v60  ;;  %16797 = vst [vmem:[#allocation17_spill] sm:$0xff] %v11720_v5  ;;  %v11760_v60 = vsel %vm165_vm0, %v3866_v0, 0.0 }
 0x695   :  { %v3575_v22 = vmul.f32 %v11258_v37, %v3500_v62  ;;  %v3767_v62 = vsel %vm3638_vm14, %v3574_v8, %v3703_v11  ;;  %v3545_v14 = vmul.f32 %v11258_v37, %v3470_v41  ;;  %v4398_v8 = vrot.slane %v11726_v13, 2  ;;  %v16801_v41 = vld [vmem:[#allocation26_spill] sm:$0xff] }
 0x696   :  { %v11734_v47 = vrot.slane %v3767_v62, 7  ;;  %v3673_v62 = vmul.f32 %v11583_v28, %v3544_v42  ;;  %vm3644_vm14 = vcmp.ge.f32.partialorder %v11464_v53, 0.0 }
 0x697   :  { %5221 = vmatmul.f32.gmra.mxu3 %v11692_v61  ;;  %v3704_v39 = vmul.f32 %v11583_v28, %v3575_v22  ;;  %v11730_v61 = vsel %vm165_vm0, 0.0, %v11712_v31  ;;  %vm3639_vm15 = vcmp.ge.f32.partialorder %v3575_v22, 0.0  ;;  %v3674_v49 = vmul.f32 %v11583_v28, %v3545_v14 }
 0x698   :  { %16799 = vst [vmem:[#allocation45_spill] sm:$0xff] %v11730_v61  ;;  %v4397_v11 = vrot.slane %v11730_v61, 2  ;;  %vm3609_vm5 = vcmp.ge.f32.partialorder %v3545_v14, 0.0  ;;  %v3737_v3 = vsel %vm3608_vm4, %v3544_v42, %v3673_v62  ;;  %v4656_v62 = vld [vmem:[#allocation3 + $0xc8] sm:$0xff]  ;;  %vm3614_vm4 = vcmp.ge.f32.partialorder %v11316_v25, 0.0 }
 0x699   :  { %16800 = vst [vmem:[#allocation46_spill] sm:$0xff] %v11734_v47  ;;  %v11744_v27 = vsel %vm3639_vm15, %v3575_v22, %v3704_v39  ;;  %v3738_v61 = vsel %vm3609_vm5, %v3545_v14, %v3674_v49  ;;  %v11775_v49 = vrot.slane %v3737_v3, 7  ;;  %4990 = vmatpush.msrb.mxu2 %v4656_v62  ;;  %v4176_v62 = vrot.slane %v11614_v43, 1 }
 0x69a   :  { %v11755_v39 = vsel %vm644_vm2, %v4397_v11, %v4398_v8  ;;  %v3869_v0 = vrot.slane %v3738_v61, 7  ;;  %vm3645_vm15 = vcmp.ge.f32.partialorder %v11470_v26, 0.0  ;;  %vm3615_vm5 = vcmp.ge.f32.partialorder %v11322_v36, 0.0 }
 0x69b   :  { %4806 = vmatmul.f32.gmra.mxu1 %v11663_v2  ;;  %5427 = vmatmul.f32.gmra.mxu0 %v11663_v2  ;;  %16802 = vst [vmem:[#allocation26_spill] sm:$0xff] %v11755_v39  ;;  %v11789_v61 = vsel %vm165_vm0, 0.0, %v11775_v49 }
 0x69c   :  { %4902 = vmatmul.f32.gmra.mxu2 %v11706_v23  ;;  %v4706_v23 = vld [vmem:[#allocation3 + $0x258] sm:$0xff]  ;;  %16804 = vst [vmem:[#allocation27_spill] sm:$0xff] %v11775_v49 }
 0x69d   :  { %5615 = vmatpush.msrb.mxu1 %v4706_v23  ;;  %v4400_v23 = vrot.slane %v11760_v60, 2 }
 0x69f   :  { %5224 = vmatmul.f32.gmra.mxu3 %v11720_v5  ;;  %v3501_v5 = vsub.f32 %v16801_v41, %v11182_v7  ;;  %v16280_v41 = vrot.slane %v11744_v27, 7 }
 0x6a1   :  { %v3576_v22 = vmul.f32 %v11258_v37, %v3501_v5  ;;  %v11769_v5 = vsel %vm165_vm0, %v11734_v47, %v16280_v41  ;;  %v4175_v41 = vrot.slane %v11617_v1, 1 }
 0x6a3   :  { %7348 = vmatmul.msk.f32.gmra.mxu1 %vm11548_vm3, %v11712_v31  ;;  %7410 = vmatmul.msk.f32.gmra.mxu0 %vm11548_vm3, %v11712_v31  ;;  %v3502_v31 = vsub.f32 %v16803_v54, %v11182_v7  ;;  %v3705_v2 = vmul.f32 %v11583_v28, %v3576_v22  ;;  %vm3640_vm6 = vcmp.ge.f32.partialorder %v3576_v22, 0.0  ;;  %v11779_v7 = vsel %vm644_vm2, %v4398_v8, %v4400_v23  ;;  %v4705_v23 = vld [vmem:[#allocation3 + $0x250] sm:$0xff] }
 0x6a4   :  { %7380 = vmatmul.msk.f32.gmra.mxu2 %vm11548_vm3, %v11734_v47  ;;  %16805 = vst [vmem:[#allocation47_spill] sm:$0xff] %v11779_v7  ;;  %v3676_v54 = vmul.f32 %v11583_v28, %v11298_v30  ;;  %5616 = vmatpush.msrb.mxu1 %v4705_v23  ;;  %v11825_v23 = vsel %vm488_vm1, %v4175_v41, %v4176_v62 }
 0x6a5   :  { %v3577_v11 = vmul.f32 %v11258_v37, %v3502_v31  ;;  %v3769_v42 = vsel %vm3640_vm6, %v3576_v22, %v3705_v2  ;;  %v11785_v37 = vsel %vm165_vm0, %v11775_v49, %v3869_v0  ;;  %v4402_v31 = vrot.slane %v11789_v61, 2 }
 0x6a6   :  { %v11791_v3 = vrot.slane %v3769_v42, 7  ;;  %v4403_v8 = vrot.slane %v11785_v37, 2  ;;  %v3675_v22 = vmul.f32 %v11583_v28, %v11292_v21  ;;  %v3707_v42 = vmul.f32 %v11583_v28, %v11452_v51 }
 0x6a7   :  { %5227 = vmatmul.f32.gmra.mxu3 %v11755_v39  ;;  %v3706_v14 = vmul.f32 %v11583_v28, %v3577_v11  ;;  %vm3641_vm7 = vcmp.ge.f32.partialorder %v3577_v11, 0.0  ;;  %vm3646_vm6 = vcmp.ge.f32.partialorder %v11476_v59, 0.0 }
 0x6a8   :  { %16806 = vst [vmem:[#allocation48_spill] sm:$0xff] %v11791_v3  ;;  %v3739_v39 = vsel %vm3610_vm8, %v11292_v21, %v3675_v22  ;;  %v3771_v41 = vsel %vm3642_vm10, %v11452_v51, %v3707_v42  ;;  %v3708_v22 = vmul.f32 %v11583_v28, %v11458_v63  ;;  %v4655_v42 = vld [vmem:[#allocation3 + $0xc0] sm:$0xff]  ;;  %vm3616_vm8 = vcmp.ge.f32.partialorder %v11328_v52, 0.0 }
 0x6a9   :  { %v11801_v2 = vsel %vm3641_vm7, %v3577_v11, %v3706_v14  ;;  %v11813_v11 = vsel %vm644_vm2, %v4402_v31, %v4403_v8  ;;  %v11818_v14 = vsel %vm165_vm0, %v3869_v0, 0.0  ;;  %v4178_v31 = vrot.slane %v11634_v45, 1  ;;  %4991 = vmatpush.msrb.mxu2 %v4655_v42 }
 0x6aa   :  { %16807 = vst [vmem:[#allocation49_spill] sm:$0xff] %v11813_v11  ;;  %v4405_v43 = vrot.slane %v11818_v14, 2  ;;  %v11840_v21 = vrot.slane %v3739_v39, 7  ;;  %vm3647_vm7 = vcmp.ge.f32.partialorder %v11482_v4, 0.0  ;;  %vm3648_vm10 = vcmp.ge.f32.partialorder %v11488_v32, 0.0 }
 0x6ab   :  { %4812 = vmatmul.f32.gmra.mxu1 %v11726_v13  ;;  %5433 = vmatmul.f32.gmra.mxu0 %v11726_v13  ;;  %v11843_v1 = vsel %vm488_vm1, %v4176_v62, %v4178_v31  ;;  %v3677_v62 = vmul.f32 %v11583_v28, %v11304_v58  ;;  %v3678_v31 = vmul.f32 %v11583_v28, %v11310_v9 }
 0x6ac   :  { %4908 = vmatmul.f32.gmra.mxu2 %v11769_v5  ;;  %16809 = vst [vmem:[#allocation50_spill] sm:$0xff] %v11840_v21  ;;  %v11847_v45 = vsel %vm644_vm2, %v4403_v8, %v4405_v43  ;;  %v11859_v39 = vsel %vm165_vm0, 0.0, %v11840_v21  ;;  %v4704_v43 = vld [vmem:[#allocation3 + $0x248] sm:$0xff] }
 0x6ad   :  { %16810 = vst [vmem:[#allocation51_spill] sm:$0xff] %v11847_v45  ;;  %v4407_v8 = vrot.slane %v11859_v39, 2  ;;  %5617 = vmatpush.msrb.mxu1 %v4704_v43  ;;  %v3741_v42 = vsel %vm3612_vm12, %v11304_v58, %v3677_v62  ;;  %v3710_v62 = vmul.f32 %v11583_v28, %v11470_v26  ;;  %vm3618_vm12 = vcmp.ge.f32.partialorder %v11340_v16, 0.0 }
 0x6af   :  { %5230 = vmatmul.f32.gmra.mxu3 %v11779_v7  ;;  %v3740_v7 = vsel %vm3611_vm9, %v11298_v30, %v3676_v54  ;;  %v11862_v54 = vrot.slane %v3771_v41, 7  ;;  %vm3617_vm9 = vcmp.ge.f32.partialorder %v11334_v29, 0.0 }
 0x6b0   :  { %v3872_v30 = vrot.slane %v3740_v7, 7 }
 0x6b1   :  { %16812 = vst [vmem:[#allocation53_spill] sm:$0xff] %v11862_v54 }
 0x6b2   :  { %v11855_v7 = vsel %vm165_vm0, %v11840_v21, %v3872_v30 }
 0x6b3   :  { %7350 = vmatmul.msk.f32.gmra.mxu1 %vm11548_vm3, %v11775_v49  ;;  %7412 = vmatmul.msk.f32.gmra.mxu0 %vm11548_vm3, %v11775_v49  ;;  %16811 = vst [vmem:[#allocation52_spill] sm:$0xff] %v11855_v7  ;;  %v4408_v51 = vrot.slane %v11855_v7, 2 }
 0x6b4   :  { %7382 = vmatmul.msk.f32.gmra.mxu2 %vm11548_vm3, %v11791_v3 }
 0x6b7   :  { %5233 = vmatmul.f32.gmra.mxu3 %v11813_v11  ;;  %v16808_v11 = vrot.slane %v11801_v2, 7 }
 0x6b9   :  { %v11834_v0 = vsel %vm165_vm0, %v11791_v3, %v16808_v11  ;;  %v11873_v11 = vsel %vm3643_vm11, %v11458_v63, %v3708_v22  ;;  %v11885_v63 = vsel %vm644_vm2, %v4407_v8, %v4408_v51  ;;  %v11890_v22 = vsel %vm165_vm0, %v3872_v30, 0.0 }
 0x6ba   :  { %16813 = vst [vmem:[#allocation54_spill] sm:$0xff] %v11873_v11  ;;  %v16292_v41 = vrot.slane %v11873_v11, 7  ;;  %v4410_v43 = vrot.slane %v11890_v22, 2  ;;  %vm3649_vm11 = vcmp.ge.f32.partialorder %v11494_v50, 0.0 }
 0x6bb   :  { %4818 = vmatmul.f32.gmra.mxu1 %v11785_v37  ;;  %5439 = vmatmul.f32.gmra.mxu0 %v11785_v37  ;;  %16814 = vst [vmem:[#allocation55_spill] sm:$0xff] %v11885_v63 }
 0x6bc   :  { %4914 = vmatmul.f32.gmra.mxu2 %v11834_v0  ;;  %v11900_v8 = vsel %vm165_vm0, %v11862_v54, %v16292_v41  ;;  %v11910_v58 = vsel %vm644_vm2, %v4408_v51, %v4410_v43  ;;  %v4654_v43 = vld [vmem:[#allocation3 + $0xb8] sm:$0xff]  ;;  %v3680_v41 = vmul.f32 %v11583_v28, %v11322_v36 }
 0x6bd   :  { %16816 = vst [vmem:[#allocation57_spill] sm:$0xff] %v11910_v58  ;;  %4992 = vmatpush.msrb.mxu2 %v4654_v43 }
 0x6be   :  { %v3744_v11 = vsel %vm3615_vm5, %v11322_v36, %v3680_v41  ;;  %v3712_v41 = vmul.f32 %v11583_v28, %v11482_v4  ;;  %vm3621_vm5 = vcmp.ge.f32.partialorder %v11358_v46, 0.0 }
 0x6bf   :  { %5236 = vmatmul.f32.gmra.mxu3 %v11847_v45  ;;  %v3742_v45 = vsel %vm3613_vm13, %v11310_v9, %v3678_v31  ;;  %v11906_v9 = vrot.slane %v3741_v42, 7  ;;  %vm3619_vm13 = vcmp.ge.f32.partialorder %v11346_v40, 0.0 }
 0x6c1   :  { %16815 = vst [vmem:[#allocation56_spill] sm:$0xff] %v11906_v9  ;;  %v11922_v31 = vsel %vm165_vm0, 0.0, %v11906_v9 }
 0x6c2   :  { %v4412_v51 = vrot.slane %v11922_v31, 2 }
 0x6c3   :  { %7352 = vmatmul.msk.f32.gmra.mxu1 %vm11548_vm3, %v11840_v21  ;;  %7414 = vmatmul.msk.f32.gmra.mxu0 %vm11548_vm3, %v11840_v21  ;;  %v3709_v21 = vmul.f32 %v11583_v28, %v11464_v53 }
 0x6c4   :  { %7384 = vmatmul.msk.f32.gmra.mxu2 %vm11548_vm3, %v11862_v54 }
 0x6c5   :  { %v3773_v30 = vsel %vm3644_vm14, %v11464_v53, %v3709_v21  ;;  %v11936_v21 = vsel %vm3645_vm15, %v11470_v26, %v3710_v62  ;;  %vm3650_vm14 = vcmp.ge.f32.partialorder %v11500_v12, 0.0  ;;  %vm3651_vm15 = vcmp.ge.f32.partialorder %v11506_v33, 0.0 }
 0x6c6   :  { %v11925_v42 = vrot.slane %v3773_v30, 7  ;;  %16819 = vst [vmem:[#allocation60_spill] sm:$0xff] %v11936_v21  ;;  %v3679_v30 = vmul.f32 %v11583_v28, %v11316_v25  ;;  %v16300_v62 = vrot.slane %v11936_v21, 7 }
 0x6c7   :  { %5239 = vmatmul.f32.gmra.mxu3 %v11885_v63  ;;  %v3875_v63 = vrot.slane %v3742_v45, 7 }
 0x6c8   :  { %16818 = vst [vmem:[#allocation59_spill] sm:$0xff] %v11925_v42  ;;  %v3743_v43 = vsel %vm3614_vm4, %v11316_v25, %v3679_v30  ;;  %vm3620_vm4 = vcmp.ge.f32.partialorder %v11352_v55, 0.0 }
 0x6c9   :  { %v11918_v45 = vsel %vm165_vm0, %v11906_v9, %v3875_v63  ;;  %v11953_v49 = vsel %vm165_vm0, %v3875_v63, 0.0  ;;  %v11969_v36 = vrot.slane %v3743_v43, 7 }
 0x6ca   :  { %16817 = vst [vmem:[#allocation58_spill] sm:$0xff] %v11918_v45  ;;  %v4413_v53 = vrot.slane %v11918_v45, 2 }
 0x6cb   :  { %4824 = vmatmul.f32.gmra.mxu1 %v11855_v7  ;;  %5445 = vmatmul.f32.gmra.mxu0 %v11855_v7  ;;  %16822 = vst [vmem:[#allocation63_spill] sm:$0xff] %v11969_v36  ;;  %v11985_v30 = vsel %vm165_vm0, 0.0, %v11969_v36 }
 0x6cc   :  { %4920 = vmatmul.f32.gmra.mxu2 %v11900_v8  ;;  %v11948_v26 = vsel %vm644_vm2, %v4412_v51, %v4413_v53  ;;  %v4415_v51 = vrot.slane %v11953_v49, 2 }
 0x6cd   :  { %16820 = vst [vmem:[#allocation61_spill] sm:$0xff] %v11948_v26 }
 0x6ce   :  { %v11973_v25 = vsel %vm644_vm2, %v4413_v53, %v4415_v51  ;;  %v4417_v53 = vrot.slane %v11985_v30, 2  ;;  %v4653_v51 = vld [vmem:[#allocation3 + $0xb0] sm:$0xff] }
 0x6cf   :  { %5242 = vmatmul.f32.gmra.mxu3 %v11910_v58  ;;  %v4703_v58 = vld [vmem:[#allocation3 + $0x240] sm:$0xff]  ;;  %16823 = vst [vmem:[#allocation64_spill] sm:$0xff] %v11973_v25  ;;  %4993 = vmatpush.msrb.mxu2 %v4653_v51 }
 0x6d0   :  { %5618 = vmatpush.msrb.mxu1 %v4703_v58  ;;  %v11963_v58 = vsel %vm165_vm0, %v11925_v42, %v16300_v62  ;;  %v3682_v62 = vmul.f32 %v11583_v28, %v11334_v29 }
 0x6d1   :  { %16821 = vst [vmem:[#allocation62_spill] sm:$0xff] %v11963_v58 }
 0x6d3   :  { %7354 = vmatmul.msk.f32.gmra.mxu1 %vm11548_vm3, %v11906_v9  ;;  %7416 = vmatmul.msk.f32.gmra.mxu0 %vm11548_vm3, %v11906_v9  ;;  %v3711_v9 = vmul.f32 %v11583_v28, %v11476_v59 }
 0x6d4   :  { %7386 = vmatmul.msk.f32.gmra.mxu2 %vm11548_vm3, %v11925_v42 }
 0x6d5   :  { %v3775_v63 = vsel %vm3646_vm6, %v11476_v59, %v3711_v9  ;;  %v11999_v9 = vsel %vm3647_vm7, %v11482_v4, %v3712_v41  ;;  %vm3652_vm6 = vcmp.ge.f32.partialorder %v11512_v20, 0.0  ;;  %vm3653_vm7 = vcmp.ge.f32.partialorder %v11518_v19, 0.0 }
 0x6d6   :  { %v11988_v43 = vrot.slane %v3775_v63, 7  ;;  %16826 = vst [vmem:[#allocation67_spill] sm:$0xff] %v11999_v9  ;;  %v3681_v63 = vmul.f32 %v11583_v28, %v11328_v52  ;;  %v16309_v41 = vrot.slane %v11999_v9, 7 }
 0x6d7   :  { %5245 = vmatmul.f32.gmra.mxu3 %v11948_v26  ;;  %v3878_v26 = vrot.slane %v3744_v11, 7 }
 0x6d8   :  { %16825 = vst [vmem:[#allocation66_spill] sm:$0xff] %v11988_v43  ;;  %v3745_v51 = vsel %vm3616_vm8, %v11328_v52, %v3681_v63  ;;  %v3714_v63 = vmul.f32 %v11583_v28, %v11494_v50  ;;  %vm3622_vm8 = vcmp.ge.f32.partialorder %v11364_v17, 0.0 }
 0x6d9   :  { %v11981_v11 = vsel %vm165_vm0, %v11969_v36, %v3878_v26  ;;  %v12016_v21 = vsel %vm165_vm0, %v3878_v26, 0.0 }
 0x6da   :  { %16824 = vst [vmem:[#allocation65_spill] sm:$0xff] %v11981_v11  ;;  %v4418_v59 = vrot.slane %v11981_v11, 2 }
 0x6db   :  { %4830 = vmatmul.f32.gmra.mxu1 %v11918_v45  ;;  %5451 = vmatmul.f32.gmra.mxu0 %v11918_v45 }
 0x6dc   :  { %4926 = vmatmul.f32.gmra.mxu2 %v11963_v58  ;;  %v12011_v4 = vsel %vm644_vm2, %v4417_v53, %v4418_v59  ;;  %v3746_v58 = vsel %vm3617_vm9, %v11334_v29, %v3682_v62  ;;  %v4420_v53 = vrot.slane %v12016_v21, 2  ;;  %v12032_v29 = vrot.slane %v3745_v51, 7 }
 0x6dd   :  { %16827 = vst [vmem:[#allocation68_spill] sm:$0xff] %v12011_v4  ;;  %vm3623_vm9 = vcmp.ge.f32.partialorder %v11370_v56, 0.0 }
 0x6de   :  { %16829 = vst [vmem:[#allocation70_spill] sm:$0xff] %v12032_v29  ;;  %v12038_v26 = vsel %vm644_vm2, %v4418_v59, %v4420_v53  ;;  %v12050_v51 = vsel %vm165_vm0, 0.0, %v12032_v29  ;;  %v12066_v53 = vsel %vm3649_vm11, %v11494_v50, %v3714_v63  ;;  %vm3655_vm11 = vcmp.ge.f32.partialorder %v11530_v10, 0.0 }
 0x6df   :  { %5248 = vmatmul.f32.gmra.mxu3 %v11973_v25  ;;  %v4702_v25 = vld [vmem:[#allocation3 + $0x238] sm:$0xff]  ;;  %16831 = vst [vmem:[#allocation72_spill] sm:$0xff] %v12038_v26 }
 0x6e0   :  { %5619 = vmatpush.msrb.mxu1 %v4702_v25  ;;  %v12026_v25 = vsel %vm165_vm0, %v11988_v43, %v16309_v41  ;;  %16835 = vst [vmem:[#allocation76_spill] sm:$0xff] %v12066_v53 }
 0x6e1   :  { %16828 = vst [vmem:[#allocation69_spill] sm:$0xff] %v12026_v25 }
 0x6e3   :  { %7356 = vmatmul.msk.f32.gmra.mxu1 %vm11548_vm3, %v11969_v36  ;;  %7418 = vmatmul.msk.f32.gmra.mxu0 %vm11548_vm3, %v11969_v36  ;;  %v3713_v36 = vmul.f32 %v11583_v28, %v11488_v32 }
 0x6e4   :  { %7388 = vmatmul.msk.f32.gmra.mxu2 %vm11548_vm3, %v11988_v43 }
 0x6e5   :  { %v3777_v62 = vsel %vm3648_vm10, %v11488_v32, %v3713_v36  ;;  %v4422_v32 = vrot.slane %v12050_v51, 2  ;;  %vm3654_vm10 = vcmp.ge.f32.partialorder %v11524_v35, 0.0 }
 0x6e6   :  { %v12053_v41 = vrot.slane %v3777_v62, 7  ;;  %v3683_v62 = vmul.f32 %v11583_v28, %v11340_v16 }
 0x6e7   :  { %5251 = vmatmul.f32.gmra.mxu3 %v12011_v4  ;;  %v3881_v4 = vrot.slane %v3746_v58, 7 }
 0x6e8   :  { %16833 = vst [vmem:[#allocation74_spill] sm:$0xff] %v12053_v41  ;;  %v3747_v43 = vsel %vm3618_vm12, %v11340_v16, %v3683_v62  ;;  %v3716_v62 = vmul.f32 %v11583_v28, %v11506_v33  ;;  %vm3624_vm12 = vcmp.ge.f32.partialorder %v11376_v6, 0.0 }
 0x6e9   :  { %v12046_v58 = vsel %vm165_vm0, %v12032_v29, %v3881_v4 }
 0x6ea   :  { %v12035_v52 = vpop.f32.mrf.mxu1  ;;  %16832 = vst [vmem:[#allocation73_spill] sm:$0xff] %v12046_v58  ;;  %v4423_v36 = vrot.slane %v12046_v58, 2 }
 0x6eb   :  { %4836 = vmatmul.f32.gmra.mxu1 %v11981_v11  ;;  %5457 = vmatmul.f32.gmra.mxu0 %v11981_v11  ;;  %16830 = vst [vmem:[#allocation71_spill] sm:$0xff] %v12035_v52  ;;  %v4652_v52 = vld [vmem:[#allocation3 + $0xa8] sm:$0xff] }
 0x6ec   :  { %4932 = vmatmul.f32.gmra.mxu2 %v12026_v25  ;;  %v12078_v50 = vsel %vm644_vm2, %v4422_v32, %v4423_v36  ;;  %v16318_v25 = vrot.slane %v12066_v53, 7 }
 0x6ed   :  { %4994 = vmatpush.msrb.mxu2 %v4652_v52  ;;  %16836 = vst [vmem:[#allocation77_spill] sm:$0xff] %v12078_v50 }
 0x6ee   :  { %v12097_v32 = vsel %vm165_vm0, %v12053_v41, %v16318_v25 }
 0x6ef   :  { %5254 = vmatmul.f32.gmra.mxu3 %v12038_v26  ;;  %v4701_v26 = vld [vmem:[#allocation3 + $0x230] sm:$0xff]  ;;  %16839 = vst [vmem:[#allocation80_spill] sm:$0xff] %v12097_v32 }
 0x6f0   :  { %5620 = vmatpush.msrb.mxu1 %v4701_v26  ;;  %v3715_v26 = vmul.f32 %v11583_v28, %v11500_v12 }
 0x6f1   :  { %v12055_v59 = vpop.f32.mrf.mxu2 }
 0x6f2   :  { %16834 = vst [vmem:[#allocation75_spill] sm:$0xff] %v12055_v59  ;;  %v3684_v59 = vmul.f32 %v11583_v28, %v11346_v40  ;;  %v12080_v63 = vpop.f32.mrf.mxu1 }
 0x6f3   :  { %7358 = vmatmul.msk.f32.gmra.mxu1 %vm11548_vm3, %v12032_v29  ;;  %7420 = vmatmul.msk.f32.gmra.mxu0 %vm11548_vm3, %v12032_v29  ;;  %16837 = vst [vmem:[#allocation78_spill] sm:$0xff] %v12080_v63  ;;  %v12087_v29 = vsel %vm165_vm0, %v3881_v4, 0.0 }
 0x6f4   :  { %7390 = vmatmul.msk.f32.gmra.mxu2 %vm11548_vm3, %v12053_v41  ;;  %v12082_v9 = vpop.f32.mrf.mxu3  ;;  %v3748_v52 = vsel %vm3619_vm13, %v11346_v40, %v3684_v59  ;;  %v4425_v63 = vrot.slane %v12087_v29, 2  ;;  %v12103_v40 = vrot.slane %v3747_v43, 7  ;;  %v3779_v59 = vsel %vm3650_vm14, %v11500_v12, %v3715_v26 }
 0x6f5   :  { %16838 = vst [vmem:[#allocation79_spill] sm:$0xff] %v12082_v9  ;;  %v3884_v9 = vrot.slane %v3748_v52, 7  ;;  %vm3625_vm13 = vcmp.ge.f32.partialorder %v11382_v38, 0.0  ;;  %vm3656_vm14 = vcmp.ge.f32.partialorder %v11536_v24, 0.0 }
 0x6f6   :  { %16840 = vst [vmem:[#allocation81_spill] sm:$0xff] %v12103_v40  ;;  %v12109_v4 = vsel %vm644_vm2, %v4423_v36, %v4425_v63  ;;  %v12121_v43 = vsel %vm165_vm0, 0.0, %v12103_v40  ;;  %v12130_v63 = vrot.slane %v3779_v59, 7  ;;  %v3685_v59 = vmul.f32 %v11583_v28, %v11352_v55 }
 0x6f7   :  { %5257 = vmatmul.f32.gmra.mxu3 %v12078_v50  ;;  %16842 = vst [vmem:[#allocation83_spill] sm:$0xff] %v12109_v4  ;;  %v12117_v52 = vsel %vm165_vm0, %v12103_v40, %v3884_v9  ;;  %v4427_v26 = vrot.slane %v12121_v43, 2  ;;  %v12160_v53 = vsel %vm165_vm0, %v3884_v9, 0.0 }
 0x6f8   :  { %16843 = vst [vmem:[#allocation84_spill] sm:$0xff] %v12117_v52  ;;  %v4430_v9 = vrot.slane %v12160_v53, 2 }
 0x6f9   :  { %v12106_v16 = vpop.f32.mrf.mxu2  ;;  %16847 = vst [vmem:[#allocation88_spill] sm:$0xff] %v12130_v63 }
 0x6fa   :  { %16841 = vst [vmem:[#allocation82_spill] sm:$0xff] %v12106_v16  ;;  %v4428_v16 = vrot.slane %v12117_v52, 2 }
 0x6fb   :  { %4842 = vmatmul.f32.gmra.mxu1 %v12046_v58  ;;  %5463 = vmatmul.f32.gmra.mxu0 %v12046_v58 }
 0x6fc   :  { %4938 = vmatmul.f32.gmra.mxu2 %v12097_v32  ;;  %v12126_v36 = vpop.f32.mrf.mxu3  ;;  %v3749_v32 = vsel %vm3620_vm4, %v11352_v55, %v3685_v59  ;;  %v12188_v59 = vsel %vm644_vm2, %v4428_v16, %v4430_v9  ;;  %vm3626_vm4 = vcmp.ge.f32.partialorder %v11388_v44, 0.0 }
 0x6fd   :  { %16845 = vst [vmem:[#allocation86_spill] sm:$0xff] %v12126_v36  ;;  %v4651_v36 = vld [vmem:[#allocation3 + $0xa0] sm:$0xff]  ;;  %v12182_v55 = vrot.slane %v3749_v32, 7 }
 0x6fe   :  { %4995 = vmatpush.msrb.mxu2 %v4651_v36  ;;  %16857 = vst [vmem:[#allocation98_spill] sm:$0xff] %v12188_v59 }
 0x6ff   :  { %5260 = vmatmul.f32.gmra.mxu3 %v12109_v4  ;;  %v4700_v4 = vld [vmem:[#allocation3 + $0x228] sm:$0xff]  ;;  %16855 = vst [vmem:[#allocation96_spill] sm:$0xff] %v12182_v55  ;;  %v12200_v32 = vsel %vm165_vm0, 0.0, %v12182_v55 }
 0x700   :  { %v12124_v25 = vpop.f32.mrf.mxu1  ;;  %v12128_v12 = vpop.f32.mrf.mxu0  ;;  %5621 = vmatpush.msrb.mxu1 %v4700_v4  ;;  %v3717_v4 = vmul.f32 %v11583_v28, %v11512_v20  ;;  %v4432_v9 = vrot.slane %v12200_v32, 2 }
 0x701   :  { %16844 = vst [vmem:[#allocation85_spill] sm:$0xff] %v12124_v25  ;;  %v12141_v25 = vsel %vm3651_vm15, %v11506_v33, %v3716_v62  ;;  %v12155_v62 = vsel %vm644_vm2, %v4427_v26, %v4428_v16  ;;  %vm3657_vm15 = vcmp.ge.f32.partialorder %v11539_v18, 0.0 }
 0x702   :  { %16846 = vst [vmem:[#allocation87_spill] sm:$0xff] %v12128_v12  ;;  %v3686_v12 = vmul.f32 %v11583_v28, %v11358_v46  ;;  %v16329_v50 = vrot.slane %v12141_v25, 7 }
 0x703   :  { %7360 = vmatmul.msk.f32.gmra.mxu1 %vm11548_vm3, %v12103_v40  ;;  %16848 = vst [vmem:[#allocation89_spill] sm:$0xff] %v12141_v25  ;;  %7422 = vmatmul.msk.f32.gmra.mxu0 %vm11548_vm3, %v12103_v40 }
 0x704   :  { %7392 = vmatmul.msk.f32.gmra.mxu2 %vm11548_vm3, %v12130_v63  ;;  %16850 = vst [vmem:[#allocation91_spill] sm:$0xff] %v12155_v62  ;;  %v3750_v36 = vsel %vm3621_vm5, %v11358_v46, %v3686_v12  ;;  %vm3627_vm5 = vcmp.ge.f32.partialorder %v11394_v48, 0.0 }
 0x705   :  { %v3887_v46 = vrot.slane %v3750_v36, 7 }
 0x707   :  { %v12152_v33 = vpop.f32.mrf.mxu2  ;;  %5263 = vmatmul.f32.gmra.mxu3 %v12155_v62  ;;  %v12196_v36 = vsel %vm165_vm0, %v12182_v55, %v3887_v46  ;;  %v12239_v62 = vsel %vm165_vm0, %v3887_v46, 0.0 }
 0x708   :  { %16849 = vst [vmem:[#allocation90_spill] sm:$0xff] %v12152_v33  ;;  %v12163_v40 = vpop.f32.mrf.mxu1  ;;  %v12166_v41 = vpop.f32.mrf.mxu0  ;;  %v12176_v33 = vsel %vm165_vm0, %v12130_v63, %v16329_v50  ;;  %v3781_v50 = vsel %vm3652_vm6, %v11512_v20, %v3717_v4  ;;  %v4435_v46 = vrot.slane %v12239_v62, 2  ;;  %vm3658_vm6 = vcmp.ge.f32.partialorder %v11542_v15, 0.0 }
 0x709   :  { %16851 = vst [vmem:[#allocation92_spill] sm:$0xff] %v12163_v40  ;;  %v3718_v40 = vmul.f32 %v11583_v28, %v11518_v19  ;;  %v12207_v20 = vrot.slane %v3781_v50, 7  ;;  %v3687_v50 = vmul.f32 %v11583_v28, %v11364_v17 }
 0x70a   :  { %16852 = vst [vmem:[#allocation93_spill] sm:$0xff] %v12166_v41  ;;  %v12170_v26 = vpop.f32.mrf.mxu3  ;;  %v4699_v41 = vld [vmem:[#allocation3 + $0x220] sm:$0xff] }
 0x70b   :  { %16853 = vst [vmem:[#allocation94_spill] sm:$0xff] %v12170_v26  ;;  %4848 = vmatmul.f32.gmra.mxu1 %v12117_v52  ;;  %5469 = vmatmul.f32.gmra.mxu0 %v12117_v52  ;;  %v4433_v26 = vrot.slane %v12196_v36, 2  ;;  %v3751_v25 = vsel %vm3622_vm8, %v11364_v17, %v3687_v50 }
 0x70c   :  { %16854 = vst [vmem:[#allocation95_spill] sm:$0xff] %v12176_v33  ;;  %4944 = vmatmul.f32.gmra.mxu2 %v12176_v33  ;;  %5622 = vmatpush.msrb.mxu1 %v4699_v41  ;;  %v3719_v41 = vmul.f32 %v11583_v28, %v11524_v35  ;;  %v12261_v17 = vrot.slane %v3751_v25, 7 }
 0x70d   :  { %16858 = vst [vmem:[#allocation99_spill] sm:$0xff] %v12196_v36  ;;  %v12267_v50 = vsel %vm644_vm2, %v4433_v26, %v4435_v46 }
 0x70e   :  { %16861 = vst [vmem:[#allocation102_spill] sm:$0xff] %v12207_v20  ;;  %v12279_v25 = vsel %vm165_vm0, 0.0, %v12261_v17 }
 0x70f   :  { %v12185_v12 = vpop.f32.mrf.mxu2  ;;  %5266 = vmatmul.f32.gmra.mxu3 %v12188_v59  ;;  %16870 = vst [vmem:[#allocation111_spill] sm:$0xff] %v12261_v17  ;;  %v4437_v46 = vrot.slane %v12279_v25, 2 }
 0x710   :  { %16856 = vst [vmem:[#allocation97_spill] sm:$0xff] %v12185_v12  ;;  %v12203_v12 = vpop.f32.mrf.mxu1  ;;  %v12205_v16 = vpop.f32.mrf.mxu0 }
 0x711   :  { %16859 = vst [vmem:[#allocation100_spill] sm:$0xff] %v12203_v12  ;;  %v12220_v12 = vsel %vm3653_vm7, %v11518_v19, %v3718_v40  ;;  %v12234_v40 = vsel %vm644_vm2, %v4432_v9, %v4433_v26  ;;  %vm3659_vm7 = vcmp.ge.f32.partialorder %v11545_v34, 0.0 }
 0x712   :  { %16860 = vst [vmem:[#allocation101_spill] sm:$0xff] %v12205_v16  ;;  %v12209_v4 = vpop.f32.mrf.mxu3  ;;  %v4650_v16 = vld [vmem:[#allocation3 + $0x98] sm:$0xff]  ;;  %v16338_v59 = vrot.slane %v12220_v12, 7 }
 0x713   :  { %16862 = vst [vmem:[#allocation103_spill] sm:$0xff] %v12209_v4  ;;  %7362 = vmatmul.msk.f32.gmra.mxu1 %vm11548_vm3, %v12182_v55  ;;  %v3688_v4 = vmul.f32 %v11583_v28, %v11370_v56  ;;  %7424 = vmatmul.msk.f32.gmra.mxu0 %vm11548_vm3, %v12182_v55 }
 0x714   :  { %7394 = vmatmul.msk.f32.gmra.mxu2 %vm11548_vm3, %v12207_v20  ;;  %16863 = vst [vmem:[#allocation104_spill] sm:$0xff] %v12220_v12 }
 0x715   :  { %4996 = vmatpush.msrb.mxu2 %v4650_v16  ;;  %16865 = vst [vmem:[#allocation106_spill] sm:$0xff] %v12234_v40  ;;  %v3752_v16 = vsel %vm3623_vm9, %v11370_v56, %v3688_v4 }
 0x716   :  { %v3890_v56 = vrot.slane %v3752_v16, 7  ;;  %16872 = vst [vmem:[#allocation113_spill] sm:$0xff] %v12267_v50 }
 0x717   :  { %v12231_v19 = vpop.f32.mrf.mxu2  ;;  %5269 = vmatmul.f32.gmra.mxu3 %v12234_v40 }
 0x718   :  { %16864 = vst [vmem:[#allocation105_spill] sm:$0xff] %v12231_v19  ;;  %v12242_v55 = vpop.f32.mrf.mxu1  ;;  %v12245_v33 = vpop.f32.mrf.mxu0  ;;  %v12255_v19 = vsel %vm165_vm0, %v12207_v20, %v16338_v59  ;;  %v3783_v59 = vsel %vm3654_vm10, %v11524_v35, %v3719_v41  ;;  %v12275_v16 = vsel %vm165_vm0, %v12261_v17, %v3890_v56  ;;  %v12318_v40 = vsel %vm165_vm0, %v3890_v56, 0.0 }
 0x719   :  { %16866 = vst [vmem:[#allocation107_spill] sm:$0xff] %v12242_v55  ;;  %v3720_v55 = vmul.f32 %v11583_v28, %v11530_v10  ;;  %v12286_v35 = vrot.slane %v3783_v59, 7  ;;  %v3689_v59 = vmul.f32 %v11583_v28, %v11376_v6  ;;  %v4440_v56 = vrot.slane %v12318_v40, 2 }
 0x71a   :  { %16867 = vst [vmem:[#allocation108_spill] sm:$0xff] %v12245_v33  ;;  %v12249_v9 = vpop.f32.mrf.mxu3  ;;  %v4698_v33 = vld [vmem:[#allocation3 + $0x218] sm:$0xff] }
 0x71b   :  { %16868 = vst [vmem:[#allocation109_spill] sm:$0xff] %v12249_v9  ;;  %4854 = vmatmul.f32.gmra.mxu1 %v12196_v36  ;;  %5475 = vmatmul.f32.gmra.mxu0 %v12196_v36  ;;  %v4438_v9 = vrot.slane %v12275_v16, 2  ;;  %v3753_v12 = vsel %vm3624_vm12, %v11376_v6, %v3689_v59 }
 0x71c   :  { %16869 = vst [vmem:[#allocation110_spill] sm:$0xff] %v12255_v19  ;;  %4950 = vmatmul.f32.gmra.mxu2 %v12255_v19  ;;  %5623 = vmatpush.msrb.mxu1 %v4698_v33  ;;  %v3721_v33 = vmul.f32 %v11583_v28, %v11536_v24  ;;  %v12340_v6 = vrot.slane %v3753_v12, 7 }
 0x71d   :  { %16873 = vst [vmem:[#allocation114_spill] sm:$0xff] %v12275_v16  ;;  %v12346_v59 = vsel %vm644_vm2, %v4438_v9, %v4440_v56 }
 0x71e   :  { %16876 = vst [vmem:[#allocation117_spill] sm:$0xff] %v12286_v35  ;;  %v12358_v12 = vsel %vm165_vm0, 0.0, %v12340_v6 }
 0x71f   :  { %v12264_v4 = vpop.f32.mrf.mxu2  ;;  %5272 = vmatmul.f32.gmra.mxu3 %v12267_v50  ;;  %16885 = vst [vmem:[#allocation126_spill] sm:$0xff] %v12340_v6  ;;  %v4442_v56 = vrot.slane %v12358_v12, 2 }
 0x720   :  { %16871 = vst [vmem:[#allocation112_spill] sm:$0xff] %v12264_v4  ;;  %v12282_v4 = vpop.f32.mrf.mxu1  ;;  %v12284_v26 = vpop.f32.mrf.mxu0 }
 0x721   :  { %16874 = vst [vmem:[#allocation115_spill] sm:$0xff] %v12282_v4  ;;  %v12299_v4 = vsel %vm3655_vm11, %v11530_v10, %v3720_v55  ;;  %v12313_v55 = vsel %vm644_vm2, %v4437_v46, %v4438_v9 }
 0x722   :  { %16875 = vst [vmem:[#allocation116_spill] sm:$0xff] %v12284_v26  ;;  %v12288_v41 = vpop.f32.mrf.mxu3  ;;  %v4649_v26 = vld [vmem:[#allocation3 + $0x90] sm:$0xff]  ;;  %v16347_v50 = vrot.slane %v12299_v4, 7 }
 0x723   :  { %16877 = vst [vmem:[#allocation118_spill] sm:$0xff] %v12288_v41  ;;  %7364 = vmatmul.msk.f32.gmra.mxu1 %vm11548_vm3, %v12261_v17  ;;  %v3690_v41 = vmul.f32 %v11583_v28, %v11382_v38  ;;  %7426 = vmatmul.msk.f32.gmra.mxu0 %vm11548_vm3, %v12261_v17 }
 0x724   :  { %7396 = vmatmul.msk.f32.gmra.mxu2 %vm11548_vm3, %v12286_v35  ;;  %16878 = vst [vmem:[#allocation119_spill] sm:$0xff] %v12299_v4 }
 0x725   :  { %4997 = vmatpush.msrb.mxu2 %v4649_v26  ;;  %16880 = vst [vmem:[#allocation121_spill] sm:$0xff] %v12313_v55  ;;  %v3754_v26 = vsel %vm3625_vm13, %v11382_v38, %v3690_v41 }
 0x726   :  { %v3893_v38 = vrot.slane %v3754_v26, 7  ;;  %16887 = vst [vmem:[#allocation128_spill] sm:$0xff] %v12346_v59 }
 0x727   :  { %v12310_v10 = vpop.f32.mrf.mxu2  ;;  %5275 = vmatmul.f32.gmra.mxu3 %v12313_v55 }
 0x728   :  { %16879 = vst [vmem:[#allocation120_spill] sm:$0xff] %v12310_v10  ;;  %v12321_v17 = vpop.f32.mrf.mxu1  ;;  %v12324_v19 = vpop.f32.mrf.mxu0  ;;  %v12334_v10 = vsel %vm165_vm0, %v12286_v35, %v16347_v50  ;;  %v3785_v50 = vsel %vm3656_vm14, %v11536_v24, %v3721_v33  ;;  %v12354_v26 = vsel %vm165_vm0, %v12340_v6, %v3893_v38  ;;  %v12397_v55 = vsel %vm165_vm0, %v3893_v38, 0.0 }
 0x729   :  { %16881 = vst [vmem:[#allocation122_spill] sm:$0xff] %v12321_v17  ;;  %v3722_v17 = vmul.f32 %v11583_v28, %v11539_v18  ;;  %v12365_v24 = vrot.slane %v3785_v50, 7  ;;  %v3691_v50 = vmul.f32 %v11583_v28, %v11388_v44  ;;  %v4445_v38 = vrot.slane %v12397_v55, 2 }
 0x72a   :  { %16882 = vst [vmem:[#allocation123_spill] sm:$0xff] %v12324_v19  ;;  %v12328_v46 = vpop.f32.mrf.mxu3  ;;  %v4697_v19 = vld [vmem:[#allocation3 + $0x210] sm:$0xff] }
 0x72b   :  { %16883 = vst [vmem:[#allocation124_spill] sm:$0xff] %v12328_v46  ;;  %4860 = vmatmul.f32.gmra.mxu1 %v12275_v16  ;;  %5481 = vmatmul.f32.gmra.mxu0 %v12275_v16  ;;  %v4443_v46 = vrot.slane %v12354_v26, 2  ;;  %v3755_v4 = vsel %vm3626_vm4, %v11388_v44, %v3691_v50 }
 0x72c   :  { %16884 = vst [vmem:[#allocation125_spill] sm:$0xff] %v12334_v10  ;;  %4956 = vmatmul.f32.gmra.mxu2 %v12334_v10  ;;  %5624 = vmatpush.msrb.mxu1 %v4697_v19  ;;  %v3723_v19 = vmul.f32 %v11583_v28, %v11542_v15  ;;  %v12419_v44 = vrot.slane %v3755_v4, 7 }
 0x72d   :  { %16888 = vst [vmem:[#allocation129_spill] sm:$0xff] %v12354_v26  ;;  %v12425_v50 = vsel %vm644_vm2, %v4443_v46, %v4445_v38 }
 0x72e   :  { %16891 = vst [vmem:[#allocation132_spill] sm:$0xff] %v12365_v24  ;;  %v12437_v4 = vsel %vm165_vm0, 0.0, %v12419_v44 }
 0x72f   :  { %v12343_v41 = vpop.f32.mrf.mxu2  ;;  %5278 = vmatmul.f32.gmra.mxu3 %v12346_v59  ;;  %16900 = vst [vmem:[#allocation141_spill] sm:$0xff] %v12419_v44  ;;  %v4447_v38 = vrot.slane %v12437_v4, 2 }
 0x730   :  { %16886 = vst [vmem:[#allocation127_spill] sm:$0xff] %v12343_v41  ;;  %v12361_v41 = vpop.f32.mrf.mxu1  ;;  %v12363_v9 = vpop.f32.mrf.mxu0 }
 0x731   :  { %16889 = vst [vmem:[#allocation130_spill] sm:$0xff] %v12361_v41  ;;  %v12378_v41 = vsel %vm3657_vm15, %v11539_v18, %v3722_v17  ;;  %v12392_v17 = vsel %vm644_vm2, %v4442_v56, %v4443_v46 }
 0x732   :  { %16890 = vst [vmem:[#allocation131_spill] sm:$0xff] %v12363_v9  ;;  %v12367_v33 = vpop.f32.mrf.mxu3  ;;  %v4648_v9 = vld [vmem:[#allocation3 + $0x88] sm:$0xff]  ;;  %v16356_v59 = vrot.slane %v12378_v41, 7 }
 0x733   :  { %16892 = vst [vmem:[#allocation133_spill] sm:$0xff] %v12367_v33  ;;  %7366 = vmatmul.msk.f32.gmra.mxu1 %vm11548_vm3, %v12340_v6  ;;  %v3692_v33 = vmul.f32 %v11583_v28, %v11394_v48  ;;  %7428 = vmatmul.msk.f32.gmra.mxu0 %vm11548_vm3, %v12340_v6 }
 0x734   :  { %7398 = vmatmul.msk.f32.gmra.mxu2 %vm11548_vm3, %v12365_v24  ;;  %16893 = vst [vmem:[#allocation134_spill] sm:$0xff] %v12378_v41 }
 0x735   :  { %4998 = vmatpush.msrb.mxu2 %v4648_v9  ;;  %16895 = vst [vmem:[#allocation136_spill] sm:$0xff] %v12392_v17  ;;  %v3756_v9 = vsel %vm3627_vm5, %v11394_v48, %v3692_v33 }
 0x736   :  { %v3896_v48 = vrot.slane %v3756_v9, 7  ;;  %16902 = vst [vmem:[#allocation143_spill] sm:$0xff] %v12425_v50 }
 0x737   :  { %v12389_v18 = vpop.f32.mrf.mxu2  ;;  %5281 = vmatmul.f32.gmra.mxu3 %v12392_v17  ;;  %16904 = vst [vmem:[#allocation145_spill] sm:$0xff] %v12437_v4  ;;  %v4696_v17 = vld [vmem:[#allocation3 + $0x208] sm:$0xff] }
 0x738   :  { %16894 = vst [vmem:[#allocation135_spill] sm:$0xff] %v12389_v18  ;;  %v12400_v6 = vpop.f32.mrf.mxu1  ;;  %v12403_v10 = vpop.f32.mrf.mxu0  ;;  %v12413_v18 = vsel %vm165_vm0, %v12365_v24, %v16356_v59  ;;  %v3787_v59 = vsel %vm3658_vm6, %v11542_v15, %v3723_v19  ;;  %v12433_v9 = vsel %vm165_vm0, %v12419_v44, %v3896_v48  ;;  %5625 = vmatpush.msrb.mxu1 %v4696_v17  ;;  %v16917_v17 = vld [vmem:[#allocation30_spill] sm:$0xff] }
 0x739   :  { %16896 = vst [vmem:[#allocation137_spill] sm:$0xff] %v12400_v6  ;;  %v3724_v6 = vmul.f32 %v11583_v28, %v11545_v34  ;;  %v12444_v15 = vrot.slane %v3787_v59, 7  ;;  %v16910_v59 = vld [vmem:[#allocation35_spill] sm:$0xff]  ;;  %vm3660_vm10 = vcmp.ge.f32.partialorder %v16917_v17, 0.0 }
 0x73a   :  { %16897 = vst [vmem:[#allocation138_spill] sm:$0xff] %v12403_v10  ;;  %v12407_v56 = vpop.f32.mrf.mxu3  ;;  %v3693_v10 = vmul.f32 %v11583_v28, %v16910_v59  ;;  %vm3628_vm8 = vcmp.ge.f32.partialorder %v16910_v59, 0.0 }
 0x73b   :  { %16898 = vst [vmem:[#allocation139_spill] sm:$0xff] %v12407_v56  ;;  %4866 = vmatmul.f32.gmra.mxu1 %v12354_v26  ;;  %5487 = vmatmul.f32.gmra.mxu0 %v12354_v26  ;;  %v4448_v56 = vrot.slane %v12433_v9, 2 }
 0x73c   :  { %16899 = vst [vmem:[#allocation140_spill] sm:$0xff] %v12413_v18  ;;  %4962 = vmatmul.f32.gmra.mxu2 %v12413_v18  ;;  %v12476_v18 = vsel %vm165_vm0, %v3896_v48, 0.0  ;;  %v3757_v24 = vsel %vm3628_vm8, %v16910_v59, %v3693_v10 }
 0x73d   :  { %16903 = vst [vmem:[#allocation144_spill] sm:$0xff] %v12433_v9  ;;  %v4450_v48 = vrot.slane %v12476_v18, 2  ;;  %v12498_v10 = vrot.slane %v3757_v24, 7 }
 0x73e   :  { %16907 = vst [vmem:[#allocation148_spill] sm:$0xff] %v12444_v15 }
 0x73f   :  { %v12422_v33 = vpop.f32.mrf.mxu2  ;;  %5284 = vmatmul.f32.gmra.mxu3 %v12425_v50  ;;  %16914 = vst [vmem:[#allocation151_spill] sm:$0xff] %v12476_v18  ;;  %v12504_v59 = vsel %vm644_vm2, %v4448_v56, %v4450_v48  ;;  %v12516_v24 = vsel %vm165_vm0, 0.0, %v12498_v10 }
 0x740   :  { %16901 = vst [vmem:[#allocation142_spill] sm:$0xff] %v12422_v33  ;;  %v12440_v33 = vpop.f32.mrf.mxu1  ;;  %v12442_v46 = vpop.f32.mrf.mxu0 }
 0x741   :  { %16905 = vst [vmem:[#allocation146_spill] sm:$0xff] %v12440_v33  ;;  %v12457_v33 = vsel %vm3659_vm7, %v11545_v34, %v3724_v6  ;;  %v12471_v6 = vsel %vm644_vm2, %v4447_v38, %v4448_v56 }
 0x742   :  { %16906 = vst [vmem:[#allocation147_spill] sm:$0xff] %v12442_v46  ;;  %v12446_v19 = vpop.f32.mrf.mxu3  ;;  %v4647_v46 = vld [vmem:[#allocation3 + $0x80] sm:$0xff]  ;;  %v16370_v41 = vrot.slane %v12457_v33, 7 }
 0x743   :  { %16908 = vst [vmem:[#allocation149_spill] sm:$0xff] %v12446_v19  ;;  %7368 = vmatmul.msk.f32.gmra.mxu1 %vm11548_vm3, %v12419_v44  ;;  %v16911_v19 = vld [vmem:[#allocation36_spill] sm:$0xff]  ;;  %7430 = vmatmul.msk.f32.gmra.mxu0 %vm11548_vm3, %v12419_v44 }
 0x744   :  { %7400 = vmatmul.msk.f32.gmra.mxu2 %vm11548_vm3, %v12444_v15  ;;  %16909 = vst [vmem:[#allocation150_spill] sm:$0xff] %v12457_v33  ;;  %v3694_v50 = vmul.f32 %v11583_v28, %v16911_v19  ;;  %vm3629_vm9 = vcmp.ge.f32.partialorder %v16911_v19, 0.0  ;;  %v4695_v33 = vld [vmem:[#allocation3 + $0x200] sm:$0xff] }
 0x745   :  { %4999 = vmatpush.msrb.mxu2 %v4647_v46  ;;  %16913 = vst [vmem:[#allocation36_spill] sm:$0xff] %v12471_v6  ;;  %5626 = vmatpush.msrb.mxu1 %v4695_v33 }
 0x746   :  { %v3758_v46 = vsel %vm3629_vm9, %v16911_v19, %v3694_v50  ;;  %16920 = vst [vmem:[#allocation155_spill] sm:$0xff] %v12498_v10 }
 0x747   :  { %v12468_v34 = vpop.f32.mrf.mxu2  ;;  %5287 = vmatmul.f32.gmra.mxu3 %v12471_v6  ;;  %v12492_v6 = vsel %vm165_vm0, %v12444_v15, %v16370_v41  ;;  %v3899_v50 = vrot.slane %v3758_v46, 7  ;;  %16922 = vst [vmem:[#allocation157_spill] sm:$0xff] %v12504_v59 }
 0x748   :  { %16912 = vst [vmem:[#allocation35_spill] sm:$0xff] %v12468_v34  ;;  %v12479_v44 = vpop.f32.mrf.mxu1  ;;  %v12482_v4 = vpop.f32.mrf.mxu0  ;;  %v3725_v34 = vmul.f32 %v11583_v28, %v16917_v17 }
 0x749   :  { %16915 = vst [vmem:[#allocation152_spill] sm:$0xff] %v12479_v44  ;;  %v16923_v44 = vld [vmem:[#allocation31_spill] sm:$0xff]  ;;  %v12512_v46 = vsel %vm165_vm0, %v12498_v10, %v3899_v50 }
 0x74a   :  { %16916 = vst [vmem:[#allocation153_spill] sm:$0xff] %v12482_v4  ;;  %v12486_v38 = vpop.f32.mrf.mxu3  ;;  %v3789_v41 = vsel %vm3660_vm10, %v16917_v17, %v3725_v34  ;;  %vm3661_vm11 = vcmp.ge.f32.partialorder %v16923_v44, 0.0  ;;  %v4742_v17 = vld [vmem:[#allocation3 + $0x378] sm:$0xff]  ;;  %v4452_v4 = vrot.slane %v12516_v24, 2 }
 0x74b   :  { %16918 = vst [vmem:[#allocation30_spill] sm:$0xff] %v12486_v38  ;;  %4872 = vmatmul.f32.gmra.mxu1 %v12433_v9  ;;  %5493 = vmatmul.f32.gmra.mxu0 %v12433_v9  ;;  %v3726_v38 = vmul.f32 %v11583_v28, %v16923_v44  ;;  %v12523_v34 = vrot.slane %v3789_v41, 7 }
 0x74c   :  { %16919 = vst [vmem:[#allocation154_spill] sm:$0xff] %v12492_v6  ;;  %4968 = vmatmul.f32.gmra.mxu2 %v12492_v6  ;;  %6029 = vmatpush.msra.mxu3 %v4742_v17  ;;  %v4726_v17 = vld [vmem:[#allocation3 + $0x2f8] sm:$0xff] }
 0x74d   :  { %16924 = vst [vmem:[#allocation31_spill] sm:$0xff] %v12512_v46  ;;  %v12536_v41 = vsel %vm3661_vm11, %v16923_v44, %v3726_v38  ;;  %5820 = vmatpush.msra.mxu2 %v4726_v17  ;;  %v16937_v17 = vld [vmem:[#allocation32_spill] sm:$0xff] }
 0x74e   :  { %16925 = vst [vmem:[#allocation158_spill] sm:$0xff] %v12516_v24  ;;  %v16385_v38 = vrot.slane %v12536_v41, 7  ;;  %v12555_v24 = vsel %vm165_vm0, %v3899_v50, 0.0  ;;  %vm3662_vm14 = vcmp.ge.f32.partialorder %v16937_v17, 0.0 }
 0x74f   :  { %v12501_v19 = vpop.f32.mrf.mxu2  ;;  %5290 = vmatmul.f32.gmra.mxu3 %v12504_v59  ;;  %16928 = vst [vmem:[#allocation161_spill] sm:$0xff] %v12523_v34  ;;  %v4453_v59 = vrot.slane %v12512_v46, 2  ;;  %v4455_v50 = vrot.slane %v12555_v24, 2 }
 0x750   :  { %16921 = vst [vmem:[#allocation156_spill] sm:$0xff] %v12501_v19  ;;  %v12519_v19 = vpop.f32.mrf.mxu1  ;;  %v12521_v56 = vpop.f32.mrf.mxu0 }
 0x751   :  { %16926 = vst [vmem:[#allocation159_spill] sm:$0xff] %v12519_v19  ;;  %v16931_v19 = vld [vmem:[#allocation37_spill] sm:$0xff]  ;;  %v12550_v44 = vsel %vm644_vm2, %v4452_v4, %v4453_v59 }
 0x752   :  { %16927 = vst [vmem:[#allocation160_spill] sm:$0xff] %v12521_v56  ;;  %v12525_v48 = vpop.f32.mrf.mxu3  ;;  %v16932_v56 = vld [vmem:[#allocation38_spill] sm:$0xff]  ;;  %vm3630_vm12 = vcmp.ge.f32.partialorder %v16931_v19, 0.0 }
 0x753   :  { %16929 = vst [vmem:[#allocation162_spill] sm:$0xff] %v12525_v48  ;;  %7370 = vmatmul.msk.f32.gmra.mxu1 %vm11548_vm3, %v12498_v10  ;;  %v3695_v48 = vmul.f32 %v11583_v28, %v16931_v19  ;;  %v3696_v6 = vmul.f32 %v11583_v28, %v16932_v56  ;;  %7432 = vmatmul.msk.f32.gmra.mxu0 %vm11548_vm3, %v12498_v10  ;;  %vm3631_vm13 = vcmp.ge.f32.partialorder %v16932_v56, 0.0 }
 0x754   :  { %7402 = vmatmul.msk.f32.gmra.mxu2 %vm11548_vm3, %v12523_v34  ;;  %16930 = vst [vmem:[#allocation163_spill] sm:$0xff] %v12536_v41 }
 0x755   :  { %16934 = vst [vmem:[#allocation38_spill] sm:$0xff] %v12550_v44  ;;  %v3760_v33 = vsel %vm3631_vm13, %v16932_v56, %v3696_v6  ;;  %v3759_v18 = vsel %vm3630_vm12, %v16931_v19, %v3695_v48  ;;  %v4758_v56 = vld [vmem:[#allocation3 + $0x3f8] sm:$0xff] }
 0x756   :  { %v3902_v6 = vrot.slane %v3760_v33, 7  ;;  %v12577_v19 = vrot.slane %v3759_v18, 7  ;;  %6238 = vmatpush.msra.mxu0 %v4758_v56 }
 0x757   :  { %v12547_v15 = vpop.f32.mrf.mxu2  ;;  %5293 = vmatmul.f32.gmra.mxu3 %v12550_v44  ;;  %v12571_v44 = vsel %vm165_vm0, %v12523_v34, %v16385_v38  ;;  %v12583_v38 = vsel %vm644_vm2, %v4453_v59, %v4455_v50 }
 0x758   :  { %16933 = vst [vmem:[#allocation37_spill] sm:$0xff] %v12547_v15  ;;  %v12558_v10 = vpop.f32.mrf.mxu1  ;;  %v12561_v9 = vpop.f32.mrf.mxu0  ;;  %v3727_v15 = vmul.f32 %v11583_v28, %v16937_v17  ;;  %v12591_v18 = vsel %vm165_vm0, %v12577_v19, %v3902_v6  ;;  %v12628_v41 = vsel %vm165_vm0, %v3902_v6, 0.0  ;;  %v16957_v6 = vld [vmem:[#allocation39_spill] sm:$0xff] }
 0x759   :  { %16935 = vst [vmem:[#allocation164_spill] sm:$0xff] %v12558_v10  ;;  %vm3632_vm4 = vcmp.ge.f32.partialorder %v16957_v6, 0.0 }
 0x75a   :  { %16936 = vst [vmem:[#allocation165_spill] sm:$0xff] %v12561_v9  ;;  %v12565_v4 = vpop.f32.mrf.mxu3  ;;  %v3791_v10 = vsel %vm3662_vm14, %v16937_v17, %v3727_v15  ;;  %v12595_v9 = vsel %vm165_vm0, 0.0, %v12577_v19 }
 0x75b   :  { %16938 = vst [vmem:[#allocation32_spill] sm:$0xff] %v12565_v4  ;;  %4878 = vmatmul.f32.gmra.mxu1 %v12512_v46  ;;  %5499 = vmatmul.f32.gmra.mxu0 %v12512_v46  ;;  %v16943_v4 = vld [vmem:[#allocation33_spill] sm:$0xff]  ;;  %v12602_v15 = vrot.slane %v3791_v10, 7  ;;  %v4457_v50 = vrot.slane %v12595_v9, 2  ;;  %v4774_v10 = vld [vmem:[#allocation3 + $0x478] sm:$0xff] }
 0x75c   :  { %16939 = vst [vmem:[#allocation166_spill] sm:$0xff] %v12571_v44  ;;  %4974 = vmatmul.f32.gmra.mxu2 %v12571_v44  ;;  %v3728_v33 = vmul.f32 %v11583_v28, %v16943_v4  ;;  %vm3663_vm15 = vcmp.ge.f32.partialorder %v16943_v4, 0.0  ;;  %6447 = vmatpush.msra.mxu1 %v4774_v10 }
 0x75d   :  { %16940 = vst [vmem:[#allocation167_spill] sm:$0xff] %v12577_v19 }
 0x75e   :  { %16942 = vst [vmem:[#allocation169_spill] sm:$0xff] %v12583_v38 }
 0x75f   :  { %v12580_v48 = vpop.f32.mrf.mxu2  ;;  %5296 = vmatmul.f32.gmra.mxu3 %v12583_v38  ;;  %16944 = vst [vmem:[#allocation33_spill] sm:$0xff] %v12591_v18 }
 0x760   :  { %16941 = vst [vmem:[#allocation168_spill] sm:$0xff] %v12580_v48  ;;  %v12598_v56 = vpop.f32.mrf.mxu1  ;;  %v12600_v59 = vpop.f32.mrf.mxu0  ;;  %v4458_v48 = vrot.slane %v12591_v18, 2 }
 0x761   :  { %16945 = vst [vmem:[#allocation170_spill] sm:$0xff] %v12598_v56  ;;  %v12615_v56 = vsel %vm3663_vm15, %v16943_v4, %v3728_v33 }
 0x762   :  { %16946 = vst [vmem:[#allocation171_spill] sm:$0xff] %v12600_v59  ;;  %v12604_v17 = vpop.f32.mrf.mxu3  ;;  %v12623_v59 = vsel %vm644_vm2, %v4457_v50, %v4458_v48  ;;  %v16391_v38 = vrot.slane %v12615_v56, 7  ;;  %v4460_v50 = vrot.slane %v12628_v41, 2 }
 0x763   :  { %16947 = vst [vmem:[#allocation172_spill] sm:$0xff] %v12602_v15  ;;  %7372 = vmatmul.msk.f32.gmra.mxu1 %vm11548_vm3, %v12577_v19  ;;  %7434 = vmatmul.msk.f32.gmra.mxu0 %vm11548_vm3, %v12577_v19 }
 0x764   :  { %16948 = vst [vmem:[#allocation173_spill] sm:$0xff] %v12604_v17  ;;  %7404 = vmatmul.msk.f32.gmra.mxu2 %vm11548_vm3, %v12602_v15  ;;  %v12640_v10 = vsel %vm165_vm0, %v12602_v15, %v16391_v38 }
 0x765   :  { %16949 = vst [vmem:[#allocation174_spill] sm:$0xff] %v12615_v56 }
 0x766   :  { %16951 = vst [vmem:[#allocation176_spill] sm:$0xff] %v12623_v59 }
 0x767   :  { %v12620_v17 = vpop.f32.mrf.mxu2  ;;  %5299 = vmatmul.f32.gmra.mxu3 %v12623_v59  ;;  %16952 = vst [vmem:[#allocation177_spill] sm:$0xff] %v12628_v41 }
 0x768   :  { %16950 = vst [vmem:[#allocation175_spill] sm:$0xff] %v12620_v17  ;;  %v12630_v4 = vpop.f32.mrf.mxu1  ;;  %v12632_v33 = vpop.f32.mrf.mxu0  ;;  %v3697_v17 = vmul.f32 %v11583_v28, %v16957_v6 }
 0x769   :  { %16953 = vst [vmem:[#allocation178_spill] sm:$0xff] %v12630_v4 }
 0x76a   :  { %16954 = vst [vmem:[#allocation179_spill] sm:$0xff] %v12632_v33  ;;  %v12634_v44 = vpop.f32.mrf.mxu3  ;;  %v3761_v38 = vsel %vm3632_vm4, %v16957_v6, %v3697_v17  ;;  %v16960_v33 = vld [vmem:[#allocation40_spill] sm:$0xff] }
 0x76b   :  { %16955 = vst [vmem:[#allocation180_spill] sm:$0xff] %v12634_v44  ;;  %4884 = vmatmul.f32.gmra.mxu1 %v12591_v18  ;;  %5505 = vmatmul.f32.gmra.mxu0 %v12591_v18  ;;  %v12652_v44 = vsel %vm644_vm2, %v4458_v48, %v4460_v50  ;;  %v3698_v59 = vmul.f32 %v11583_v28, %v16960_v33  ;;  %vm3633_vm5 = vcmp.ge.f32.partialorder %v16960_v33, 0.0  ;;  %v16965_v48 = vld [vmem:[#allocation10_spill] sm:$0xff]  ;;  %v4725_v50 = vld [vmem:[#allocation3 + $0x2f0] sm:$0xff] }
 0x76c   :  { %16956 = vst [vmem:[#allocation181_spill] sm:$0xff] %v12640_v10  ;;  %4980 = vmatmul.f32.gmra.mxu2 %v12640_v10  ;;  %v4741_v10 = vld [vmem:[#allocation3 + $0x370] sm:$0xff] }
 0x76d   :  { %16959 = vst [vmem:[#allocation182_spill] sm:$0xff] %v12652_v44  ;;  %6030 = vmatpush.msra.mxu3 %v4741_v10  ;;  %v12673_v17 = vsel %vm3633_vm5, %v16960_v33, %v3698_v59  ;;  %5821 = vmatpush.msra.mxu2 %v4725_v50  ;;  %v4757_v33 = vld [vmem:[#allocation3 + $0x3f0] sm:$0xff] }
 0x76e   :  { %16966 = vst [vmem:[#allocation186_spill] sm:$0xff] %v12673_v17  ;;  %6239 = vmatpush.msra.mxu0 %v4757_v33 }
 0x76f   :  { %v12649_v4 = vpop.f32.mrf.mxu2  ;;  %5302 = vmatmul.f32.gmra.mxu3 %v12652_v44  ;;  %v16972_v44 = vld [vmem:[#allocation11_spill] sm:$0xff] }
 0x770   :  { %16958 = vst [vmem:[#allocation39_spill] sm:$0xff] %v12649_v4  ;;  %v12658_v19 = vpop.f32.mrf.mxu1  ;;  %v12660_v56 = vpop.f32.mrf.mxu0  ;;  %v12665_v4 = vrot.slane %v3761_v38, 7  ;;  %v16402_v38 = vrot.slane %v12673_v17, 7 }
 0x771   :  { %16961 = vst [vmem:[#allocation40_spill] sm:$0xff] %v12658_v19  ;;  %v16968_v19 = vld [vmem:[#allocation12_spill] sm:$0xff] }
 0x772   :  { %16962 = vst [vmem:[#allocation183_spill] sm:$0xff] %v12660_v56  ;;  %v12663_v15 = vpop.f32.mrf.mxu3  ;;  %v12690_v59 = vsel %vm165_vm0, %v12665_v4, %v16402_v38 }
 0x773   :  { %16963 = vst [vmem:[#allocation184_spill] sm:$0xff] %v12663_v15  ;;  %5627 = vmatmul.f32.vlgmr.msrb.gmra.mxu1 %v11825_v23  ;;  %7436 = vmatmul.msk.f32.gmra.mxu0 %vm11548_vm3, %v12665_v4 }
 0x774   :  { %16964 = vst [vmem:[#allocation185_spill] sm:$0xff] %v12665_v4  ;;  %5000 = vmatmul.f32.vlgmr.msrb.gmra.mxu2 %v16965_v48 }
 0x775   :  { %16973 = vst [vmem:[#allocation191_spill] sm:$0xff] %v12690_v59 }
 0x777   :  { %v12675_v6 = vpop.f32.mrf.mxu2  ;;  %5305 = vmatmul.f32.gmra.mxu3 %v16968_v19  ;;  %v16977_v19 = vld [vmem:[#allocation13_spill] sm:$0xff] }
 0x778   :  { %16967 = vst [vmem:[#allocation187_spill] sm:$0xff] %v12675_v6  ;;  %v12679_v10 = vpop.f32.mrf.mxu1  ;;  %v12681_v15 = vpop.f32.mrf.mxu0  ;;  %v16975_v6 = vld [vmem:[#allocation24_spill] sm:$0xff] }
 0x779   :  { %16969 = vst [vmem:[#allocation188_spill] sm:$0xff] %v12679_v10  ;;  %v4180_v10 = vrot.slane %v16975_v6, 1  ;;  %v16984_v6 = vld [vmem:[#allocation22_spill] sm:$0xff] }
 0x77a   :  { %16970 = vst [vmem:[#allocation189_spill] sm:$0xff] %v12681_v15  ;;  %v12683_v56 = vpop.f32.mrf.mxu3  ;;  %v16976_v15 = vld [vmem:[#allocation19_spill] sm:$0xff] }
 0x77b   :  { %16971 = vst [vmem:[#allocation190_spill] sm:$0xff] %v12683_v56  ;;  %5630 = vmatmul.f32.gmra.mxu1 %v11843_v1  ;;  %5511 = vmatmul.f32.gmra.mxu0 %v12690_v59  ;;  %v4181_v56 = vrot.slane %v16976_v15, 1  ;;  %v4463_v59 = vrot.slane %v16984_v6, 2 }
 0x77c   :  { %5003 = vmatmul.f32.gmra.mxu2 %v16972_v44  ;;  %v16978_v44 = vld [vmem:[#allocation20_spill] sm:$0xff] }
 0x77d   :  { %v12701_v48 = vsel %vm165_vm0, 0.0, %v16978_v44  ;;  %v12710_v33 = vsel %vm488_vm1, %v4180_v10, %v4181_v56 }
 0x77e   :  { %16979 = vst [vmem:[#allocation24_spill] sm:$0xff] %v12701_v48 }
 0x77f   :  { %v12694_v50 = vpop.f32.mrf.mxu2  ;;  %5308 = vmatmul.f32.gmra.mxu3 %v16977_v19  ;;  %16983 = vst [vmem:[#allocation195_spill] sm:$0xff] %v12710_v33 }
 0x780   :  { %16974 = vst [vmem:[#allocation192_spill] sm:$0xff] %v12694_v50  ;;  %v12703_v38 = vpop.f32.mrf.mxu1  ;;  %v12705_v28 = vpop.f32.mrf.mxu0  ;;  %v4462_v50 = vrot.slane %v12701_v48, 2 }
 0x781   :  { %16980 = vst [vmem:[#allocation20_spill] sm:$0xff] %v12703_v38  ;;  %v12719_v38 = vld [vmem:[#allocation3 + $0x470] sm:$0xff] }
 0x782   :  { %16981 = vst [vmem:[#allocation193_spill] sm:$0xff] %v12705_v28  ;;  %v12707_v17 = vpop.f32.mrf.mxu3  ;;  %6448 = vmatpush.msra.mxu1 %v12719_v38  ;;  %v12725_v10 = vsel %vm644_vm2, %v4462_v50, %v4463_v59  ;;  %v16987_v28 = vld [vmem:[#allocation43_spill] sm:$0xff] }
 0x783   :  { %16982 = vst [vmem:[#allocation194_spill] sm:$0xff] %v12707_v17  ;;  %5633 = vmatmul.f32.gmra.mxu1 %v12710_v33  ;;  %7438 = vmatmul.msk.f32.gmra.mxu0 %vm11548_vm3, %v16978_v44  ;;  %v4183_v19 = vrot.slane %v16987_v28, 1 }
 0x784   :  { %5006 = vmatmul.f32.gmra.mxu2 %v11825_v23  ;;  %16986 = vst [vmem:[#allocation196_spill] sm:$0xff] %v12725_v10  ;;  %v16988_v23 = vld [vmem:[#allocation28_spill] sm:$0xff] }
 0x785   :  { %v16989_v15 = vrot.slane %v16988_v23, 7  ;;  %v16996_v23 = vld [vmem:[#allocation45_spill] sm:$0xff] }
 0x787   :  { %v12722_v17 = vpop.f32.mrf.mxu2  ;;  %5311 = vmatmul.f32.gmra.mxu3 %v12725_v10  ;;  %v12732_v48 = vsel %vm165_vm0, %v16989_v15, 0.0  ;;  %v4740_v10 = vld [vmem:[#allocation3 + $0x368] sm:$0xff] }
 0x788   :  { %16985 = vst [vmem:[#allocation22_spill] sm:$0xff] %v12722_v17  ;;  %v12734_v4 = vpop.f32.mrf.mxu1  ;;  %v12736_v44 = vpop.f32.mrf.mxu0  ;;  %v12741_v17 = vsel %vm488_vm1, %v4181_v56, %v4183_v19  ;;  %v4465_v50 = vrot.slane %v12732_v48, 2  ;;  %v16997_v19 = vld [vmem:[#allocation25_spill] sm:$0xff]  ;;  %6031 = vmatpush.msra.mxu3 %v4740_v10  ;;  %v17005_v10 = vld [vmem:[#allocation42_spill] sm:$0xff] }
 0x789   :  { %16990 = vst [vmem:[#allocation43_spill] sm:$0xff] %v12732_v48  ;;  %v12757_v56 = vsel %vm165_vm0, 0.0, %v16997_v19 }
 0x78a   :  { %16991 = vst [vmem:[#allocation28_spill] sm:$0xff] %v12734_v4  ;;  %v12738_v41 = vpop.f32.mrf.mxu3  ;;  %v12750_v15 = vsel %vm644_vm2, %v4463_v59, %v4465_v50  ;;  %v4185_v4 = vrot.slane %v16996_v23, 1  ;;  %v4467_v50 = vrot.slane %v12757_v56, 2  ;;  %v17002_v23 = vld [vmem:[#allocation15_spill] sm:$0xff] }
 0x78b   :  { %16992 = vst [vmem:[#allocation197_spill] sm:$0xff] %v12736_v44  ;;  %5636 = vmatmul.f32.gmra.mxu1 %v12741_v17  ;;  %5517 = vmatmul.f32.gmra.mxu0 %v16984_v6 }
 0x78c   :  { %16993 = vst [vmem:[#allocation198_spill] sm:$0xff] %v12738_v41  ;;  %5009 = vmatmul.f32.gmra.mxu2 %v11843_v1  ;;  %v4186_v41 = vrot.slane %v11726_v13, 1 }
 0x78d   :  { %16995 = vst [vmem:[#allocation200_spill] sm:$0xff] %v12750_v15 }
 0x78e   :  { %16998 = vst [vmem:[#allocation45_spill] sm:$0xff] %v12757_v56  ;;  %v12766_v59 = vsel %vm488_vm1, %v4185_v4, %v4186_v41 }
 0x78f   :  { %v12747_v28 = vpop.f32.mrf.mxu2  ;;  %5314 = vmatmul.f32.gmra.mxu3 %v12750_v15  ;;  %v17006_v15 = vrot.slane %v17005_v10, 7 }
 0x790   :  { %16994 = vst [vmem:[#allocation199_spill] sm:$0xff] %v12747_v28  ;;  %v12759_v1 = vpop.f32.mrf.mxu1  ;;  %v12761_v44 = vpop.f32.mrf.mxu0  ;;  %v4468_v28 = vrot.slane %v17002_v23, 2 }
 0x791   :  { %16999 = vst [vmem:[#allocation201_spill] sm:$0xff] %v12759_v1  ;;  %v4724_v1 = vld [vmem:[#allocation3 + $0x2e8] sm:$0xff]  ;;  %v12785_v13 = vsel %vm165_vm0, %v17006_v15, 0.0 }
 0x792   :  { %17000 = vst [vmem:[#allocation202_spill] sm:$0xff] %v12761_v44  ;;  %v12763_v48 = vpop.f32.mrf.mxu3  ;;  %5822 = vmatpush.msra.mxu2 %v4724_v1  ;;  %v12778_v4 = vsel %vm644_vm2, %v4467_v50, %v4468_v28  ;;  %v4470_v50 = vrot.slane %v12785_v13, 2 }
 0x793   :  { %17001 = vst [vmem:[#allocation203_spill] sm:$0xff] %v12763_v48  ;;  %5639 = vmatmul.f32.gmra.mxu1 %v12766_v59  ;;  %7440 = vmatmul.msk.f32.gmra.mxu0 %vm11548_vm3, %v16997_v19  ;;  %v4188_v48 = vrot.slane %v11760_v60, 1  ;;  %v4756_v60 = vld [vmem:[#allocation3 + $0x3e8] sm:$0xff] }
 0x794   :  { %5012 = vmatmul.f32.gmra.mxu2 %v12710_v33  ;;  %17004 = vst [vmem:[#allocation204_spill] sm:$0xff] %v12778_v4  ;;  %6240 = vmatpush.msra.mxu0 %v4756_v60  ;;  %v12803_v10 = vsel %vm644_vm2, %v4468_v28, %v4470_v50  ;;  %v12828_v50 = vld [vmem:[#allocation3 + $0x468] sm:$0xff] }
 0x795   :  { %v12794_v1 = vsel %vm488_vm1, %v4186_v41, %v4188_v48  ;;  %17011 = vst [vmem:[#allocation208_spill] sm:$0xff] %v12803_v10  ;;  %v4191_v41 = vrot.slane %v11785_v37, 1  ;;  %v12810_v48 = vsel %vm165_vm0, 0.0, %v11734_v47  ;;  %6449 = vmatpush.msra.mxu1 %v12828_v50 }
 0x796   :  { %v4472_v28 = vrot.slane %v12810_v48, 2 }
 0x797   :  { %v12775_v44 = vpop.f32.mrf.mxu2  ;;  %5317 = vmatmul.f32.gmra.mxu3 %v12778_v4 }
 0x798   :  { %17003 = vst [vmem:[#allocation15_spill] sm:$0xff] %v12775_v44  ;;  %v12787_v33 = vpop.f32.mrf.mxu1  ;;  %v12789_v56 = vpop.f32.mrf.mxu0  ;;  %v4190_v44 = vrot.slane %v11789_v61, 1  ;;  %v4473_v61 = vrot.slane %v11769_v5, 2 }
 0x799   :  { %17007 = vst [vmem:[#allocation42_spill] sm:$0xff] %v12787_v33 }
 0x79a   :  { %17008 = vst [vmem:[#allocation205_spill] sm:$0xff] %v12789_v56  ;;  %v12791_v19 = vpop.f32.mrf.mxu3 }
 0x79b   :  { %17009 = vst [vmem:[#allocation206_spill] sm:$0xff] %v12791_v19  ;;  %5642 = vmatmul.f32.gmra.mxu1 %v12794_v1  ;;  %5523 = vmatmul.f32.gmra.mxu0 %v17002_v23 }
 0x79c   :  { %5015 = vmatmul.f32.gmra.mxu2 %v12741_v17 }
 0x79f   :  { %v12800_v15 = vpop.f32.mrf.mxu2  ;;  %5320 = vmatmul.f32.gmra.mxu3 %v12803_v10 }
 0x7a0   :  { %17010 = vst [vmem:[#allocation207_spill] sm:$0xff] %v12800_v15  ;;  %v12812_v33 = vpop.f32.mrf.mxu1  ;;  %v12814_v19 = vpop.f32.mrf.mxu0  ;;  %v12819_v15 = vsel %vm488_vm1, %v4190_v44, %v4191_v41  ;;  %v12834_v44 = vsel %vm644_vm2, %v4472_v28, %v4473_v61 }
 0x7a1   :  { %17012 = vst [vmem:[#allocation209_spill] sm:$0xff] %v12812_v33 }
 0x7a2   :  { %17013 = vst [vmem:[#allocation210_spill] sm:$0xff] %v12814_v19  ;;  %v12816_v60 = vpop.f32.mrf.mxu3  ;;  %v17017_v19 = vrot.slane %v11744_v27, 7 }
 0x7a3   :  { %17014 = vst [vmem:[#allocation211_spill] sm:$0xff] %v12816_v60  ;;  %5645 = vmatmul.f32.gmra.mxu1 %v12819_v15  ;;  %7442 = vmatmul.msk.f32.gmra.mxu0 %vm11548_vm3, %v11734_v47  ;;  %v4193_v60 = vrot.slane %v11818_v14, 1 }
 0x7a4   :  { %5018 = vmatmul.f32.gmra.mxu2 %v12766_v59  ;;  %17016 = vst [vmem:[#allocation213_spill] sm:$0xff] %v12834_v44  ;;  %v12841_v56 = vsel %vm165_vm0, %v17017_v19, 0.0  ;;  %v4195_v19 = vrot.slane %v11859_v39, 1 }
 0x7a5   :  { %v4475_v28 = vrot.slane %v12841_v56, 2 }
 0x7a7   :  { %v12831_v33 = vpop.f32.mrf.mxu2  ;;  %5323 = vmatmul.f32.gmra.mxu3 %v12834_v44  ;;  %v12859_v14 = vsel %vm644_vm2, %v4473_v61, %v4475_v28  ;;  %v4478_v28 = vrot.slane %v11834_v0, 2 }
 0x7a8   :  { %17015 = vst [vmem:[#allocation212_spill] sm:$0xff] %v12831_v33  ;;  %v12843_v10 = vpop.f32.mrf.mxu1  ;;  %v12845_v4 = vpop.f32.mrf.mxu0  ;;  %v12850_v33 = vsel %vm488_vm1, %v4191_v41, %v4193_v60  ;;  %v12866_v41 = vsel %vm165_vm0, 0.0, %v11791_v3 }
 0x7a9   :  { %17018 = vst [vmem:[#allocation214_spill] sm:$0xff] %v12843_v10  ;;  %v4196_v10 = vrot.slane %v11855_v7, 1  ;;  %v4477_v39 = vrot.slane %v12866_v41, 2 }
 0x7aa   :  { %17019 = vst [vmem:[#allocation215_spill] sm:$0xff] %v12845_v4  ;;  %v12847_v47 = vpop.f32.mrf.mxu3  ;;  %v4739_v4 = vld [vmem:[#allocation3 + $0x360] sm:$0xff] }
 0x7ab   :  { %17020 = vst [vmem:[#allocation216_spill] sm:$0xff] %v12847_v47  ;;  %5648 = vmatmul.f32.gmra.mxu1 %v12850_v33  ;;  %5529 = vmatmul.f32.gmra.mxu0 %v11769_v5  ;;  %v12875_v61 = vsel %vm488_vm1, %v4195_v19, %v4196_v10  ;;  %v12887_v19 = vsel %vm644_vm2, %v4477_v39, %v4478_v28 }
 0x7ac   :  { %5021 = vmatmul.f32.gmra.mxu2 %v12794_v1  ;;  %17022 = vst [vmem:[#allocation218_spill] sm:$0xff] %v12859_v14  ;;  %6032 = vmatpush.msra.mxu3 %v4739_v4  ;;  %v17028_v4 = vrot.slane %v11801_v2, 7  ;;  %v4755_v2 = vld [vmem:[#allocation3 + $0x3e0] sm:$0xff] }
 0x7ad   :  { %17027 = vst [vmem:[#allocation223_spill] sm:$0xff] %v12887_v19  ;;  %6241 = vmatpush.msra.mxu0 %v4755_v2 }
 0x7af   :  { %v12856_v27 = vpop.f32.mrf.mxu2  ;;  %5326 = vmatmul.f32.gmra.mxu3 %v12859_v14 }
 0x7b0   :  { %17021 = vst [vmem:[#allocation217_spill] sm:$0xff] %v12856_v27  ;;  %v12868_v60 = vpop.f32.mrf.mxu1  ;;  %v12870_v47 = vpop.f32.mrf.mxu0  ;;  %v4723_v27 = vld [vmem:[#allocation3 + $0x2e0] sm:$0xff] }
 0x7b1   :  { %17023 = vst [vmem:[#allocation219_spill] sm:$0xff] %v12868_v60  ;;  %5823 = vmatpush.msra.mxu2 %v4723_v27 }
 0x7b2   :  { %17024 = vst [vmem:[#allocation220_spill] sm:$0xff] %v12870_v47  ;;  %v12872_v44 = vpop.f32.mrf.mxu3  ;;  %v12894_v47 = vsel %vm165_vm0, %v17028_v4, 0.0 }
 0x7b3   :  { %17025 = vst [vmem:[#allocation221_spill] sm:$0xff] %v12872_v44  ;;  %5651 = vmatmul.f32.gmra.mxu1 %v12875_v61  ;;  %7444 = vmatmul.msk.f32.gmra.mxu0 %vm11548_vm3, %v11791_v3  ;;  %v4198_v44 = vrot.slane %v11890_v22, 1  ;;  %v4480_v39 = vrot.slane %v12894_v47, 2 }
 0x7b4   :  { %5024 = vmatmul.f32.gmra.mxu2 %v12819_v15 }
 0x7b5   :  { %v12903_v27 = vsel %vm488_vm1, %v4196_v10, %v4198_v44  ;;  %v12912_v4 = vsel %vm644_vm2, %v4478_v28, %v4480_v39  ;;  %v4201_v10 = vrot.slane %v11918_v45, 1  ;;  %v12919_v44 = vsel %vm165_vm0, 0.0, %v11862_v54  ;;  %v12937_v39 = vld [vmem:[#allocation3 + $0x460] sm:$0xff] }
 0x7b6   :  { %17033 = vst [vmem:[#allocation228_spill] sm:$0xff] %v12912_v4  ;;  %v4482_v28 = vrot.slane %v12919_v44, 2  ;;  %6450 = vmatpush.msra.mxu1 %v12937_v39 }
 0x7b7   :  { %v12884_v60 = vpop.f32.mrf.mxu2  ;;  %5329 = vmatmul.f32.gmra.mxu3 %v12887_v19 }
 0x7b8   :  { %17026 = vst [vmem:[#allocation222_spill] sm:$0xff] %v12884_v60  ;;  %v12896_v14 = vpop.f32.mrf.mxu1  ;;  %v12898_v7 = vpop.f32.mrf.mxu0  ;;  %v4200_v60 = vrot.slane %v11922_v31, 1  ;;  %v4483_v31 = vrot.slane %v11900_v8, 2 }
 0x7b9   :  { %17029 = vst [vmem:[#allocation224_spill] sm:$0xff] %v12896_v14 }
 0x7ba   :  { %17030 = vst [vmem:[#allocation225_spill] sm:$0xff] %v12898_v7  ;;  %v12900_v3 = vpop.f32.mrf.mxu3 }
 0x7bb   :  { %17031 = vst [vmem:[#allocation226_spill] sm:$0xff] %v12900_v3  ;;  %5654 = vmatmul.f32.gmra.mxu1 %v12903_v27  ;;  %5535 = vmatmul.f32.gmra.mxu0 %v11834_v0 }
 0x7bc   :  { %5027 = vmatmul.f32.gmra.mxu2 %v12850_v33 }
 0x7bf   :  { %v12909_v22 = vpop.f32.mrf.mxu2  ;;  %5332 = vmatmul.f32.gmra.mxu3 %v12912_v4 }
 0x7c0   :  { %17032 = vst [vmem:[#allocation227_spill] sm:$0xff] %v12909_v22  ;;  %v12921_v14 = vpop.f32.mrf.mxu1  ;;  %v12923_v3 = vpop.f32.mrf.mxu0  ;;  %v12928_v22 = vsel %vm488_vm1, %v4200_v60, %v4201_v10  ;;  %v12943_v60 = vsel %vm644_vm2, %v4482_v28, %v4483_v31 }
 0x7c1   :  { %17034 = vst [vmem:[#allocation229_spill] sm:$0xff] %v12921_v14 }
 0x7c2   :  { %17035 = vst [vmem:[#allocation230_spill] sm:$0xff] %v12923_v3  ;;  %v12925_v2 = vpop.f32.mrf.mxu3  ;;  %v17040_v3 = vld [vmem:[#allocation54_spill] sm:$0xff] }
 0x7c3   :  { %17036 = vst [vmem:[#allocation231_spill] sm:$0xff] %v12925_v2  ;;  %5657 = vmatmul.f32.gmra.mxu1 %v12928_v22  ;;  %7446 = vmatmul.msk.f32.gmra.mxu0 %vm11548_vm3, %v11862_v54  ;;  %v4203_v2 = vrot.slane %v11953_v49, 1  ;;  %v17041_v7 = vrot.slane %v17040_v3, 7 }
 0x7c4   :  { %17037 = vst [vmem:[#allocation232_spill] sm:$0xff] %v12928_v22  ;;  %5030 = vmatmul.f32.gmra.mxu2 %v12875_v61 }
 0x7c5   :  { %17039 = vst [vmem:[#allocation234_spill] sm:$0xff] %v12943_v60  ;;  %v12950_v4 = vsel %vm165_vm0, %v17041_v7, 0.0  ;;  %v4205_v7 = vrot.slane %v11985_v30, 1 }
 0x7c6   :  { %v4485_v28 = vrot.slane %v12950_v4, 2 }
 0x7c7   :  { %v12940_v14 = vpop.f32.mrf.mxu2  ;;  %5335 = vmatmul.f32.gmra.mxu3 %v12943_v60 }
 0x7c8   :  { %17038 = vst [vmem:[#allocation233_spill] sm:$0xff] %v12940_v14  ;;  %v12952_v19 = vpop.f32.mrf.mxu1  ;;  %v12954_v54 = vpop.f32.mrf.mxu0  ;;  %v12959_v14 = vsel %vm488_vm1, %v4201_v10, %v4203_v2  ;;  %v12968_v3 = vsel %vm644_vm2, %v4483_v31, %v4485_v28  ;;  %v12975_v10 = vsel %vm165_vm0, 0.0, %v11925_v42  ;;  %v17052_v28 = vld [vmem:[#allocation62_spill] sm:$0xff] }
 0x7c9   :  { %17042 = vst [vmem:[#allocation54_spill] sm:$0xff] %v12952_v19  ;;  %v4206_v19 = vrot.slane %v11981_v11, 1  ;;  %v4487_v30 = vrot.slane %v12975_v10, 2 }
 0x7ca   :  { %17043 = vst [vmem:[#allocation235_spill] sm:$0xff] %v12954_v54  ;;  %v12956_v45 = vpop.f32.mrf.mxu3  ;;  %v4738_v54 = vld [vmem:[#allocation3 + $0x358] sm:$0xff] }
 0x7cb   :  { %17044 = vst [vmem:[#allocation236_spill] sm:$0xff] %v12956_v45  ;;  %5660 = vmatmul.f32.gmra.mxu1 %v12959_v14  ;;  %5541 = vmatmul.f32.gmra.mxu0 %v11900_v8  ;;  %v12984_v31 = vsel %vm488_vm1, %v4205_v7, %v4206_v19 }
 0x7cc   :  { %5033 = vmatmul.f32.gmra.mxu2 %v12903_v27  ;;  %17046 = vst [vmem:[#allocation238_spill] sm:$0xff] %v12968_v3  ;;  %6033 = vmatpush.msra.mxu3 %v4738_v54  ;;  %v17055_v54 = vld [vmem:[#allocation60_spill] sm:$0xff] }
 0x7cd   :  { %17047 = vst [vmem:[#allocation239_spill] sm:$0xff] %v12975_v10 }
 0x7ce   :  { %17051 = vst [vmem:[#allocation243_spill] sm:$0xff] %v12984_v31 }
 0x7cf   :  { %v12965_v49 = vpop.f32.mrf.mxu2  ;;  %5338 = vmatmul.f32.gmra.mxu3 %v12968_v3  ;;  %v17056_v3 = vrot.slane %v17055_v54, 7 }
 0x7d0   :  { %17045 = vst [vmem:[#allocation237_spill] sm:$0xff] %v12965_v49  ;;  %v12977_v2 = vpop.f32.mrf.mxu1  ;;  %v12979_v45 = vpop.f32.mrf.mxu0  ;;  %v4488_v49 = vrot.slane %v17052_v28, 2 }
 0x7d1   :  { %17048 = vst [vmem:[#allocation240_spill] sm:$0xff] %v12977_v2  ;;  %v4722_v2 = vld [vmem:[#allocation3 + $0x2d8] sm:$0xff]  ;;  %v13003_v11 = vsel %vm165_vm0, %v17056_v3, 0.0 }
 0x7d2   :  { %17049 = vst [vmem:[#allocation241_spill] sm:$0xff] %v12979_v45  ;;  %v12981_v60 = vpop.f32.mrf.mxu3  ;;  %5824 = vmatpush.msra.mxu2 %v4722_v2  ;;  %v12996_v7 = vsel %vm644_vm2, %v4487_v30, %v4488_v49  ;;  %v4490_v30 = vrot.slane %v13003_v11, 2 }
 0x7d3   :  { %17050 = vst [vmem:[#allocation242_spill] sm:$0xff] %v12981_v60  ;;  %5663 = vmatmul.f32.gmra.mxu1 %v12984_v31  ;;  %7448 = vmatmul.msk.f32.gmra.mxu0 %vm11548_vm3, %v11925_v42  ;;  %v4208_v60 = vrot.slane %v12016_v21, 1  ;;  %v4754_v21 = vld [vmem:[#allocation3 + $0x3d8] sm:$0xff] }
 0x7d4   :  { %5036 = vmatmul.f32.gmra.mxu2 %v12928_v22  ;;  %17054 = vst [vmem:[#allocation244_spill] sm:$0xff] %v12996_v7  ;;  %6242 = vmatpush.msra.mxu0 %v4754_v21  ;;  %v13021_v54 = vsel %vm644_vm2, %v4488_v49, %v4490_v30 }
 0x7d5   :  { %v13012_v2 = vsel %vm488_vm1, %v4206_v19, %v4208_v60  ;;  %17062 = vst [vmem:[#allocation249_spill] sm:$0xff] %v13021_v54  ;;  %v4211_v19 = vrot.slane %v12046_v58, 1  ;;  %v17063_v60 = vld [vmem:[#allocation66_spill] sm:$0xff] }
 0x7d6   :  { %17060 = vst [vmem:[#allocation247_spill] sm:$0xff] %v13012_v2 }
 0x7d7   :  { %v12993_v45 = vpop.f32.mrf.mxu2  ;;  %5341 = vmatmul.f32.gmra.mxu3 %v12996_v7 }
 0x7d8   :  { %17053 = vst [vmem:[#allocation62_spill] sm:$0xff] %v12993_v45  ;;  %v13005_v22 = vpop.f32.mrf.mxu1  ;;  %v13007_v10 = vpop.f32.mrf.mxu0  ;;  %v4210_v45 = vrot.slane %v12050_v51, 1  ;;  %v17069_v51 = vld [vmem:[#allocation69_spill] sm:$0xff] }
 0x7d9   :  { %17057 = vst [vmem:[#allocation60_spill] sm:$0xff] %v13005_v22  ;;  %v13028_v22 = vsel %vm165_vm0, 0.0, %v17063_v60  ;;  %v4493_v30 = vrot.slane %v17069_v51, 2 }
 0x7da   :  { %17058 = vst [vmem:[#allocation245_spill] sm:$0xff] %v13007_v10  ;;  %v13009_v42 = vpop.f32.mrf.mxu3  ;;  %v4492_v49 = vrot.slane %v13028_v22, 2 }
 0x7db   :  { %17059 = vst [vmem:[#allocation246_spill] sm:$0xff] %v13009_v42  ;;  %5666 = vmatmul.f32.gmra.mxu1 %v13012_v2  ;;  %5547 = vmatmul.f32.gmra.mxu0 %v17052_v28 }
 0x7dc   :  { %5039 = vmatmul.f32.gmra.mxu2 %v12959_v14  ;;  %17064 = vst [vmem:[#allocation250_spill] sm:$0xff] %v13028_v22 }
 0x7df   :  { %v13018_v3 = vpop.f32.mrf.mxu2  ;;  %5344 = vmatmul.f32.gmra.mxu3 %v13021_v54  ;;  %v17072_v54 = vld [vmem:[#allocation67_spill] sm:$0xff] }
 0x7e0   :  { %17061 = vst [vmem:[#allocation248_spill] sm:$0xff] %v13018_v3  ;;  %v13030_v42 = vpop.f32.mrf.mxu1  ;;  %v13032_v10 = vpop.f32.mrf.mxu0  ;;  %v13037_v3 = vsel %vm488_vm1, %v4210_v45, %v4211_v19  ;;  %v13052_v45 = vsel %vm644_vm2, %v4492_v49, %v4493_v30  ;;  %v17073_v7 = vrot.slane %v17072_v54, 7  ;;  %v4215_v54 = vrot.slane %v12121_v43, 1 }
 0x7e1   :  { %17065 = vst [vmem:[#allocation251_spill] sm:$0xff] %v13030_v42  ;;  %v13046_v42 = vld [vmem:[#allocation3 + $0x458] sm:$0xff] }
 0x7e2   :  { %17066 = vst [vmem:[#allocation252_spill] sm:$0xff] %v13032_v10  ;;  %v13034_v21 = vpop.f32.mrf.mxu3  ;;  %6451 = vmatpush.msra.mxu1 %v13046_v42  ;;  %v4213_v10 = vrot.slane %v12087_v29, 1  ;;  %v13059_v58 = vsel %vm165_vm0, %v17073_v7, 0.0 }
 0x7e3   :  { %17067 = vst [vmem:[#allocation253_spill] sm:$0xff] %v13034_v21  ;;  %5669 = vmatmul.f32.gmra.mxu1 %v13037_v3  ;;  %7450 = vmatmul.msk.f32.gmra.mxu0 %vm11548_vm3, %v17063_v60  ;;  %v4495_v49 = vrot.slane %v13059_v58, 2 }
 0x7e4   :  { %17068 = vst [vmem:[#allocation254_spill] sm:$0xff] %v13037_v3  ;;  %5042 = vmatmul.f32.gmra.mxu2 %v12984_v31 }
 0x7e5   :  { %17071 = vst [vmem:[#allocation255_spill] sm:$0xff] %v13052_v45  ;;  %v13077_v7 = vsel %vm644_vm2, %v4493_v30, %v4495_v49  ;;  %v17085_v49 = vld [vmem:[#allocation80_spill] sm:$0xff] }
 0x7e6   :  { %17078 = vst [vmem:[#allocation259_spill] sm:$0xff] %v13077_v7 }
 0x7e7   :  { %v13049_v21 = vpop.f32.mrf.mxu2  ;;  %5347 = vmatmul.f32.gmra.mxu3 %v13052_v45  ;;  %v4737_v45 = vld [vmem:[#allocation3 + $0x350] sm:$0xff] }
 0x7e8   :  { %17070 = vst [vmem:[#allocation69_spill] sm:$0xff] %v13049_v21  ;;  %v13061_v31 = vpop.f32.mrf.mxu1  ;;  %v13063_v60 = vpop.f32.mrf.mxu0  ;;  %v13068_v21 = vsel %vm488_vm1, %v4211_v19, %v4213_v10  ;;  %v17079_v10 = vld [vmem:[#allocation74_spill] sm:$0xff]  ;;  %6034 = vmatpush.msra.mxu3 %v4737_v45  ;;  %v17088_v45 = vld [vmem:[#allocation76_spill] sm:$0xff] }
 0x7e9   :  { %17074 = vst [vmem:[#allocation67_spill] sm:$0xff] %v13061_v31  ;;  %v4216_v31 = vrot.slane %v12117_v52, 1  ;;  %v13084_v19 = vsel %vm165_vm0, 0.0, %v17079_v10 }
 0x7ea   :  { %17075 = vst [vmem:[#allocation256_spill] sm:$0xff] %v13063_v60  ;;  %v13065_v22 = vpop.f32.mrf.mxu3  ;;  %v4497_v43 = vrot.slane %v13084_v19, 2 }
 0x7eb   :  { %17076 = vst [vmem:[#allocation257_spill] sm:$0xff] %v13065_v22  ;;  %5672 = vmatmul.f32.gmra.mxu1 %v13068_v21  ;;  %5553 = vmatmul.f32.gmra.mxu0 %v17069_v51  ;;  %v13093_v30 = vsel %vm488_vm1, %v4215_v54, %v4216_v31 }
 0x7ec   :  { %5045 = vmatmul.f32.gmra.mxu2 %v13012_v2  ;;  %17080 = vst [vmem:[#allocation260_spill] sm:$0xff] %v13084_v19 }
 0x7ed   :  { %17084 = vst [vmem:[#allocation264_spill] sm:$0xff] %v13093_v30 }
 0x7ef   :  { %v13074_v29 = vpop.f32.mrf.mxu2  ;;  %5350 = vmatmul.f32.gmra.mxu3 %v13077_v7 }
 0x7f0   :  { %17077 = vst [vmem:[#allocation258_spill] sm:$0xff] %v13074_v29  ;;  %v13086_v22 = vpop.f32.mrf.mxu1  ;;  %v13088_v60 = vpop.f32.mrf.mxu0  ;;  %v4498_v29 = vrot.slane %v17085_v49, 2 }
 0x7f1   :  { %17081 = vst [vmem:[#allocation261_spill] sm:$0xff] %v13086_v22  ;;  %v17089_v22 = vrot.slane %v17088_v45, 7 }
 0x7f2   :  { %17082 = vst [vmem:[#allocation262_spill] sm:$0xff] %v13088_v60  ;;  %v13090_v2 = vpop.f32.mrf.mxu3  ;;  %v4721_v60 = vld [vmem:[#allocation3 + $0x2d0] sm:$0xff]  ;;  %v13105_v54 = vsel %vm644_vm2, %v4497_v43, %v4498_v29 }
 0x7f3   :  { %17083 = vst [vmem:[#allocation263_spill] sm:$0xff] %v13090_v2  ;;  %5675 = vmatmul.f32.gmra.mxu1 %v13093_v30  ;;  %7452 = vmatmul.msk.f32.gmra.mxu0 %vm11548_vm3, %v17079_v10  ;;  %v4218_v2 = vrot.slane %v12160_v53, 1  ;;  %v13112_v52 = vsel %vm165_vm0, %v17089_v22, 0.0  ;;  %v4753_v53 = vld [vmem:[#allocation3 + $0x3d0] sm:$0xff] }
 0x7f4   :  { %5048 = vmatmul.f32.gmra.mxu2 %v13037_v3  ;;  %17087 = vst [vmem:[#allocation265_spill] sm:$0xff] %v13105_v54  ;;  %v4500_v43 = vrot.slane %v13112_v52, 2  ;;  %6243 = vmatpush.msra.mxu0 %v4753_v53 }
 0x7f5   :  { %5825 = vmatpush.msra.mxu2 %v4721_v60  ;;  %v13121_v60 = vsel %vm488_vm1, %v4216_v31, %v4218_v2  ;;  %v4221_v31 = vrot.slane %v12196_v36, 1  ;;  %v13137_v2 = vsel %vm165_vm0, 0.0, %v12130_v63 }
 0x7f6   :  { %v13130_v45 = vsel %vm644_vm2, %v4498_v29, %v4500_v43  ;;  %v4502_v29 = vrot.slane %v13137_v2, 2 }
 0x7f7   :  { %v13102_v7 = vpop.f32.mrf.mxu2  ;;  %5353 = vmatmul.f32.gmra.mxu3 %v13105_v54  ;;  %17094 = vst [vmem:[#allocation269_spill] sm:$0xff] %v13130_v45 }
 0x7f8   :  { %17086 = vst [vmem:[#allocation80_spill] sm:$0xff] %v13102_v7  ;;  %v13114_v3 = vpop.f32.mrf.mxu1  ;;  %v13116_v19 = vpop.f32.mrf.mxu0 }
 0x7f9   :  { %17090 = vst [vmem:[#allocation76_spill] sm:$0xff] %v13114_v3 }
 0x7fa   :  { %17091 = vst [vmem:[#allocation266_spill] sm:$0xff] %v13116_v19  ;;  %v13118_v10 = vpop.f32.mrf.mxu3 }
 0x7fb   :  { %17092 = vst [vmem:[#allocation267_spill] sm:$0xff] %v13118_v10  ;;  %5678 = vmatmul.f32.gmra.mxu1 %v13121_v60  ;;  %5559 = vmatmul.f32.gmra.mxu0 %v17085_v49  ;;  %v4220_v10 = vrot.slane %v12200_v32, 1  ;;  %v17099_v32 = vld [vmem:[#allocation95_spill] sm:$0xff] }
 0x7fc   :  { %5051 = vmatmul.f32.gmra.mxu2 %v13068_v21  ;;  %v4503_v43 = vrot.slane %v17099_v32, 2 }
 0x7fd   :  { %v13146_v3 = vsel %vm488_vm1, %v4220_v10, %v4221_v31 }
 0x7fe   :  { %17098 = vst [vmem:[#allocation273_spill] sm:$0xff] %v13146_v3  ;;  %v13161_v10 = vsel %vm644_vm2, %v4502_v29, %v4503_v43 }
 0x7ff   :  { %v13127_v22 = vpop.f32.mrf.mxu2  ;;  %5356 = vmatmul.f32.gmra.mxu3 %v13130_v45  ;;  %v13155_v45 = vld [vmem:[#allocation3 + $0x450] sm:$0xff]  ;;  %17101 = vst [vmem:[#allocation274_spill] sm:$0xff] %v13161_v10 }
 0x800   :  { %17093 = vst [vmem:[#allocation268_spill] sm:$0xff] %v13127_v22  ;;  %v13139_v19 = vpop.f32.mrf.mxu1  ;;  %v13141_v54 = vpop.f32.mrf.mxu0  ;;  %6452 = vmatpush.msra.mxu1 %v13155_v45 }
 0x801   :  { %17095 = vst [vmem:[#allocation270_spill] sm:$0xff] %v13139_v19  ;;  %v17102_v19 = vld [vmem:[#allocation89_spill] sm:$0xff] }
 0x802   :  { %17096 = vst [vmem:[#allocation271_spill] sm:$0xff] %v13141_v54  ;;  %v13143_v53 = vpop.f32.mrf.mxu3  ;;  %v4223_v54 = vrot.slane %v12239_v62, 1  ;;  %v17103_v22 = vrot.slane %v17102_v19, 7 }
 0x803   :  { %17097 = vst [vmem:[#allocation272_spill] sm:$0xff] %v13143_v53  ;;  %5681 = vmatmul.f32.gmra.mxu1 %v13146_v3  ;;  %7454 = vmatmul.msk.f32.gmra.mxu0 %vm11548_vm3, %v12130_v63 }
 0x804   :  { %5054 = vmatmul.f32.gmra.mxu2 %v13093_v30  ;;  %v13168_v7 = vsel %vm165_vm0, %v17103_v22, 0.0  ;;  %v4225_v22 = vrot.slane %v12279_v25, 1 }
 0x805   :  { %v4505_v29 = vrot.slane %v13168_v7, 2 }
 0x807   :  { %v13158_v53 = vpop.f32.mrf.mxu2  ;;  %5359 = vmatmul.f32.gmra.mxu3 %v13161_v10  ;;  %v13186_v19 = vsel %vm644_vm2, %v4503_v43, %v4505_v29  ;;  %v4736_v10 = vld [vmem:[#allocation3 + $0x348] sm:$0xff] }
 0x808   :  { %17100 = vst [vmem:[#allocation95_spill] sm:$0xff] %v13158_v53  ;;  %v13170_v36 = vpop.f32.mrf.mxu1  ;;  %v13172_v63 = vpop.f32.mrf.mxu0  ;;  %v13177_v53 = vsel %vm488_vm1, %v4221_v31, %v4223_v54  ;;  %v13193_v54 = vsel %vm165_vm0, 0.0, %v12207_v20  ;;  %v17114_v29 = vld [vmem:[#allocation110_spill] sm:$0xff]  ;;  %6035 = vmatpush.msra.mxu3 %v4736_v10  ;;  %v17117_v10 = vld [vmem:[#allocation104_spill] sm:$0xff] }
 0x809   :  { %17104 = vst [vmem:[#allocation89_spill] sm:$0xff] %v13170_v36  ;;  %v4507_v25 = vrot.slane %v13193_v54, 2 }
 0x80a   :  { %17105 = vst [vmem:[#allocation275_spill] sm:$0xff] %v13172_v63  ;;  %v13174_v30 = vpop.f32.mrf.mxu3 }
 0x80b   :  { %17106 = vst [vmem:[#allocation276_spill] sm:$0xff] %v13174_v30  ;;  %5684 = vmatmul.f32.gmra.mxu1 %v13177_v53  ;;  %5565 = vmatmul.f32.gmra.mxu0 %v17099_v32  ;;  %v4226_v30 = vrot.slane %v12275_v16, 1 }
 0x80c   :  { %5057 = vmatmul.f32.gmra.mxu2 %v13121_v60  ;;  %17108 = vst [vmem:[#allocation278_spill] sm:$0xff] %v13186_v19 }
 0x80d   :  { %17109 = vst [vmem:[#allocation279_spill] sm:$0xff] %v13193_v54  ;;  %v13202_v43 = vsel %vm488_vm1, %v4225_v22, %v4226_v30 }
 0x80e   :  { %17113 = vst [vmem:[#allocation283_spill] sm:$0xff] %v13202_v43 }
 0x80f   :  { %v13183_v62 = vpop.f32.mrf.mxu2  ;;  %5362 = vmatmul.f32.gmra.mxu3 %v13186_v19 }
 0x810   :  { %17107 = vst [vmem:[#allocation277_spill] sm:$0xff] %v13183_v62  ;;  %v13195_v31 = vpop.f32.mrf.mxu1  ;;  %v13197_v63 = vpop.f32.mrf.mxu0  ;;  %v4508_v62 = vrot.slane %v17114_v29, 2 }
 0x811   :  { %17110 = vst [vmem:[#allocation280_spill] sm:$0xff] %v13195_v31  ;;  %v17118_v31 = vrot.slane %v17117_v10, 7 }
 0x812   :  { %17111 = vst [vmem:[#allocation281_spill] sm:$0xff] %v13197_v63  ;;  %v13199_v36 = vpop.f32.mrf.mxu3  ;;  %v4720_v63 = vld [vmem:[#allocation3 + $0x2c8] sm:$0xff]  ;;  %v13214_v22 = vsel %vm644_vm2, %v4507_v25, %v4508_v62 }
 0x813   :  { %17112 = vst [vmem:[#allocation282_spill] sm:$0xff] %v13199_v36  ;;  %5687 = vmatmul.f32.gmra.mxu1 %v13202_v43  ;;  %7456 = vmatmul.msk.f32.gmra.mxu0 %vm11548_vm3, %v12207_v20  ;;  %v4228_v36 = vrot.slane %v12318_v40, 1  ;;  %v13221_v16 = vsel %vm165_vm0, %v17118_v31, 0.0  ;;  %v4752_v40 = vld [vmem:[#allocation3 + $0x3c8] sm:$0xff] }
 0x814   :  { %5060 = vmatmul.f32.gmra.mxu2 %v13146_v3  ;;  %17116 = vst [vmem:[#allocation284_spill] sm:$0xff] %v13214_v22  ;;  %v4510_v25 = vrot.slane %v13221_v16, 2  ;;  %6244 = vmatpush.msra.mxu0 %v4752_v40 }
 0x815   :  { %5826 = vmatpush.msra.mxu2 %v4720_v63  ;;  %v13230_v63 = vsel %vm488_vm1, %v4226_v30, %v4228_v36  ;;  %v4231_v36 = vrot.slane %v12354_v26, 1  ;;  %v13246_v30 = vsel %vm165_vm0, 0.0, %v12286_v35 }
 0x816   :  { %17122 = vst [vmem:[#allocation287_spill] sm:$0xff] %v13230_v63  ;;  %v13239_v10 = vsel %vm644_vm2, %v4508_v62, %v4510_v25  ;;  %v4512_v62 = vrot.slane %v13246_v30, 2 }
 0x817   :  { %v13211_v19 = vpop.f32.mrf.mxu2  ;;  %5365 = vmatmul.f32.gmra.mxu3 %v13214_v22  ;;  %17124 = vst [vmem:[#allocation289_spill] sm:$0xff] %v13239_v10 }
 0x818   :  { %17115 = vst [vmem:[#allocation110_spill] sm:$0xff] %v13211_v19  ;;  %v13223_v3 = vpop.f32.mrf.mxu1  ;;  %v13225_v54 = vpop.f32.mrf.mxu0 }
 0x819   :  { %17119 = vst [vmem:[#allocation104_spill] sm:$0xff] %v13223_v3 }
 0x81a   :  { %17120 = vst [vmem:[#allocation285_spill] sm:$0xff] %v13225_v54  ;;  %v13227_v20 = vpop.f32.mrf.mxu3 }
 0x81b   :  { %17121 = vst [vmem:[#allocation286_spill] sm:$0xff] %v13227_v20  ;;  %5690 = vmatmul.f32.gmra.mxu1 %v13230_v63  ;;  %5571 = vmatmul.f32.gmra.mxu0 %v17114_v29  ;;  %v4230_v20 = vrot.slane %v12358_v12, 1  ;;  %v17130_v12 = vld [vmem:[#allocation125_spill] sm:$0xff] }
 0x81c   :  { %5063 = vmatmul.f32.gmra.mxu2 %v13177_v53  ;;  %17125 = vst [vmem:[#allocation290_spill] sm:$0xff] %v13246_v30  ;;  %v4513_v25 = vrot.slane %v17130_v12, 2 }
 0x81d   :  { %v13255_v3 = vsel %vm488_vm1, %v4230_v20, %v4231_v36 }
 0x81e   :  { %17129 = vst [vmem:[#allocation294_spill] sm:$0xff] %v13255_v3  ;;  %v13270_v20 = vsel %vm644_vm2, %v4512_v62, %v4513_v25 }
 0x81f   :  { %v13236_v31 = vpop.f32.mrf.mxu2  ;;  %5368 = vmatmul.f32.gmra.mxu3 %v13239_v10  ;;  %v13264_v10 = vld [vmem:[#allocation3 + $0x448] sm:$0xff]  ;;  %17132 = vst [vmem:[#allocation296_spill] sm:$0xff] %v13270_v20 }
 0x820   :  { %17123 = vst [vmem:[#allocation288_spill] sm:$0xff] %v13236_v31  ;;  %v13248_v54 = vpop.f32.mrf.mxu1  ;;  %v13250_v22 = vpop.f32.mrf.mxu0  ;;  %6453 = vmatpush.msra.mxu1 %v13264_v10 }
 0x821   :  { %17126 = vst [vmem:[#allocation291_spill] sm:$0xff] %v13248_v54  ;;  %v17133_v54 = vld [vmem:[#allocation119_spill] sm:$0xff] }
 0x822   :  { %17127 = vst [vmem:[#allocation292_spill] sm:$0xff] %v13250_v22  ;;  %v13252_v40 = vpop.f32.mrf.mxu3  ;;  %v4233_v22 = vrot.slane %v12397_v55, 1  ;;  %v17134_v31 = vrot.slane %v17133_v54, 7 }
 0x823   :  { %17128 = vst [vmem:[#allocation293_spill] sm:$0xff] %v13252_v40  ;;  %5693 = vmatmul.f32.gmra.mxu1 %v13255_v3  ;;  %7458 = vmatmul.msk.f32.gmra.mxu0 %vm11548_vm3, %v12286_v35 }
 0x824   :  { %5066 = vmatmul.f32.gmra.mxu2 %v13202_v43  ;;  %v13277_v19 = vsel %vm165_vm0, %v17134_v31, 0.0  ;;  %v17142_v31 = vld [vmem:[#allocation145_spill] sm:$0xff] }
 0x825   :  { %17135 = vst [vmem:[#allocation119_spill] sm:$0xff] %v13277_v19  ;;  %v4515_v62 = vrot.slane %v13277_v19, 2  ;;  %v4735_v19 = vld [vmem:[#allocation3 + $0x340] sm:$0xff] }
 0x826   :  { %6036 = vmatpush.msra.mxu3 %v4735_v19  ;;  %v17154_v19 = vld [vmem:[#allocation134_spill] sm:$0xff] }
 0x827   :  { %v13267_v40 = vpop.f32.mrf.mxu2  ;;  %5371 = vmatmul.f32.gmra.mxu3 %v13270_v20  ;;  %v13295_v54 = vsel %vm644_vm2, %v4513_v25, %v4515_v62  ;;  %v17143_v20 = vld [vmem:[#allocation144_spill] sm:$0xff] }
 0x828   :  { %17131 = vst [vmem:[#allocation295_spill] sm:$0xff] %v13267_v40  ;;  %v13279_v26 = vpop.f32.mrf.mxu1  ;;  %v13281_v35 = vpop.f32.mrf.mxu0  ;;  %v13286_v40 = vsel %vm488_vm1, %v4231_v36, %v4233_v22  ;;  %v17144_v22 = vld [vmem:[#allocation132_spill] sm:$0xff] }
 0x829   :  { %17136 = vst [vmem:[#allocation297_spill] sm:$0xff] %v13279_v26  ;;  %v13302_v36 = vsel %vm165_vm0, 0.0, %v17144_v22 }
 0x82a   :  { %17137 = vst [vmem:[#allocation298_spill] sm:$0xff] %v13281_v35  ;;  %v13283_v43 = vpop.f32.mrf.mxu3  ;;  %v4235_v35 = vrot.slane %v17142_v31, 1  ;;  %v4517_v62 = vrot.slane %v13302_v36, 2  ;;  %v17150_v31 = vld [vmem:[#allocation140_spill] sm:$0xff] }
 0x82b   :  { %17138 = vst [vmem:[#allocation299_spill] sm:$0xff] %v13283_v43  ;;  %5696 = vmatmul.f32.gmra.mxu1 %v13286_v40  ;;  %5577 = vmatmul.f32.gmra.mxu0 %v17130_v12  ;;  %v4236_v43 = vrot.slane %v17143_v20, 1  ;;  %v17155_v20 = vrot.slane %v17154_v19, 7 }
 0x82c   :  { %17139 = vst [vmem:[#allocation300_spill] sm:$0xff] %v13286_v40  ;;  %5069 = vmatmul.f32.gmra.mxu2 %v13230_v63 }
 0x82d   :  { %17141 = vst [vmem:[#allocation302_spill] sm:$0xff] %v13295_v54  ;;  %v13311_v25 = vsel %vm488_vm1, %v4235_v35, %v4236_v43 }
 0x82e   :  { %17145 = vst [vmem:[#allocation145_spill] sm:$0xff] %v13302_v36 }
 0x82f   :  { %v13292_v55 = vpop.f32.mrf.mxu2  ;;  %5374 = vmatmul.f32.gmra.mxu3 %v13295_v54  ;;  %17149 = vst [vmem:[#allocation306_spill] sm:$0xff] %v13311_v25 }
 0x830   :  { %17140 = vst [vmem:[#allocation301_spill] sm:$0xff] %v13292_v55  ;;  %v13304_v26 = vpop.f32.mrf.mxu1  ;;  %v13306_v63 = vpop.f32.mrf.mxu0  ;;  %v4518_v55 = vrot.slane %v17150_v31, 2 }
 0x831   :  { %17146 = vst [vmem:[#allocation303_spill] sm:$0xff] %v13304_v26 }
 0x832   :  { %17147 = vst [vmem:[#allocation304_spill] sm:$0xff] %v13306_v63  ;;  %v13308_v12 = vpop.f32.mrf.mxu3  ;;  %v4719_v63 = vld [vmem:[#allocation3 + $0x2c0] sm:$0xff]  ;;  %v13323_v35 = vsel %vm644_vm2, %v4517_v62, %v4518_v55 }
 0x833   :  { %17148 = vst [vmem:[#allocation305_spill] sm:$0xff] %v13308_v12  ;;  %5699 = vmatmul.f32.gmra.mxu1 %v13311_v25  ;;  %7460 = vmatmul.msk.f32.gmra.mxu0 %vm11548_vm3, %v17144_v22  ;;  %v17153_v12 = vld [vmem:[#allocation151_spill] sm:$0xff] }
 0x834   :  { %5072 = vmatmul.f32.gmra.mxu2 %v13255_v3  ;;  %17152 = vst [vmem:[#allocation308_spill] sm:$0xff] %v13323_v35  ;;  %v4238_v26 = vrot.slane %v17153_v12, 1  ;;  %v13330_v3 = vsel %vm165_vm0, %v17155_v20, 0.0  ;;  %v4751_v12 = vld [vmem:[#allocation3 + $0x3c0] sm:$0xff] }
 0x835   :  { %5827 = vmatpush.msra.mxu2 %v4719_v63  ;;  %17156 = vst [vmem:[#allocation151_spill] sm:$0xff] %v13330_v3  ;;  %v4520_v62 = vrot.slane %v13330_v3, 2  ;;  %6245 = vmatpush.msra.mxu0 %v4751_v12 }
 0x836   :  { %v13339_v63 = vsel %vm488_vm1, %v4236_v43, %v4238_v26  ;;  %v4241_v26 = vrot.slane %v12512_v46, 1  ;;  %v17164_v43 = vld [vmem:[#allocation148_spill] sm:$0xff] }
 0x837   :  { %v13320_v54 = vpop.f32.mrf.mxu2  ;;  %5377 = vmatmul.f32.gmra.mxu3 %v13323_v35  ;;  %17160 = vst [vmem:[#allocation311_spill] sm:$0xff] %v13339_v63  ;;  %v13348_v19 = vsel %vm644_vm2, %v4518_v55, %v4520_v62  ;;  %v13355_v35 = vsel %vm165_vm0, 0.0, %v17164_v43 }
 0x838   :  { %17151 = vst [vmem:[#allocation307_spill] sm:$0xff] %v13320_v54  ;;  %v13332_v36 = vpop.f32.mrf.mxu1  ;;  %v13334_v30 = vpop.f32.mrf.mxu0  ;;  %v4522_v55 = vrot.slane %v13355_v35, 2 }
 0x839   :  { %17157 = vst [vmem:[#allocation134_spill] sm:$0xff] %v13332_v36 }
 0x83a   :  { %17158 = vst [vmem:[#allocation309_spill] sm:$0xff] %v13334_v30  ;;  %v13336_v22 = vpop.f32.mrf.mxu3  ;;  %v17163_v30 = vld [vmem:[#allocation158_spill] sm:$0xff] }
 0x83b   :  { %17159 = vst [vmem:[#allocation310_spill] sm:$0xff] %v13336_v22  ;;  %5702 = vmatmul.f32.gmra.mxu1 %v13339_v63  ;;  %5583 = vmatmul.f32.gmra.mxu0 %v17150_v31  ;;  %v4240_v22 = vrot.slane %v17163_v30, 1  ;;  %v17170_v30 = vld [vmem:[#allocation154_spill] sm:$0xff] }
 0x83c   :  { %5075 = vmatmul.f32.gmra.mxu2 %v13286_v40  ;;  %17162 = vst [vmem:[#allocation313_spill] sm:$0xff] %v13348_v19  ;;  %v4523_v62 = vrot.slane %v17170_v30, 2  ;;  %v4734_v40 = vld [vmem:[#allocation3 + $0x338] sm:$0xff] }
 0x83d   :  { %17165 = vst [vmem:[#allocation158_spill] sm:$0xff] %v13355_v35  ;;  %6037 = vmatpush.msra.mxu3 %v4734_v40  ;;  %v13411_v40 = vsel %vm165_vm0, 0.0, %v12523_v34 }
 0x83e   :  { %17181 = vst [vmem:[#allocation325_spill] sm:$0xff] %v13411_v40 }
 0x83f   :  { %v13345_v20 = vpop.f32.mrf.mxu2  ;;  %5380 = vmatmul.f32.gmra.mxu3 %v13348_v19  ;;  %v13373_v19 = vld [vmem:[#allocation3 + $0x440] sm:$0xff] }
 0x840   :  { %17161 = vst [vmem:[#allocation312_spill] sm:$0xff] %v13345_v20  ;;  %v13357_v36 = vpop.f32.mrf.mxu1  ;;  %v13359_v54 = vpop.f32.mrf.mxu0  ;;  %v13364_v20 = vsel %vm488_vm1, %v4240_v22, %v4241_v26  ;;  %6454 = vmatpush.msra.mxu1 %v13373_v19  ;;  %v13379_v22 = vsel %vm644_vm2, %v4522_v55, %v4523_v62 }
 0x841   :  { %17166 = vst [vmem:[#allocation314_spill] sm:$0xff] %v13357_v36  ;;  %v17173_v36 = vld [vmem:[#allocation150_spill] sm:$0xff] }
 0x842   :  { %17167 = vst [vmem:[#allocation315_spill] sm:$0xff] %v13359_v54  ;;  %v13361_v12 = vpop.f32.mrf.mxu3  ;;  %v4243_v54 = vrot.slane %v12555_v24, 1  ;;  %v17174_v46 = vrot.slane %v17173_v36, 7  ;;  %v4733_v24 = vld [vmem:[#allocation3 + $0x330] sm:$0xff] }
 0x843   :  { %17168 = vst [vmem:[#allocation316_spill] sm:$0xff] %v13361_v12  ;;  %5705 = vmatmul.f32.gmra.mxu1 %v13364_v20  ;;  %7462 = vmatmul.msk.f32.gmra.mxu0 %vm11548_vm3, %v17164_v43 }
 0x844   :  { %17169 = vst [vmem:[#allocation317_spill] sm:$0xff] %v13364_v20  ;;  %5078 = vmatmul.f32.gmra.mxu2 %v13311_v25  ;;  %v13386_v25 = vsel %vm165_vm0, %v17174_v46, 0.0  ;;  %6038 = vmatpush.msra.mxu3 %v4733_v24  ;;  %v4732_v46 = vld [vmem:[#allocation3 + $0x328] sm:$0xff] }
 0x845   :  { %17172 = vst [vmem:[#allocation319_spill] sm:$0xff] %v13379_v22  ;;  %v4525_v55 = vrot.slane %v13386_v25, 2 }
 0x846   :  { %17175 = vst [vmem:[#allocation150_spill] sm:$0xff] %v13386_v25  ;;  %6039 = vmatpush.msra.mxu3 %v4732_v46 }
 0x847   :  { %v13376_v12 = vpop.f32.mrf.mxu2  ;;  %5383 = vmatmul.f32.gmra.mxu3 %v13379_v22  ;;  %v4731_v22 = vld [vmem:[#allocation3 + $0x320] sm:$0xff] }
 0x848   :  { %17171 = vst [vmem:[#allocation318_spill] sm:$0xff] %v13376_v12  ;;  %v13388_v35 = vpop.f32.mrf.mxu1  ;;  %v13390_v43 = vpop.f32.mrf.mxu0  ;;  %v13395_v12 = vsel %vm488_vm1, %v4241_v26, %v4243_v54  ;;  %v4245_v54 = vrot.slane %v12595_v9, 1  ;;  %v4246_v26 = vrot.slane %v12591_v18, 1  ;;  %v4527_v9 = vrot.slane %v13411_v40, 2  ;;  %6040 = vmatpush.msra.mxu3 %v4731_v22  ;;  %v17188_v22 = vld [vmem:[#allocation177_spill] sm:$0xff]  ;;  %v17189_v40 = vld [vmem:[#allocation163_spill] sm:$0xff] }
 0x849   :  { %17176 = vst [vmem:[#allocation320_spill] sm:$0xff] %v13388_v35  ;;  %v4730_v35 = vld [vmem:[#allocation3 + $0x318] sm:$0xff] }
 0x84a   :  { %17177 = vst [vmem:[#allocation321_spill] sm:$0xff] %v13390_v43  ;;  %v13392_v3 = vpop.f32.mrf.mxu3  ;;  %v13404_v43 = vsel %vm644_vm2, %v4523_v62, %v4525_v55  ;;  %v13420_v62 = vsel %vm488_vm1, %v4245_v54, %v4246_v26  ;;  %v17185_v55 = vld [vmem:[#allocation166_spill] sm:$0xff]  ;;  %6041 = vmatpush.msra.mxu3 %v4730_v35 }
 0x84b   :  { %17178 = vst [vmem:[#allocation322_spill] sm:$0xff] %v13392_v3  ;;  %5708 = vmatmul.f32.gmra.mxu1 %v13395_v12  ;;  %5589 = vmatmul.f32.gmra.mxu0 %v17170_v30  ;;  %v4528_v46 = vrot.slane %v17185_v55, 2  ;;  %v4728_v54 = vld [vmem:[#allocation3 + $0x308] sm:$0xff] }
 0x84c   :  { %5081 = vmatmul.f32.gmra.mxu2 %v13339_v63  ;;  %17180 = vst [vmem:[#allocation324_spill] sm:$0xff] %v13404_v43  ;;  %v17190_v63 = vrot.slane %v17189_v40, 7  ;;  %v4748_v40 = vld [vmem:[#allocation3 + $0x3a8] sm:$0xff] }
 0x84d   :  { %v13432_v18 = vsel %vm644_vm2, %v4527_v9, %v4528_v46 }
 0x84e   :  { %17187 = vst [vmem:[#allocation330_spill] sm:$0xff] %v13432_v18 }
 0x84f   :  { %v13401_v36 = vpop.f32.mrf.mxu2  ;;  %5386 = vmatmul.f32.gmra.mxu3 %v13404_v43  ;;  %v4729_v43 = vld [vmem:[#allocation3 + $0x310] sm:$0xff] }
 0x850   :  { %17179 = vst [vmem:[#allocation323_spill] sm:$0xff] %v13401_v36  ;;  %v13413_v3 = vpop.f32.mrf.mxu1  ;;  %v13415_v24 = vpop.f32.mrf.mxu0  ;;  %6042 = vmatpush.msra.mxu3 %v4729_v43 }
 0x851   :  { %17182 = vst [vmem:[#allocation326_spill] sm:$0xff] %v13413_v3 }
 0x852   :  { %17183 = vst [vmem:[#allocation327_spill] sm:$0xff] %v13415_v24  ;;  %v13417_v36 = vpop.f32.mrf.mxu3  ;;  %v4718_v24 = vld [vmem:[#allocation3 + $0x2b8] sm:$0xff]  ;;  %6043 = vmatpush.msra.mxu3 %v4728_v54 }
 0x853   :  { %17184 = vst [vmem:[#allocation328_spill] sm:$0xff] %v13417_v36  ;;  %5711 = vmatmul.f32.gmra.mxu1 %v13420_v62  ;;  %7464 = vmatmul.msk.f32.gmra.mxu0 %vm11548_vm3, %v12523_v34  ;;  %v4750_v36 = vld [vmem:[#allocation3 + $0x3b8] sm:$0xff]  ;;  %v13439_v34 = vsel %vm165_vm0, %v17190_v63, 0.0  ;;  %v17194_v63 = vld [vmem:[#allocation185_spill] sm:$0xff] }
 0x854   :  { %5084 = vmatmul.f32.gmra.mxu2 %v13364_v20  ;;  %6246 = vmatpush.msra.mxu0 %v4750_v36  ;;  %v4248_v20 = vrot.slane %v17188_v22, 1  ;;  %v4727_v36 = vld [vmem:[#allocation3 + $0x300] sm:$0xff]  ;;  %v4530_v43 = vrot.slane %v13439_v34, 2  ;;  %v13455_v54 = vsel %vm165_vm0, 0.0, %v17194_v63 }
 0x855   :  { %5828 = vmatpush.msra.mxu2 %v4718_v24  ;;  %6044 = vmatpush.msra.mxu3 %v4727_v36  ;;  %17195 = vst [vmem:[#allocation332_spill] sm:$0xff] %v13455_v54  ;;  %v4747_v22 = vld [vmem:[#allocation3 + $0x3a0] sm:$0xff]  ;;  %v17198_v36 = vld [vmem:[#allocation191_spill] sm:$0xff] }
 0x856   :  { %v13448_v9 = vsel %vm488_vm1, %v4246_v26, %v4248_v20  ;;  %v13461_v26 = vsel %vm644_vm2, %v4528_v46, %v4530_v43 }
 0x857   :  { %v13429_v3 = vpop.f32.mrf.mxu2  ;;  %5389 = vmatmul.f32.gmra.mxu3 %v13432_v18  ;;  %17197 = vst [vmem:[#allocation334_spill] sm:$0xff] %v13461_v26  ;;  %v4746_v18 = vld [vmem:[#allocation3 + $0x398] sm:$0xff] }
 0x858   :  { %17186 = vst [vmem:[#allocation329_spill] sm:$0xff] %v13429_v3  ;;  %v13441_v35 = vpop.f32.mrf.mxu1  ;;  %v13443_v24 = vpop.f32.mrf.mxu0  ;;  %v4749_v3 = vld [vmem:[#allocation3 + $0x3b0] sm:$0xff] }
 0x859   :  { %17191 = vst [vmem:[#allocation177_spill] sm:$0xff] %v13441_v35  ;;  %6247 = vmatpush.msra.mxu0 %v4749_v3  ;;  %v4603_v3 = vrot.slane %v13455_v54, 1  ;;  %v17199_v35 = vld [vmem:[#allocation172_spill] sm:$0xff]  ;;  %v4745_v54 = vld [vmem:[#allocation3 + $0x390] sm:$0xff] }
 0x85a   :  { %17192 = vst [vmem:[#allocation163_spill] sm:$0xff] %v13443_v24  ;;  %v13445_v25 = vpop.f32.mrf.mxu3  ;;  %v4604_v24 = vrot.slane %v17198_v36, 1  ;;  %v13469_v63 = vsel %vm165_vm0, 0.0, %v17199_v35 }
 0x85b   :  { %17193 = vst [vmem:[#allocation331_spill] sm:$0xff] %v13445_v25  ;;  %5714 = vmatmul.f32.gmra.mxu1 %v13448_v9  ;;  %5595 = vmatmul.f32.gmra.mxu0 %v17185_v55  ;;  %v7611_v25 = vld [vmem:[#allocation3 + $0x478] sm:$0xff] }
 0x85c   :  { %5087 = vmatmul.f32.gmra.mxu2 %v13395_v12  ;;  %7554 = vmatpush.msrb.mxu3 %v7611_v25 }
 0x85d   :  { %6248 = vmatpush.msra.mxu0 %v4748_v40  ;;  %v13479_v40 = vsel %vm488_vm1, %v4603_v3, %v4604_v24  ;;  %v4744_v3 = vld [vmem:[#allocation3 + $0x388] sm:$0xff] }
 0x85e   :  { %7555 = vmatpush.msrb.mxu3 %v12719_v38  ;;  %17203 = vst [vmem:[#allocation337_spill] sm:$0xff] %v13479_v40  ;;  %v4532_v38 = vrot.slane %v13469_v63, 2 }
 0x85f   :  { %v13458_v20 = vpop.f32.mrf.mxu2  ;;  %5392 = vmatmul.f32.gmra.mxu3 %v13461_v26  ;;  %6249 = vmatpush.msra.mxu0 %v4747_v22  ;;  %v17204_v26 = vld [vmem:[#allocation181_spill] sm:$0xff] }
 0x860   :  { %17196 = vst [vmem:[#allocation333_spill] sm:$0xff] %v13458_v20  ;;  %v13471_v25 = vpop.f32.mrf.mxu1  ;;  %7556 = vmatpush.msrb.mxu3 %v12828_v50  ;;  %v13474_v46 = vpop.f32.mrf.mxu0  ;;  %v4533_v20 = vrot.slane %v17204_v26, 2  ;;  %v17205_v50 = vld [vmem:[#allocation186_spill] sm:$0xff] }
 0x861   :  { %17200 = vst [vmem:[#allocation191_spill] sm:$0xff] %v13471_v25  ;;  %6250 = vmatpush.msra.mxu0 %v4746_v18  ;;  %v17206_v22 = vrot.slane %v17205_v50, 7  ;;  %v4743_v25 = vld [vmem:[#allocation3 + $0x380] sm:$0xff] }
 0x862   :  { %17201 = vst [vmem:[#allocation335_spill] sm:$0xff] %v13474_v46  ;;  %v13476_v43 = vpop.f32.mrf.mxu3  ;;  %7557 = vmatpush.msrb.mxu3 %v12937_v39  ;;  %v13498_v46 = vsel %vm644_vm2, %v4532_v38, %v4533_v20 }
 0x863   :  { %17202 = vst [vmem:[#allocation336_spill] sm:$0xff] %v13476_v43  ;;  %5717 = vmatmul.f32.gmra.mxu1 %v13479_v40  ;;  %v13489_v18 = vsel %vm165_vm0, %v17206_v22, 0.0  ;;  %7466 = vmatmul.msk.f32.gmra.mxu0 %vm11548_vm3, %v17199_v35  ;;  %v4766_v43 = vld [vmem:[#allocation3 + $0x438] sm:$0xff]  ;;  %v17210_v22 = vld [vmem:[#allocation174_spill] sm:$0xff] }
 0x864   :  { %5090 = vmatmul.f32.gmra.mxu2 %v13420_v62  ;;  %17207 = vst [vmem:[#allocation181_spill] sm:$0xff] %v13489_v18  ;;  %7558 = vmatpush.msrb.mxu3 %v13046_v42  ;;  %v4606_v50 = vrot.slane %v13489_v18, 1  ;;  %v17211_v35 = vrot.slane %v17210_v22, 7 }
 0x865   :  { %6251 = vmatpush.msra.mxu0 %v4745_v54  ;;  %6455 = vmatpush.msra.mxu1 %v4766_v43  ;;  %17209 = vst [vmem:[#allocation338_spill] sm:$0xff] %v13498_v46 }
 0x866   :  { %7559 = vmatpush.msrb.mxu3 %v13155_v45  ;;  %v13506_v40 = vsel %vm165_vm0, %v17211_v35, 0.0  ;;  %v17215_v35 = vld [vmem:[#allocation41_spill] sm:$0xff] }
 0x867   :  { %v13495_v39 = vpop.f32.mrf.mxu2  ;;  %5395 = vmatmul.f32.gmra.mxu3 %v13498_v46  ;;  %6252 = vmatpush.msra.mxu0 %v4744_v3  ;;  %v4535_v45 = vrot.slane %v13506_v40, 2  ;;  %v17216_v3 = vld [vmem:[#allocation21_spill] sm:$0xff]  ;;  %vm3664_vm6 = vcmp.ge.f32.partialorder %v17215_v35, 0.0 }
 0x868   :  { %17208 = vst [vmem:[#allocation186_spill] sm:$0xff] %v13495_v39  ;;  %v13508_v42 = vpop.f32.mrf.mxu1  ;;  %7560 = vmatpush.msrb.mxu3 %v13264_v10  ;;  %v13511_v54 = vpop.f32.mrf.mxu0  ;;  %v13516_v39 = vsel %vm488_vm1, %v4604_v24, %v4606_v50  ;;  %v3729_v22 = vmul.f32 %v17216_v3, %v17215_v35 }
 0x869   :  { %17212 = vst [vmem:[#allocation174_spill] sm:$0xff] %v13508_v42  ;;  %6253 = vmatpush.msra.mxu0 %v4743_v25  ;;  %v13529_v24 = vsel %vm644_vm2, %v4533_v20, %v4535_v45  ;;  %v17219_v25 = vld [vmem:[#allocation24_spill] sm:$0xff] }
 0x86a   :  { %17213 = vst [vmem:[#allocation339_spill] sm:$0xff] %v13511_v54  ;;  %v13513_v38 = vpop.f32.mrf.mxu3  ;;  %7561 = vmatpush.msrb.mxu3 %v13373_v19  ;;  %v4250_v50 = vrot.slane %v17219_v25, 1  ;;  %v4251_v19 = vrot.slane %v16984_v6, 1  ;;  %v17220_v54 = vld [vmem:[#allocation34_spill] sm:$0xff]  ;;  %v4717_v25 = vld [vmem:[#allocation3 + $0x2b0] sm:$0xff] }
 0x86b   :  { %17214 = vst [vmem:[#allocation340_spill] sm:$0xff] %v13513_v38  ;;  %5720 = vmatmul.f32.gmra.mxu1 %v13516_v39  ;;  %5601 = vmatmul.f32.gmra.mxu0 %v17204_v26  ;;  %v3793_v38 = vsel %vm3664_vm6, %v17215_v35, %v3729_v22  ;;  %v3730_v46 = vmul.f32 %v17216_v3, %v17220_v54  ;;  %vm3665_vm7 = vcmp.ge.f32.partialorder %v17220_v54, 0.0  ;;  %v17225_v6 = vld [vmem:[#allocation10_spill] sm:$0xff]  ;;  %v17227_v3 = vld [vmem:[#allocation43_spill] sm:$0xff] }
 0x86c   :  { %5093 = vmatmul.f32.gmra.mxu2 %v13448_v9  ;;  %7562 = vmatpush.msrb.mxu3 %v4766_v43  ;;  %17218 = vst [vmem:[#allocation341_spill] sm:$0xff] %v13529_v24  ;;  %v13544_v20 = vrot.slane %v3793_v38, 7  ;;  %v4252_v45 = vsel %vm488_vm1, %v4250_v50, %v4251_v19  ;;  %v17228_v38 = vld [vmem:[#allocation23_spill] sm:$0xff] }
 0x86d   :  { %v13552_v35 = vsel %vm3665_vm7, %v17220_v54, %v3730_v46  ;;  %5829 = vmatpush.msra.mxu2 %v4717_v25  ;;  %v17232_v54 = vld [vmem:[#allocation11_spill] sm:$0xff] }
 0x86e   :  { %17224 = vst [vmem:[#allocation343_spill] sm:$0xff] %v13544_v20  ;;  %v16527_v50 = vrot.slane %v13552_v35, 7 }
 0x86f   :  { %v13526_v10 = vpop.f32.mrf.mxu2  ;;  %5398 = vmatmul.f32.gmra.mxu3 %v13529_v24 }
 0x870   :  { %17217 = vst [vmem:[#allocation41_spill] sm:$0xff] %v13526_v10  ;;  %v13537_v42 = vpop.f32.mrf.mxu1  ;;  %v13539_v18 = vpop.f32.mrf.mxu0  ;;  %v17240_v10 = vld [vmem:[#allocation195_spill] sm:$0xff] }
 0x871   :  { %17221 = vst [vmem:[#allocation24_spill] sm:$0xff] %v13537_v42 }
 0x872   :  { %17222 = vst [vmem:[#allocation34_spill] sm:$0xff] %v13539_v18  ;;  %v13542_v43 = vpop.f32.mrf.mxu3 }
 0x873   :  { %17223 = vst [vmem:[#allocation342_spill] sm:$0xff] %v13542_v43  ;;  %5723 = vmatmul.f32.gmra.mxu1 %v4252_v45  ;;  %7468 = vmatmul.msk.f32.gmra.mxu0 %vm11548_vm3, %v13544_v20  ;;  %v4253_v43 = vrot.slane %v17227_v3, 1  ;;  %v13573_v3 = vsel %vm165_vm0, %v13544_v20, %v16527_v50 }
 0x874   :  { %5096 = vmatmul.f32.gmra.mxu2 %v17225_v6  ;;  %17233 = vst [vmem:[#allocation346_spill] sm:$0xff] %v13573_v3 }
 0x875   :  { %v4254_v46 = vsel %vm488_vm1, %v4251_v19, %v4253_v43 }
 0x877   :  { %v13554_v22 = vpop.f32.mrf.mxu2  ;;  %7470 = vmatmul.msk.f32.vlgmr.msra.gmra.mxu3 %vm11548_vm3, %v17228_v38  ;;  %v17235_v38 = vld [vmem:[#allocation45_spill] sm:$0xff] }
 0x878   :  { %17226 = vst [vmem:[#allocation344_spill] sm:$0xff] %v13554_v22  ;;  %v13561_v18 = vpop.f32.mrf.mxu1  ;;  %v13563_v24 = vpop.f32.mrf.mxu0 }
 0x879   :  { %17229 = vst [vmem:[#allocation43_spill] sm:$0xff] %v13561_v18  ;;  %v4255_v18 = vrot.slane %v17235_v38, 1 }
 0x87a   :  { %17230 = vst [vmem:[#allocation23_spill] sm:$0xff] %v13563_v24  ;;  %v13565_v42 = vpop.f32.mrf.mxu3  ;;  %v4256_v24 = vrot.slane %v17002_v23, 1 }
 0x87b   :  { %17231 = vst [vmem:[#allocation345_spill] sm:$0xff] %v13565_v42  ;;  %5726 = vmatmul.f32.gmra.mxu1 %v4254_v46  ;;  %5607 = vmatmul.f32.gmra.mxu0 %v13573_v3  ;;  %v17236_v42 = vld [vmem:[#allocation19_spill] sm:$0xff] }
 0x87c   :  { %5099 = vmatmul.f32.gmra.mxu2 %v17232_v54  ;;  %v13588_v50 = vsel %vm488_vm1, %v4255_v18, %v4256_v24 }
 0x87f   :  { %v13576_v25 = vpop.f32.mrf.mxu2  ;;  %6048 = vmatmul.f32.gmra.mxu3 %v17236_v42  ;;  %v4258_v42 = vrot.slane %v12785_v13, 1  ;;  %v4260_v13 = vrot.slane %v12810_v48, 1 }
 0x880   :  { %17234 = vst [vmem:[#allocation347_spill] sm:$0xff] %v13576_v25  ;;  %v13581_v19 = vpop.f32.mrf.mxu1  ;;  %v13583_v43 = vpop.f32.mrf.mxu0  ;;  %v4765_v25 = vld [vmem:[#allocation3 + $0x430] sm:$0xff] }
 0x881   :  { %17237 = vst [vmem:[#allocation45_spill] sm:$0xff] %v13581_v19  ;;  %6456 = vmatpush.msra.mxu1 %v4765_v25  ;;  %7563 = vmatpush.msrb.mxu3 %v4765_v25  ;;  %v17242_v19 = vld [vmem:[#allocation44_spill] sm:$0xff]  ;;  %v4261_v25 = vrot.slane %v11769_v5, 1 }
 0x882   :  { %17238 = vst [vmem:[#allocation19_spill] sm:$0xff] %v13583_v43  ;;  %v13585_v22 = vpop.f32.mrf.mxu3  ;;  %v13605_v43 = vsel %vm488_vm1, %v4256_v24, %v4258_v42  ;;  %v17252_v42 = vld [vmem:[#allocation27_spill] sm:$0xff] }
 0x883   :  { %17239 = vst [vmem:[#allocation348_spill] sm:$0xff] %v13585_v22  ;;  %5729 = vmatmul.f32.gmra.mxu1 %v13588_v50  ;;  %6254 = vmatmul.f32.vlgmr.msra.gmra.mxu0 %v17240_v10  ;;  %v13621_v24 = vsel %vm488_vm1, %v4260_v13, %v4261_v25 }
 0x884   :  { %5102 = vmatmul.f32.gmra.mxu2 %v4252_v45 }
 0x887   :  { %v13592_v38 = vpop.f32.mrf.mxu2  ;;  %7472 = vmatmul.msk.f32.gmra.mxu3 %vm11548_vm3, %v17242_v19  ;;  %v17247_v19 = vld [vmem:[#allocation16_spill] sm:$0xff] }
 0x888   :  { %17241 = vst [vmem:[#allocation195_spill] sm:$0xff] %v13592_v38  ;;  %v13598_v22 = vpop.f32.mrf.mxu1  ;;  %v13600_v18 = vpop.f32.mrf.mxu0 }
 0x889   :  { %17243 = vst [vmem:[#allocation44_spill] sm:$0xff] %v13598_v22 }
 0x88a   :  { %17244 = vst [vmem:[#allocation349_spill] sm:$0xff] %v13600_v18  ;;  %v13602_v45 = vpop.f32.mrf.mxu3 }
 0x88b   :  { %17245 = vst [vmem:[#allocation350_spill] sm:$0xff] %v13602_v45  ;;  %5732 = vmatmul.f32.gmra.mxu1 %v13605_v43  ;;  %6257 = vmatmul.f32.gmra.mxu0 %v12741_v17  ;;  %v4716_v17 = vld [vmem:[#allocation3 + $0x2a8] sm:$0xff] }
 0x88c   :  { %5105 = vmatmul.f32.gmra.mxu2 %v4254_v46  ;;  %v4263_v46 = vrot.slane %v12841_v56, 1 }
 0x88d   :  { %5830 = vmatpush.msra.mxu2 %v4716_v17  ;;  %v4266_v17 = vrot.slane %v11834_v0, 1 }
 0x88f   :  { %v13609_v10 = vpop.f32.mrf.mxu2  ;;  %6054 = vmatmul.f32.gmra.mxu3 %v17247_v19 }
 0x890   :  { %17246 = vst [vmem:[#allocation351_spill] sm:$0xff] %v13609_v10  ;;  %v13614_v22 = vpop.f32.mrf.mxu1  ;;  %v13616_v18 = vpop.f32.mrf.mxu0 }
 0x891   :  { %17248 = vst [vmem:[#allocation16_spill] sm:$0xff] %v13614_v22 }
 0x892   :  { %17249 = vst [vmem:[#allocation352_spill] sm:$0xff] %v13616_v18  ;;  %v13618_v45 = vpop.f32.mrf.mxu3  ;;  %v13639_v18 = vsel %vm488_vm1, %v4261_v25, %v4263_v46 }
 0x893   :  { %17250 = vst [vmem:[#allocation353_spill] sm:$0xff] %v13618_v45  ;;  %5735 = vmatmul.f32.gmra.mxu1 %v13621_v24  ;;  %6260 = vmatmul.f32.gmra.mxu0 %v12766_v59  ;;  %v4265_v59 = vrot.slane %v12866_v41, 1 }
 0x894   :  { %5108 = vmatmul.f32.gmra.mxu2 %v13588_v50 }
 0x895   :  { %v13656_v46 = vsel %vm488_vm1, %v4265_v59, %v4266_v17 }
 0x897   :  { %v13626_v48 = vpop.f32.mrf.mxu2  ;;  %7474 = vmatmul.msk.f32.gmra.mxu3 %vm11548_vm3, %v17252_v42 }
 0x898   :  { %17251 = vst [vmem:[#allocation354_spill] sm:$0xff] %v13626_v48  ;;  %v13632_v19 = vpop.f32.mrf.mxu1  ;;  %v13634_v13 = vpop.f32.mrf.mxu0 }
 0x899   :  { %17253 = vst [vmem:[#allocation27_spill] sm:$0xff] %v13632_v19 }
 0x89a   :  { %17254 = vst [vmem:[#allocation355_spill] sm:$0xff] %v13634_v13  ;;  %v13636_v45 = vpop.f32.mrf.mxu3  ;;  %v17261_v13 = vld [vmem:[#allocation50_spill] sm:$0xff] }
 0x89b   :  { %17255 = vst [vmem:[#allocation356_spill] sm:$0xff] %v13636_v45  ;;  %5738 = vmatmul.f32.gmra.mxu1 %v13639_v18  ;;  %6263 = vmatmul.f32.gmra.mxu0 %v12794_v1  ;;  %v4764_v1 = vld [vmem:[#allocation3 + $0x428] sm:$0xff] }
 0x89c   :  { %5111 = vmatmul.f32.gmra.mxu2 %v13605_v43  ;;  %6457 = vmatpush.msra.mxu1 %v4764_v1 }
 0x89d   :  { %7564 = vmatpush.msrb.mxu3 %v4764_v1  ;;  %v17266_v1 = vld [vmem:[#allocation52_spill] sm:$0xff] }
 0x89f   :  { %v13644_v56 = vpop.f32.mrf.mxu2  ;;  %6060 = vmatmul.f32.gmra.mxu3 %v11785_v37  ;;  %v4268_v37 = vrot.slane %v12894_v47, 1 }
 0x8a0   :  { %17256 = vst [vmem:[#allocation357_spill] sm:$0xff] %v13644_v56  ;;  %v13649_v42 = vpop.f32.mrf.mxu1  ;;  %v13651_v45 = vpop.f32.mrf.mxu0 }
 0x8a1   :  { %17257 = vst [vmem:[#allocation358_spill] sm:$0xff] %v13649_v42  ;;  %v13674_v42 = vsel %vm488_vm1, %v4266_v17, %v4268_v37 }
 0x8a2   :  { %17258 = vst [vmem:[#allocation359_spill] sm:$0xff] %v13651_v45  ;;  %v13653_v25 = vpop.f32.mrf.mxu3 }
 0x8a3   :  { %17259 = vst [vmem:[#allocation360_spill] sm:$0xff] %v13653_v25  ;;  %5741 = vmatmul.f32.gmra.mxu1 %v13656_v46  ;;  %6266 = vmatmul.f32.gmra.mxu0 %v12819_v15  ;;  %v4270_v15 = vrot.slane %v12919_v44, 1 }
 0x8a4   :  { %5114 = vmatmul.f32.gmra.mxu2 %v13621_v24 }
 0x8a7   :  { %v13661_v41 = vpop.f32.mrf.mxu2  ;;  %7476 = vmatmul.msk.f32.gmra.mxu3 %vm11548_vm3, %v17261_v13  ;;  %v4271_v13 = vrot.slane %v11900_v8, 1 }
 0x8a8   :  { %17260 = vst [vmem:[#allocation361_spill] sm:$0xff] %v13661_v41  ;;  %v13667_v25 = vpop.f32.mrf.mxu1  ;;  %v13669_v59 = vpop.f32.mrf.mxu0 }
 0x8a9   :  { %17262 = vst [vmem:[#allocation50_spill] sm:$0xff] %v13667_v25  ;;  %v13691_v37 = vsel %vm488_vm1, %v4270_v15, %v4271_v13 }
 0x8aa   :  { %17263 = vst [vmem:[#allocation362_spill] sm:$0xff] %v13669_v59  ;;  %v13671_v45 = vpop.f32.mrf.mxu3 }
 0x8ab   :  { %17264 = vst [vmem:[#allocation363_spill] sm:$0xff] %v13671_v45  ;;  %5744 = vmatmul.f32.gmra.mxu1 %v13674_v42  ;;  %6269 = vmatmul.f32.gmra.mxu0 %v12850_v33  ;;  %v4715_v33 = vld [vmem:[#allocation3 + $0x2a0] sm:$0xff] }
 0x8ac   :  { %5117 = vmatmul.f32.gmra.mxu2 %v13639_v18 }
 0x8ad   :  { %5831 = vmatpush.msra.mxu2 %v4715_v33 }
 0x8af   :  { %v13679_v47 = vpop.f32.mrf.mxu2  ;;  %6066 = vmatmul.f32.gmra.mxu3 %v17266_v1  ;;  %v4273_v1 = vrot.slane %v12950_v4, 1  ;;  %v17276_v4 = vld [vmem:[#allocation239_spill] sm:$0xff] }
 0x8b0   :  { %17265 = vst [vmem:[#allocation364_spill] sm:$0xff] %v13679_v47  ;;  %v13684_v59 = vpop.f32.mrf.mxu1  ;;  %v13686_v45 = vpop.f32.mrf.mxu0  ;;  %v4275_v33 = vrot.slane %v17276_v4, 1  ;;  %v4763_v4 = vld [vmem:[#allocation3 + $0x420] sm:$0xff] }
 0x8b1   :  { %17267 = vst [vmem:[#allocation52_spill] sm:$0xff] %v13684_v59  ;;  %v17271_v59 = vld [vmem:[#allocation56_spill] sm:$0xff]  ;;  %v13709_v25 = vsel %vm488_vm1, %v4271_v13, %v4273_v1  ;;  %6458 = vmatpush.msra.mxu1 %v4763_v4  ;;  %7565 = vmatpush.msrb.mxu3 %v4763_v4 }
 0x8b2   :  { %17268 = vst [vmem:[#allocation365_spill] sm:$0xff] %v13686_v45  ;;  %v13688_v17 = vpop.f32.mrf.mxu3 }
 0x8b3   :  { %17269 = vst [vmem:[#allocation366_spill] sm:$0xff] %v13688_v17  ;;  %5747 = vmatmul.f32.gmra.mxu1 %v13691_v37  ;;  %6272 = vmatmul.f32.gmra.mxu0 %v12875_v61 }
 0x8b4   :  { %5120 = vmatmul.f32.gmra.mxu2 %v13656_v46 }
 0x8b7   :  { %v13696_v44 = vpop.f32.mrf.mxu2  ;;  %7478 = vmatmul.msk.f32.gmra.mxu3 %vm11548_vm3, %v17271_v59  ;;  %v4276_v59 = vrot.slane %v17052_v28, 1 }
 0x8b8   :  { %17270 = vst [vmem:[#allocation367_spill] sm:$0xff] %v13696_v44  ;;  %v13702_v45 = vpop.f32.mrf.mxu1  ;;  %v13704_v15 = vpop.f32.mrf.mxu0 }
 0x8b9   :  { %17272 = vst [vmem:[#allocation56_spill] sm:$0xff] %v13702_v45  ;;  %v17277_v45 = vld [vmem:[#allocation58_spill] sm:$0xff]  ;;  %v13726_v1 = vsel %vm488_vm1, %v4275_v33, %v4276_v59 }
 0x8ba   :  { %17273 = vst [vmem:[#allocation368_spill] sm:$0xff] %v13704_v15  ;;  %v13706_v17 = vpop.f32.mrf.mxu3 }
 0x8bb   :  { %17274 = vst [vmem:[#allocation369_spill] sm:$0xff] %v13706_v17  ;;  %5750 = vmatmul.f32.gmra.mxu1 %v13709_v25  ;;  %6275 = vmatmul.f32.gmra.mxu0 %v12903_v27  ;;  %v17281_v27 = vld [vmem:[#allocation232_spill] sm:$0xff] }
 0x8bc   :  { %5123 = vmatmul.f32.gmra.mxu2 %v13674_v42 }
 0x8bf   :  { %v13714_v61 = vpop.f32.mrf.mxu2  ;;  %6072 = vmatmul.f32.gmra.mxu3 %v17277_v45  ;;  %v4278_v45 = vrot.slane %v13003_v11, 1 }
 0x8c0   :  { %17275 = vst [vmem:[#allocation370_spill] sm:$0xff] %v13714_v61  ;;  %v13719_v15 = vpop.f32.mrf.mxu1  ;;  %v13721_v17 = vpop.f32.mrf.mxu0 }
 0x8c1   :  { %17278 = vst [vmem:[#allocation239_spill] sm:$0xff] %v13719_v15  ;;  %v17283_v15 = vld [vmem:[#allocation63_spill] sm:$0xff]  ;;  %v13744_v44 = vsel %vm488_vm1, %v4276_v59, %v4278_v45 }
 0x8c2   :  { %17279 = vst [vmem:[#allocation58_spill] sm:$0xff] %v13721_v17  ;;  %v13723_v13 = vpop.f32.mrf.mxu3 }
 0x8c3   :  { %17280 = vst [vmem:[#allocation371_spill] sm:$0xff] %v13723_v13  ;;  %5753 = vmatmul.f32.gmra.mxu1 %v13726_v1  ;;  %6278 = vmatmul.f32.gmra.mxu0 %v17281_v27  ;;  %v17288_v27 = vld [vmem:[#allocation250_spill] sm:$0xff] }
 0x8c4   :  { %5126 = vmatmul.f32.gmra.mxu2 %v13691_v37  ;;  %v4280_v4 = vrot.slane %v17288_v27, 1 }
 0x8c7   :  { %v13731_v61 = vpop.f32.mrf.mxu2  ;;  %7480 = vmatmul.msk.f32.gmra.mxu3 %vm11548_vm3, %v17283_v15  ;;  %v4281_v15 = vrot.slane %v17069_v51, 1 }
 0x8c8   :  { %17282 = vst [vmem:[#allocation232_spill] sm:$0xff] %v13731_v61  ;;  %v13737_v17 = vpop.f32.mrf.mxu1  ;;  %v13739_v33 = vpop.f32.mrf.mxu0 }
 0x8c9   :  { %17284 = vst [vmem:[#allocation63_spill] sm:$0xff] %v13737_v17  ;;  %v17289_v17 = vld [vmem:[#allocation65_spill] sm:$0xff]  ;;  %v13761_v45 = vsel %vm488_vm1, %v4280_v4, %v4281_v15 }
 0x8ca   :  { %17285 = vst [vmem:[#allocation372_spill] sm:$0xff] %v13739_v33  ;;  %v13741_v13 = vpop.f32.mrf.mxu3 }
 0x8cb   :  { %17286 = vst [vmem:[#allocation373_spill] sm:$0xff] %v13741_v13  ;;  %5756 = vmatmul.f32.gmra.mxu1 %v13744_v44  ;;  %6281 = vmatmul.f32.gmra.mxu0 %v12959_v14  ;;  %v4714_v14 = vld [vmem:[#allocation3 + $0x298] sm:$0xff] }
 0x8cc   :  { %5129 = vmatmul.f32.gmra.mxu2 %v13709_v25 }
 0x8cd   :  { %5832 = vmatpush.msra.mxu2 %v4714_v14  ;;  %v17301_v14 = vld [vmem:[#allocation260_spill] sm:$0xff] }
 0x8cf   :  { %v13749_v11 = vpop.f32.mrf.mxu2  ;;  %6078 = vmatmul.f32.gmra.mxu3 %v17289_v17  ;;  %v4283_v17 = vrot.slane %v13059_v58, 1 }
 0x8d0   :  { %17287 = vst [vmem:[#allocation374_spill] sm:$0xff] %v13749_v11  ;;  %v13754_v33 = vpop.f32.mrf.mxu1  ;;  %v13756_v13 = vpop.f32.mrf.mxu0  ;;  %v17293_v11 = vld [vmem:[#allocation243_spill] sm:$0xff] }
 0x8d1   :  { %17290 = vst [vmem:[#allocation250_spill] sm:$0xff] %v13754_v33  ;;  %v17295_v33 = vld [vmem:[#allocation70_spill] sm:$0xff]  ;;  %v13779_v61 = vsel %vm488_vm1, %v4281_v15, %v4283_v17 }
 0x8d2   :  { %17291 = vst [vmem:[#allocation65_spill] sm:$0xff] %v13756_v13  ;;  %v13758_v59 = vpop.f32.mrf.mxu3 }
 0x8d3   :  { %17292 = vst [vmem:[#allocation375_spill] sm:$0xff] %v13758_v59  ;;  %5759 = vmatmul.f32.gmra.mxu1 %v13761_v45  ;;  %6284 = vmatmul.f32.gmra.mxu0 %v17293_v11  ;;  %v17299_v11 = vld [vmem:[#allocation247_spill] sm:$0xff] }
 0x8d4   :  { %5132 = vmatmul.f32.gmra.mxu2 %v13726_v1 }
 0x8d7   :  { %v13766_v27 = vpop.f32.mrf.mxu2  ;;  %7482 = vmatmul.msk.f32.gmra.mxu3 %vm11548_vm3, %v17295_v33  ;;  %v4286_v33 = vrot.slane %v17085_v49, 1 }
 0x8d8   :  { %17294 = vst [vmem:[#allocation243_spill] sm:$0xff] %v13766_v27  ;;  %v13772_v13 = vpop.f32.mrf.mxu1  ;;  %v13774_v4 = vpop.f32.mrf.mxu0  ;;  %v4285_v27 = vrot.slane %v17301_v14, 1  ;;  %v4762_v14 = vld [vmem:[#allocation3 + $0x418] sm:$0xff] }
 0x8d9   :  { %17296 = vst [vmem:[#allocation70_spill] sm:$0xff] %v13772_v13  ;;  %v17302_v13 = vld [vmem:[#allocation73_spill] sm:$0xff]  ;;  %6459 = vmatpush.msra.mxu1 %v4762_v14  ;;  %7566 = vmatpush.msrb.mxu3 %v4762_v14  ;;  %v17313_v14 = vld [vmem:[#allocation84_spill] sm:$0xff] }
 0x8da   :  { %17297 = vst [vmem:[#allocation376_spill] sm:$0xff] %v13774_v4  ;;  %v13776_v59 = vpop.f32.mrf.mxu3  ;;  %v13796_v17 = vsel %vm488_vm1, %v4285_v27, %v4286_v33 }
 0x8db   :  { %17298 = vst [vmem:[#allocation377_spill] sm:$0xff] %v13776_v59  ;;  %5762 = vmatmul.f32.gmra.mxu1 %v13779_v61  ;;  %6287 = vmatmul.f32.gmra.mxu0 %v17299_v11  ;;  %v17306_v11 = vld [vmem:[#allocation254_spill] sm:$0xff] }
 0x8dc   :  { %5135 = vmatmul.f32.gmra.mxu2 %v13744_v44 }
 0x8df   :  { %v13784_v58 = vpop.f32.mrf.mxu2  ;;  %6084 = vmatmul.f32.gmra.mxu3 %v17302_v13  ;;  %v4288_v13 = vrot.slane %v13112_v52, 1 }
 0x8e0   :  { %17300 = vst [vmem:[#allocation247_spill] sm:$0xff] %v13784_v58  ;;  %v13789_v4 = vpop.f32.mrf.mxu1  ;;  %v13791_v59 = vpop.f32.mrf.mxu0 }
 0x8e1   :  { %17303 = vst [vmem:[#allocation260_spill] sm:$0xff] %v13789_v4  ;;  %v17308_v4 = vld [vmem:[#allocation81_spill] sm:$0xff]  ;;  %v13814_v47 = vsel %vm488_vm1, %v4286_v33, %v4288_v13 }
 0x8e2   :  { %17304 = vst [vmem:[#allocation73_spill] sm:$0xff] %v13791_v59  ;;  %v13793_v15 = vpop.f32.mrf.mxu3 }
 0x8e3   :  { %17305 = vst [vmem:[#allocation378_spill] sm:$0xff] %v13793_v15  ;;  %5765 = vmatmul.f32.gmra.mxu1 %v13796_v17  ;;  %6290 = vmatmul.f32.gmra.mxu0 %v17306_v11  ;;  %v4290_v11 = vrot.slane %v13137_v2, 1 }
 0x8e4   :  { %5138 = vmatmul.f32.gmra.mxu2 %v13761_v45 }
 0x8e7   :  { %v13801_v58 = vpop.f32.mrf.mxu2  ;;  %7484 = vmatmul.msk.f32.gmra.mxu3 %vm11548_vm3, %v17308_v4  ;;  %v4291_v4 = vrot.slane %v17099_v32, 1 }
 0x8e8   :  { %17307 = vst [vmem:[#allocation254_spill] sm:$0xff] %v13801_v58  ;;  %v13807_v15 = vpop.f32.mrf.mxu1  ;;  %v13809_v27 = vpop.f32.mrf.mxu0 }
 0x8e9   :  { %17309 = vst [vmem:[#allocation81_spill] sm:$0xff] %v13807_v15  ;;  %v13831_v13 = vsel %vm488_vm1, %v4290_v11, %v4291_v4  ;;  %v17317_v15 = vld [vmem:[#allocation264_spill] sm:$0xff] }
 0x8ea   :  { %17310 = vst [vmem:[#allocation379_spill] sm:$0xff] %v13809_v27  ;;  %v13811_v59 = vpop.f32.mrf.mxu3 }
 0x8eb   :  { %17311 = vst [vmem:[#allocation380_spill] sm:$0xff] %v13811_v59  ;;  %5768 = vmatmul.f32.gmra.mxu1 %v13814_v47  ;;  %6293 = vmatmul.f32.gmra.mxu0 %v13068_v21  ;;  %v4713_v21 = vld [vmem:[#allocation3 + $0x290] sm:$0xff] }
 0x8ec   :  { %5141 = vmatmul.f32.gmra.mxu2 %v13779_v61 }
 0x8ed   :  { %5833 = vmatpush.msra.mxu2 %v4713_v21 }
 0x8ef   :  { %v13819_v52 = vpop.f32.mrf.mxu2  ;;  %6090 = vmatmul.f32.gmra.mxu3 %v17313_v14  ;;  %v4293_v14 = vrot.slane %v13168_v7, 1 }
 0x8f0   :  { %17312 = vst [vmem:[#allocation381_spill] sm:$0xff] %v13819_v52  ;;  %v13824_v27 = vpop.f32.mrf.mxu1  ;;  %v13826_v59 = vpop.f32.mrf.mxu0 }
 0x8f1   :  { %17314 = vst [vmem:[#allocation84_spill] sm:$0xff] %v13824_v27  ;;  %v17319_v27 = vld [vmem:[#allocation96_spill] sm:$0xff]  ;;  %v13849_v52 = vsel %vm488_vm1, %v4291_v4, %v4293_v14 }
 0x8f2   :  { %17315 = vst [vmem:[#allocation382_spill] sm:$0xff] %v13826_v59  ;;  %v13828_v33 = vpop.f32.mrf.mxu3 }
 0x8f3   :  { %17316 = vst [vmem:[#allocation383_spill] sm:$0xff] %v13828_v33  ;;  %5771 = vmatmul.f32.gmra.mxu1 %v13831_v13  ;;  %6296 = vmatmul.f32.gmra.mxu0 %v17317_v15  ;;  %v17323_v15 = vld [vmem:[#allocation279_spill] sm:$0xff] }
 0x8f4   :  { %5144 = vmatmul.f32.gmra.mxu2 %v13796_v17  ;;  %v4295_v21 = vrot.slane %v17323_v15, 1  ;;  %v4761_v15 = vld [vmem:[#allocation3 + $0x410] sm:$0xff] }
 0x8f5   :  { %6460 = vmatpush.msra.mxu1 %v4761_v15  ;;  %7567 = vmatpush.msrb.mxu3 %v4761_v15 }
 0x8f7   :  { %v13836_v2 = vpop.f32.mrf.mxu2  ;;  %7486 = vmatmul.msk.f32.gmra.mxu3 %vm11548_vm3, %v17319_v27  ;;  %v4296_v27 = vrot.slane %v17114_v29, 1 }
 0x8f8   :  { %17318 = vst [vmem:[#allocation264_spill] sm:$0xff] %v13836_v2  ;;  %v13842_v33 = vpop.f32.mrf.mxu1  ;;  %v13844_v11 = vpop.f32.mrf.mxu0 }
 0x8f9   :  { %17320 = vst [vmem:[#allocation96_spill] sm:$0xff] %v13842_v33  ;;  %v17324_v33 = vld [vmem:[#allocation99_spill] sm:$0xff]  ;;  %v13866_v14 = vsel %vm488_vm1, %v4295_v21, %v4296_v27 }
 0x8fa   :  { %17321 = vst [vmem:[#allocation384_spill] sm:$0xff] %v13844_v11  ;;  %v13846_v59 = vpop.f32.mrf.mxu3 }
 0x8fb   :  { %5774 = vmatmul.f32.gmra.mxu1 %v13849_v52  ;;  %6299 = vmatmul.f32.gmra.mxu0 %v13121_v60  ;;  %v17326_v60 = vld [vmem:[#allocation273_spill] sm:$0xff] }
 0x8fc   :  { %5147 = vmatmul.f32.gmra.mxu2 %v13814_v47 }
 0x8ff   :  { %v13854_v7 = vpop.f32.mrf.mxu2  ;;  %6096 = vmatmul.f32.gmra.mxu3 %v17324_v33  ;;  %v4298_v33 = vrot.slane %v13221_v16, 1 }
 0x900   :  { %17322 = vst [vmem:[#allocation385_spill] sm:$0xff] %v13854_v7  ;;  %v13859_v11 = vpop.f32.mrf.mxu1  ;;  %v13861_v2 = vpop.f32.mrf.mxu0 }
 0x901   :  { %17325 = vst [vmem:[#allocation279_spill] sm:$0xff] %v13859_v11  ;;  %v17328_v11 = vld [vmem:[#allocation111_spill] sm:$0xff]  ;;  %v13884_v41 = vsel %vm488_vm1, %v4296_v27, %v4298_v33 }
 0x902   :  { %v13863_v4 = vpop.f32.mrf.mxu3 }
 0x903   :  { %5777 = vmatmul.f32.gmra.mxu1 %v13866_v14  ;;  %6302 = vmatmul.f32.gmra.mxu0 %v17326_v60  ;;  %v17331_v60 = vld [vmem:[#allocation290_spill] sm:$0xff] }
 0x904   :  { %5150 = vmatmul.f32.gmra.mxu2 %v13831_v13  ;;  %v4300_v15 = vrot.slane %v17331_v60, 1 }
 0x907   :  { %v13871_v7 = vpop.f32.mrf.mxu2  ;;  %7488 = vmatmul.msk.f32.gmra.mxu3 %vm11548_vm3, %v17328_v11  ;;  %v17332_v11 = vld [vmem:[#allocation125_spill] sm:$0xff] }
 0x908   :  { %17327 = vst [vmem:[#allocation99_spill] sm:$0xff] %v13871_v7  ;;  %v13877_v58 = vpop.f32.mrf.mxu1  ;;  %v13879_v21 = vpop.f32.mrf.mxu0  ;;  %v4301_v7 = vrot.slane %v17332_v11, 1 }
 0x909   :  { %17329 = vst [vmem:[#allocation273_spill] sm:$0xff] %v13877_v58  ;;  %v17333_v58 = vld [vmem:[#allocation114_spill] sm:$0xff] }
 0x90a   :  { %v13881_v19 = vpop.f32.mrf.mxu3  ;;  %v13901_v33 = vsel %vm488_vm1, %v4300_v15, %v4301_v7 }
 0x90b   :  { %5780 = vmatmul.f32.gmra.mxu1 %v13884_v41  ;;  %6305 = vmatmul.f32.gmra.mxu0 %v13177_v53  ;;  %17336 = vst [vmem:[#allocation114_spill] sm:$0xff] %v13901_v33  ;;  %v4712_v53 = vld [vmem:[#allocation3 + $0x288] sm:$0xff] }
 0x90c   :  { %5153 = vmatmul.f32.gmra.mxu2 %v13849_v52 }
 0x90d   :  { %5834 = vmatpush.msra.mxu2 %v4712_v53 }
 0x90f   :  { %v13889_v16 = vpop.f32.mrf.mxu2  ;;  %6102 = vmatmul.f32.gmra.mxu3 %v17333_v58  ;;  %v17339_v58 = vld [vmem:[#allocation119_spill] sm:$0xff] }
 0x910   :  { %17330 = vst [vmem:[#allocation111_spill] sm:$0xff] %v13889_v16  ;;  %v13894_v22 = vpop.f32.mrf.mxu1  ;;  %v13896_v56 = vpop.f32.mrf.mxu0  ;;  %v17337_v16 = vld [vmem:[#allocation283_spill] sm:$0xff]  ;;  %v4303_v48 = vrot.slane %v17339_v58, 1  ;;  %v17346_v58 = vld [vmem:[#allocation145_spill] sm:$0xff] }
 0x911   :  { %17334 = vst [vmem:[#allocation290_spill] sm:$0xff] %v13894_v22  ;;  %v17340_v22 = vld [vmem:[#allocation126_spill] sm:$0xff] }
 0x912   :  { %v13898_v27 = vpop.f32.mrf.mxu3 }
 0x913   :  { %17335 = vst [vmem:[#allocation125_spill] sm:$0xff] %v13898_v27  ;;  %5783 = vmatmul.f32.gmra.mxu1 %v13901_v33  ;;  %6308 = vmatmul.f32.gmra.mxu0 %v17337_v16  ;;  %v13919_v27 = vsel %vm488_vm1, %v4301_v7, %v4303_v48  ;;  %v17344_v16 = vld [vmem:[#allocation287_spill] sm:$0xff] }
 0x914   :  { %5156 = vmatmul.f32.gmra.mxu2 %v13866_v14 }
 0x917   :  { %v13906_v60 = vpop.f32.mrf.mxu2  ;;  %7490 = vmatmul.msk.f32.gmra.mxu3 %vm11548_vm3, %v17340_v22  ;;  %v4306_v22 = vrot.slane %v17150_v31, 1  ;;  %v17355_v31 = vld [vmem:[#allocation141_spill] sm:$0xff] }
 0x918   :  { %17338 = vst [vmem:[#allocation283_spill] sm:$0xff] %v13906_v60  ;;  %v13912_v10 = vpop.f32.mrf.mxu1  ;;  %v13914_v15 = vpop.f32.mrf.mxu0  ;;  %v4305_v60 = vrot.slane %v17346_v58, 1  ;;  %v4760_v58 = vld [vmem:[#allocation3 + $0x408] sm:$0xff] }
 0x919   :  { %17341 = vst [vmem:[#allocation119_spill] sm:$0xff] %v13912_v10  ;;  %v17347_v10 = vld [vmem:[#allocation129_spill] sm:$0xff]  ;;  %6461 = vmatpush.msra.mxu1 %v4760_v58  ;;  %7568 = vmatpush.msrb.mxu3 %v4760_v58 }
 0x91a   :  { %17342 = vst [vmem:[#allocation126_spill] sm:$0xff] %v13914_v15  ;;  %v13916_v38 = vpop.f32.mrf.mxu3  ;;  %v13936_v7 = vsel %vm488_vm1, %v4305_v60, %v4306_v22 }
 0x91b   :  { %17343 = vst [vmem:[#allocation386_spill] sm:$0xff] %v13916_v38  ;;  %5786 = vmatmul.f32.gmra.mxu1 %v13919_v27  ;;  %6311 = vmatmul.f32.gmra.mxu0 %v17344_v16  ;;  %v17352_v16 = vld [vmem:[#allocation294_spill] sm:$0xff] }
 0x91c   :  { %5159 = vmatmul.f32.gmra.mxu2 %v13884_v41  ;;  %17351 = vst [vmem:[#allocation388_spill] sm:$0xff] %v13936_v7 }
 0x91f   :  { %v13924_v53 = vpop.f32.mrf.mxu2  ;;  %6108 = vmatmul.f32.gmra.mxu3 %v17347_v10  ;;  %v17354_v10 = vld [vmem:[#allocation151_spill] sm:$0xff] }
 0x920   :  { %17345 = vst [vmem:[#allocation287_spill] sm:$0xff] %v13924_v53  ;;  %v13929_v15 = vpop.f32.mrf.mxu1  ;;  %v13931_v38 = vpop.f32.mrf.mxu0 }
 0x921   :  { %17348 = vst [vmem:[#allocation145_spill] sm:$0xff] %v13929_v15  ;;  %v4308_v15 = vrot.slane %v17354_v10, 1  ;;  %v17361_v10 = vld [vmem:[#allocation158_spill] sm:$0xff] }
 0x922   :  { %17349 = vst [vmem:[#allocation129_spill] sm:$0xff] %v13931_v38  ;;  %v13933_v48 = vpop.f32.mrf.mxu3 }
 0x923   :  { %17350 = vst [vmem:[#allocation387_spill] sm:$0xff] %v13933_v48  ;;  %5789 = vmatmul.f32.gmra.mxu1 %v13936_v7  ;;  %6314 = vmatmul.f32.gmra.mxu0 %v17352_v16  ;;  %v17359_v16 = vld [vmem:[#allocation300_spill] sm:$0xff] }
 0x924   :  { %5162 = vmatmul.f32.gmra.mxu2 %v13901_v33  ;;  %v13954_v33 = vsel %vm488_vm1, %v4306_v22, %v4308_v15 }
 0x927   :  { %v13941_v53 = vpop.f32.mrf.mxu2  ;;  %7492 = vmatmul.msk.f32.gmra.mxu3 %vm11548_vm3, %v17355_v31  ;;  %v4311_v31 = vrot.slane %v17170_v30, 1 }
 0x928   :  { %17353 = vst [vmem:[#allocation294_spill] sm:$0xff] %v13941_v53  ;;  %v13947_v48 = vpop.f32.mrf.mxu1  ;;  %v13949_v60 = vpop.f32.mrf.mxu0  ;;  %v4310_v53 = vrot.slane %v17361_v10, 1 }
 0x929   :  { %17356 = vst [vmem:[#allocation151_spill] sm:$0xff] %v13947_v48  ;;  %v17362_v48 = vld [vmem:[#allocation144_spill] sm:$0xff] }
 0x92a   :  { %17357 = vst [vmem:[#allocation141_spill] sm:$0xff] %v13949_v60  ;;  %v13951_v38 = vpop.f32.mrf.mxu3  ;;  %v13971_v22 = vsel %vm488_vm1, %v4310_v53, %v4311_v31 }
 0x92b   :  { %17358 = vst [vmem:[#allocation389_spill] sm:$0xff] %v13951_v38  ;;  %5792 = vmatmul.f32.gmra.mxu1 %v13954_v33  ;;  %6317 = vmatmul.f32.gmra.mxu0 %v17359_v16  ;;  %v4711_v16 = vld [vmem:[#allocation3 + $0x280] sm:$0xff] }
 0x92c   :  { %5165 = vmatmul.f32.gmra.mxu2 %v13919_v27  ;;  %17366 = vst [vmem:[#allocation391_spill] sm:$0xff] %v13971_v22 }
 0x92d   :  { %5835 = vmatpush.msra.mxu2 %v4711_v16  ;;  %v17373_v16 = vld [vmem:[#allocation311_spill] sm:$0xff] }
 0x92f   :  { %v13959_v58 = vpop.f32.mrf.mxu2  ;;  %6114 = vmatmul.f32.gmra.mxu3 %v17362_v48  ;;  %v17369_v48 = vld [vmem:[#allocation150_spill] sm:$0xff] }
 0x930   :  { %17360 = vst [vmem:[#allocation300_spill] sm:$0xff] %v13959_v58  ;;  %v13964_v60 = vpop.f32.mrf.mxu1  ;;  %v13966_v38 = vpop.f32.mrf.mxu0  ;;  %v17367_v58 = vld [vmem:[#allocation306_spill] sm:$0xff]  ;;  %v4313_v30 = vrot.slane %v17369_v48, 1 }
 0x931   :  { %17363 = vst [vmem:[#allocation158_spill] sm:$0xff] %v13964_v60  ;;  %v17370_v60 = vld [vmem:[#allocation155_spill] sm:$0xff] }
 0x932   :  { %17364 = vst [vmem:[#allocation144_spill] sm:$0xff] %v13966_v38  ;;  %v13968_v15 = vpop.f32.mrf.mxu3  ;;  %v13987_v38 = vsel %vm488_vm1, %v4311_v31, %v4313_v30 }
 0x933   :  { %17365 = vst [vmem:[#allocation390_spill] sm:$0xff] %v13968_v15  ;;  %5795 = vmatmul.f32.gmra.mxu1 %v13971_v22  ;;  %6320 = vmatmul.f32.gmra.mxu0 %v17367_v58 }
 0x934   :  { %5168 = vmatmul.f32.gmra.mxu2 %v13936_v7 }
 0x937   :  { %v13976_v10 = vpop.f32.mrf.mxu2  ;;  %7494 = vmatmul.msk.f32.gmra.mxu3 %vm11548_vm3, %v17370_v60  ;;  %v4316_v60 = vrot.slane %v17185_v55, 1 }
 0x938   :  { %17368 = vst [vmem:[#allocation306_spill] sm:$0xff] %v13976_v10  ;;  %v13982_v15 = vpop.f32.mrf.mxu1  ;;  %v13991_v58 = vpop.f32.mrf.mxu0  ;;  %v17375_v10 = vld [vmem:[#allocation325_spill] sm:$0xff] }
 0x939   :  { %17371 = vst [vmem:[#allocation150_spill] sm:$0xff] %v13982_v15  ;;  %v4315_v7 = vrot.slane %v17375_v10, 1  ;;  %v17376_v15 = vld [vmem:[#allocation31_spill] sm:$0xff] }
 0x93a   :  { %v13984_v53 = vpop.f32.mrf.mxu3 }
 0x93b   :  { %17372 = vst [vmem:[#allocation155_spill] sm:$0xff] %v13984_v53  ;;  %5798 = vmatmul.f32.gmra.mxu1 %v13987_v38  ;;  %6323 = vmatmul.f32.gmra.mxu0 %v17373_v16  ;;  %v14004_v31 = vsel %vm488_vm1, %v4315_v7, %v4316_v60  ;;  %v17379_v16 = vld [vmem:[#allocation317_spill] sm:$0xff] }
 0x93c   :  { %5171 = vmatmul.f32.gmra.mxu2 %v13954_v33 }
 0x93f   :  { %v13994_v48 = vpop.f32.mrf.mxu2  ;;  %6120 = vmatmul.f32.gmra.mxu3 %v17376_v15  ;;  %v4318_v15 = vrot.slane %v13439_v34, 1  ;;  %v4320_v34 = vrot.slane %v13469_v63, 1 }
 0x940   :  { %17374 = vst [vmem:[#allocation311_spill] sm:$0xff] %v13994_v48  ;;  %v13999_v53 = vpop.f32.mrf.mxu1  ;;  %v4759_v48 = vld [vmem:[#allocation3 + $0x400] sm:$0xff]  ;;  %v14009_v10 = vpop.f32.mrf.mxu0 }
 0x941   :  { %17377 = vst [vmem:[#allocation325_spill] sm:$0xff] %v13999_v53  ;;  %6462 = vmatpush.msra.mxu1 %v4759_v48  ;;  %7569 = vmatpush.msrb.mxu3 %v4759_v48  ;;  %v17381_v53 = vld [vmem:[#allocation167_spill] sm:$0xff] }
 0x942   :  { %v14001_v30 = vpop.f32.mrf.mxu3 }
 0x943   :  { %17378 = vst [vmem:[#allocation31_spill] sm:$0xff] %v14001_v30  ;;  %5801 = vmatmul.f32.gmra.mxu1 %v14004_v31  ;;  %6326 = vmatmul.f32.gmra.mxu0 %v17379_v16  ;;  %v14020_v30 = vsel %vm488_vm1, %v4316_v60, %v4318_v15  ;;  %v4321_v16 = vrot.slane %v17204_v26, 1 }
 0x944   :  { %5174 = vmatmul.f32.gmra.mxu2 %v13971_v22 }
 0x945   :  { %v14037_v15 = vsel %vm488_vm1, %v4320_v34, %v4321_v16 }
 0x947   :  { %v14011_v55 = vpop.f32.mrf.mxu2  ;;  %7496 = vmatmul.msk.f32.gmra.mxu3 %vm11548_vm3, %v17381_v53  ;;  %v17384_v53 = vld [vmem:[#allocation33_spill] sm:$0xff] }
 0x948   :  { %17380 = vst [vmem:[#allocation317_spill] sm:$0xff] %v14011_v55  ;;  %v14017_v7 = vpop.f32.mrf.mxu1 }
 0x949   :  { %17382 = vst [vmem:[#allocation167_spill] sm:$0xff] %v14017_v7  ;;  %v14032_v7 = vpop.f32.mrf.mxu0 }
 0x94a   :  { %v14022_v22 = vpop.f32.mrf.mxu3 }
 0x94b   :  { %5804 = vmatmul.f32.gmra.mxu1 %v14020_v30  ;;  %6329 = vmatmul.f32.gmra.mxu0 %v13395_v12 }
 0x94c   :  { %5177 = vmatmul.f32.gmra.mxu2 %v13987_v38 }
 0x94f   :  { %v14027_v48 = vpop.f32.mrf.mxu2  ;;  %6126 = vmatmul.f32.gmra.mxu3 %v17384_v53  ;;  %v17387_v53 = vld [vmem:[#allocation185_spill] sm:$0xff] }
 0x950   :  { %17383 = vst [vmem:[#allocation392_spill] sm:$0xff] %v14027_v48  ;;  %v14034_v60 = vpop.f32.mrf.mxu1  ;;  %v4323_v48 = vrot.slane %v13506_v40, 1 }
 0x951   :  { %17385 = vst [vmem:[#allocation33_spill] sm:$0xff] %v14034_v60  ;;  %v14052_v34 = vpop.f32.mrf.mxu0 }
 0x952   :  { %v14042_v12 = vpop.f32.mrf.mxu3  ;;  %v14055_v55 = vsel %vm488_vm1, %v4321_v16, %v4323_v48 }
 0x953   :  { %5807 = vmatmul.f32.gmra.mxu1 %v14037_v15  ;;  %6332 = vmatmul.f32.gmra.mxu0 %v13420_v62  ;;  %v14061_v62 = vsel %vm165_vm0, 0.0, %v13544_v20  ;;  %v17398_v20 = vld [vmem:[#allocation9_spill] sm:$0xff] }
 0x954   :  { %5180 = vmatmul.f32.gmra.mxu2 %v14004_v31  ;;  %17389 = vst [vmem:[#allocation394_spill] sm:$0xff] %v14061_v62 }
 0x957   :  { %v14044_v63 = vpop.f32.mrf.mxu2  ;;  %7498 = vmatmul.msk.f32.gmra.mxu3 %vm11548_vm3, %v17387_v53  ;;  %v4608_v53 = vrot.slane %v14061_v62, 1 }
 0x958   :  { %17386 = vst [vmem:[#allocation393_spill] sm:$0xff] %v14044_v63  ;;  %v14050_v60 = vpop.f32.mrf.mxu1 }
 0x959   :  { %17388 = vst [vmem:[#allocation185_spill] sm:$0xff] %v14050_v60  ;;  %v4609_v60 = vrot.slane %v13573_v3, 1  ;;  %v14083_v62 = vpop.f32.mrf.mxu0  ;;  %v17396_v3 = vld [vmem:[#allocation337_spill] sm:$0xff] }
 0x95a   :  { %v14068_v63 = vpop.f32.mrf.mxu3 }
 0x95b   :  { %5810 = vmatmul.f32.gmra.mxu1 %v14055_v55  ;;  %6335 = vmatmul.f32.gmra.mxu0 %v13448_v9  ;;  %17391 = vst [vmem:[#allocation396_spill] sm:$0xff] %v14068_v63  ;;  %v14074_v16 = vsel %vm488_vm1, %v4608_v53, %v4609_v60  ;;  %v17394_v9 = vrot.slane %v13552_v35, 7 }
 0x95c   :  { %5183 = vmatmul.f32.gmra.mxu2 %v14020_v30  ;;  %17393 = vst [vmem:[#allocation398_spill] sm:$0xff] %v14074_v16 }
 0x95f   :  { %v14064_v40 = vpop.f32.mrf.mxu2  ;;  %6132 = vmatmul.f32.gmra.mxu3 %v17198_v36 }
 0x960   :  { %17390 = vst [vmem:[#allocation395_spill] sm:$0xff] %v14064_v40  ;;  %v14071_v48 = vpop.f32.mrf.mxu1  ;;  %v14081_v40 = vsel %vm165_vm0, %v17394_v9, 0.0 }
 0x961   :  { %17392 = vst [vmem:[#allocation397_spill] sm:$0xff] %v14071_v48  ;;  %v4611_v48 = vrot.slane %v14081_v40, 1 }
 0x962   :  { %17395 = vst [vmem:[#allocation399_spill] sm:$0xff] %v14081_v40  ;;  %v17404_v40 = vld [vmem:[#allocation29_spill] sm:$0xff] }
 0x963   :  { %5813 = vmatmul.f32.gmra.mxu1 %v14074_v16  ;;  %6338 = vmatmul.f32.gmra.mxu0 %v17396_v3  ;;  %v14094_v16 = vpop.f32.mrf.mxu3  ;;  %v14097_v35 = vsel %vm488_vm1, %v4609_v60, %v4611_v48  ;;  %v14102_v3 = vpop.f32.mrf.mxu0  ;;  %v17405_v60 = vld [vmem:[#allocation14_spill] sm:$0xff] }
 0x964   :  { %5186 = vmatmul.f32.gmra.mxu2 %v14037_v15  ;;  %17400 = vst [vmem:[#allocation401_spill] sm:$0xff] %v14097_v35 }
 0x967   :  { %v14086_v63 = vpop.f32.mrf.mxu2  ;;  %7500 = vmatmul.msk.f32.gmra.mxu3 %vm11548_vm3, %v17398_v20 }
 0x968   :  { %17397 = vst [vmem:[#allocation337_spill] sm:$0xff] %v14086_v63  ;;  %v14092_v53 = vpop.f32.mrf.mxu1 }
 0x969   :  { %17399 = vst [vmem:[#allocation400_spill] sm:$0xff] %v14092_v53 }
 0x96b   :  { %5816 = vmatmul.f32.gmra.mxu1 %v14097_v35  ;;  %6341 = vmatmul.f32.gmra.mxu0 %v13516_v39  ;;  %v14109_v53 = vpop.f32.mrf.mxu3  ;;  %v17407_v35 = vld [vmem:[#allocation25_spill] sm:$0xff]  ;;  %v14119_v39 = vpop.f32.mrf.mxu0 }
 0x96c   :  { %5189 = vmatmul.f32.gmra.mxu2 %v14055_v55  ;;  %17403 = vst [vmem:[#allocation404_spill] sm:$0xff] %v14109_v53 }
 0x96f   :  { %v14104_v9 = vpop.f32.mrf.mxu2  ;;  %6138 = vmatmul.f32.gmra.mxu3 %v17398_v20  ;;  %v17409_v20 = vld [vmem:[#allocation18_spill] sm:$0xff] }
 0x970   :  { %17401 = vst [vmem:[#allocation402_spill] sm:$0xff] %v14104_v9  ;;  %v14107_v63 = vpop.f32.mrf.mxu1 }
 0x971   :  { %17402 = vst [vmem:[#allocation403_spill] sm:$0xff] %v14107_v63  ;;  %v17410_v63 = vld [vmem:[#allocation17_spill] sm:$0xff] }
 0x973   :  { %6463 = vmatmul.f32.vlgmr.msra.gmra.mxu1 %v17405_v60  ;;  %6344 = vmatmul.f32.gmra.mxu0 %v17225_v6  ;;  %v14133_v6 = vpop.f32.mrf.mxu0 }
 0x974   :  { %5836 = vmatmul.f32.vlgmr.msra.gmra.mxu2 %v17404_v40  ;;  %v14126_v40 = vpop.f32.mrf.mxu3 }
 0x977   :  { %v14114_v48 = vpop.f32.mrf.mxu2  ;;  %7502 = vmatmul.msk.f32.gmra.mxu3 %vm11548_vm3, %v17407_v35  ;;  %v17413_v35 = vld [vmem:[#allocation26_spill] sm:$0xff] }
 0x978   :  { %17406 = vst [vmem:[#allocation29_spill] sm:$0xff] %v14114_v48  ;;  %v14121_v9 = vpop.f32.mrf.mxu1 }
 0x979   :  { %17408 = vst [vmem:[#allocation14_spill] sm:$0xff] %v14121_v9 }
 0x97b   :  { %6466 = vmatmul.f32.gmra.mxu1 %v17410_v63  ;;  %6347 = vmatmul.f32.gmra.mxu0 %v17232_v54  ;;  %v17416_v54 = vld [vmem:[#allocation46_spill] sm:$0xff] }
 0x97c   :  { %5839 = vmatmul.f32.gmra.mxu2 %v17409_v20  ;;  %v14140_v9 = vpop.f32.mrf.mxu3 }
 0x97d   :  { %17415 = vst [vmem:[#allocation26_spill] sm:$0xff] %v14140_v9  ;;  %v17423_v9 = vld [vmem:[#allocation48_spill] sm:$0xff] }
 0x97f   :  { %v14128_v53 = vpop.f32.mrf.mxu2  ;;  %6144 = vmatmul.f32.gmra.mxu3 %v17002_v23  ;;  %v17418_v23 = vld [vmem:[#allocation47_spill] sm:$0xff] }
 0x980   :  { %17411 = vst [vmem:[#allocation25_spill] sm:$0xff] %v14128_v53  ;;  %v14131_v48 = vpop.f32.mrf.mxu1 }
 0x981   :  { %17412 = vst [vmem:[#allocation18_spill] sm:$0xff] %v14131_v48  ;;  %v14149_v48 = vpop.f32.mrf.mxu0 }
 0x983   :  { %6469 = vmatmul.f32.gmra.mxu1 %v17413_v35  ;;  %6350 = vmatmul.f32.gmra.mxu0 %v13588_v50 }
 0x984   :  { %5842 = vmatmul.f32.gmra.mxu2 %v17405_v60 }
 0x987   :  { %v14138_v20 = vpop.f32.mrf.mxu2  ;;  %7504 = vmatmul.msk.f32.gmra.mxu3 %vm11548_vm3, %v17416_v54  ;;  %v17421_v54 = vld [vmem:[#allocation49_spill] sm:$0xff] }
 0x988   :  { %17414 = vst [vmem:[#allocation17_spill] sm:$0xff] %v14138_v20  ;;  %v14145_v53 = vpop.f32.mrf.mxu1  ;;  %v14157_v20 = vpop.f32.mrf.mxu3 }
 0x989   :  { %17417 = vst [vmem:[#allocation46_spill] sm:$0xff] %v14145_v53 }
 0x98b   :  { %6472 = vmatmul.f32.gmra.mxu1 %v17418_v23  ;;  %6353 = vmatmul.f32.gmra.mxu0 %v13605_v43 }
 0x98c   :  { %5845 = vmatmul.f32.gmra.mxu2 %v17410_v63  ;;  %v14162_v63 = vpop.f32.mrf.mxu0 }
 0x98f   :  { %v14152_v60 = vpop.f32.mrf.mxu2  ;;  %6150 = vmatmul.f32.gmra.mxu3 %v11769_v5 }
 0x990   :  { %17419 = vst [vmem:[#allocation47_spill] sm:$0xff] %v14152_v60  ;;  %v14155_v50 = vpop.f32.mrf.mxu1  ;;  %v14171_v5 = vpop.f32.mrf.mxu3  ;;  %v17430_v60 = vld [vmem:[#allocation53_spill] sm:$0xff] }
 0x991   :  { %17420 = vst [vmem:[#allocation405_spill] sm:$0xff] %v14155_v50  ;;  %v17425_v50 = vld [vmem:[#allocation51_spill] sm:$0xff] }
 0x993   :  { %6475 = vmatmul.f32.gmra.mxu1 %v17421_v54  ;;  %6356 = vmatmul.f32.gmra.mxu0 %v13621_v24 }
 0x994   :  { %5848 = vmatmul.f32.gmra.mxu2 %v17413_v35  ;;  %v14179_v24 = vpop.f32.mrf.mxu0 }
 0x997   :  { %v14164_v53 = vpop.f32.mrf.mxu2  ;;  %7506 = vmatmul.msk.f32.gmra.mxu3 %vm11548_vm3, %v17423_v9  ;;  %v17428_v9 = vld [vmem:[#allocation55_spill] sm:$0xff] }
 0x998   :  { %17422 = vst [vmem:[#allocation49_spill] sm:$0xff] %v14164_v53  ;;  %v14169_v43 = vpop.f32.mrf.mxu1 }
 0x999   :  { %17424 = vst [vmem:[#allocation48_spill] sm:$0xff] %v14169_v43  ;;  %v14186_v43 = vpop.f32.mrf.mxu3 }
 0x99b   :  { %6478 = vmatmul.f32.gmra.mxu1 %v17425_v50  ;;  %6359 = vmatmul.f32.gmra.mxu0 %v13639_v18 }
 0x99c   :  { %5851 = vmatmul.f32.gmra.mxu2 %v17418_v23 }
 0x99f   :  { %v14176_v35 = vpop.f32.mrf.mxu2  ;;  %6156 = vmatmul.f32.gmra.mxu3 %v11834_v0  ;;  %v14195_v0 = vpop.f32.mrf.mxu0 }
 0x9a0   :  { %17426 = vst [vmem:[#allocation51_spill] sm:$0xff] %v14176_v35  ;;  %v14181_v53 = vpop.f32.mrf.mxu1  ;;  %v17437_v35 = vld [vmem:[#allocation59_spill] sm:$0xff] }
 0x9a1   :  { %17427 = vst [vmem:[#allocation406_spill] sm:$0xff] %v14181_v53  ;;  %v17432_v53 = vld [vmem:[#allocation57_spill] sm:$0xff] }
 0x9a3   :  { %6481 = vmatmul.f32.gmra.mxu1 %v17428_v9  ;;  %6362 = vmatmul.f32.gmra.mxu0 %v13656_v46  ;;  %v14202_v46 = vpop.f32.mrf.mxu3 }
 0x9a4   :  { %5854 = vmatmul.f32.gmra.mxu2 %v17421_v54 }
 0x9a7   :  { %v14188_v23 = vpop.f32.mrf.mxu2  ;;  %7508 = vmatmul.msk.f32.gmra.mxu3 %vm11548_vm3, %v17430_v60  ;;  %v17435_v60 = vld [vmem:[#allocation61_spill] sm:$0xff] }
 0x9a8   :  { %17429 = vst [vmem:[#allocation55_spill] sm:$0xff] %v14188_v23  ;;  %v14193_v18 = vpop.f32.mrf.mxu1 }
 0x9a9   :  { %17431 = vst [vmem:[#allocation53_spill] sm:$0xff] %v14193_v18  ;;  %v14209_v18 = vpop.f32.mrf.mxu0 }
 0x9ab   :  { %6484 = vmatmul.f32.gmra.mxu1 %v17432_v53  ;;  %6365 = vmatmul.f32.gmra.mxu0 %v13674_v42 }
 0x9ac   :  { %5857 = vmatmul.f32.gmra.mxu2 %v17425_v50 }
 0x9af   :  { %v14200_v54 = vpop.f32.mrf.mxu2  ;;  %6162 = vmatmul.f32.gmra.mxu3 %v11900_v8  ;;  %v17440_v8 = vld [vmem:[#allocation64_spill] sm:$0xff] }
 0x9b0   :  { %17433 = vst [vmem:[#allocation57_spill] sm:$0xff] %v14200_v54  ;;  %v14205_v23 = vpop.f32.mrf.mxu1  ;;  %v14219_v54 = vpop.f32.mrf.mxu3 }
 0x9b1   :  { %17434 = vst [vmem:[#allocation407_spill] sm:$0xff] %v14205_v23 }
 0x9b2   :  { %17439 = vst [vmem:[#allocation408_spill] sm:$0xff] %v14219_v54 }
 0x9b3   :  { %6487 = vmatmul.f32.gmra.mxu1 %v17435_v60  ;;  %6368 = vmatmul.f32.gmra.mxu0 %v13691_v37 }
 0x9b4   :  { %5860 = vmatmul.f32.gmra.mxu2 %v17428_v9  ;;  %v14224_v9 = vpop.f32.mrf.mxu0 }
 0x9b7   :  { %v14212_v50 = vpop.f32.mrf.mxu2  ;;  %7510 = vmatmul.msk.f32.gmra.mxu3 %vm11548_vm3, %v17437_v35  ;;  %v17444_v35 = vld [vmem:[#allocation68_spill] sm:$0xff] }
 0x9b8   :  { %17436 = vst [vmem:[#allocation61_spill] sm:$0xff] %v14212_v50  ;;  %v14217_v42 = vpop.f32.mrf.mxu1  ;;  %v14231_v50 = vpop.f32.mrf.mxu3 }
 0x9b9   :  { %17438 = vst [vmem:[#allocation59_spill] sm:$0xff] %v14217_v42  ;;  %v17446_v42 = vld [vmem:[#allocation66_spill] sm:$0xff] }
 0x9ba   :  { %17443 = vst [vmem:[#allocation410_spill] sm:$0xff] %v14231_v50  ;;  %v17482_v50 = vld [vmem:[#allocation102_spill] sm:$0xff] }
 0x9bb   :  { %6490 = vmatmul.f32.gmra.mxu1 %v17440_v8  ;;  %6371 = vmatmul.f32.gmra.mxu0 %v13709_v25 }
 0x9bc   :  { %5863 = vmatmul.f32.gmra.mxu2 %v17432_v53  ;;  %v14241_v25 = vpop.f32.mrf.mxu0 }
 0x9bd   :  { %17447 = vst [vmem:[#allocation66_spill] sm:$0xff] %v14241_v25  ;;  %v17485_v25 = vld [vmem:[#allocation93_spill] sm:$0xff] }
 0x9bf   :  { %v14226_v23 = vpop.f32.mrf.mxu2  ;;  %6168 = vmatmul.f32.gmra.mxu3 %v17052_v28  ;;  %v17449_v28 = vld [vmem:[#allocation72_spill] sm:$0xff] }
 0x9c0   :  { %17441 = vst [vmem:[#allocation64_spill] sm:$0xff] %v14226_v23  ;;  %v14229_v37 = vpop.f32.mrf.mxu1 }
 0x9c1   :  { %17442 = vst [vmem:[#allocation409_spill] sm:$0xff] %v14229_v37 }
 0x9c3   :  { %6493 = vmatmul.f32.gmra.mxu1 %v17444_v35  ;;  %6374 = vmatmul.f32.gmra.mxu0 %v13726_v1 }
 0x9c4   :  { %5866 = vmatmul.f32.gmra.mxu2 %v17435_v60  ;;  %v14248_v60 = vpop.f32.mrf.mxu3 }
 0x9c5   :  { %17450 = vst [vmem:[#allocation72_spill] sm:$0xff] %v14248_v60  ;;  %v17477_v60 = vld [vmem:[#allocation268_spill] sm:$0xff] }
 0x9c7   :  { %v14236_v53 = vpop.f32.mrf.mxu2  ;;  %7512 = vmatmul.msk.f32.gmra.mxu3 %vm11548_vm3, %v17446_v42  ;;  %v17454_v42 = vld [vmem:[#allocation77_spill] sm:$0xff] }
 0x9c8   :  { %17445 = vst [vmem:[#allocation68_spill] sm:$0xff] %v14236_v53  ;;  %v14243_v23 = vpop.f32.mrf.mxu1  ;;  %v14255_v53 = vpop.f32.mrf.mxu0 }
 0x9c9   :  { %17448 = vst [vmem:[#allocation411_spill] sm:$0xff] %v14243_v23 }
 0x9ca   :  { %17453 = vst [vmem:[#allocation414_spill] sm:$0xff] %v14255_v53 }
 0x9cb   :  { %6496 = vmatmul.f32.gmra.mxu1 %v17449_v28  ;;  %6377 = vmatmul.f32.gmra.mxu0 %v13744_v44  ;;  %v17457_v44 = vld [vmem:[#allocation74_spill] sm:$0xff] }
 0x9cc   :  { %5869 = vmatmul.f32.gmra.mxu2 %v17440_v8  ;;  %v14262_v23 = vpop.f32.mrf.mxu3 }
 0x9cd   :  { %17456 = vst [vmem:[#allocation415_spill] sm:$0xff] %v14262_v23  ;;  %v17467_v23 = vld [vmem:[#allocation88_spill] sm:$0xff] }
 0x9cf   :  { %v14250_v37 = vpop.f32.mrf.mxu2  ;;  %6174 = vmatmul.f32.gmra.mxu3 %v17069_v51  ;;  %v17459_v51 = vld [vmem:[#allocation83_spill] sm:$0xff] }
 0x9d0   :  { %17451 = vst [vmem:[#allocation412_spill] sm:$0xff] %v14250_v37  ;;  %v14253_v1 = vpop.f32.mrf.mxu1 }
 0x9d1   :  { %17452 = vst [vmem:[#allocation413_spill] sm:$0xff] %v14253_v1  ;;  %v14271_v1 = vpop.f32.mrf.mxu0 }
 0x9d2   :  { %17460 = vst [vmem:[#allocation83_spill] sm:$0xff] %v14271_v1  ;;  %v17476_v1 = vld [vmem:[#allocation78_spill] sm:$0xff] }
 0x9d3   :  { %6499 = vmatmul.f32.gmra.mxu1 %v17454_v42  ;;  %6380 = vmatmul.f32.gmra.mxu0 %v13761_v45 }
 0x9d4   :  { %5872 = vmatmul.f32.gmra.mxu2 %v17444_v35 }
 0x9d7   :  { %v14260_v8 = vpop.f32.mrf.mxu2  ;;  %7514 = vmatmul.msk.f32.gmra.mxu3 %vm11548_vm3, %v17457_v44  ;;  %v17464_v44 = vld [vmem:[#allocation91_spill] sm:$0xff] }
 0x9d8   :  { %17455 = vst [vmem:[#allocation77_spill] sm:$0xff] %v14260_v8  ;;  %v14267_v37 = vpop.f32.mrf.mxu1  ;;  %v14279_v8 = vpop.f32.mrf.mxu3 }
 0x9d9   :  { %17458 = vst [vmem:[#allocation74_spill] sm:$0xff] %v14267_v37 }
 0x9da   :  { %17463 = vst [vmem:[#allocation418_spill] sm:$0xff] %v14279_v8 }
 0x9db   :  { %6502 = vmatmul.f32.gmra.mxu1 %v17459_v51  ;;  %6383 = vmatmul.f32.gmra.mxu0 %v13779_v61 }
 0x9dc   :  { %5875 = vmatmul.f32.gmra.mxu2 %v17449_v28  ;;  %v14284_v28 = vpop.f32.mrf.mxu0 }
 0x9dd   :  { %17465 = vst [vmem:[#allocation91_spill] sm:$0xff] %v14284_v28 }
 0x9df   :  { %v14274_v35 = vpop.f32.mrf.mxu2  ;;  %6180 = vmatmul.f32.gmra.mxu3 %v17085_v49  ;;  %v17469_v49 = vld [vmem:[#allocation71_spill] sm:$0xff] }
 0x9e0   :  { %17461 = vst [vmem:[#allocation416_spill] sm:$0xff] %v14274_v35  ;;  %v14277_v45 = vpop.f32.mrf.mxu1  ;;  %v14295_v8 = vpop.f32.mrf.mxu3 }
 0x9e1   :  { %17462 = vst [vmem:[#allocation417_spill] sm:$0xff] %v14277_v45  ;;  %v17470_v45 = vld [vmem:[#allocation80_spill] sm:$0xff] }
 0x9e2   :  { %v5002_v35 = vadd.f32 %v17470_v45, %v17469_v49  ;;  %17471 = vst [vmem:[#allocation71_spill] sm:$0xff] %v14295_v8  ;;  %v5005_v45 = vadd.f32 %v17477_v60, %v17476_v1  ;;  %v17478_v49 = vld [vmem:[#allocation87_spill] sm:$0xff]  ;;  %v17483_v1 = vld [vmem:[#allocation85_spill] sm:$0xff] }
 0x9e3   :  { %6505 = vmatmul.f32.gmra.mxu1 %v17464_v44  ;;  %6386 = vmatmul.f32.gmra.mxu0 %v13796_v17  ;;  %v17473_v17 = vld [vmem:[#allocation79_spill] sm:$0xff] }
 0x9e4   :  { %5878 = vmatmul.f32.gmra.mxu2 %v17454_v42  ;;  %v17472_v42 = vld [vmem:[#allocation98_spill] sm:$0xff]  ;;  %v5211_v28 = vadd.f32 %v17473_v17, %v5002_v35 }
 0x9e6   :  { %v5420_v8 = vadd.f32 %v17478_v49, %v5211_v28  ;;  %v17484_v28 = vld [vmem:[#allocation95_spill] sm:$0xff] }
 0x9e7   :  { %v14286_v37 = vpop.f32.mrf.mxu2  ;;  %7516 = vmatmul.msk.f32.gmra.mxu3 %vm11548_vm3, %v17467_v23  ;;  %v14304_v23 = vpop.f32.mrf.mxu0 }
 0x9e8   :  { %17466 = vst [vmem:[#allocation419_spill] sm:$0xff] %v14286_v37  ;;  %v14291_v61 = vpop.f32.mrf.mxu1  ;;  %v14313_v17 = vpop.f32.mrf.mxu3 }
 0x9e9   :  { %17468 = vst [vmem:[#allocation88_spill] sm:$0xff] %v14291_v61 }
 0x9ea   :  { %17475 = vst [vmem:[#allocation98_spill] sm:$0xff] %v14304_v23 }
 0x9eb   :  { %6508 = vmatmul.f32.gmra.mxu1 %v17472_v42  ;;  %6389 = vmatmul.f32.gmra.mxu0 %v13814_v47  ;;  %v17480_v47 = vld [vmem:[#allocation86_spill] sm:$0xff] }
 0x9ec   :  { %5881 = vmatmul.f32.gmra.mxu2 %v17459_v51  ;;  %v17479_v51 = vld [vmem:[#allocation106_spill] sm:$0xff]  ;;  %v5214_v35 = vadd.f32 %v17480_v47, %v5005_v45  ;;  %v17489_v47 = vld [vmem:[#allocation76_spill] sm:$0xff] }
 0x9ef   :  { %v14301_v37 = vpop.f32.mrf.mxu2  ;;  %6186 = vmatmul.f32.gmra.mxu3 %v17099_v32  ;;  %v14323_v54 = vpop.f32.mrf.mxu0 }
 0x9f0   :  { %17474 = vst [vmem:[#allocation80_spill] sm:$0xff] %v14301_v37  ;;  %v6464_v61 = vpop.f32.mrf.mxu1  ;;  %v17481_v37 = vld [vmem:[#allocation261_spill] sm:$0xff] }
 0x9f1   :  { %v5629_v32 = vadd.f32 %v17481_v37, %v5420_v8  ;;  %v17486_v37 = vld [vmem:[#allocation113_spill] sm:$0xff] }
 0x9f3   :  { %6511 = vmatmul.f32.gmra.mxu1 %v17479_v51  ;;  %6392 = vmatmul.f32.gmra.mxu0 %v13831_v13  ;;  %v5423_v13 = vadd.f32 %v17485_v25, %v5214_v35  ;;  %v17491_v35 = vld [vmem:[#allocation277_spill] sm:$0xff] }
 0x9f4   :  { %5884 = vmatmul.f32.gmra.mxu2 %v17464_v44  ;;  %v5008_v44 = vadd.f32 %v17484_v28, %v17483_v1 }
 0x9f7   :  { %v5837_v53 = vpop.f32.mrf.mxu2  ;;  %7518 = vmatmul.msk.f32.gmra.mxu3 %vm11548_vm3, %v17482_v50 }
 0x9f8   :  { %v5838_v23 = vadd.f32 %v5837_v53, %v5629_v32  ;;  %v6467_v60 = vpop.f32.mrf.mxu1  ;;  %v17487_v53 = vld [vmem:[#allocation94_spill] sm:$0xff]  ;;  %v5632_v32 = vadd.f32 %v17489_v47, %v5423_v13  ;;  %v14343_v13 = vpop.f32.mrf.mxu0 }
 0x9f9   :  { %v5217_v50 = vadd.f32 %v17487_v53, %v5008_v44  ;;  %v17496_v47 = vld [vmem:[#allocation270_spill] sm:$0xff] }
 0x9fa   :  { %v6047_v49 = vadd.f32 %v13846_v59, %v5838_v23  ;;  %v14333_v59 = vpop.f32.mrf.mxu3 }
 0x9fb   :  { %6514 = vmatmul.f32.gmra.mxu1 %v17486_v37  ;;  %6395 = vmatmul.f32.gmra.mxu0 %v13849_v52 }
 0x9fc   :  { %v6256_v45 = vadd.f32 %v13861_v2, %v6047_v49  ;;  %5887 = vmatmul.f32.gmra.mxu2 %v17472_v42  ;;  %v17490_v2 = vld [vmem:[#allocation92_spill] sm:$0xff]  ;;  %v17492_v49 = vld [vmem:[#allocation101_spill] sm:$0xff] }
 0x9fd   :  { %v5011_v42 = vadd.f32 %v17491_v35, %v17490_v2  ;;  %v5426_v52 = vadd.f32 %v17492_v49, %v5217_v50  ;;  %v17499_v50 = vld [vmem:[#allocation110_spill] sm:$0xff]  ;;  %v17501_v49 = vld [vmem:[#allocation128_spill] sm:$0xff] }
 0x9fe   :  { %v14330_v8 = vadd.f32 %v6464_v61, %v6256_v45  ;;  %v17493_v61 = vld [vmem:[#allocation121_spill] sm:$0xff]  ;;  %v17494_v45 = vld [vmem:[#allocation103_spill] sm:$0xff] }
 0x9ff   :  { %v5840_v1 = vpop.f32.mrf.mxu2  ;;  %6192 = vmatmul.f32.gmra.mxu3 %v17114_v29  ;;  %v5220_v29 = vadd.f32 %v17494_v45, %v5011_v42 }
 0xa00   :  { %17488 = vst [vmem:[#allocation79_spill] sm:$0xff] %v14330_v8  ;;  %v5841_v25 = vadd.f32 %v5840_v1, %v5632_v32  ;;  %v6470_v23 = vpop.f32.mrf.mxu1  ;;  %v5635_v32 = vadd.f32 %v17496_v47, %v5426_v52  ;;  %v17502_v52 = vld [vmem:[#allocation109_spill] sm:$0xff]  ;;  %v17529_v8 = vld [vmem:[#allocation131_spill] sm:$0xff] }
 0xa01   :  { %v17504_v47 = vld [vmem:[#allocation89_spill] sm:$0xff] }
 0xa02   :  { %v6050_v28 = vadd.f32 %v13863_v4, %v5841_v25  ;;  %v17497_v25 = vld [vmem:[#allocation117_spill] sm:$0xff]  ;;  %v14355_v35 = vpop.f32.mrf.mxu3 }
 0xa03   :  { %6517 = vmatmul.f32.gmra.mxu1 %v17493_v61  ;;  %6398 = vmatmul.f32.gmra.mxu0 %v13866_v14 }
 0xa04   :  { %v6259_v44 = vadd.f32 %v13879_v21, %v6050_v28  ;;  %5890 = vmatmul.f32.gmra.mxu2 %v17479_v51  ;;  %v17498_v51 = vld [vmem:[#allocation100_spill] sm:$0xff] }
 0xa05   :  { %v5014_v2 = vadd.f32 %v17499_v50, %v17498_v51  ;;  %v17500_v28 = vld [vmem:[#allocation108_spill] sm:$0xff]  ;;  %v17507_v51 = vld [vmem:[#allocation125_spill] sm:$0xff] }
 0xa06   :  { %v14347_v53 = vadd.f32 %v6467_v60, %v6259_v44  ;;  %v5429_v42 = vadd.f32 %v17500_v28, %v5220_v29 }
 0xa07   :  { %v5843_v1 = vpop.f32.mrf.mxu2  ;;  %7520 = vmatmul.msk.f32.gmra.mxu3 %vm11548_vm3, %v17497_v25  ;;  %v5223_v44 = vadd.f32 %v17502_v52, %v5014_v2  ;;  %v17512_v52 = vld [vmem:[#allocation118_spill] sm:$0xff] }
 0xa08   :  { %17495 = vst [vmem:[#allocation78_spill] sm:$0xff] %v14347_v53  ;;  %v5844_v4 = vadd.f32 %v5843_v1, %v5635_v32  ;;  %v6473_v21 = vpop.f32.mrf.mxu1  ;;  %v5638_v32 = vadd.f32 %v17504_v47, %v5429_v42  ;;  %v14367_v1 = vpop.f32.mrf.mxu0  ;;  %v17510_v42 = vld [vmem:[#allocation136_spill] sm:$0xff] }
 0xa0a   :  { %v6053_v14 = vadd.f32 %v13881_v19, %v5844_v4  ;;  %v17506_v4 = vld [vmem:[#allocation288_spill] sm:$0xff]  ;;  %v14374_v28 = vpop.f32.mrf.mxu3 }
 0xa0b   :  { %6520 = vmatmul.f32.gmra.mxu1 %v17501_v49  ;;  %6401 = vmatmul.f32.gmra.mxu0 %v13884_v41 }
 0xa0c   :  { %v6262_v60 = vadd.f32 %v13896_v56, %v6053_v14  ;;  %5893 = vmatmul.f32.gmra.mxu2 %v17486_v37  ;;  %v17505_v56 = vld [vmem:[#allocation107_spill] sm:$0xff]  ;;  %v17508_v14 = vld [vmem:[#allocation116_spill] sm:$0xff] }
 0xa0d   :  { %v5017_v37 = vadd.f32 %v17506_v4, %v17505_v56  ;;  %v5432_v41 = vadd.f32 %v17508_v14, %v5223_v44  ;;  %v17515_v4 = vld [vmem:[#allocation132_spill] sm:$0xff] }
 0xa0e   :  { %v14364_v45 = vadd.f32 %v6470_v23, %v6262_v60  ;;  %v17509_v23 = vld [vmem:[#allocation126_spill] sm:$0xff] }
 0xa0f   :  { %v5846_v25 = vpop.f32.mrf.mxu2  ;;  %6198 = vmatmul.f32.gmra.mxu3 %v17332_v11  ;;  %v17511_v60 = vld [vmem:[#allocation114_spill] sm:$0xff]  ;;  %v5226_v11 = vadd.f32 %v17512_v52, %v5017_v37  ;;  %v17522_v52 = vld [vmem:[#allocation124_spill] sm:$0xff] }
 0xa10   :  { %17503 = vst [vmem:[#allocation268_spill] sm:$0xff] %v14364_v45  ;;  %v5847_v19 = vadd.f32 %v5846_v25, %v5638_v32  ;;  %v6476_v29 = vpop.f32.mrf.mxu1  ;;  %v17514_v32 = vld [vmem:[#allocation280_spill] sm:$0xff]  ;;  %v14387_v44 = vpop.f32.mrf.mxu0  ;;  %v17519_v45 = vld [vmem:[#allocation123_spill] sm:$0xff] }
 0xa11   :  { %v5641_v25 = vadd.f32 %v17514_v32, %v5432_v41  ;;  %v5435_v37 = vadd.f32 %v17519_v45, %v5226_v11  ;;  %v17521_v41 = vld [vmem:[#allocation143_spill] sm:$0xff]  ;;  %v17526_v11 = vld [vmem:[#allocation122_spill] sm:$0xff] }
 0xa12   :  { %v6056_v50 = vadd.f32 %v17507_v51, %v5847_v19 }
 0xa13   :  { %6523 = vmatmul.f32.gmra.mxu1 %v17510_v42  ;;  %6404 = vmatmul.f32.gmra.mxu0 %v17511_v60 }
 0xa14   :  { %v6265_v2 = vadd.f32 %v17509_v23, %v6056_v50  ;;  %5896 = vmatmul.f32.gmra.mxu2 %v17493_v61  ;;  %v17516_v61 = vld [vmem:[#allocation115_spill] sm:$0xff]  ;;  %v17518_v23 = vld [vmem:[#allocation386_spill] sm:$0xff] }
 0xa15   :  { %v17517_v50 = vld [vmem:[#allocation295_spill] sm:$0xff] }
 0xa16   :  { %v14381_v47 = vadd.f32 %v6473_v21, %v6265_v2  ;;  %v5020_v14 = vadd.f32 %v17517_v50, %v17516_v61  ;;  %v17520_v21 = vld [vmem:[#allocation129_spill] sm:$0xff] }
 0xa17   :  { %v5849_v56 = vpop.f32.mrf.mxu2  ;;  %7522 = vmatmul.msk.f32.gmra.mxu3 %vm11548_vm3, %v17515_v4  ;;  %v17524_v4 = vld [vmem:[#allocation104_spill] sm:$0xff] }
 0xa18   :  { %17513 = vst [vmem:[#allocation87_spill] sm:$0xff] %v14381_v47  ;;  %v5850_v19 = vadd.f32 %v5849_v56, %v5641_v25  ;;  %v6479_v51 = vpop.f32.mrf.mxu1  ;;  %v5229_v32 = vadd.f32 %v17522_v52, %v5020_v14  ;;  %v14398_v25 = vpop.f32.mrf.mxu3  ;;  %v5644_v61 = vadd.f32 %v17524_v4, %v5435_v37  ;;  %v17530_v14 = vld [vmem:[#allocation141_spill] sm:$0xff]  ;;  %v17532_v37 = vld [vmem:[#allocation388_spill] sm:$0xff] }
 0xa19   :  { %v14408_v53 = vpop.f32.mrf.mxu0 }
 0xa1a   :  { %v6059_v60 = vadd.f32 %v17518_v23, %v5850_v19  ;;  %v17525_v23 = vld [vmem:[#allocation140_spill] sm:$0xff] }
 0xa1b   :  { %6526 = vmatmul.f32.gmra.mxu1 %v17521_v41  ;;  %6407 = vmatmul.f32.gmra.mxu0 %v13919_v27  ;;  %v5438_v27 = vadd.f32 %v17529_v8, %v5229_v32  ;;  %v17537_v32 = vld [vmem:[#allocation148_spill] sm:$0xff] }
 0xa1c   :  { %v6268_v2 = vadd.f32 %v17520_v21, %v6059_v60  ;;  %5899 = vmatmul.f32.gmra.mxu2 %v17501_v49  ;;  %v17527_v60 = vld [vmem:[#allocation301_spill] sm:$0xff]  ;;  %v17528_v21 = vld [vmem:[#allocation387_spill] sm:$0xff] }
 0xa1d   :  { %v5023_v49 = vadd.f32 %v17527_v60, %v17526_v11  ;;  %v17539_v60 = vld [vmem:[#allocation307_spill] sm:$0xff] }
 0xa1e   :  { %v14400_v56 = vadd.f32 %v6476_v29, %v6268_v2  ;;  %v17531_v29 = vld [vmem:[#allocation36_spill] sm:$0xff]  ;;  %v17533_v2 = vld [vmem:[#allocation133_spill] sm:$0xff] }
 0xa1f   :  { %v5852_v50 = vpop.f32.mrf.mxu2  ;;  %6204 = vmatmul.f32.gmra.mxu3 %v17525_v23  ;;  %v5232_v4 = vadd.f32 %v17533_v2, %v5023_v49 }
 0xa20   :  { %17523 = vst [vmem:[#allocation106_spill] sm:$0xff] %v14400_v56  ;;  %v5853_v19 = vadd.f32 %v5852_v50, %v5644_v61  ;;  %v6482_v45 = vpop.f32.mrf.mxu1  ;;  %v17535_v50 = vld [vmem:[#allocation291_spill] sm:$0xff]  ;;  %v17541_v56 = vld [vmem:[#allocation138_spill] sm:$0xff] }
 0xa21   :  { %v5647_v23 = vadd.f32 %v17535_v50, %v5438_v27  ;;  %v5441_v49 = vadd.f32 %v17541_v56, %v5232_v4  ;;  %v17543_v27 = vld [vmem:[#allocation157_spill] sm:$0xff]  ;;  %v14430_v2 = vpop.f32.mrf.mxu0  ;;  %v17545_v50 = vld [vmem:[#allocation139_spill] sm:$0xff] }
 0xa22   :  { %v6062_v47 = vadd.f32 %v17528_v21, %v5853_v19  ;;  %v14418_v19 = vpop.f32.mrf.mxu3  ;;  %17544 = vst [vmem:[#allocation102_spill] sm:$0xff] %v14430_v2  ;;  %v17549_v4 = vld [vmem:[#allocation137_spill] sm:$0xff]  ;;  %v17552_v2 = vld [vmem:[#allocation147_spill] sm:$0xff] }
 0xa23   :  { %6529 = vmatmul.f32.gmra.mxu1 %v17531_v29  ;;  %6410 = vmatmul.f32.gmra.mxu0 %v17532_v37  ;;  %17536 = vst [vmem:[#allocation261_spill] sm:$0xff] %v14418_v19 }
 0xa24   :  { %v6271_v52 = vadd.f32 %v17530_v14, %v6062_v47  ;;  %5902 = vmatmul.f32.gmra.mxu2 %v17510_v42  ;;  %v17538_v42 = vld [vmem:[#allocation130_spill] sm:$0xff]  ;;  %v17540_v14 = vld [vmem:[#allocation389_spill] sm:$0xff] }
 0xa25   :  { %v5026_v21 = vadd.f32 %v17539_v60, %v17538_v42 }
 0xa26   :  { %v14415_v61 = vadd.f32 %v6479_v51, %v6271_v52  ;;  %v17542_v51 = vld [vmem:[#allocation144_spill] sm:$0xff] }
 0xa27   :  { %v5855_v11 = vpop.f32.mrf.mxu2  ;;  %7524 = vmatmul.msk.f32.gmra.mxu3 %vm11548_vm3, %v17537_v32  ;;  %v17547_v32 = vld [vmem:[#allocation297_spill] sm:$0xff] }
 0xa28   :  { %17534 = vst [vmem:[#allocation86_spill] sm:$0xff] %v14415_v61  ;;  %v5856_v8 = vadd.f32 %v5855_v11, %v5647_v23  ;;  %v6485_v47 = vpop.f32.mrf.mxu1  ;;  %v5235_v23 = vadd.f32 %v17545_v50, %v5026_v21  ;;  %v5650_v42 = vadd.f32 %v17547_v32, %v5441_v49  ;;  %v17551_v61 = vld [vmem:[#allocation390_spill] sm:$0xff]  ;;  %v17554_v49 = vld [vmem:[#allocation391_spill] sm:$0xff] }
 0xa2a   :  { %v6065_v37 = vadd.f32 %v17540_v14, %v5856_v8  ;;  %v17548_v14 = vld [vmem:[#allocation154_spill] sm:$0xff] }
 0xa2b   :  { %6532 = vmatmul.f32.gmra.mxu1 %v17543_v27  ;;  %6413 = vmatmul.f32.gmra.mxu0 %v13954_v33  ;;  %v5444_v33 = vadd.f32 %v17552_v2, %v5235_v23  ;;  %v17561_v23 = vld [vmem:[#allocation155_spill] sm:$0xff] }
 0xa2c   :  { %v6274_v52 = vadd.f32 %v17542_v51, %v6065_v37  ;;  %5905 = vmatmul.f32.gmra.mxu2 %v17521_v41  ;;  %v17550_v37 = vld [vmem:[#allocation312_spill] sm:$0xff]  ;;  %v14440_v51 = vpop.f32.mrf.mxu3 }
 0xa2d   :  { %v5029_v41 = vadd.f32 %v17550_v37, %v17549_v4 }
 0xa2e   :  { %v14434_v11 = vadd.f32 %v6482_v45, %v6274_v52  ;;  %v17553_v45 = vld [vmem:[#allocation38_spill] sm:$0xff]  ;;  %v17555_v52 = vld [vmem:[#allocation149_spill] sm:$0xff] }
 0xa2f   :  { %v5858_v60 = vpop.f32.mrf.mxu2  ;;  %6210 = vmatmul.f32.gmra.mxu3 %v17548_v14  ;;  %v5238_v50 = vadd.f32 %v17555_v52, %v5029_v41  ;;  %v14452_v14 = vpop.f32.mrf.mxu0  ;;  %v17564_v52 = vld [vmem:[#allocation30_spill] sm:$0xff] }
 0xa30   :  { %17546 = vst [vmem:[#allocation85_spill] sm:$0xff] %v14434_v11  ;;  %v5859_v8 = vadd.f32 %v5858_v60, %v5650_v42  ;;  %v6488_v56 = vpop.f32.mrf.mxu1  ;;  %v17557_v42 = vld [vmem:[#allocation303_spill] sm:$0xff]  ;;  %v17570_v11 = vld [vmem:[#allocation160_spill] sm:$0xff] }
 0xa31   :  { %v5653_v60 = vadd.f32 %v17557_v42, %v5444_v33 }
 0xa32   :  { %v6068_v19 = vadd.f32 %v17551_v61, %v5859_v8  ;;  %v17558_v8 = vld [vmem:[#allocation161_spill] sm:$0xff] }
 0xa33   :  { %6535 = vmatmul.f32.gmra.mxu1 %v17553_v45  ;;  %6416 = vmatmul.f32.gmra.mxu0 %v17554_v49  ;;  %v17562_v49 = vld [vmem:[#allocation153_spill] sm:$0xff] }
 0xa34   :  { %v6277_v21 = vadd.f32 %v13991_v58, %v6068_v19  ;;  %5908 = vmatmul.f32.gmra.mxu2 %v17531_v29  ;;  %v17559_v29 = vld [vmem:[#allocation146_spill] sm:$0xff]  ;;  %v5447_v41 = vadd.f32 %v17562_v49, %v5238_v50  ;;  %v17569_v49 = vld [vmem:[#allocation31_spill] sm:$0xff] }
 0xa35   :  { %v17560_v19 = vld [vmem:[#allocation318_spill] sm:$0xff] }
 0xa36   :  { %v14449_v32 = vadd.f32 %v6485_v47, %v6277_v21  ;;  %v5032_v2 = vadd.f32 %v17560_v19, %v17559_v29  ;;  %v14461_v47 = vpop.f32.mrf.mxu3  ;;  %v17563_v21 = vld [vmem:[#allocation169_spill] sm:$0xff]  ;;  %v17566_v19 = vld [vmem:[#allocation166_spill] sm:$0xff] }
 0xa37   :  { %v5861_v4 = vpop.f32.mrf.mxu2  ;;  %7526 = vmatmul.msk.f32.gmra.mxu3 %vm11548_vm3, %v17558_v8  ;;  %v14472_v50 = vpop.f32.mrf.mxu0 }
 0xa38   :  { %17556 = vst [vmem:[#allocation95_spill] sm:$0xff] %v14449_v32  ;;  %v5862_v61 = vadd.f32 %v5861_v4, %v5653_v60  ;;  %v6491_v58 = vpop.f32.mrf.mxu1  ;;  %v5241_v42 = vadd.f32 %v17564_v52, %v5032_v2  ;;  %v17565_v4 = vld [vmem:[#allocation134_spill] sm:$0xff] }
 0xa39   :  { %v5656_v8 = vadd.f32 %v17565_v4, %v5447_v41  ;;  %v17572_v41 = vld [vmem:[#allocation162_spill] sm:$0xff] }
 0xa3a   :  { %v6071_v37 = vadd.f32 %v17561_v23, %v5862_v61 }
 0xa3b   :  { %6538 = vmatmul.f32.gmra.mxu1 %v17563_v21  ;;  %6419 = vmatmul.f32.gmra.mxu0 %v13987_v38  ;;  %v5450_v38 = vadd.f32 %v17570_v11, %v5241_v42  ;;  %v17576_v11 = vld [vmem:[#allocation159_spill] sm:$0xff]  ;;  %v17578_v42 = vld [vmem:[#allocation165_spill] sm:$0xff] }
 0xa3c   :  { %v6280_v33 = vadd.f32 %v14009_v10, %v6071_v37  ;;  %5911 = vmatmul.f32.gmra.mxu2 %v17543_v27  ;;  %v17567_v10 = vld [vmem:[#allocation152_spill] sm:$0xff]  ;;  %v17568_v37 = vld [vmem:[#allocation323_spill] sm:$0xff] }
 0xa3d   :  { %v5035_v27 = vadd.f32 %v17568_v37, %v17567_v10  ;;  %v17575_v10 = vld [vmem:[#allocation172_spill] sm:$0xff] }
 0xa3e   :  { %v14468_v60 = vadd.f32 %v6488_v56, %v6280_v33  ;;  %v17571_v56 = vld [vmem:[#allocation176_spill] sm:$0xff]  ;;  %v14483_v52 = vpop.f32.mrf.mxu3 }
 0xa3f   :  { %v5864_v29 = vpop.f32.mrf.mxu2  ;;  %6216 = vmatmul.f32.gmra.mxu3 %v17566_v19  ;;  %v5244_v33 = vadd.f32 %v17572_v41, %v5035_v27  ;;  %v14495_v27 = vpop.f32.mrf.mxu0 }
 0xa40   :  { %v5865_v61 = vadd.f32 %v5864_v29, %v5656_v8  ;;  %v6494_v23 = vpop.f32.mrf.mxu1  ;;  %v17574_v8 = vld [vmem:[#allocation314_spill] sm:$0xff] }
 0xa41   :  { %v5659_v29 = vadd.f32 %v17574_v8, %v5450_v38  ;;  %v5453_v37 = vadd.f32 %v17578_v42, %v5244_v33  ;;  %v17580_v38 = vld [vmem:[#allocation32_spill] sm:$0xff]  ;;  %v4618_v33 = vrot.slane %v17198_v36, 2 }
 0xa42   :  { %v6074_v32 = vadd.f32 %v17569_v49, %v5865_v61  ;;  %v17579_v49 = vld [vmem:[#allocation182_spill] sm:$0xff]  ;;  %v17582_v8 = vld [vmem:[#allocation320_spill] sm:$0xff] }
 0xa43   :  { %6541 = vmatmul.f32.gmra.mxu1 %v17571_v56  ;;  %6422 = vmatmul.f32.gmra.mxu0 %v14004_v31 }
 0xa44   :  { %v6283_v2 = vadd.f32 %v14032_v7, %v6074_v32  ;;  %5914 = vmatmul.f32.gmra.mxu2 %v17553_v45  ;;  %v17577_v45 = vld [vmem:[#allocation329_spill] sm:$0xff] }
 0xa45   :  { %v5038_v32 = vadd.f32 %v17577_v45, %v17576_v11  ;;  %v17584_v11 = vld [vmem:[#allocation164_spill] sm:$0xff]  ;;  %v17585_v45 = vld [vmem:[#allocation333_spill] sm:$0xff] }
 0xa46   :  { %v14485_v4 = vadd.f32 %v6491_v58, %v6283_v2 }
 0xa47   :  { %v5867_v19 = vpop.f32.mrf.mxu2  ;;  %7528 = vmatmul.msk.f32.gmra.mxu3 %vm11548_vm3, %v17575_v10  ;;  %v5247_v2 = vadd.f32 %v17580_v38, %v5038_v32  ;;  %v14507_v10 = vpop.f32.mrf.mxu3 }
 0xa48   :  { %17573 = vst [vmem:[#allocation93_spill] sm:$0xff] %v14485_v4  ;;  %v5868_v61 = vadd.f32 %v5867_v19, %v5659_v29  ;;  %v6497_v7 = vpop.f32.mrf.mxu1  ;;  %v5662_v29 = vadd.f32 %v17582_v8, %v5453_v37  ;;  %v14517_v36 = vpop.f32.mrf.mxu0  ;;  %v17589_v8 = vld [vmem:[#allocation326_spill] sm:$0xff] }
 0xa4a   :  { %v6077_v31 = vadd.f32 %v14022_v22, %v5868_v61  ;;  %v17583_v22 = vld [vmem:[#allocation332_spill] sm:$0xff] }
 0xa4b   :  { %6544 = vmatmul.f32.gmra.mxu1 %v17579_v49  ;;  %6425 = vmatmul.f32.gmra.mxu0 %v14020_v30  ;;  %v4617_v61 = vrot.slane %v17583_v22, 2  ;;  %v5041_v30 = vadd.f32 %v17585_v45, %v17584_v11 }
 0xa4c   :  { %v6286_v58 = vadd.f32 %v14052_v34, %v6077_v31  ;;  %5917 = vmatmul.f32.gmra.mxu2 %v17563_v21 }
 0xa4d   :  { %v4619_v42 = vsel %vm644_vm2, %v4617_v61, %v4618_v33  ;;  %v17591_v61 = vld [vmem:[#allocation343_spill] sm:$0xff] }
 0xa4e   :  { %v14502_v41 = vadd.f32 %v6494_v23, %v6286_v58  ;;  %v17586_v23 = vld [vmem:[#allocation171_spill] sm:$0xff] }
 0xa4f   :  { %v5870_v19 = vpop.f32.mrf.mxu2  ;;  %6222 = vmatmul.f32.gmra.mxu3 %v17204_v26  ;;  %v5456_v31 = vadd.f32 %v17586_v23, %v5247_v2  ;;  %v17587_v26 = vld [vmem:[#allocation173_spill] sm:$0xff]  ;;  %v14530_v45 = vpop.f32.mrf.mxu3 }
 0xa50   :  { %17581 = vst [vmem:[#allocation113_spill] sm:$0xff] %v14502_v41  ;;  %v5871_v34 = vadd.f32 %v5870_v19, %v5662_v29  ;;  %v6500_v21 = vpop.f32.mrf.mxu1  ;;  %v5250_v58 = vadd.f32 %v17587_v26, %v5041_v30  ;;  %v17590_v19 = vld [vmem:[#allocation181_spill] sm:$0xff] }
 0xa51   :  { %v5665_v29 = vadd.f32 %v17589_v8, %v5456_v31  ;;  %v4620_v2 = vrot.slane %v17590_v19, 2  ;;  %v14542_v19 = vpop.f32.mrf.mxu0 }
 0xa52   :  { %v6080_v32 = vadd.f32 %v14042_v12, %v5871_v34  ;;  %v17593_v34 = vld [vmem:[#allocation186_spill] sm:$0xff] }
 0xa53   :  { %6547 = vmatmul.f32.gmra.mxu1 %v4619_v42  ;;  %6428 = vmatmul.f32.gmra.mxu0 %v14037_v15  ;;  %v17594_v15 = vld [vmem:[#allocation396_spill] sm:$0xff]  ;;  %v4621_v23 = vsel %vm644_vm2, %v4618_v33, %v4620_v2  ;;  %v17600_v2 = vld [vmem:[#allocation178_spill] sm:$0xff] }
 0xa54   :  { %v6289_v37 = vadd.f32 %v14083_v62, %v6080_v32  ;;  %5920 = vmatmul.f32.gmra.mxu2 %v17571_v56  ;;  %v17592_v56 = vld [vmem:[#allocation170_spill] sm:$0xff] }
 0xa55   :  { %v5044_v11 = vadd.f32 %v17593_v34, %v17592_v56  ;;  %v17602_v34 = vld [vmem:[#allocation183_spill] sm:$0xff] }
 0xa56   :  { %v14521_v38 = vadd.f32 %v6497_v7, %v6289_v37  ;;  %v17595_v7 = vld [vmem:[#allocation179_spill] sm:$0xff]  ;;  %v17596_v37 = vld [vmem:[#allocation180_spill] sm:$0xff] }
 0xa57   :  { %v5873_v12 = vpop.f32.mrf.mxu2  ;;  %7530 = vmatmul.msk.f32.gmra.mxu3 %vm11548_vm3, %v17591_v61  ;;  %v5459_v32 = vadd.f32 %v17595_v7, %v5250_v58  ;;  %v5253_v26 = vadd.f32 %v17596_v37, %v5044_v11  ;;  %v17599_v58 = vld [vmem:[#allocation346_spill] sm:$0xff]  ;;  %v17603_v11 = vld [vmem:[#allocation12_spill] sm:$0xff]  ;;  %v17607_v37 = vld [vmem:[#allocation191_spill] sm:$0xff] }
 0xa58   :  { %17588 = vst [vmem:[#allocation94_spill] sm:$0xff] %v14521_v38  ;;  %v5874_v22 = vadd.f32 %v5873_v12, %v5665_v29  ;;  %v6503_v62 = vpop.f32.mrf.mxu1  ;;  %v17598_v29 = vld [vmem:[#allocation177_spill] sm:$0xff]  ;;  %v17605_v7 = vld [vmem:[#allocation184_spill] sm:$0xff] }
 0xa59   :  { %v5668_v12 = vadd.f32 %v17598_v29, %v5459_v32 }
 0xa5a   :  { %v6083_v30 = vadd.f32 %v17594_v15, %v5874_v22  ;;  %v14549_v15 = vpop.f32.mrf.mxu3 }
 0xa5b   :  { %6550 = vmatmul.f32.gmra.mxu1 %v4621_v23  ;;  %6431 = vmatmul.f32.gmra.mxu0 %v14055_v55  ;;  %v5462_v55 = vadd.f32 %v17602_v34, %v5253_v26  ;;  %v14561_v26 = vpop.f32.mrf.mxu0  ;;  %v17612_v34 = vld [vmem:[#allocation189_spill] sm:$0xff] }
 0xa5c   :  { %v6292_v31 = vadd.f32 %v14102_v3, %v6083_v30  ;;  %5923 = vmatmul.f32.gmra.mxu2 %v17579_v49  ;;  %v17601_v3 = vld [vmem:[#allocation41_spill] sm:$0xff]  ;;  %v17604_v30 = vld [vmem:[#allocation398_spill] sm:$0xff] }
 0xa5d   :  { %v5047_v56 = vadd.f32 %v17601_v3, %v17600_v2  ;;  %v5671_v29 = vadd.f32 %v17607_v37, %v5462_v55  ;;  %v17611_v3 = vld [vmem:[#allocation404_spill] sm:$0xff]  ;;  %v17613_v55 = vld [vmem:[#allocation13_spill] sm:$0xff] }
 0xa5e   :  { %v14539_v8 = vadd.f32 %v6500_v21, %v6292_v31 }
 0xa5f   :  { %v5876_v22 = vpop.f32.mrf.mxu2  ;;  %6228 = vmatmul.f32.gmra.mxu3 %v17599_v58  ;;  %v5256_v32 = vadd.f32 %v17605_v7, %v5047_v56 }
 0xa60   :  { %17597 = vst [vmem:[#allocation76_spill] sm:$0xff] %v14539_v8  ;;  %v5877_v61 = vadd.f32 %v5876_v22, %v5668_v12  ;;  %v6506_v33 = vpop.f32.mrf.mxu1 }
 0xa61   :  { %v5465_v56 = vadd.f32 %v17612_v34, %v5256_v32 }
 0xa62   :  { %v6086_v49 = vadd.f32 %v14094_v16, %v5877_v61  ;;  %v17608_v16 = vld [vmem:[#allocation9_spill] sm:$0xff]  ;;  %v17610_v61 = vld [vmem:[#allocation344_spill] sm:$0xff]  ;;  %v14571_v7 = vpop.f32.mrf.mxu3 }
 0xa63   :  { %6553 = vmatmul.f32.gmra.mxu1 %v17603_v11  ;;  %6434 = vmatmul.f32.gmra.mxu0 %v17604_v30  ;;  %v17615_v30 = vld [vmem:[#allocation190_spill] sm:$0xff] }
 0xa64   :  { %v6295_v21 = vadd.f32 %v14119_v39, %v6086_v49  ;;  %5926 = vmatmul.f32.gmra.mxu2 %v4619_v42  ;;  %v17609_v42 = vld [vmem:[#allocation40_spill] sm:$0xff] }
 0xa65   :  { %v5050_v2 = vadd.f32 %v17610_v61, %v17609_v42 }
 0xa66   :  { %v14555_v31 = vadd.f32 %v6503_v62, %v6295_v21  ;;  %v17614_v21 = vld [vmem:[#allocation401_spill] sm:$0xff] }
 0xa67   :  { %v5879_v12 = vpop.f32.mrf.mxu2  ;;  %7532 = vmatmul.msk.f32.gmra.mxu3 %vm11548_vm3, %v17608_v16  ;;  %v5259_v57 = vadd.f32 %v17615_v30, %v5050_v2  ;;  %v17624_v30 = vld [vmem:[#allocation194_spill] sm:$0xff] }
 0xa68   :  { %17606 = vst [vmem:[#allocation92_spill] sm:$0xff] %v14555_v31  ;;  %v5880_v22 = vadd.f32 %v5879_v12, %v5671_v29  ;;  %v6509_v39 = vpop.f32.mrf.mxu1  ;;  %v17617_v29 = vld [vmem:[#allocation174_spill] sm:$0xff] }
 0xa69   :  { %v5674_v12 = vadd.f32 %v17617_v29, %v5465_v56  ;;  %v17623_v56 = vld [vmem:[#allocation10_spill] sm:$0xff] }
 0xa6a   :  { %v6089_v49 = vadd.f32 %v17611_v3, %v5880_v22  ;;  %v17618_v22 = vld [vmem:[#allocation188_spill] sm:$0xff] }
 0xa6b   :  { %6556 = vmatmul.f32.gmra.mxu1 %v17613_v55  ;;  %6437 = vmatmul.f32.gmra.mxu0 %v17614_v21  ;;  %v14581_v21 = vpop.f32.mrf.mxu0 }
 0xa6c   :  { %v6298_v62 = vadd.f32 %v14133_v6, %v6089_v49  ;;  %5929 = vmatmul.f32.gmra.mxu2 %v4621_v23  ;;  %v17619_v6 = vld [vmem:[#allocation347_spill] sm:$0xff]  ;;  %v17620_v49 = vld [vmem:[#allocation193_spill] sm:$0xff] }
 0xa6d   :  { %v5053_v23 = vadd.f32 %v17619_v6, %v17618_v22  ;;  %v5468_v34 = vadd.f32 %v17620_v49, %v5259_v57  ;;  %v17628_v6 = vld [vmem:[#allocation195_spill] sm:$0xff]  ;;  %v17629_v49 = vld [vmem:[#allocation26_spill] sm:$0xff] }
 0xa6e   :  { %v14573_v37 = vadd.f32 %v6506_v33, %v6298_v62  ;;  %v17621_v33 = vld [vmem:[#allocation196_spill] sm:$0xff] }
 0xa6f   :  { %v5882_v42 = vpop.f32.mrf.mxu2  ;;  %6234 = vmatmul.f32.gmra.mxu3 %v17608_v16  ;;  %v17622_v62 = vld [vmem:[#allocation204_spill] sm:$0xff]  ;;  %v5262_v16 = vadd.f32 %v17624_v30, %v5053_v23  ;;  %v17633_v30 = vld [vmem:[#allocation11_spill] sm:$0xff] }
 0xa70   :  { %17616 = vst [vmem:[#allocation277_spill] sm:$0xff] %v14573_v37  ;;  %v5883_v61 = vadd.f32 %v5882_v42, %v5674_v12  ;;  %v6512_v32 = vpop.f32.mrf.mxu1  ;;  %v17626_v12 = vld [vmem:[#allocation24_spill] sm:$0xff]  ;;  %v17630_v37 = vld [vmem:[#allocation197_spill] sm:$0xff] }
 0xa71   :  { %v5677_v42 = vadd.f32 %v17626_v12, %v5468_v34  ;;  %v17634_v12 = vld [vmem:[#allocation198_spill] sm:$0xff] }
 0xa72   :  { %v6092_v3 = vadd.f32 %v14126_v40, %v5883_v61  ;;  %v14591_v40 = vpop.f32.mrf.mxu3 }
 0xa73   :  { %6559 = vmatmul.f32.gmra.mxu1 %v17622_v62  ;;  %6440 = vmatmul.f32.gmra.mxu0 %v17623_v56  ;;  %v5471_v56 = vadd.f32 %v17630_v37, %v5262_v16  ;;  %v14601_v34 = vpop.f32.mrf.mxu0  ;;  %v17637_v37 = vld [vmem:[#allocation28_spill] sm:$0xff]  ;;  %v17638_v16 = vld [vmem:[#allocation351_spill] sm:$0xff] }
 0xa74   :  { %v6301_v2 = vadd.f32 %v14149_v48, %v6092_v3  ;;  %5932 = vmatmul.f32.gmra.mxu2 %v17621_v33  ;;  %v17627_v48 = vld [vmem:[#allocation20_spill] sm:$0xff] }
 0xa75   :  { %v5056_v3 = vadd.f32 %v17628_v6, %v17627_v48 }
 0xa76   :  { %v14588_v29 = vadd.f32 %v6509_v39, %v6301_v2  ;;  %v17631_v39 = vld [vmem:[#allocation200_spill] sm:$0xff] }
 0xa77   :  { %v5885_v22 = vpop.f32.mrf.mxu2  ;;  %6652 = vmatmul.f32.vlgmr.msrb.gmra.mxu3 %v17613_v55  ;;  %v17632_v2 = vld [vmem:[#allocation208_spill] sm:$0xff]  ;;  %v5265_v55 = vadd.f32 %v17634_v12, %v5056_v3 }
 0xa78   :  { %17625 = vst [vmem:[#allocation101_spill] sm:$0xff] %v14588_v29  ;;  %v5886_v57 = vadd.f32 %v5885_v22, %v5677_v42  ;;  %v6515_v61 = vpop.f32.mrf.mxu1  ;;  %v17636_v22 = vld [vmem:[#allocation43_spill] sm:$0xff] }
 0xa79   :  { %v5680_v48 = vadd.f32 %v17636_v22, %v5471_v56  ;;  %v17643_v56 = vld [vmem:[#allocation45_spill] sm:$0xff] }
 0xa7a   :  { %v6095_v33 = vadd.f32 %v17629_v49, %v5886_v57 }
 0xa7b   :  { %6562 = vmatmul.f32.gmra.mxu1 %v17632_v2  ;;  %6443 = vmatmul.f32.gmra.mxu0 %v17633_v30  ;;  %v17640_v30 = vld [vmem:[#allocation213_spill] sm:$0xff] }
 0xa7c   :  { %v6304_v23 = vadd.f32 %v14162_v63, %v6095_v33  ;;  %5935 = vmatmul.f32.gmra.mxu2 %v17631_v39  ;;  %v5059_v63 = vadd.f32 %v17638_v16, %v17637_v37  ;;  %v17639_v39 = vld [vmem:[#allocation202_spill] sm:$0xff]  ;;  %v17644_v37 = vld [vmem:[#allocation201_spill] sm:$0xff] }
 0xa7d   :  { %v5474_v29 = vadd.f32 %v17639_v39, %v5265_v55  ;;  %v17645_v16 = vld [vmem:[#allocation354_spill] sm:$0xff] }
 0xa7e   :  { %v14605_v42 = vadd.f32 %v6512_v32, %v6304_v23  ;;  %v17641_v32 = vld [vmem:[#allocation203_spill] sm:$0xff] }
 0xa7f   :  { %v5888_v6 = vpop.f32.mrf.mxu2  ;;  %v5268_v3 = vadd.f32 %v17641_v32, %v5059_v63  ;;  %v5683_v12 = vadd.f32 %v17643_v56, %v5474_v29  ;;  %v17650_v29 = vld [vmem:[#allocation44_spill] sm:$0xff] }
 0xa80   :  { %17635 = vst [vmem:[#allocation121_spill] sm:$0xff] %v14605_v42  ;;  %v5889_v57 = vadd.f32 %v5888_v6, %v5680_v48  ;;  %v6518_v49 = vpop.f32.mrf.mxu1 }
 0xa82   :  { %v6098_v33 = vadd.f32 %v14157_v20, %v5889_v57  ;;  %v5062_v20 = vadd.f32 %v17645_v16, %v17644_v37  ;;  %v17646_v57 = vld [vmem:[#allocation205_spill] sm:$0xff]  ;;  %v17654_v16 = vld [vmem:[#allocation223_spill] sm:$0xff] }
 0xa83   :  { %6565 = vmatmul.f32.gmra.mxu1 %v17640_v30  ;;  %v17652_v37 = vld [vmem:[#allocation357_spill] sm:$0xff] }
 0xa84   :  { %v6307_v31 = vadd.f32 %v14179_v24, %v6098_v33  ;;  %5938 = vmatmul.f32.gmra.mxu2 %v17622_v62  ;;  %v5477_v24 = vadd.f32 %v17646_v57, %v5268_v3  ;;  %v17647_v33 = vld [vmem:[#allocation218_spill] sm:$0xff]  ;;  %v17657_v57 = vld [vmem:[#allocation16_spill] sm:$0xff] }
 0xa86   :  { %v14616_v23 = vadd.f32 %v6515_v61, %v6307_v31  ;;  %v17648_v31 = vld [vmem:[#allocation206_spill] sm:$0xff]  ;;  %v5686_v39 = vadd.f32 %v17650_v29, %v5477_v24 }
 0xa87   :  { %v5891_v22 = vpop.f32.mrf.mxu2  ;;  %v5271_v61 = vadd.f32 %v17648_v31, %v5062_v20 }
 0xa88   :  { %17642 = vst [vmem:[#allocation103_spill] sm:$0xff] %v14616_v23  ;;  %v5892_v48 = vadd.f32 %v5891_v22, %v5683_v12  ;;  %v6521_v6 = vpop.f32.mrf.mxu1  ;;  %v17651_v22 = vld [vmem:[#allocation42_spill] sm:$0xff] }
 0xa8a   :  { %v6101_v55 = vadd.f32 %v14171_v5, %v5892_v48  ;;  %v5065_v5 = vadd.f32 %v17652_v37, %v17651_v22  ;;  %v17653_v48 = vld [vmem:[#allocation210_spill] sm:$0xff]  ;;  %v17661_v22 = vld [vmem:[#allocation228_spill] sm:$0xff] }
 0xa8b   :  { %6568 = vmatmul.f32.gmra.mxu1 %v17647_v33 }
 0xa8c   :  { %v6310_v62 = vadd.f32 %v14195_v0, %v6101_v55  ;;  %5941 = vmatmul.f32.gmra.mxu2 %v17632_v2  ;;  %v5480_v0 = vadd.f32 %v17653_v48, %v5271_v61 }
 0xa8e   :  { %v14627_v63 = vadd.f32 %v6518_v49, %v6310_v62  ;;  %v17655_v49 = vld [vmem:[#allocation211_spill] sm:$0xff]  ;;  %v5689_v24 = vadd.f32 %v17657_v57, %v5480_v0  ;;  %v17665_v57 = vld [vmem:[#allocation214_spill] sm:$0xff] }
 0xa8f   :  { %v5894_v32 = vpop.f32.mrf.mxu2  ;;  %v5274_v20 = vadd.f32 %v17655_v49, %v5065_v5 }
 0xa90   :  { %17649 = vst [vmem:[#allocation270_spill] sm:$0xff] %v14627_v63  ;;  %v5895_v56 = vadd.f32 %v5894_v32, %v5686_v39  ;;  %v6524_v12 = vpop.f32.mrf.mxu1  ;;  %v17658_v39 = vld [vmem:[#allocation209_spill] sm:$0xff] }
 0xa91   :  { %v17659_v32 = vld [vmem:[#allocation361_spill] sm:$0xff] }
 0xa92   :  { %v6104_v3 = vadd.f32 %v14186_v43, %v5895_v56  ;;  %v5068_v43 = vadd.f32 %v17659_v32, %v17658_v39  ;;  %v17660_v56 = vld [vmem:[#allocation215_spill] sm:$0xff]  ;;  %v17669_v39 = vld [vmem:[#allocation66_spill] sm:$0xff] }
 0xa93   :  { %6571 = vmatmul.f32.gmra.mxu1 %v17654_v16  ;;  %v17670_v32 = vld [vmem:[#allocation234_spill] sm:$0xff] }
 0xa94   :  { %v6313_v2 = vadd.f32 %v14209_v18, %v6104_v3  ;;  %5944 = vmatmul.f32.gmra.mxu2 %v17640_v30  ;;  %v5483_v18 = vadd.f32 %v17660_v56, %v5274_v20  ;;  %v17664_v3 = vld [vmem:[#allocation27_spill] sm:$0xff]  ;;  %v17673_v56 = vld [vmem:[#allocation358_spill] sm:$0xff] }
 0xa96   :  { %v14638_v55 = vadd.f32 %v6521_v6, %v6313_v2  ;;  %v17662_v6 = vld [vmem:[#allocation216_spill] sm:$0xff]  ;;  %v5692_v48 = vadd.f32 %v17664_v3, %v5483_v18 }
 0xa97   :  { %v5897_v62 = vpop.f32.mrf.mxu2  ;;  %v5277_v37 = vadd.f32 %v17662_v6, %v5068_v43 }
 0xa98   :  { %17656 = vst [vmem:[#allocation117_spill] sm:$0xff] %v14638_v55  ;;  %v5898_v31 = vadd.f32 %v5897_v62, %v5689_v24  ;;  %v6527_v29 = vpop.f32.mrf.mxu1  ;;  %v17666_v24 = vld [vmem:[#allocation364_spill] sm:$0xff] }
 0xa99   :  { %v17667_v62 = vld [vmem:[#allocation408_spill] sm:$0xff] }
 0xa9a   :  { %v6107_v61 = vadd.f32 %v14202_v46, %v5898_v31  ;;  %v5071_v46 = vadd.f32 %v17666_v24, %v17665_v57  ;;  %v17668_v31 = vld [vmem:[#allocation220_spill] sm:$0xff]  ;;  %v17676_v57 = vld [vmem:[#allocation410_spill] sm:$0xff]  ;;  %v17677_v24 = vld [vmem:[#allocation225_spill] sm:$0xff] }
 0xa9b   :  { %6574 = vmatmul.f32.gmra.mxu1 %v17661_v22 }
 0xa9c   :  { %v6316_v30 = vadd.f32 %v14224_v9, %v6107_v61  ;;  %5947 = vmatmul.f32.gmra.mxu2 %v17647_v33  ;;  %v5486_v9 = vadd.f32 %v17668_v31, %v5277_v37  ;;  %v17679_v31 = vld [vmem:[#allocation238_spill] sm:$0xff] }
 0xa9e   :  { %v14649_v5 = vadd.f32 %v6524_v12, %v6316_v30  ;;  %v17671_v12 = vld [vmem:[#allocation221_spill] sm:$0xff]  ;;  %v5695_v18 = vadd.f32 %v17673_v56, %v5486_v9  ;;  %v17682_v9 = vld [vmem:[#allocation50_spill] sm:$0xff] }
 0xa9f   :  { %v5900_v0 = vpop.f32.mrf.mxu2  ;;  %v5280_v43 = vadd.f32 %v17671_v12, %v5071_v46 }
 0xaa0   :  { %17663 = vst [vmem:[#allocation100_spill] sm:$0xff] %v14649_v5  ;;  %v5901_v2 = vadd.f32 %v5900_v0, %v5692_v48  ;;  %v6530_v49 = vpop.f32.mrf.mxu1  ;;  %v17674_v48 = vld [vmem:[#allocation219_spill] sm:$0xff] }
 0xaa1   :  { %v17675_v0 = vld [vmem:[#allocation367_spill] sm:$0xff] }
 0xaa2   :  { %v6110_v20 = vadd.f32 %v17667_v62, %v5901_v2  ;;  %v5074_v2 = vadd.f32 %v17675_v0, %v17674_v48  ;;  %v5489_v62 = vadd.f32 %v17677_v24, %v5280_v43  ;;  %v17684_v48 = vld [vmem:[#allocation370_spill] sm:$0xff]  ;;  %v17685_v0 = vld [vmem:[#allocation72_spill] sm:$0xff]  ;;  %v17687_v24 = vld [vmem:[#allocation83_spill] sm:$0xff] }
 0xaa3   :  { %6577 = vmatmul.f32.gmra.mxu1 %v17670_v32 }
 0xaa4   :  { %v6319_v33 = vadd.f32 %v17669_v39, %v6110_v20  ;;  %5950 = vmatmul.f32.gmra.mxu2 %v17654_v16  ;;  %v17678_v20 = vld [vmem:[#allocation414_spill] sm:$0xff] }
 0xaa6   :  { %v14660_v61 = vadd.f32 %v6527_v29, %v6319_v33  ;;  %v17680_v29 = vld [vmem:[#allocation226_spill] sm:$0xff]  ;;  %v5698_v33 = vadd.f32 %v17682_v9, %v5489_v62  ;;  %v17691_v62 = vld [vmem:[#allocation52_spill] sm:$0xff] }
 0xaa7   :  { %v5903_v30 = vpop.f32.mrf.mxu2  ;;  %v5283_v46 = vadd.f32 %v17680_v29, %v5074_v2 }
 0xaa8   :  { %17672 = vst [vmem:[#allocation110_spill] sm:$0xff] %v14660_v61  ;;  %v5904_v6 = vadd.f32 %v5903_v30, %v5695_v18  ;;  %v6533_v3 = vpop.f32.mrf.mxu1  ;;  %v17683_v30 = vld [vmem:[#allocation224_spill] sm:$0xff] }
 0xaaa   :  { %v6113_v37 = vadd.f32 %v17676_v57, %v5904_v6  ;;  %v5077_v6 = vadd.f32 %v17684_v48, %v17683_v30  ;;  %v17686_v57 = vld [vmem:[#allocation230_spill] sm:$0xff]  ;;  %v17692_v30 = vld [vmem:[#allocation229_spill] sm:$0xff]  ;;  %v17693_v48 = vld [vmem:[#allocation232_spill] sm:$0xff] }
 0xaab   :  { %6580 = vmatmul.f32.gmra.mxu1 %v17679_v31 }
 0xaac   :  { %v6322_v16 = vadd.f32 %v17678_v20, %v6113_v37  ;;  %5953 = vmatmul.f32.gmra.mxu2 %v17661_v22  ;;  %v5492_v37 = vadd.f32 %v17686_v57, %v5283_v46  ;;  %v17688_v20 = vld [vmem:[#allocation244_spill] sm:$0xff]  ;;  %v17695_v57 = vld [vmem:[#allocation235_spill] sm:$0xff] }
 0xaae   :  { %v14671_v39 = vadd.f32 %v6530_v49, %v6322_v16  ;;  %v17689_v49 = vld [vmem:[#allocation231_spill] sm:$0xff]  ;;  %v5701_v29 = vadd.f32 %v17691_v62, %v5492_v37  ;;  %v17700_v37 = vld [vmem:[#allocation56_spill] sm:$0xff] }
 0xaaf   :  { %v5906_v12 = vpop.f32.mrf.mxu2  ;;  %v5286_v2 = vadd.f32 %v17689_v49, %v5077_v6 }
 0xab0   :  { %17681 = vst [vmem:[#allocation108_spill] sm:$0xff] %v14671_v39  ;;  %v5907_v56 = vadd.f32 %v5906_v12, %v5698_v33  ;;  %v6536_v18 = vpop.f32.mrf.mxu1  ;;  %v17697_v39 = vld [vmem:[#allocation249_spill] sm:$0xff] }
 0xab2   :  { %v6116_v43 = vadd.f32 %v17685_v0, %v5907_v56  ;;  %v5080_v56 = vadd.f32 %v17693_v48, %v17692_v30  ;;  %v17694_v0 = vld [vmem:[#allocation415_spill] sm:$0xff]  ;;  %v17701_v30 = vld [vmem:[#allocation54_spill] sm:$0xff] }
 0xab3   :  { %6583 = vmatmul.f32.gmra.mxu1 %v17688_v20  ;;  %v17702_v48 = vld [vmem:[#allocation374_spill] sm:$0xff] }
 0xab4   :  { %v6325_v22 = vadd.f32 %v17687_v24, %v6116_v43  ;;  %5956 = vmatmul.f32.gmra.mxu2 %v17670_v32  ;;  %v5495_v43 = vadd.f32 %v17695_v57, %v5286_v2  ;;  %v17696_v24 = vld [vmem:[#allocation91_spill] sm:$0xff]  ;;  %v17704_v57 = vld [vmem:[#allocation241_spill] sm:$0xff] }
 0xab6   :  { %v14682_v16 = vadd.f32 %v6533_v3, %v6325_v22  ;;  %v17698_v3 = vld [vmem:[#allocation236_spill] sm:$0xff]  ;;  %v5704_v49 = vadd.f32 %v17700_v37, %v5495_v43  ;;  %v17709_v43 = vld [vmem:[#allocation239_spill] sm:$0xff] }
 0xab7   :  { %v5909_v9 = vpop.f32.mrf.mxu2  ;;  %v5289_v6 = vadd.f32 %v17698_v3, %v5080_v56 }
 0xab8   :  { %17690 = vst [vmem:[#allocation128_spill] sm:$0xff] %v14682_v16  ;;  %v5910_v33 = vadd.f32 %v5909_v9, %v5701_v29  ;;  %v6539_v12 = vpop.f32.mrf.mxu1  ;;  %v17706_v16 = vld [vmem:[#allocation255_spill] sm:$0xff] }
 0xaba   :  { %v6119_v46 = vadd.f32 %v17694_v0, %v5910_v33  ;;  %v5083_v33 = vadd.f32 %v17702_v48, %v17701_v30  ;;  %v17703_v0 = vld [vmem:[#allocation418_spill] sm:$0xff]  ;;  %v17710_v30 = vld [vmem:[#allocation240_spill] sm:$0xff]  ;;  %v17711_v48 = vld [vmem:[#allocation243_spill] sm:$0xff] }
 0xabb   :  { %6586 = vmatmul.f32.gmra.mxu1 %v17697_v39 }
 0xabc   :  { %v6328_v32 = vadd.f32 %v17696_v24, %v6119_v46  ;;  %5959 = vmatmul.f32.gmra.mxu2 %v17679_v31  ;;  %v5498_v46 = vadd.f32 %v17704_v57, %v5289_v6  ;;  %v17705_v24 = vld [vmem:[#allocation98_spill] sm:$0xff]  ;;  %v17713_v57 = vld [vmem:[#allocation245_spill] sm:$0xff] }
 0xabe   :  { %v14693_v22 = vadd.f32 %v6536_v18, %v6328_v32  ;;  %v17707_v18 = vld [vmem:[#allocation242_spill] sm:$0xff]  ;;  %v5707_v3 = vadd.f32 %v17709_v43, %v5498_v46  ;;  %v17717_v46 = vld [vmem:[#allocation63_spill] sm:$0xff] }
 0xabf   :  { %v5912_v62 = vpop.f32.mrf.mxu2  ;;  %v5292_v56 = vadd.f32 %v17707_v18, %v5083_v33 }
 0xac0   :  { %17699 = vst [vmem:[#allocation109_spill] sm:$0xff] %v14693_v22  ;;  %v5913_v29 = vadd.f32 %v5912_v62, %v5704_v49  ;;  %v6542_v9 = vpop.f32.mrf.mxu1 }
 0xac2   :  { %v6122_v2 = vadd.f32 %v17703_v0, %v5913_v29  ;;  %v5086_v29 = vadd.f32 %v17711_v48, %v17710_v30  ;;  %v17712_v0 = vld [vmem:[#allocation71_spill] sm:$0xff]  ;;  %v17718_v30 = vld [vmem:[#allocation60_spill] sm:$0xff] }
 0xac3   :  { %6589 = vmatmul.f32.gmra.mxu1 %v17706_v16  ;;  %v17719_v48 = vld [vmem:[#allocation247_spill] sm:$0xff] }
 0xac4   :  { %v6331_v31 = vadd.f32 %v17705_v24, %v6122_v2  ;;  %5962 = vmatmul.f32.gmra.mxu2 %v17688_v20  ;;  %v5501_v2 = vadd.f32 %v17713_v57, %v5292_v56  ;;  %v17714_v24 = vld [vmem:[#allocation259_spill] sm:$0xff] }
 0xac6   :  { %v14704_v32 = vadd.f32 %v6539_v12, %v6331_v31  ;;  %v17715_v12 = vld [vmem:[#allocation246_spill] sm:$0xff]  ;;  %v5710_v18 = vadd.f32 %v17717_v46, %v5501_v2 }
 0xac7   :  { %v5915_v37 = vpop.f32.mrf.mxu2  ;;  %v5295_v33 = vadd.f32 %v17715_v12, %v5086_v29  ;;  %v17724_v2 = vld [vmem:[#allocation250_spill] sm:$0xff] }
 0xac8   :  { %17708 = vst [vmem:[#allocation89_spill] sm:$0xff] %v14704_v32  ;;  %v5916_v49 = vadd.f32 %v5915_v37, %v5707_v3  ;;  %v6545_v62 = vpop.f32.mrf.mxu1 }
 0xaca   :  { %v6125_v6 = vadd.f32 %v17712_v0, %v5916_v49  ;;  %v5089_v49 = vadd.f32 %v17719_v48, %v17718_v30  ;;  %v17720_v0 = vld [vmem:[#allocation252_spill] sm:$0xff]  ;;  %v17726_v30 = vld [vmem:[#allocation254_spill] sm:$0xff]  ;;  %v17728_v48 = vld [vmem:[#allocation269_spill] sm:$0xff] }
 0xacb   :  { %6592 = vmatmul.f32.gmra.mxu1 %v17714_v24 }
 0xacc   :  { %v6334_v20 = vadd.f32 %v14323_v54, %v6125_v6  ;;  %5965 = vmatmul.f32.gmra.mxu2 %v17697_v39  ;;  %v5504_v54 = vadd.f32 %v17720_v0, %v5295_v33  ;;  %v17721_v6 = vld [vmem:[#allocation265_spill] sm:$0xff]  ;;  %v17731_v0 = vld [vmem:[#allocation70_spill] sm:$0xff] }
 0xace   :  { %v14715_v31 = vadd.f32 %v6542_v9, %v6334_v20  ;;  %v17722_v9 = vld [vmem:[#allocation253_spill] sm:$0xff]  ;;  %v5713_v20 = vadd.f32 %v17724_v2, %v5504_v54 }
 0xacf   :  { %v5918_v43 = vpop.f32.mrf.mxu2  ;;  %v5298_v29 = vadd.f32 %v17722_v9, %v5089_v49 }
 0xad0   :  { %17716 = vst [vmem:[#allocation107_spill] sm:$0xff] %v14715_v31  ;;  %v5919_v3 = vadd.f32 %v5918_v43, %v5710_v18  ;;  %v6548_v37 = vpop.f32.mrf.mxu1  ;;  %v17725_v43 = vld [vmem:[#allocation251_spill] sm:$0xff] }
 0xad2   :  { %v6128_v56 = vadd.f32 %v14313_v17, %v5919_v3  ;;  %v5092_v17 = vadd.f32 %v17726_v30, %v17725_v43  ;;  %v17727_v3 = vld [vmem:[#allocation256_spill] sm:$0xff]  ;;  %v17735_v43 = vld [vmem:[#allocation274_spill] sm:$0xff] }
 0xad3   :  { %6595 = vmatmul.f32.gmra.mxu1 %v17721_v6 }
 0xad4   :  { %v6337_v39 = vadd.f32 %v14343_v13, %v6128_v56  ;;  %5968 = vmatmul.f32.gmra.mxu2 %v17706_v16  ;;  %v5507_v13 = vadd.f32 %v17727_v3, %v5298_v29 }
 0xad6   :  { %v14726_v57 = vadd.f32 %v6545_v62, %v6337_v39  ;;  %v17729_v62 = vld [vmem:[#allocation257_spill] sm:$0xff]  ;;  %v5716_v54 = vadd.f32 %v17731_v0, %v5507_v13  ;;  %v17739_v0 = vld [vmem:[#allocation75_spill] sm:$0xff] }
 0xad7   :  { %v5921_v12 = vpop.f32.mrf.mxu2  ;;  %v5301_v49 = vadd.f32 %v17729_v62, %v5092_v17 }
 0xad8   :  { %17723 = vst [vmem:[#allocation288_spill] sm:$0xff] %v14726_v57  ;;  %v5922_v46 = vadd.f32 %v5921_v12, %v5713_v20  ;;  %v6551_v18 = vpop.f32.mrf.mxu1  ;;  %v17732_v20 = vld [vmem:[#allocation67_spill] sm:$0xff]  ;;  %v17733_v12 = vld [vmem:[#allocation381_spill] sm:$0xff] }
 0xada   :  { %v6131_v33 = vadd.f32 %v14333_v59, %v5922_v46  ;;  %v5095_v59 = vadd.f32 %v17733_v12, %v17732_v20  ;;  %v17734_v46 = vld [vmem:[#allocation262_spill] sm:$0xff] }
 0xadb   :  { %6598 = vmatmul.f32.gmra.mxu1 %v17728_v48 }
 0xadc   :  { %v6340_v16 = vadd.f32 %v14367_v1, %v6131_v33  ;;  %5971 = vmatmul.f32.gmra.mxu2 %v17714_v24  ;;  %v5510_v1 = vadd.f32 %v17734_v46, %v5301_v49  ;;  %v17738_v33 = vld [vmem:[#allocation260_spill] sm:$0xff] }
 0xade   :  { %v14737_v56 = vadd.f32 %v6548_v37, %v6340_v16  ;;  %v17736_v37 = vld [vmem:[#allocation263_spill] sm:$0xff]  ;;  %v5719_v3 = vadd.f32 %v17738_v33, %v5510_v1  ;;  %v17747_v33 = vld [vmem:[#allocation385_spill] sm:$0xff] }
 0xadf   :  { %v5924_v39 = vpop.f32.mrf.mxu2  ;;  %v5304_v30 = vadd.f32 %v17736_v37, %v5095_v59  ;;  %v17745_v59 = vld [vmem:[#allocation81_spill] sm:$0xff]  ;;  %v17746_v37 = vld [vmem:[#allocation82_spill] sm:$0xff] }
 0xae0   :  { %17730 = vst [vmem:[#allocation125_spill] sm:$0xff] %v14737_v56  ;;  %v5925_v9 = vadd.f32 %v5924_v39, %v5716_v54  ;;  %v6554_v2 = vpop.f32.mrf.mxu1  ;;  %v17740_v54 = vld [vmem:[#allocation264_spill] sm:$0xff]  ;;  %v17741_v39 = vld [vmem:[#allocation266_spill] sm:$0xff] }
 0xae2   :  { %v6134_v29 = vadd.f32 %v14355_v35, %v5925_v9  ;;  %v5098_v35 = vadd.f32 %v17740_v54, %v17739_v0  ;;  %v17742_v9 = vld [vmem:[#allocation278_spill] sm:$0xff] }
 0xae3   :  { %6601 = vmatmul.f32.gmra.mxu1 %v17735_v43 }
 0xae4   :  { %v6343_v24 = vadd.f32 %v14387_v44, %v6134_v29  ;;  %5974 = vmatmul.f32.gmra.mxu2 %v17721_v6  ;;  %v5513_v44 = vadd.f32 %v17741_v39, %v5304_v30 }
 0xae6   :  { %v14748_v17 = vadd.f32 %v6551_v18, %v6343_v24  ;;  %v17743_v18 = vld [vmem:[#allocation267_spill] sm:$0xff]  ;;  %v5722_v29 = vadd.f32 %v17745_v59, %v5513_v44 }
 0xae7   :  { %v5927_v13 = vpop.f32.mrf.mxu2  ;;  %v5307_v20 = vadd.f32 %v17743_v18, %v5098_v35  ;;  %v17753_v35 = vld [vmem:[#allocation84_spill] sm:$0xff]  ;;  %v17754_v18 = vld [vmem:[#allocation90_spill] sm:$0xff]  ;;  %v17755_v59 = vld [vmem:[#allocation99_spill] sm:$0xff] }
 0xae8   :  { %17737 = vst [vmem:[#allocation116_spill] sm:$0xff] %v14748_v17  ;;  %v5928_v16 = vadd.f32 %v5927_v13, %v5719_v3  ;;  %v6557_v62 = vpop.f32.mrf.mxu1  ;;  %v17748_v3 = vld [vmem:[#allocation271_spill] sm:$0xff]  ;;  %v17749_v13 = vld [vmem:[#allocation102_spill] sm:$0xff] }
 0xaea   :  { %v6137_v49 = vadd.f32 %v14374_v28, %v5928_v16  ;;  %v5101_v28 = vadd.f32 %v17747_v33, %v17746_v37  ;;  %v17750_v16 = vld [vmem:[#allocation284_spill] sm:$0xff]  ;;  %v17758_v37 = vld [vmem:[#allocation289_spill] sm:$0xff] }
 0xaeb   :  { %6604 = vmatmul.f32.gmra.mxu1 %v17742_v9 }
 0xaec   :  { %v6346_v6 = vadd.f32 %v14408_v53, %v6137_v49  ;;  %5977 = vmatmul.f32.gmra.mxu2 %v17728_v48  ;;  %v5516_v53 = vadd.f32 %v17748_v3, %v5307_v20 }
 0xaee   :  { %v14759_v12 = vadd.f32 %v6554_v2, %v6346_v6  ;;  %v17751_v2 = vld [vmem:[#allocation272_spill] sm:$0xff]  ;;  %v5725_v49 = vadd.f32 %v17753_v35, %v5516_v53  ;;  %v17763_v35 = vld [vmem:[#allocation111_spill] sm:$0xff] }
 0xaef   :  { %v5930_v46 = vpop.f32.mrf.mxu2  ;;  %v5310_v0 = vadd.f32 %v17751_v2, %v5101_v28  ;;  %v17762_v2 = vld [vmem:[#allocation97_spill] sm:$0xff] }
 0xaf0   :  { %17744 = vst [vmem:[#allocation126_spill] sm:$0xff] %v14759_v12  ;;  %v5931_v1 = vadd.f32 %v5930_v46, %v5722_v29  ;;  %v6560_v24 = vpop.f32.mrf.mxu1  ;;  %v17756_v29 = vld [vmem:[#allocation261_spill] sm:$0xff]  ;;  %v17757_v46 = vld [vmem:[#allocation275_spill] sm:$0xff] }
 0xaf2   :  { %v6140_v30 = vadd.f32 %v14398_v25, %v5931_v1  ;;  %v5104_v25 = vadd.f32 %v17755_v59, %v17754_v18  ;;  %v5519_v1 = vadd.f32 %v17757_v46, %v5310_v0 }
 0xaf3   :  { %6607 = vmatmul.f32.gmra.mxu1 %v17750_v16 }
 0xaf4   :  { %v6349_v48 = vadd.f32 %v17749_v13, %v6140_v30  ;;  %5980 = vmatmul.f32.gmra.mxu2 %v17735_v43  ;;  %v17761_v30 = vld [vmem:[#allocation96_spill] sm:$0xff] }
 0xaf5   :  { %v5728_v3 = vadd.f32 %v17761_v30, %v5519_v1  ;;  %v17771_v30 = vld [vmem:[#allocation285_spill] sm:$0xff] }
 0xaf6   :  { %v14770_v54 = vadd.f32 %v6557_v62, %v6349_v48  ;;  %v17759_v62 = vld [vmem:[#allocation276_spill] sm:$0xff] }
 0xaf7   :  { %v5933_v39 = vpop.f32.mrf.mxu2  ;;  %v5313_v33 = vadd.f32 %v17759_v62, %v5104_v25  ;;  %v17768_v25 = vld [vmem:[#allocation279_spill] sm:$0xff] }
 0xaf8   :  { %17752 = vst [vmem:[#allocation136_spill] sm:$0xff] %v14770_v54  ;;  %v5934_v44 = vadd.f32 %v5933_v39, %v5725_v49  ;;  %v6563_v6 = vpop.f32.mrf.mxu1  ;;  %v5107_v49 = vadd.f32 %v17763_v35, %v17762_v2  ;;  %v17764_v39 = vld [vmem:[#allocation281_spill] sm:$0xff]  ;;  %v17770_v62 = vld [vmem:[#allocation283_spill] sm:$0xff] }
 0xaf9   :  { %v17775_v35 = vld [vmem:[#allocation273_spill] sm:$0xff] }
 0xafa   :  { %v6143_v20 = vadd.f32 %v17756_v29, %v5934_v44  ;;  %v17765_v44 = vld [vmem:[#allocation296_spill] sm:$0xff] }
 0xafb   :  { %6610 = vmatmul.f32.gmra.mxu1 %v17758_v37 }
 0xafc   :  { %v6352_v43 = vadd.f32 %v14452_v14, %v6143_v20  ;;  %5983 = vmatmul.f32.gmra.mxu2 %v17742_v9  ;;  %v5522_v14 = vadd.f32 %v17764_v39, %v5313_v33 }
 0xafe   :  { %v14781_v28 = vadd.f32 %v6560_v24, %v6352_v43  ;;  %v17766_v24 = vld [vmem:[#allocation282_spill] sm:$0xff]  ;;  %v5731_v29 = vadd.f32 %v17768_v25, %v5522_v14  ;;  %v17769_v43 = vld [vmem:[#allocation105_spill] sm:$0xff]  ;;  %v17778_v25 = vld [vmem:[#allocation292_spill] sm:$0xff] }
 0xaff   :  { %v5936_v53 = vpop.f32.mrf.mxu2  ;;  %v5316_v18 = vadd.f32 %v17766_v24, %v5107_v49  ;;  %v17777_v24 = vld [vmem:[#allocation287_spill] sm:$0xff] }
 0xb00   :  { %17760 = vst [vmem:[#allocation114_spill] sm:$0xff] %v14781_v28  ;;  %v5937_v13 = vadd.f32 %v5936_v53, %v5728_v3  ;;  %v6566_v48 = vpop.f32.mrf.mxu1  ;;  %v14799_v3 = vpop.f32.mrf.mxu0  ;;  %v17773_v53 = vld [vmem:[#allocation286_spill] sm:$0xff] }
 0xb02   :  { %v6146_v0 = vadd.f32 %v14440_v51, %v5937_v13  ;;  %v5110_v51 = vadd.f32 %v17770_v62, %v17769_v43 }
 0xb03   :  { %6613 = vmatmul.f32.gmra.mxu1 %v17765_v44 }
 0xb04   :  { %v6355_v9 = vadd.f32 %v14472_v50, %v6146_v0  ;;  %5986 = vmatmul.f32.gmra.mxu2 %v17750_v16  ;;  %v5525_v50 = vadd.f32 %v17771_v30, %v5316_v18  ;;  %v5319_v13 = vadd.f32 %v17773_v53, %v5110_v51  ;;  %v14808_v0 = vpop.f32.mrf.mxu3  ;;  %v17782_v51 = vld [vmem:[#allocation290_spill] sm:$0xff]  ;;  %v17783_v53 = vld [vmem:[#allocation120_spill] sm:$0xff] }
 0xb06   :  { %v14792_v59 = vadd.f32 %v6563_v6, %v6355_v9  ;;  %v17772_v6 = vld [vmem:[#allocation302_spill] sm:$0xff]  ;;  %v5734_v49 = vadd.f32 %v17775_v35, %v5525_v50  ;;  %v17776_v9 = vld [vmem:[#allocation112_spill] sm:$0xff] }
 0xb07   :  { %v5939_v20 = vpop.f32.mrf.mxu2  ;;  %v5113_v18 = vadd.f32 %v17777_v24, %v17776_v9  ;;  %v17785_v35 = vld [vmem:[#allocation298_spill] sm:$0xff] }
 0xb08   :  { %17767 = vst [vmem:[#allocation118_spill] sm:$0xff] %v14792_v59  ;;  %v5940_v46 = vadd.f32 %v5939_v20, %v5731_v29  ;;  %v6569_v1 = vpop.f32.mrf.mxu1  ;;  %v17780_v20 = vld [vmem:[#allocation293_spill] sm:$0xff]  ;;  %v14818_v43 = vpop.f32.mrf.mxu0 }
 0xb0a   :  { %v6149_v33 = vadd.f32 %v14461_v47, %v5940_v46  ;;  %v5322_v46 = vadd.f32 %v17780_v20, %v5113_v18  ;;  %v17789_v18 = vld [vmem:[#allocation119_spill] sm:$0xff] }
 0xb0b   :  { %6616 = vmatmul.f32.gmra.mxu1 %v17772_v6 }
 0xb0c   :  { %v6358_v16 = vadd.f32 %v14495_v27, %v6149_v33  ;;  %5989 = vmatmul.f32.gmra.mxu2 %v17758_v37  ;;  %v5528_v37 = vadd.f32 %v17778_v25, %v5319_v13  ;;  %v17784_v13 = vld [vmem:[#allocation294_spill] sm:$0xff] }
 0xb0e   :  { %v14805_v2 = vadd.f32 %v6566_v48, %v6358_v16  ;;  %v17779_v48 = vld [vmem:[#allocation308_spill] sm:$0xff]  ;;  %v5737_v33 = vadd.f32 %v17782_v51, %v5528_v37  ;;  %v14823_v16 = vpop.f32.mrf.mxu3 }
 0xb0f   :  { %v5942_v39 = vpop.f32.mrf.mxu2  ;;  %v17791_v51 = vld [vmem:[#allocation300_spill] sm:$0xff] }
 0xb10   :  { %17774 = vst [vmem:[#allocation280_spill] sm:$0xff] %v14805_v2  ;;  %v5943_v47 = vadd.f32 %v5942_v39, %v5734_v49  ;;  %v6572_v14 = vpop.f32.mrf.mxu1  ;;  %v5531_v49 = vadd.f32 %v17785_v35, %v5322_v46  ;;  %v14836_v37 = vpop.f32.mrf.mxu0 }
 0xb12   :  { %v6152_v27 = vadd.f32 %v14483_v52, %v5943_v47  ;;  %v17787_v47 = vld [vmem:[#allocation299_spill] sm:$0xff] }
 0xb13   :  { %6619 = vmatmul.f32.gmra.mxu1 %v17779_v48 }
 0xb14   :  { %v6361_v29 = vadd.f32 %v14517_v36, %v6152_v27  ;;  %5992 = vmatmul.f32.gmra.mxu2 %v17765_v44  ;;  %v5116_v36 = vadd.f32 %v17784_v13, %v17783_v53  ;;  %v5740_v27 = vadd.f32 %v17789_v18, %v5531_v49  ;;  %v17794_v53 = vld [vmem:[#allocation305_spill] sm:$0xff]  ;;  %v17798_v18 = vld [vmem:[#allocation306_spill] sm:$0xff] }
 0xb16   :  { %v14820_v62 = vadd.f32 %v6569_v1, %v6361_v29  ;;  %v17786_v1 = vld [vmem:[#allocation313_spill] sm:$0xff]  ;;  %v5325_v9 = vadd.f32 %v17787_v47, %v5116_v36 }
 0xb17   :  { %v5945_v30 = vpop.f32.mrf.mxu2 }
 0xb18   :  { %17781 = vst [vmem:[#allocation132_spill] sm:$0xff] %v14820_v62  ;;  %v5946_v50 = vadd.f32 %v5945_v30, %v5737_v33  ;;  %v6575_v52 = vpop.f32.mrf.mxu1  ;;  %v17792_v33 = vld [vmem:[#allocation304_spill] sm:$0xff]  ;;  %v14842_v30 = vpop.f32.mrf.mxu3 }
 0xb1a   :  { %v6155_v44 = vadd.f32 %v14507_v10, %v5946_v50  ;;  %v17790_v10 = vld [vmem:[#allocation127_spill] sm:$0xff] }
 0xb1b   :  { %6622 = vmatmul.f32.gmra.mxu1 %v17786_v1  ;;  %v5119_v46 = vadd.f32 %v17791_v51, %v17790_v10  ;;  %v17801_v51 = vld [vmem:[#allocation310_spill] sm:$0xff] }
 0xb1c   :  { %v6364_v39 = vadd.f32 %v14542_v19, %v6155_v44  ;;  %5995 = vmatmul.f32.gmra.mxu2 %v17772_v6  ;;  %v5534_v6 = vadd.f32 %v17792_v33, %v5325_v9  ;;  %v17796_v44 = vld [vmem:[#allocation145_spill] sm:$0xff]  ;;  %v17803_v33 = vld [vmem:[#allocation151_spill] sm:$0xff] }
 0xb1d   :  { %v5328_v13 = vadd.f32 %v17794_v53, %v5119_v46 }
 0xb1e   :  { %v14833_v24 = vadd.f32 %v6572_v14, %v6364_v39  ;;  %v17793_v14 = vld [vmem:[#allocation319_spill] sm:$0xff]  ;;  %v5743_v35 = vadd.f32 %v17796_v44, %v5534_v6 }
 0xb1f   :  { %v5948_v25 = vpop.f32.mrf.mxu2 }
 0xb20   :  { %17788 = vst [vmem:[#allocation115_spill] sm:$0xff] %v14833_v24  ;;  %v5949_v29 = vadd.f32 %v5948_v25, %v5740_v27  ;;  %v6578_v20 = vpop.f32.mrf.mxu1  ;;  %v14853_v27 = vpop.f32.mrf.mxu0  ;;  %v17799_v25 = vld [vmem:[#allocation309_spill] sm:$0xff] }
 0xb21   :  { %v14860_v10 = vpop.f32.mrf.mxu3 }
 0xb22   :  { %v6158_v19 = vadd.f32 %v14530_v45, %v5949_v29  ;;  %v17797_v45 = vld [vmem:[#allocation135_spill] sm:$0xff] }
 0xb23   :  { %6625 = vmatmul.f32.gmra.mxu1 %v17793_v14  ;;  %v5122_v9 = vadd.f32 %v17798_v18, %v17797_v45  ;;  %v17808_v18 = vld [vmem:[#allocation316_spill] sm:$0xff] }
 0xb24   :  { %v6367_v50 = vadd.f32 %v14561_v26, %v6158_v19  ;;  %5998 = vmatmul.f32.gmra.mxu2 %v17779_v48  ;;  %v5537_v48 = vadd.f32 %v17799_v25, %v5328_v13  ;;  %v17810_v25 = vld [vmem:[#allocation158_spill] sm:$0xff] }
 0xb25   :  { %v5331_v46 = vadd.f32 %v17801_v51, %v5122_v9 }
 0xb26   :  { %v14848_v36 = vadd.f32 %v6575_v52, %v6367_v50  ;;  %v17800_v52 = vld [vmem:[#allocation324_spill] sm:$0xff]  ;;  %v5746_v6 = vadd.f32 %v17803_v33, %v5537_v48 }
 0xb27   :  { %v5951_v49 = vpop.f32.mrf.mxu2 }
 0xb28   :  { %17795 = vst [vmem:[#allocation295_spill] sm:$0xff] %v14848_v36  ;;  %v5952_v39 = vadd.f32 %v5951_v49, %v5743_v35  ;;  %v6581_v47 = vpop.f32.mrf.mxu1  ;;  %v17805_v35 = vld [vmem:[#allocation311_spill] sm:$0xff] }
 0xb29   :  { %v17806_v49 = vld [vmem:[#allocation315_spill] sm:$0xff] }
 0xb2a   :  { %v6161_v26 = vadd.f32 %v14549_v15, %v5952_v39  ;;  %v17804_v15 = vld [vmem:[#allocation142_spill] sm:$0xff]  ;;  %v14870_v39 = vpop.f32.mrf.mxu0 }
 0xb2b   :  { %6628 = vmatmul.f32.gmra.mxu1 %v17800_v52  ;;  %v5125_v13 = vadd.f32 %v17805_v35, %v17804_v15  ;;  %v17815_v35 = vld [vmem:[#allocation322_spill] sm:$0xff] }
 0xb2c   :  { %v6370_v29 = vadd.f32 %v14581_v21, %v6161_v26  ;;  %6001 = vmatmul.f32.gmra.mxu2 %v17786_v1  ;;  %v5540_v1 = vadd.f32 %v17806_v49, %v5331_v46  ;;  %v17811_v46 = vld [vmem:[#allocation35_spill] sm:$0xff] }
 0xb2d   :  { %v5334_v9 = vadd.f32 %v17808_v18, %v5125_v13 }
 0xb2e   :  { %v14863_v19 = vadd.f32 %v6578_v20, %v6370_v29  ;;  %v17807_v20 = vld [vmem:[#allocation330_spill] sm:$0xff]  ;;  %v5749_v48 = vadd.f32 %v17810_v25, %v5540_v1  ;;  %v14879_v29 = vpop.f32.mrf.mxu3 }
 0xb2f   :  { %v5954_v50 = vpop.f32.mrf.mxu2  ;;  %v17817_v1 = vld [vmem:[#allocation150_spill] sm:$0xff] }
 0xb30   :  { %17802 = vst [vmem:[#allocation386_spill] sm:$0xff] %v14863_v19  ;;  %v5955_v53 = vadd.f32 %v5954_v50, %v5746_v6  ;;  %v6584_v44 = vpop.f32.mrf.mxu1  ;;  %v17812_v6 = vld [vmem:[#allocation317_spill] sm:$0xff] }
 0xb31   :  { %v5128_v50 = vadd.f32 %v17812_v6, %v17811_v46 }
 0xb32   :  { %v6164_v21 = vadd.f32 %v14571_v7, %v5955_v53  ;;  %v17813_v53 = vld [vmem:[#allocation321_spill] sm:$0xff] }
 0xb33   :  { %6631 = vmatmul.f32.gmra.mxu1 %v17807_v20  ;;  %v5337_v13 = vadd.f32 %v17815_v35, %v5128_v50  ;;  %v17822_v50 = vld [vmem:[#allocation328_spill] sm:$0xff] }
 0xb34   :  { %v6373_v45 = vadd.f32 %v14601_v34, %v6164_v21  ;;  %6004 = vmatmul.f32.gmra.mxu2 %v17793_v14  ;;  %v5543_v14 = vadd.f32 %v17813_v53, %v5334_v9  ;;  %v14889_v21 = vpop.f32.mrf.mxu0  ;;  %v17818_v9 = vld [vmem:[#allocation156_spill] sm:$0xff] }
 0xb36   :  { %v14876_v26 = vadd.f32 %v6581_v47, %v6373_v45  ;;  %v17814_v47 = vld [vmem:[#allocation334_spill] sm:$0xff]  ;;  %v5752_v45 = vadd.f32 %v17817_v1, %v5543_v14  ;;  %v17824_v14 = vld [vmem:[#allocation325_spill] sm:$0xff] }
 0xb37   :  { %v5957_v51 = vpop.f32.mrf.mxu2 }
 0xb38   :  { %17809 = vst [vmem:[#allocation123_spill] sm:$0xff] %v14876_v26  ;;  %v5958_v7 = vadd.f32 %v5957_v51, %v5749_v48  ;;  %v6587_v33 = vpop.f32.mrf.mxu1  ;;  %v14894_v48 = vpop.f32.mrf.mxu3  ;;  %v17819_v51 = vld [vmem:[#allocation392_spill] sm:$0xff] }
 0xb3a   :  { %v6167_v34 = vadd.f32 %v14591_v40, %v5958_v7  ;;  %v17820_v7 = vld [vmem:[#allocation327_spill] sm:$0xff] }
 0xb3b   :  { %6634 = vmatmul.f32.gmra.mxu1 %v17814_v47  ;;  %v5546_v46 = vadd.f32 %v17820_v7, %v5337_v13 }
 0xb3c   :  { %v6376_v15 = vadd.f32 %v14799_v3, %v6167_v34  ;;  %6007 = vmatmul.f32.gmra.mxu2 %v17800_v52  ;;  %v5131_v3 = vadd.f32 %v17819_v51, %v17818_v9  ;;  %v14907_v1 = vpop.f32.mrf.mxu0  ;;  %v17827_v9 = vld [vmem:[#allocation163_spill] sm:$0xff] }
 0xb3e   :  { %v14891_v49 = vadd.f32 %v6584_v44, %v6376_v15  ;;  %v17821_v44 = vld [vmem:[#allocation338_spill] sm:$0xff]  ;;  %v5340_v34 = vadd.f32 %v17822_v50, %v5131_v3  ;;  %v5755_v15 = vadd.f32 %v17824_v14, %v5546_v46 }
 0xb3f   :  { %v5960_v18 = vpop.f32.mrf.mxu2 }
 0xb40   :  { %17816 = vst [vmem:[#allocation129_spill] sm:$0xff] %v14891_v49  ;;  %v5961_v25 = vadd.f32 %v5960_v18, %v5752_v45  ;;  %v6590_v40 = vpop.f32.mrf.mxu1  ;;  %v14913_v51 = vpop.f32.mrf.mxu3 }
 0xb42   :  { %v6170_v52 = vadd.f32 %v14808_v0, %v5961_v25  ;;  %v17825_v0 = vld [vmem:[#allocation37_spill] sm:$0xff] }
 0xb43   :  { %6637 = vmatmul.f32.gmra.mxu1 %v17821_v44  ;;  %v17826_v25 = vld [vmem:[#allocation393_spill] sm:$0xff] }
 0xb44   :  { %v6379_v6 = vadd.f32 %v14818_v43, %v6170_v52  ;;  %6010 = vmatmul.f32.gmra.mxu2 %v17807_v20  ;;  %v5134_v13 = vadd.f32 %v17826_v25, %v17825_v0  ;;  %v5549_v20 = vadd.f32 %v17827_v9, %v5340_v34  ;;  %v17829_v52 = vld [vmem:[#allocation331_spill] sm:$0xff]  ;;  %v17833_v0 = vld [vmem:[#allocation168_spill] sm:$0xff] }
 0xb45   :  { %v17834_v25 = vld [vmem:[#allocation395_spill] sm:$0xff] }
 0xb46   :  { %v14904_v53 = vadd.f32 %v6587_v33, %v6379_v6  ;;  %v17828_v33 = vld [vmem:[#allocation341_spill] sm:$0xff]  ;;  %v5343_v7 = vadd.f32 %v17829_v52, %v5134_v13  ;;  %v17831_v6 = vld [vmem:[#allocation167_spill] sm:$0xff] }
 0xb47   :  { %v5963_v35 = vpop.f32.mrf.mxu2  ;;  %v5758_v50 = vadd.f32 %v17831_v6, %v5549_v20  ;;  %v17835_v9 = vld [vmem:[#allocation335_spill] sm:$0xff] }
 0xb48   :  { %17823 = vst [vmem:[#allocation143_spill] sm:$0xff] %v14904_v53  ;;  %v5964_v45 = vadd.f32 %v5963_v35, %v5755_v15  ;;  %v6593_v18 = vpop.f32.mrf.mxu1  ;;  %v17832_v15 = vld [vmem:[#allocation394_spill] sm:$0xff]  ;;  %v5552_v13 = vadd.f32 %v17835_v9, %v5343_v7 }
 0xb49   :  { %v4622_v35 = vrot.slane %v17832_v15, 2 }
 0xb4a   :  { %v6173_v43 = vadd.f32 %v14823_v16, %v5964_v45  ;;  %v4623_v16 = vrot.slane %v17599_v58, 2  ;;  %v17836_v58 = vld [vmem:[#allocation336_spill] sm:$0xff] }
 0xb4b   :  { %6640 = vmatmul.f32.gmra.mxu1 %v17828_v33 }
 0xb4c   :  { %v6382_v3 = vadd.f32 %v14836_v37, %v6173_v43  ;;  %6013 = vmatmul.f32.gmra.mxu2 %v17814_v47  ;;  %v5137_v37 = vadd.f32 %v17834_v25, %v17833_v0  ;;  %v14926_v43 = vpop.f32.mrf.mxu0  ;;  %v17839_v0 = vld [vmem:[#allocation399_spill] sm:$0xff] }
 0xb4d   :  { %v17840_v25 = vld [vmem:[#allocation175_spill] sm:$0xff] }
 0xb4e   :  { %v14919_v46 = vadd.f32 %v6590_v40, %v6382_v3  ;;  %v4624_v40 = vsel %vm644_vm2, %v4622_v35, %v4623_v16  ;;  %v14933_v3 = vpop.f32.mrf.mxu3  ;;  %v5346_v52 = vadd.f32 %v17836_v58, %v5137_v37  ;;  %v17841_v35 = vld [vmem:[#allocation337_spill] sm:$0xff]  ;;  %v17843_v37 = vld [vmem:[#allocation340_spill] sm:$0xff] }
 0xb4f   :  { %v5966_v14 = vpop.f32.mrf.mxu2  ;;  %v5140_v9 = vadd.f32 %v17841_v35, %v17840_v25  ;;  %v17845_v58 = vld [vmem:[#allocation185_spill] sm:$0xff] }
 0xb50   :  { %17830 = vst [vmem:[#allocation124_spill] sm:$0xff] %v14919_v46  ;;  %v5967_v34 = vadd.f32 %v5966_v14, %v5758_v50  ;;  %v6596_v45 = vpop.f32.mrf.mxu1  ;;  %v17838_v50 = vld [vmem:[#allocation33_spill] sm:$0xff] }
 0xb51   :  { %v5761_v14 = vadd.f32 %v17838_v50, %v5552_v13  ;;  %v5349_v13 = vadd.f32 %v17843_v37, %v5140_v9 }
 0xb52   :  { %v6176_v47 = vadd.f32 %v14842_v30, %v5967_v34  ;;  %v4625_v30 = vrot.slane %v17839_v0, 2  ;;  %v17846_v0 = vld [vmem:[#allocation39_spill] sm:$0xff] }
 0xb53   :  { %6643 = vmatmul.f32.gmra.mxu1 %v4624_v40 }
 0xb54   :  { %v6385_v20 = vadd.f32 %v14853_v27, %v6176_v47  ;;  %6016 = vmatmul.f32.gmra.mxu2 %v17821_v44  ;;  %v17842_v44 = vld [vmem:[#allocation339_spill] sm:$0xff]  ;;  %v4626_v46 = vsel %vm644_vm2, %v4623_v16, %v4625_v30  ;;  %v14945_v53 = vpop.f32.mrf.mxu0  ;;  %v17847_v16 = vld [vmem:[#allocation402_spill] sm:$0xff] }
 0xb55   :  { %v5555_v47 = vadd.f32 %v17842_v44, %v5346_v52  ;;  %v5143_v30 = vadd.f32 %v17847_v16, %v17846_v0  ;;  %v17851_v44 = vld [vmem:[#allocation397_spill] sm:$0xff] }
 0xb56   :  { %v14936_v6 = vadd.f32 %v6593_v18, %v6385_v20  ;;  %v17856_v16 = vld [vmem:[#allocation345_spill] sm:$0xff] }
 0xb57   :  { %v5969_v15 = vpop.f32.mrf.mxu2  ;;  %v5764_v50 = vadd.f32 %v17845_v58, %v5555_v47  ;;  %v17852_v58 = vld [vmem:[#allocation187_spill] sm:$0xff] }
 0xb58   :  { %17837 = vst [vmem:[#allocation104_spill] sm:$0xff] %v14936_v6  ;;  %v5970_v34 = vadd.f32 %v5969_v15, %v5761_v14  ;;  %v6599_v7 = vpop.f32.mrf.mxu1  ;;  %v14953_v14 = vpop.f32.mrf.mxu3 }
 0xb5a   :  { %v6179_v27 = vadd.f32 %v14860_v10, %v5970_v34 }
 0xb5b   :  { %6646 = vmatmul.f32.gmra.mxu1 %v4626_v46 }
 0xb5c   :  { %v6388_v18 = vadd.f32 %v14870_v39, %v6179_v27  ;;  %6019 = vmatmul.f32.gmra.mxu2 %v17828_v33  ;;  %v17848_v39 = vld [vmem:[#allocation34_spill] sm:$0xff]  ;;  %v14962_v9 = vpop.f32.mrf.mxu0 }
 0xb5d   :  { %v5558_v25 = vadd.f32 %v17848_v39, %v5349_v13 }
 0xb5e   :  { %v14950_v20 = vadd.f32 %v6596_v45, %v6388_v18  ;;  %v17849_v45 = vld [vmem:[#allocation342_spill] sm:$0xff] }
 0xb5f   :  { %v5972_v10 = vpop.f32.mrf.mxu2  ;;  %v5352_v35 = vadd.f32 %v17849_v45, %v5143_v30  ;;  %v5767_v47 = vadd.f32 %v17851_v44, %v5558_v25  ;;  %v17858_v25 = vld [vmem:[#allocation268_spill] sm:$0xff] }
 0xb60   :  { %17844 = vst [vmem:[#allocation140_spill] sm:$0xff] %v14950_v20  ;;  %v5973_v15 = vadd.f32 %v5972_v10, %v5764_v50  ;;  %v6602_v52 = vpop.f32.mrf.mxu1  ;;  %v17853_v50 = vld [vmem:[#allocation29_spill] sm:$0xff]  ;;  %v14969_v10 = vpop.f32.mrf.mxu3  ;;  %v17860_v44 = vld [vmem:[#allocation400_spill] sm:$0xff] }
 0xb62   :  { %v6182_v34 = vadd.f32 %v14879_v29, %v5973_v15  ;;  %v5146_v29 = vadd.f32 %v17853_v50, %v17852_v58  ;;  %v17855_v15 = vld [vmem:[#allocation78_spill] sm:$0xff]  ;;  %v17862_v50 = vld [vmem:[#allocation192_spill] sm:$0xff] }
 0xb63   :  { %6649 = vmatmul.f32.gmra.mxu1 %v17603_v11  ;;  %v6726_v0 = vmul.f32 %v17855_v15, %v17855_v15 }
 0xb64   :  { %v6391_v33 = vadd.f32 %v14889_v21, %v6182_v34  ;;  %6022 = vmatmul.f32.gmra.mxu2 %v4624_v40  ;;  %v17854_v40 = vld [vmem:[#allocation23_spill] sm:$0xff]  ;;  %v5355_v30 = vadd.f32 %v17856_v16, %v5146_v29  ;;  %v17863_v29 = vld [vmem:[#allocation25_spill] sm:$0xff] }
 0xb65   :  { %v5561_v11 = vadd.f32 %v17854_v40, %v5352_v35  ;;  %v17857_v34 = vld [vmem:[#allocation79_spill] sm:$0xff] }
 0xb66   :  { %v14964_v27 = vadd.f32 %v6599_v7, %v6391_v33  ;;  %v6725_v39 = vmul.f32 %v17857_v34, %v17857_v34  ;;  %v6727_v33 = vmul.f32 %v17858_v25, %v17858_v25  ;;  %v6656_v35 = vadd.f32 %v17855_v15, %v17857_v34  ;;  %v17864_v16 = vld [vmem:[#allocation19_spill] sm:$0xff] }
 0xb67   :  { %v5975_v18 = vpop.f32.mrf.mxu2 }
 0xb68   :  { %17850 = vst [vmem:[#allocation122_spill] sm:$0xff] %v14964_v27  ;;  %v5976_v37 = vadd.f32 %v5975_v18, %v5767_v47  ;;  %v6605_v13 = vpop.f32.mrf.mxu1  ;;  %v6789_v18 = vadd.f32 %v6726_v0, %v6725_v39  ;;  %v14997_v39 = vpop.f32.mrf.mxu3 }
 0xb6a   :  { %v6185_v21 = vadd.f32 %v14894_v48, %v5976_v37  ;;  %v5770_v48 = vadd.f32 %v17860_v44, %v5561_v11  ;;  %v17861_v37 = vld [vmem:[#allocation87_spill] sm:$0xff]  ;;  %v6790_v11 = vadd.f32 %v6789_v18, %v6727_v33  ;;  %v17865_v44 = vld [vmem:[#allocation106_spill] sm:$0xff] }
 0xb6c   :  { %v6394_v7 = vadd.f32 %v14907_v1, %v6185_v21  ;;  %6025 = vmatmul.f32.gmra.mxu2 %v4626_v46  ;;  %v6728_v1 = vmul.f32 %v17861_v37, %v17861_v37  ;;  %v14988_v46 = vpop.f32.mrf.mxu0  ;;  %v5149_v21 = vadd.f32 %v17863_v29, %v17862_v50  ;;  %v17867_v29 = vld [vmem:[#allocation348_spill] sm:$0xff] }
 0xb6e   :  { %v14981_v45 = vadd.f32 %v6602_v52, %v6394_v7  ;;  %v5564_v52 = vadd.f32 %v17864_v16, %v5355_v30  ;;  %v6657_v7 = vadd.f32 %v6656_v35, %v17858_v25  ;;  %v6791_v34 = vadd.f32 %v6790_v11, %v6728_v1  ;;  %v17868_v16 = vld [vmem:[#allocation403_spill] sm:$0xff]  ;;  %v17869_v25 = vld [vmem:[#allocation85_spill] sm:$0xff] }
 0xb6f   :  { %v5978_v47 = vpop.f32.mrf.mxu2  ;;  %v5358_v30 = vadd.f32 %v17867_v29, %v5149_v21  ;;  %v17870_v11 = vld [vmem:[#allocation95_spill] sm:$0xff]  ;;  %v17872_v21 = vld [vmem:[#allocation17_spill] sm:$0xff] }
 0xb70   :  { %17859 = vst [vmem:[#allocation301_spill] sm:$0xff] %v14981_v45  ;;  %v5979_v58 = vadd.f32 %v5978_v47, %v5770_v48  ;;  %v6608_v40 = vpop.f32.mrf.mxu1  ;;  %v6729_v45 = vmul.f32 %v17865_v44, %v17865_v44  ;;  %v6658_v15 = vadd.f32 %v6657_v7, %v17861_v37  ;;  %v17866_v48 = vld [vmem:[#allocation86_spill] sm:$0xff]  ;;  %v5773_v35 = vadd.f32 %v17868_v16, %v5564_v52  ;;  %v17873_v16 = vld [vmem:[#allocation349_spill] sm:$0xff] }
 0xb71   :  { %v6730_v47 = vmul.f32 %v17866_v48, %v17866_v48  ;;  %v6732_v37 = vmul.f32 %v17870_v11, %v17870_v11 }
 0xb72   :  { %v6188_v0 = vadd.f32 %v14913_v51, %v5979_v58  ;;  %v6659_v33 = vadd.f32 %v6658_v15, %v17865_v44  ;;  %v6792_v18 = vadd.f32 %v6791_v34, %v6729_v45  ;;  %v6731_v51 = vmul.f32 %v17869_v25, %v17869_v25 }
 0xb73   :  { %v5567_v15 = vadd.f32 %v17873_v16, %v5358_v30 }
 0xb74   :  { %v6397_v50 = vadd.f32 %v14926_v43, %v6188_v0  ;;  %v6660_v1 = vadd.f32 %v6659_v33, %v17866_v48  ;;  %v6793_v7 = vadd.f32 %v6792_v18, %v6730_v47  ;;  %v17871_v0 = vld [vmem:[#allocation22_spill] sm:$0xff] }
 0xb75   :  { %v5152_v29 = vadd.f32 %v17872_v21, %v17871_v0  ;;  %v17874_v0 = vld [vmem:[#allocation350_spill] sm:$0xff]  ;;  %v15027_v21 = vpop.f32.mrf.mxu3 }
 0xb76   :  { %v15008_v58 = vadd.f32 %v6605_v13, %v6397_v50  ;;  %v6661_v34 = vadd.f32 %v6660_v1, %v17869_v25  ;;  %v6794_v45 = vadd.f32 %v6793_v7, %v6731_v51  ;;  %v6733_v13 = vmul.f32 %v14468_v60, %v14468_v60  ;;  %v15019_v50 = vpop.f32.mrf.mxu0  ;;  %v17875_v51 = vld [vmem:[#allocation14_spill] sm:$0xff] }
 0xb77   :  { %v5981_v27 = vpop.f32.mrf.mxu2  ;;  %v5361_v30 = vadd.f32 %v17874_v0, %v5152_v29  ;;  %v5776_v1 = vadd.f32 %v17875_v51, %v5567_v15  ;;  %v17877_v0 = vld [vmem:[#allocation47_spill] sm:$0xff]  ;;  %v17878_v51 = vld [vmem:[#allocation352_spill] sm:$0xff] }
 0xb78   :  { %v5982_v43 = vadd.f32 %v5981_v27, %v5773_v35  ;;  %v6611_v52 = vpop.f32.mrf.mxu1  ;;  %v6662_v33 = vadd.f32 %v6661_v34, %v17870_v11  ;;  %v6795_v18 = vadd.f32 %v6794_v45, %v6732_v37  ;;  %v6734_v27 = vmul.f32 %v14485_v4, %v14485_v4 }
 0xb7a   :  { %v6191_v47 = vadd.f32 %v14933_v3, %v5982_v43  ;;  %v6663_v7 = vadd.f32 %v6662_v33, %v14468_v60  ;;  %v6796_v16 = vadd.f32 %v6795_v18, %v6733_v13  ;;  %v6735_v3 = vmul.f32 %v14502_v41, %v14502_v41 }
 0xb7b   :  { %v5570_v33 = vadd.f32 %v17878_v51, %v5361_v30  ;;  %v17881_v51 = vld [vmem:[#allocation18_spill] sm:$0xff] }
 0xb7c   :  { %v6400_v35 = vadd.f32 %v14945_v53, %v6191_v47  ;;  %v6664_v34 = vadd.f32 %v6663_v7, %v14485_v4  ;;  %v6797_v45 = vadd.f32 %v6796_v16, %v6734_v27  ;;  %v6736_v53 = vmul.f32 %v14521_v38, %v14521_v38  ;;  %v17876_v47 = vld [vmem:[#allocation199_spill] sm:$0xff]  ;;  %v17879_v16 = vld [vmem:[#allocation92_spill] sm:$0xff]  ;;  %v17883_v4 = vld [vmem:[#allocation101_spill] sm:$0xff] }
 0xb7d   :  { %v5155_v11 = vadd.f32 %v17877_v0, %v17876_v47  ;;  %v17880_v0 = vld [vmem:[#allocation353_spill] sm:$0xff] }
 0xb7e   :  { %v15033_v43 = vadd.f32 %v6608_v40, %v6400_v35  ;;  %v6665_v13 = vadd.f32 %v6664_v34, %v14502_v41  ;;  %v6798_v18 = vadd.f32 %v6797_v45, %v6735_v3  ;;  %v6737_v40 = vmul.f32 %v14539_v8, %v14539_v8  ;;  %v17882_v41 = vld [vmem:[#allocation277_spill] sm:$0xff] }
 0xb7f   :  { %v5984_v37 = vpop.f32.mrf.mxu2  ;;  %v5364_v30 = vadd.f32 %v17880_v0, %v5155_v11  ;;  %v5779_v34 = vadd.f32 %v17881_v51, %v5570_v33  ;;  %v17885_v33 = vld [vmem:[#allocation49_spill] sm:$0xff] }
 0xb80   :  { %v5985_v29 = vadd.f32 %v5984_v37, %v5776_v1  ;;  %v6614_v15 = vpop.f32.mrf.mxu1  ;;  %v6666_v27 = vadd.f32 %v6665_v13, %v14521_v38  ;;  %v6799_v7 = vadd.f32 %v6798_v18, %v6736_v53  ;;  %v6738_v1 = vmul.f32 %v17879_v16, %v17879_v16  ;;  %v15048_v37 = vpop.f32.mrf.mxu0 }
 0xb81   :  { %v15058_v53 = vpop.f32.mrf.mxu3 }
 0xb82   :  { %v6194_v35 = vadd.f32 %v14953_v14, %v5985_v29  ;;  %v6667_v3 = vadd.f32 %v6666_v27, %v14539_v8  ;;  %v6800_v45 = vadd.f32 %v6799_v7, %v6737_v40  ;;  %v6739_v14 = vmul.f32 %v17882_v41, %v17882_v41  ;;  %v17886_v40 = vld [vmem:[#allocation355_spill] sm:$0xff] }
 0xb83   :  { %v5573_v7 = vadd.f32 %v17886_v40, %v5364_v30 }
 0xb84   :  { %v6403_v47 = vadd.f32 %v14962_v9, %v6194_v35  ;;  %v6668_v18 = vadd.f32 %v6667_v3, %v17879_v16  ;;  %v6801_v38 = vadd.f32 %v6800_v45, %v6738_v1  ;;  %v6740_v9 = vmul.f32 %v17883_v4, %v17883_v4  ;;  %v17884_v35 = vld [vmem:[#allocation15_spill] sm:$0xff] }
 0xb85   :  { %v5158_v0 = vadd.f32 %v17885_v33, %v17884_v35  ;;  %v17888_v33 = vld [vmem:[#allocation46_spill] sm:$0xff] }
 0xb86   :  { %v15056_v29 = vadd.f32 %v6611_v52, %v6403_v47  ;;  %v6669_v51 = vadd.f32 %v6668_v18, %v17882_v41  ;;  %v6802_v52 = vadd.f32 %v6801_v38, %v6739_v14  ;;  %v6741_v47 = vmul.f32 %v14605_v42, %v14605_v42 }
 0xb87   :  { %v5987_v13 = vpop.f32.mrf.mxu2  ;;  %v5782_v30 = vadd.f32 %v17888_v33, %v5573_v7  ;;  %v6743_v14 = vmul.f32 %v14627_v63, %v14627_v63  ;;  %v17890_v7 = vld [vmem:[#allocation51_spill] sm:$0xff]  ;;  %v6745_v33 = vmul.f32 %v14649_v5, %v14649_v5 }
 0xb88   :  { %v5988_v11 = vadd.f32 %v5987_v13, %v5779_v34  ;;  %v6617_v27 = vpop.f32.mrf.mxu1  ;;  %v6670_v1 = vadd.f32 %v6669_v51, %v17883_v4  ;;  %v6803_v3 = vadd.f32 %v6802_v52, %v6740_v9  ;;  %v6742_v34 = vmul.f32 %v14616_v23, %v14616_v23  ;;  %v17887_v13 = vld [vmem:[#allocation356_spill] sm:$0xff]  ;;  %v15079_v40 = vpop.f32.mrf.mxu0 }
 0xb89   :  { %v5367_v35 = vadd.f32 %v17887_v13, %v5158_v0  ;;  %v17889_v0 = vld [vmem:[#allocation207_spill] sm:$0xff] }
 0xb8a   :  { %v6197_v8 = vadd.f32 %v14969_v10, %v5988_v11  ;;  %v6671_v18 = vadd.f32 %v6670_v1, %v14605_v42  ;;  %v6804_v38 = vadd.f32 %v6803_v3, %v6741_v47  ;;  %v5161_v52 = vadd.f32 %v17890_v7, %v17889_v0  ;;  %v15088_v1 = vpop.f32.mrf.mxu3  ;;  %v17891_v3 = vld [vmem:[#allocation359_spill] sm:$0xff]  ;;  %v17892_v0 = vld [vmem:[#allocation360_spill] sm:$0xff]  ;;  %v17921_v42 = vld [vmem:[#allocation373_spill] sm:$0xff] }
 0xb8b   :  { %v5576_v13 = vadd.f32 %v17891_v3, %v5367_v35 }
 0xb8c   :  { %v6406_v45 = vadd.f32 %v14988_v46, %v6197_v8  ;;  %v6672_v11 = vadd.f32 %v6671_v18, %v14616_v23  ;;  %v6805_v51 = vadd.f32 %v6804_v38, %v6742_v34  ;;  %v6744_v8 = vmul.f32 %v14638_v55, %v14638_v55  ;;  %v17893_v23 = vld [vmem:[#allocation405_spill] sm:$0xff] }
 0xb8d   :  { %v6746_v38 = vmul.f32 %v14660_v61, %v14660_v61  ;;  %v5370_v7 = vadd.f32 %v17892_v0, %v5161_v52  ;;  %v5785_v35 = vadd.f32 %v17893_v23, %v5576_v13  ;;  %v17896_v23 = vld [vmem:[#allocation362_spill] sm:$0xff] }
 0xb8e   :  { %v15081_v10 = vadd.f32 %v6614_v15, %v6406_v45  ;;  %v6673_v15 = vadd.f32 %v6672_v11, %v14627_v63  ;;  %v6806_v45 = vadd.f32 %v6805_v51, %v6743_v14  ;;  %v17894_v51 = vld [vmem:[#allocation108_spill] sm:$0xff] }
 0xb8f   :  { %v5990_v9 = vpop.f32.mrf.mxu2  ;;  %v6747_v3 = vmul.f32 %v17894_v51, %v17894_v51  ;;  %v5579_v13 = vadd.f32 %v17896_v23, %v5370_v7 }
 0xb90   :  { %v5991_v46 = vadd.f32 %v5990_v9, %v5782_v30  ;;  %v15090_v47 = vpop.f32.mrf.mxu1  ;;  %v6674_v18 = vadd.f32 %v6673_v15, %v14638_v55  ;;  %v6807_v30 = vadd.f32 %v6806_v45, %v6744_v8  ;;  %v17895_v15 = vld [vmem:[#allocation128_spill] sm:$0xff]  ;;  %v17917_v55 = vld [vmem:[#allocation371_spill] sm:$0xff] }
 0xb91   :  { %v6748_v45 = vmul.f32 %v17895_v15, %v17895_v15 }
 0xb92   :  { %v6200_v34 = vadd.f32 %v14997_v39, %v5991_v46  ;;  %v6675_v11 = vadd.f32 %v6674_v18, %v14649_v5  ;;  %v6808_v14 = vadd.f32 %v6807_v30, %v6745_v33  ;;  %v17915_v5 = vld [vmem:[#allocation412_spill] sm:$0xff] }
 0xb94   :  { %v6409_v9 = vadd.f32 %v15019_v50, %v6200_v34  ;;  %v6676_v8 = vadd.f32 %v6675_v11, %v14660_v61  ;;  %v6809_v46 = vadd.f32 %v6808_v14, %v6746_v38  ;;  %v15111_v50 = vpop.f32.mrf.mxu0 }
 0xb96   :  { %v15106_v63 = vadd.f32 %v6617_v27, %v6409_v9  ;;  %v6677_v33 = vadd.f32 %v6676_v8, %v17894_v51  ;;  %v6810_v18 = vadd.f32 %v6809_v46, %v6747_v3  ;;  %v6749_v27 = vmul.f32 %v14693_v22, %v14693_v22  ;;  %v15120_v9 = vpop.f32.mrf.mxu3  ;;  %v17908_v51 = vld [vmem:[#allocation227_spill] sm:$0xff] }
 0xb97   :  { %v5993_v39 = vpop.f32.mrf.mxu2  ;;  %v6751_v3 = vmul.f32 %v14715_v31, %v14715_v31 }
 0xb98   :  { %v5994_v52 = vadd.f32 %v5993_v39, %v5785_v35  ;;  %v15113_v34 = vpop.f32.mrf.mxu1  ;;  %v6678_v38 = vadd.f32 %v6677_v33, %v17895_v15  ;;  %v6811_v0 = vadd.f32 %v6810_v18, %v6748_v45  ;;  %v6750_v35 = vmul.f32 %v14704_v32, %v14704_v32  ;;  %v17897_v39 = vld [vmem:[#allocation48_spill] sm:$0xff] }
 0xb99   :  { %v5788_v8 = vadd.f32 %v17897_v39, %v5579_v13  ;;  %v6752_v45 = vmul.f32 %v14726_v57, %v14726_v57 }
 0xb9a   :  { %v6203_v30 = vadd.f32 %v15027_v21, %v5994_v52  ;;  %v6679_v7 = vadd.f32 %v6678_v38, %v14693_v22  ;;  %v6812_v14 = vadd.f32 %v6811_v0, %v6749_v27 }
 0xb9c   :  { %v15126_v11 = vadd.f32 %v15048_v37, %v6203_v30  ;;  %v6680_v46 = vadd.f32 %v6679_v7, %v14704_v32  ;;  %v6813_v52 = vadd.f32 %v6812_v14, %v6750_v35  ;;  %v15137_v37 = vpop.f32.mrf.mxu0  ;;  %v6753_v30 = vmul.f32 %v14737_v56, %v14737_v56  ;;  %v17905_v32 = vld [vmem:[#allocation61_spill] sm:$0xff] }
 0xb9d   :  { %v6754_v35 = vmul.f32 %v14748_v17, %v14748_v17 }
 0xb9e   :  { %v6681_v18 = vadd.f32 %v6680_v46, %v14715_v31  ;;  %v6814_v27 = vadd.f32 %v6813_v52, %v6751_v3  ;;  %v15148_v7 = vpop.f32.mrf.mxu3  ;;  %v6755_v3 = vmul.f32 %v14759_v12, %v14759_v12  ;;  %v6756_v46 = vmul.f32 %v14770_v54, %v14770_v54  ;;  %v17904_v31 = vld [vmem:[#allocation222_spill] sm:$0xff] }
 0xb9f   :  { %v5996_v21 = vpop.f32.mrf.mxu2 }
 0xba0   :  { %v5997_v23 = vadd.f32 %v5996_v21, %v5788_v8  ;;  %v15135_v33 = vpop.f32.mrf.mxu1  ;;  %v6682_v38 = vadd.f32 %v6681_v18, %v14726_v57  ;;  %v6815_v0 = vadd.f32 %v6814_v27, %v6752_v45  ;;  %v6757_v18 = vmul.f32 %v14781_v28, %v14781_v28 }
 0xba2   :  { %v15143_v13 = vadd.f32 %v15058_v53, %v5997_v23  ;;  %v6683_v14 = vadd.f32 %v6682_v38, %v14737_v56  ;;  %v6816_v39 = vadd.f32 %v6815_v0, %v6753_v30  ;;  %v6758_v0 = vmul.f32 %v14792_v59, %v14792_v59 }
 0xba4   :  { %v6684_v21 = vadd.f32 %v6683_v14, %v14748_v17  ;;  %v6817_v53 = vadd.f32 %v6816_v39, %v6754_v35  ;;  %v15163_v27 = vpop.f32.mrf.mxu0  ;;  %v6759_v39 = vmul.f32 %v14805_v2, %v14805_v2 }
 0xba6   :  { %v6685_v45 = vadd.f32 %v6684_v21, %v14759_v12  ;;  %v6818_v23 = vadd.f32 %v6817_v53, %v6755_v3  ;;  %v15171_v17 = vpop.f32.mrf.mxu3 }
 0xba7   :  { %v15153_v8 = vpop.f32.mrf.mxu2 }
 0xba8   :  { %v15158_v52 = vpop.f32.mrf.mxu1  ;;  %v6686_v30 = vadd.f32 %v6685_v45, %v14770_v54  ;;  %v6819_v38 = vadd.f32 %v6818_v23, %v6756_v46  ;;  %v6760_v45 = vmul.f32 %v14820_v62, %v14820_v62 }
 0xbaa   :  { %v6687_v35 = vadd.f32 %v6686_v30, %v14781_v28  ;;  %v6820_v14 = vadd.f32 %v6819_v38, %v6757_v18  ;;  %v6761_v18 = vmul.f32 %v14833_v24, %v14833_v24  ;;  %v6762_v28 = vmul.f32 %v14848_v36, %v14848_v36 }
 0xbac   :  { %v6688_v21 = vadd.f32 %v6687_v35, %v14792_v59  ;;  %v6821_v53 = vadd.f32 %v6820_v14, %v6758_v0  ;;  %v15186_v12 = vpop.f32.mrf.mxu0  ;;  %v6763_v14 = vmul.f32 %v14863_v19, %v14863_v19 }
 0xbae   :  { %v6689_v23 = vadd.f32 %v6688_v21, %v14805_v2  ;;  %v6822_v54 = vadd.f32 %v6821_v53, %v6759_v39  ;;  %v6764_v53 = vmul.f32 %v14876_v26, %v14876_v26 }
 0xbaf   :  { %v15173_v3 = vpop.f32.mrf.mxu2 }
 0xbb0   :  { %v15178_v46 = vpop.f32.mrf.mxu1  ;;  %v6690_v30 = vadd.f32 %v6689_v23, %v14820_v62  ;;  %v6823_v38 = vadd.f32 %v6822_v54, %v6760_v45  ;;  %v17898_v54 = vld [vmem:[#allocation212_spill] sm:$0xff]  ;;  %v17899_v45 = vld [vmem:[#allocation55_spill] sm:$0xff]  ;;  %v15198_v62 = vpop.f32.mrf.mxu3 }
 0xbb1   :  { %v5164_v23 = vadd.f32 %v17899_v45, %v17898_v54  ;;  %v17903_v54 = vld [vmem:[#allocation363_spill] sm:$0xff] }
 0xbb2   :  { %v6691_v0 = vadd.f32 %v6690_v30, %v14833_v24  ;;  %v6824_v35 = vadd.f32 %v6823_v38, %v6761_v18  ;;  %v6765_v18 = vmul.f32 %v14891_v49, %v14891_v49  ;;  %v17900_v38 = vld [vmem:[#allocation217_spill] sm:$0xff] }
 0xbb3   :  { %v17901_v24 = vld [vmem:[#allocation57_spill] sm:$0xff]  ;;  %v5373_v45 = vadd.f32 %v17903_v54, %v5164_v23 }
 0xbb4   :  { %v6692_v39 = vadd.f32 %v6691_v0, %v14848_v36  ;;  %v6825_v21 = vadd.f32 %v6824_v35, %v6762_v28  ;;  %v5167_v56 = vadd.f32 %v17901_v24, %v17900_v38  ;;  %v17902_v35 = vld [vmem:[#allocation143_spill] sm:$0xff]  ;;  %v17907_v24 = vld [vmem:[#allocation366_spill] sm:$0xff]  ;;  %v17912_v54 = vld [vmem:[#allocation233_spill] sm:$0xff] }
 0xbb5   :  { %v6766_v36 = vmul.f32 %v17902_v35, %v17902_v35 }
 0xbb6   :  { %v6693_v2 = vadd.f32 %v6692_v39, %v14863_v19  ;;  %v6826_v30 = vadd.f32 %v6825_v21, %v6763_v14  ;;  %v5170_v39 = vadd.f32 %v17905_v32, %v17904_v31  ;;  %v17906_v19 = vld [vmem:[#allocation124_spill] sm:$0xff]  ;;  %v5376_v38 = vadd.f32 %v17907_v24, %v5167_v56  ;;  %v17910_v31 = vld [vmem:[#allocation369_spill] sm:$0xff] }
 0xbb7   :  { %v15191_v59 = vpop.f32.mrf.mxu2  ;;  %v6767_v22 = vmul.f32 %v17906_v19, %v17906_v19  ;;  %v6768_v32 = vmul.f32 %v14936_v6, %v14936_v6 }
 0xbb8   :  { %v15205_v57 = vpop.f32.mrf.mxu1  ;;  %v6694_v28 = vadd.f32 %v6693_v2, %v14876_v26  ;;  %v6827_v0 = vadd.f32 %v6826_v30, %v6764_v53  ;;  %v17909_v2 = vld [vmem:[#allocation64_spill] sm:$0xff]  ;;  %v15219_v30 = vpop.f32.mrf.mxu0 }
 0xbb9   :  { %v5173_v53 = vadd.f32 %v17909_v2, %v17908_v51  ;;  %v6769_v51 = vmul.f32 %v14950_v20, %v14950_v20  ;;  %v17914_v2 = vld [vmem:[#allocation237_spill] sm:$0xff] }
 0xbba   :  { %v6695_v14 = vadd.f32 %v6694_v28, %v14891_v49  ;;  %v6828_v21 = vadd.f32 %v6827_v0, %v6765_v18  ;;  %v5379_v28 = vadd.f32 %v17910_v31, %v5170_v39  ;;  %v17911_v18 = vld [vmem:[#allocation365_spill] sm:$0xff]  ;;  %v17913_v49 = vld [vmem:[#allocation68_spill] sm:$0xff] }
 0xbbb   :  { %v5582_v0 = vadd.f32 %v17911_v18, %v5373_v45  ;;  %v5176_v61 = vadd.f32 %v17913_v49, %v17912_v54  ;;  %v5382_v39 = vadd.f32 %v17917_v55, %v5173_v53  ;;  %v17918_v18 = vld [vmem:[#allocation122_spill] sm:$0xff]  ;;  %v17923_v53 = vld [vmem:[#allocation375_spill] sm:$0xff] }
 0xbbc   :  { %v6696_v26 = vadd.f32 %v6695_v14, %v17902_v35  ;;  %v6829_v23 = vadd.f32 %v6828_v21, %v6766_v36  ;;  %v5179_v14 = vadd.f32 %v17915_v5, %v17914_v2  ;;  %v15233_v36 = vpop.f32.mrf.mxu3  ;;  %v17916_v21 = vld [vmem:[#allocation368_spill] sm:$0xff]  ;;  %v6770_v49 = vmul.f32 %v17918_v18, %v17918_v18 }
 0xbbd   :  { %v5585_v35 = vadd.f32 %v17916_v21, %v5376_v38  ;;  %v5385_v5 = vadd.f32 %v17921_v42, %v5176_v61  ;;  %v17922_v38 = vld [vmem:[#allocation301_spill] sm:$0xff]  ;;  %v17925_v42 = vld [vmem:[#allocation372_spill] sm:$0xff] }
 0xbbe   :  { %v6697_v56 = vadd.f32 %v6696_v26, %v17906_v19  ;;  %v6830_v24 = vadd.f32 %v6829_v23, %v6767_v22  ;;  %v17919_v26 = vld [vmem:[#allocation406_spill] sm:$0xff]  ;;  %v6771_v55 = vmul.f32 %v17922_v38, %v17922_v38  ;;  %v5591_v61 = vadd.f32 %v17925_v42, %v5382_v39 }
 0xbbf   :  { %v6008_v15 = vpop.f32.mrf.mxu2  ;;  %v5791_v22 = vadd.f32 %v17919_v26, %v5582_v0  ;;  %v17920_v23 = vld [vmem:[#allocation58_spill] sm:$0xff]  ;;  %v6772_v26 = vmul.f32 %v15008_v58, %v15008_v58 }
 0xbc0   :  { %v6698_v45 = vadd.f32 %v6697_v56, %v14936_v6  ;;  %v6831_v31 = vadd.f32 %v6830_v24, %v6768_v32  ;;  %v5588_v54 = vadd.f32 %v17920_v23, %v5379_v28  ;;  %v15242_v19 = vpop.f32.mrf.mxu1  ;;  %v5388_v56 = vadd.f32 %v17923_v53, %v5179_v14  ;;  %v17924_v24 = vld [vmem:[#allocation53_spill] sm:$0xff]  ;;  %v15259_v53 = vpop.f32.mrf.mxu0 }
 0xbc1   :  { %v6000_v32 = vadd.f32 %v15153_v8, %v5791_v22  ;;  %v5794_v21 = vadd.f32 %v17924_v24, %v5585_v35 }
 0xbc2   :  { %v6699_v2 = vadd.f32 %v6698_v45, %v14950_v20  ;;  %v6832_v4 = vadd.f32 %v6831_v31, %v6769_v51  ;;  %v17926_v45 = vld [vmem:[#allocation62_spill] sm:$0xff]  ;;  %v17927_v51 = vld [vmem:[#allocation77_spill] sm:$0xff]  ;;  %v17928_v20 = vld [vmem:[#allocation407_spill] sm:$0xff] }
 0xbc3   :  { %v5182_v31 = vadd.f32 %v17927_v51, %v17926_v45  ;;  %v6003_v23 = vadd.f32 %v15173_v3, %v5794_v21  ;;  %v5797_v14 = vadd.f32 %v17928_v20, %v5588_v54  ;;  %v17930_v3 = vld [vmem:[#allocation59_spill] sm:$0xff]  ;;  %v17931_v20 = vld [vmem:[#allocation376_spill] sm:$0xff]  ;;  %v17932_v45 = vld [vmem:[#allocation377_spill] sm:$0xff] }
 0xbc4   :  { %v6700_v0 = vadd.f32 %v6699_v2, %v17918_v18  ;;  %v6833_v28 = vadd.f32 %v6832_v4, %v6770_v49  ;;  %v6773_v4 = vmul.f32 %v15033_v43, %v15033_v43  ;;  %v17929_v49 = vld [vmem:[#allocation65_spill] sm:$0xff]  ;;  %v6209_v2 = vadd.f32 %v15088_v1, %v6000_v32 }
 0xbc5   :  { %v5594_v22 = vadd.f32 %v17929_v49, %v5385_v5  ;;  %v6006_v39 = vadd.f32 %v15191_v59, %v5797_v14  ;;  %v5800_v21 = vadd.f32 %v17930_v3, %v5591_v61  ;;  %v5597_v54 = vadd.f32 %v17931_v20, %v5388_v56  ;;  %v17936_v49 = vld [vmem:[#allocation411_spill] sm:$0xff] }
 0xbc6   :  { %v6701_v8 = vadd.f32 %v6700_v0, %v17922_v38  ;;  %v6834_v35 = vadd.f32 %v6833_v28, %v6771_v55  ;;  %v5391_v51 = vadd.f32 %v17932_v45, %v5182_v31  ;;  %v6226_v0 = vpop.f32.mrf.mxu3  ;;  %v6774_v55 = vmul.f32 %v15056_v29, %v15056_v29 }
 0xbc7   :  { %v6011_v6 = vpop.f32.mrf.mxu2  ;;  %v6415_v5 = vadd.f32 %v15079_v40, %v15143_v13  ;;  %v6212_v1 = vadd.f32 %v15120_v9, %v6003_v23  ;;  %v6009_v28 = vadd.f32 %v6008_v15, %v5800_v21  ;;  %v6775_v56 = vmul.f32 %v15081_v10, %v15081_v10  ;;  %v17934_v9 = vld [vmem:[#allocation248_spill] sm:$0xff] }
 0xbc8   :  { %v6702_v24 = vadd.f32 %v6701_v8, %v15008_v58  ;;  %v6835_v42 = vadd.f32 %v6834_v35, %v6772_v26  ;;  %v17933_v26 = vld [vmem:[#allocation409_spill] sm:$0xff]  ;;  %v15282_v61 = vadd.f32 %v15090_v47, %v15126_v11  ;;  %v6418_v31 = vadd.f32 %v15111_v50, %v6209_v2  ;;  %v6641_v40 = vpop.f32.mrf.mxu1  ;;  %v17935_v23 = vld [vmem:[#allocation416_spill] sm:$0xff] }
 0xbc9   :  { %v5803_v14 = vadd.f32 %v17933_v26, %v5594_v22  ;;  %v6215_v8 = vadd.f32 %v15148_v7, %v6006_v39  ;;  %v5185_v35 = vadd.f32 %v17935_v23, %v17934_v9  ;;  %v5806_v22 = vadd.f32 %v17936_v49, %v5597_v54  ;;  %v17937_v39 = vld [vmem:[#allocation73_spill] sm:$0xff] }
 0xbca   :  { %v6703_v59 = vadd.f32 %v6702_v24, %v15033_v43  ;;  %v6836_v32 = vadd.f32 %v6835_v42, %v6773_v4  ;;  %v6776_v42 = vmul.f32 %v15106_v63, %v15106_v63  ;;  %v15293_v47 = vadd.f32 %v15113_v34, %v6415_v5  ;;  %v6435_v34 = vpop.f32.mrf.mxu0  ;;  %v17940_v9 = vld [vmem:[#allocation69_spill] sm:$0xff] }
 0xbcb   :  { %v6012_v4 = vadd.f32 %v6011_v6, %v5803_v14  ;;  %v6421_v50 = vadd.f32 %v15137_v37, %v6212_v1  ;;  %v6218_v7 = vadd.f32 %v15171_v17, %v6009_v28  ;;  %v5600_v3 = vadd.f32 %v17937_v39, %v5391_v51  ;;  %v17943_v39 = vld [vmem:[#allocation380_spill] sm:$0xff] }
 0xbcc   :  { %v6704_v15 = vadd.f32 %v6703_v59, %v15056_v29  ;;  %v6837_v24 = vadd.f32 %v6836_v32, %v6774_v55  ;;  %v6777_v6 = vmul.f32 %v15282_v61, %v15282_v61  ;;  %v15302_v20 = vadd.f32 %v15135_v33, %v6418_v31  ;;  %v17938_v55 = vld [vmem:[#allocation378_spill] sm:$0xff]  ;;  %v17939_v32 = vld [vmem:[#allocation413_spill] sm:$0xff] }
 0xbcd   :  { %v6424_v54 = vadd.f32 %v15163_v27, %v6215_v8  ;;  %v6221_v37 = vadd.f32 %v15198_v62, %v6012_v4  ;;  %v5394_v5 = vadd.f32 %v17938_v55, %v5185_v35  ;;  %v6778_v51 = vmul.f32 %v15293_v47, %v15293_v47  ;;  %v17942_v4 = vld [vmem:[#allocation379_spill] sm:$0xff] }
 0xbce   :  { %v6705_v11 = vadd.f32 %v6704_v15, %v15081_v10  ;;  %v6838_v21 = vadd.f32 %v6837_v24, %v6775_v56  ;;  %v15311_v1 = vadd.f32 %v15158_v52, %v6421_v50  ;;  %v6427_v33 = vadd.f32 %v15186_v12, %v6218_v7  ;;  %v6229_v26 = vpop.f32.mrf.mxu3  ;;  %v17941_v12 = vld [vmem:[#allocation419_spill] sm:$0xff] }
 0xbcf   :  { %v6014_v13 = vpop.f32.mrf.mxu2  ;;  %v5809_v28 = vadd.f32 %v17939_v32, %v5600_v3  ;;  %v6779_v62 = vmul.f32 %v15302_v20, %v15302_v20  ;;  %v15320_v56 = vadd.f32 %v15178_v46, %v6424_v54  ;;  %v6430_v8 = vadd.f32 %v15219_v30, %v6221_v37  ;;  %v17944_v54 = vld [vmem:[#allocation74_spill] sm:$0xff] }
 0xbd0   :  { %v6015_v2 = vadd.f32 %v6014_v13, %v5806_v22  ;;  %v6706_v45 = vadd.f32 %v6705_v11, %v15106_v63  ;;  %v6839_v17 = vadd.f32 %v6838_v21, %v6776_v42  ;;  %v5188_v23 = vadd.f32 %v17941_v12, %v17940_v9  ;;  %v6644_v15 = vpop.f32.mrf.mxu1  ;;  %v17947_v32 = vld [vmem:[#allocation382_spill] sm:$0xff] }
 0xbd1   :  { %v6780_v35 = vmul.f32 %v15311_v1, %v15311_v1  ;;  %v5603_v49 = vadd.f32 %v17942_v4, %v5394_v5  ;;  %v15331_v46 = vadd.f32 %v15205_v57, %v6427_v33  ;;  %v6781_v50 = vmul.f32 %v15320_v56, %v15320_v56  ;;  %v17946_v33 = vld [vmem:[#allocation80_spill] sm:$0xff] }
 0xbd2   :  { %v6707_v59 = vadd.f32 %v6706_v45, %v15282_v61  ;;  %v6224_v27 = vadd.f32 %v15233_v36, %v6015_v2  ;;  %v6840_v14 = vadd.f32 %v6839_v17, %v6777_v6  ;;  %v15338_v7 = vadd.f32 %v15242_v19, %v6430_v8  ;;  %v6438_v6 = vpop.f32.mrf.mxu0 }
 0xbd3   :  { %v5397_v3 = vadd.f32 %v17943_v39, %v5188_v23  ;;  %v5812_v45 = vadd.f32 %v17944_v54, %v5603_v49  ;;  %v17948_v23 = vld [vmem:[#allocation383_spill] sm:$0xff] }
 0xbd4   :  { %v6708_v52 = vadd.f32 %v6707_v59, %v15293_v47  ;;  %v6841_v36 = vadd.f32 %v6840_v14, %v6778_v51  ;;  %v6433_v24 = vadd.f32 %v15259_v53, %v6224_v27  ;;  %v6782_v53 = vmul.f32 %v15331_v46, %v15331_v46  ;;  %v17945_v59 = vld [vmem:[#allocation258_spill] sm:$0xff] }
 0xbd5   :  { %v5191_v27 = vadd.f32 %v17946_v33, %v17945_v59 }
 0xbd6   :  { %v6709_v22 = vadd.f32 %v6708_v52, %v15302_v20  ;;  %v6842_v30 = vadd.f32 %v6841_v36, %v6779_v62  ;;  %v6232_v5 = vpop.f32.mrf.mxu3 }
 0xbd7   :  { %v6017_v31 = vpop.f32.mrf.mxu2  ;;  %v5400_v36 = vadd.f32 %v17948_v23, %v5191_v27 }
 0xbd8   :  { %v6018_v13 = vadd.f32 %v6017_v31, %v5809_v28  ;;  %v6710_v11 = vadd.f32 %v6709_v22, %v15311_v1  ;;  %v6843_v21 = vadd.f32 %v6842_v30, %v6780_v35  ;;  %v5606_v28 = vadd.f32 %v17947_v32, %v5397_v3  ;;  %v6647_v52 = vpop.f32.mrf.mxu1 }
 0xbda   :  { %v6227_v42 = vadd.f32 %v6226_v0, %v6018_v13  ;;  %v6711_v57 = vadd.f32 %v6710_v11, %v15320_v56  ;;  %v15344_v0 = vadd.f32 %v6641_v40, %v6433_v24  ;;  %v6844_v37 = vadd.f32 %v6843_v21, %v6781_v50  ;;  %v17950_v21 = vld [vmem:[#allocation384_spill] sm:$0xff] }
 0xbdc   :  { %v6436_v2 = vadd.f32 %v6435_v34, %v6227_v42  ;;  %v6712_v19 = vadd.f32 %v6711_v57, %v15331_v46  ;;  %v6783_v34 = vmul.f32 %v15338_v7, %v15338_v7  ;;  %v6845_v40 = vadd.f32 %v6844_v37, %v6782_v53  ;;  %v6441_v42 = vpop.f32.mrf.mxu0 }
 0xbdd   :  { %v6784_v62 = vmul.f32 %v15344_v0, %v15344_v0 }
 0xbde   :  { %v15350_v17 = vadd.f32 %v6644_v15, %v6436_v2  ;;  %v6713_v14 = vadd.f32 %v6712_v19, %v15338_v7  ;;  %v6846_v8 = vadd.f32 %v6845_v40, %v6783_v34  ;;  %v17949_v15 = vld [vmem:[#allocation417_spill] sm:$0xff]  ;;  %v6235_v2 = vpop.f32.mrf.mxu3 }
 0xbdf   :  { %v6020_v55 = vpop.f32.mrf.mxu2  ;;  %v5815_v4 = vadd.f32 %v17949_v15, %v5606_v28 }
 0xbe0   :  { %v6021_v51 = vadd.f32 %v6020_v55, %v5812_v45  ;;  %v6785_v13 = vmul.f32 %v15350_v17, %v15350_v17  ;;  %v6714_v12 = vadd.f32 %v6713_v14, %v15344_v0  ;;  %v6847_v22 = vadd.f32 %v6846_v8, %v6784_v62  ;;  %v6650_v57 = vpop.f32.mrf.mxu1  ;;  %v17952_v45 = vld [vmem:[#allocation88_spill] sm:$0xff] }
 0xbe2   :  { %v6230_v31 = vadd.f32 %v6229_v26, %v6021_v51  ;;  %v6715_v49 = vadd.f32 %v6714_v12, %v15350_v17  ;;  %v6848_v11 = vadd.f32 %v6847_v22, %v6785_v13 }
 0xbe4   :  { %v6439_v9 = vadd.f32 %v6438_v6, %v6230_v31  ;;  %v5609_v6 = vadd.f32 %v17950_v21, %v5400_v36  ;;  %v6444_v59 = vpop.f32.mrf.mxu0 }
 0xbe6   :  { %v15362_v35 = vadd.f32 %v6647_v52, %v6439_v9  ;;  %v5818_v37 = vadd.f32 %v17952_v45, %v5609_v6  ;;  %v17955_v6 = vld [vmem:[#allocation268_spill] sm:$0xff] }
 0xbe7   :  { %v6023_v24 = vpop.f32.mrf.mxu2 }
 0xbe8   :  { %v6024_v26 = vadd.f32 %v6023_v24, %v5815_v4  ;;  %v6716_v30 = vadd.f32 %v6715_v49, %v15362_v35  ;;  %v6786_v50 = vmul.f32 %v15362_v35, %v15362_v35 }
 0xbea   :  { %v6233_v39 = vadd.f32 %v6232_v5, %v6024_v26  ;;  %v6849_v3 = vadd.f32 %v6848_v11, %v6786_v50  ;;  %v6653_v5 = vpop.f32.mrf.mxu3 }
 0xbec   :  { %v6442_v53 = vadd.f32 %v6441_v42, %v6233_v39 }
 0xbee   :  { %v15370_v54 = vadd.f32 %v6650_v57, %v6442_v53  ;;  %v17956_v53 = vld [vmem:[#allocation87_spill] sm:$0xff]  ;;  %v17985_v57 = vld [vmem:[#allocation386_spill] sm:$0xff] }
 0xbef   :  { %v6026_v55 = vpop.f32.mrf.mxu2 }
 0xbf0   :  { %17951 = vst [vmem:[#allocation387_spill] sm:$0xff] %v15370_v54  ;;  %v6717_v19 = vadd.f32 %v6716_v30, %v15370_v54  ;;  %v6787_v34 = vmul.f32 %v15370_v54, %v15370_v54  ;;  %v6027_v51 = vadd.f32 %v6026_v55, %v5818_v37  ;;  %v17982_v55 = vld [vmem:[#allocation132_spill] sm:$0xff] }
 0xbf2   :  { %v6850_v33 = vadd.f32 %v6849_v3, %v6787_v34  ;;  %v6236_v27 = vadd.f32 %v6235_v2, %v6027_v51  ;;  %v17953_v2 = vld [vmem:[#allocation79_spill] sm:$0xff]  ;;  %v17954_v3 = vld [vmem:[#allocation78_spill] sm:$0xff] }
 0xbf3   :  { %v17957_v34 = vld [vmem:[#allocation95_spill] sm:$0xff] }
 0xbf4   :  { %v6445_v32 = vadd.f32 %v6444_v59, %v6236_v27  ;;  %v17988_v51 = vld [vmem:[#allocation143_spill] sm:$0xff]  ;;  %v17990_v27 = vld [vmem:[#allocation104_spill] sm:$0xff] }
 0xbf6   :  { %v15376_v28 = vadd.f32 %v6653_v5, %v6445_v32  ;;  %v17959_v5 = vld [vmem:[#allocation113_spill] sm:$0xff]  ;;  %v17989_v32 = vld [vmem:[#allocation124_spill] sm:$0xff] }
 0xbf8   :  { %v6718_v40 = vadd.f32 %v6717_v19, %v15376_v28  ;;  %v6788_v14 = vmul.f32 %v15376_v28, %v15376_v28 }
 0xbfa   :  { %v6719_v62 = vrot.slane %v6718_v40, 4  ;;  %v6851_v31 = vadd.f32 %v6850_v33, %v6788_v14  ;;  %v17958_v33 = vld [vmem:[#allocation93_spill] sm:$0xff] }
 0xbfc   :  { %v6720_v52 = vadd.f32 %v6719_v62, %v6718_v40  ;;  %v6852_v8 = vrot.slane %v6851_v31, 4  ;;  %v17960_v40 = vld [vmem:[#allocation94_spill] sm:$0xff]  ;;  %v17961_v62 = vld [vmem:[#allocation76_spill] sm:$0xff] }
 0xbfe   :  { %v6721_v13 = vrot.slane %v6720_v52, 2  ;;  %v6853_v9 = vadd.f32 %v6852_v8, %v6851_v31  ;;  %v17968_v8 = vld [vmem:[#allocation110_spill] sm:$0xff] }
 0xc00   :  { %v6722_v12 = vadd.f32 %v6721_v13, %v6720_v52  ;;  %v6854_v23 = vrot.slane %v6853_v9, 2  ;;  %v17962_v13 = vld [vmem:[#allocation101_spill] sm:$0xff]  ;;  %v17991_v52 = vld [vmem:[#allocation140_spill] sm:$0xff] }
 0xc02   :  { %v6723_v36 = vrot.slane %v6722_v12, 1  ;;  %v6855_v15 = vadd.f32 %v6854_v23, %v6853_v9  ;;  %v17969_v9 = vld [vmem:[#allocation108_spill] sm:$0xff] }
 0xc03   :  { %v17970_v23 = vld [vmem:[#allocation128_spill] sm:$0xff] }
 0xc04   :  { %v6724_v4 = vadd.f32 %v6723_v36, %v6722_v12  ;;  %v6856_v49 = vrot.slane %v6855_v15, 1  ;;  %v17963_v12 = vld [vmem:[#allocation121_spill] sm:$0xff]  ;;  %v17964_v36 = vld [vmem:[#allocation103_spill] sm:$0xff] }
 0xc06   :  { %v6857_v22 = vadd.f32 %v6856_v49, %v6855_v15  ;;  %v15381_v24 = vmul.f32 0.001953125, %v6724_v4  ;;  %v17965_v4 = vld [vmem:[#allocation270_spill] sm:$0xff]  ;;  %v17971_v15 = vld [vmem:[#allocation109_spill] sm:$0xff] }
 0xc07   :  { %v17972_v49 = vld [vmem:[#allocation89_spill] sm:$0xff] }
 0xc08   :  { %v6859_v42 = vmul.f32 0.001953125, %v6857_v22  ;;  %v6860_v26 = vmul.f32 %v15381_v24, %v15381_v24  ;;  %v17966_v22 = vld [vmem:[#allocation117_spill] sm:$0xff]  ;;  %v17992_v59 = vsub.f32 %v15376_v28, %v15381_v24  ;;  %v17995_v45 = vsub.f32 %v17955_v6, %v15381_v24 }
 0xc09   :  { %v17996_v28 = vsub.f32 %v17956_v53, %v15381_v24  ;;  %v18004_v54 = vsub.f32 %v17959_v5, %v15381_v24  ;;  %v18007_v37 = vsub.f32 %v17879_v16, %v15381_v24 }
 0xc0a   :  { %v6861_v50 = vsub.f32 %v6859_v42, %v6860_v26  ;;  %v17967_v26 = vld [vmem:[#allocation100_spill] sm:$0xff] }
 0xc0c   :  { %v15387_v11 = vadd.f32 1e-05, %v6861_v50  ;;  %v17987_v50 = vld [vmem:[#allocation129_spill] sm:$0xff] }
 0xc0e   :  { %7609 = vrsqrt.f32 %v15387_v11  ;;  %vm6933_vm0 = vweird.f32 %v15387_v11 }
 0xc14   :  { %v7610_v31 = vpop.eup %7609 }
 0xc15   :  { %v6928_v42 = vmul.f32 %v7610_v31, %v15387_v11  ;;  %vm6934_vm1 = vweird.f32 %v7610_v31 }
 0xc16   :  { %vm6935_vm2 = vmor %vm6933_vm0, %vm6934_vm1 }
 0xc17   :  { %v6929_v30 = vmul.f32 %v7610_v31, %v6928_v42  ;;  %v17986_v42 = vld [vmem:[#allocation123_spill] sm:$0xff] }
 0xc19   :  { %v6930_v21 = vmul.f32 0.5, %v6929_v30 }
 0xc1b   :  { %v6931_v39 = vsub.f32 1.5, %v6930_v21 }
 0xc1d   :  { %v6932_v21 = vmul.f32 %v7610_v31, %v6931_v39  ;;  %v17993_v39 = vsub.f32 %v17953_v2, %v15381_v24 }
 0xc1f   :  { %v15514_v30 = vsel %vm6935_vm2, %v7610_v31, %v6932_v21  ;;  %v17994_v21 = vsub.f32 %v17954_v3, %v15381_v24 }
 0xc20   :  { %v7000_v19 = vmul.f32 %v15514_v30, %v17992_v59  ;;  %v15530_v31 = vmul.f32 %v15514_v30, %v17993_v39  ;;  %v15542_v11 = vmul.f32 %v15514_v30, %v17995_v45  ;;  %v15548_v2 = vmul.f32 %v15514_v30, %v17996_v28 }
 0xc21   :  { %v15536_v14 = vmul.f32 %v15514_v30, %v17994_v21  ;;  %v17997_v59 = vsub.f32 %v17865_v44, %v15381_v24  ;;  %v17998_v39 = vsub.f32 %v17866_v48, %v15381_v24  ;;  %v17999_v45 = vsub.f32 %v17869_v25, %v15381_v24  ;;  %v18000_v21 = vld [vmem:[#allocation21_spill] sm:$0xff] }
 0xc22   :  { %vm7064_vm3 = vcmp.ge.f32.partialorder %v7000_v19, 0.0  ;;  %v7128_v28 = vmul.f32 %v7000_v19, %v18000_v21  ;;  %v18001_v44 = vsub.f32 %v17957_v34, %v15381_v24  ;;  %v18002_v48 = vsub.f32 %v14468_v60, %v15381_v24 }
 0xc23   :  { %v15554_v3 = vmul.f32 %v15514_v30, %v17997_v59  ;;  %v15560_v6 = vmul.f32 %v15514_v30, %v17998_v39  ;;  %v15566_v53 = vmul.f32 %v15514_v30, %v17999_v45  ;;  %v18003_v25 = vsub.f32 %v17958_v33, %v15381_v24 }
 0xc24   :  { %v15573_v59 = vmul.f32 %v15514_v30, %v18001_v44  ;;  %v15579_v39 = vmul.f32 %v15514_v30, %v18002_v48  ;;  %v15591_v34 = vmul.f32 %v15514_v30, %v18004_v54  ;;  %v18005_v44 = vsub.f32 %v17960_v40, %v15381_v24 }
 0xc25   :  { %v15585_v45 = vmul.f32 %v15514_v30, %v18003_v25  ;;  %v18006_v48 = vsub.f32 %v17961_v62, %v15381_v24  ;;  %v7192_v25 = vsel %vm7064_vm3, %v7000_v19, %v7128_v28  ;;  %v15609_v5 = vmul.f32 %v15514_v30, %v18007_v37 }
 0xc26   :  { %v15597_v60 = vmul.f32 %v15514_v30, %v18005_v44  ;;  %v18008_v54 = vsub.f32 %v17882_v41, %v15381_v24  ;;  %v18009_v44 = vsub.f32 %v17962_v13, %v15381_v24  ;;  %7256 = vst [vmem:[#allocation6 + $0x1f8] sm:$0xff] %v7192_v25  ;;  %v18010_v19 = vsub.f32 %v17963_v12, %v15381_v24 }
 0xc27   :  { %v15603_v33 = vmul.f32 %v15514_v30, %v18006_v48  ;;  %v18011_v37 = vsub.f32 %v17964_v36, %v15381_v24  ;;  %v18012_v28 = vsub.f32 %v17965_v4, %v15381_v24  ;;  %v18013_v48 = vsub.f32 %v17966_v22, %v15381_v24 }
 0xc28   :  { %v15615_v40 = vmul.f32 %v15514_v30, %v18008_v54  ;;  %v15621_v62 = vmul.f32 %v15514_v30, %v18009_v44  ;;  %v15627_v16 = vmul.f32 %v15514_v30, %v18010_v19  ;;  %v18014_v25 = vsub.f32 %v17967_v26, %v15381_v24 }
 0xc29   :  { %v15633_v41 = vmul.f32 %v15514_v30, %v18011_v37  ;;  %v15639_v13 = vmul.f32 %v15514_v30, %v18012_v28  ;;  %v15645_v12 = vmul.f32 %v15514_v30, %v18013_v48  ;;  %v18015_v54 = vsub.f32 %v17968_v8, %v15381_v24  ;;  %v18021_v48 = vld [vmem:[#allocation107_spill] sm:$0xff] }
 0xc2a   :  { %v15651_v36 = vmul.f32 %v15514_v30, %v18014_v25  ;;  %v18016_v44 = vsub.f32 %v17969_v9, %v15381_v24  ;;  %v18017_v19 = vsub.f32 %v17970_v23, %v15381_v24  ;;  %v18018_v37 = vsub.f32 %v17971_v15, %v15381_v24 }
 0xc2b   :  { %v15657_v4 = vmul.f32 %v15514_v30, %v18015_v54  ;;  %v18019_v28 = vsub.f32 %v17972_v49, %v15381_v24  ;;  %v18022_v25 = vsub.f32 %v18021_v48, %v15381_v24  ;;  %v18024_v54 = vld [vmem:[#allocation288_spill] sm:$0xff]  ;;  %vm7001_vm8 = vcmp.ge.f32.partialorder %v15530_v31, 0.0 }
 0xc2c   :  { %v15663_v22 = vmul.f32 %v15514_v30, %v18016_v44  ;;  %v15669_v26 = vmul.f32 %v15514_v30, %v18017_v19  ;;  %v15675_v8 = vmul.f32 %v15514_v30, %v18018_v37  ;;  %v18025_v44 = vsub.f32 %v18024_v54, %v15381_v24  ;;  %v18027_v19 = vld [vmem:[#allocation125_spill] sm:$0xff] }
 0xc2d   :  { %v15681_v9 = vmul.f32 %v15514_v30, %v18019_v28  ;;  %v15687_v23 = vmul.f32 %v15514_v30, %v18022_v25  ;;  %v18028_v37 = vsub.f32 %v18027_v19, %v15381_v24  ;;  %v18030_v28 = vld [vmem:[#allocation116_spill] sm:$0xff]  ;;  %v18033_v25 = vld [vmem:[#allocation126_spill] sm:$0xff]  ;;  %vm7002_vm9 = vcmp.ge.f32.partialorder %v15536_v14, 0.0 }
 0xc2e   :  { %v15693_v15 = vmul.f32 %v15514_v30, %v18025_v44  ;;  %v18036_v44 = vld [vmem:[#allocation136_spill] sm:$0xff]  ;;  %vm7003_vm10 = vcmp.ge.f32.partialorder %v15542_v11, 0.0  ;;  %vm7004_vm11 = vcmp.ge.f32.partialorder %v15548_v2, 0.0  ;;  %vm7005_vm12 = vcmp.ge.f32.partialorder %v15554_v3, 0.0 }
 0xc2f   :  { %18020 = vst [vmem:[#allocation131_spill] sm:$0xff] %v15681_v9  ;;  %v15699_v49 = vmul.f32 %v15514_v30, %v18028_v37  ;;  %v18031_v9 = vsub.f32 %v18030_v28, %v15381_v24  ;;  %v18038_v37 = vld [vmem:[#allocation114_spill] sm:$0xff]  ;;  %vm7006_vm13 = vcmp.ge.f32.partialorder %v15560_v6, 0.0  ;;  %vm7007_vm14 = vcmp.ge.f32.partialorder %v15566_v53, 0.0 }
 0xc30   :  { %18023 = vst [vmem:[#allocation141_spill] sm:$0xff] %v15687_v23  ;;  %v18034_v23 = vsub.f32 %v18033_v25, %v15381_v24  ;;  %vm7008_vm15 = vcmp.ge.f32.partialorder %v15573_v59, 0.0  ;;  %vm7009_vm4 = vcmp.ge.f32.partialorder %v15579_v39, 0.0  ;;  %vm7010_vm5 = vcmp.ge.f32.partialorder %v15585_v45, 0.0 }
 0xc31   :  { %18026 = vst [vmem:[#allocation36_spill] sm:$0xff] %v15693_v15  ;;  %v15705_v48 = vmul.f32 %v15514_v30, %v18031_v9  ;;  %v18037_v15 = vsub.f32 %v18036_v44, %v15381_v24  ;;  %v18041_v9 = vld [vmem:[#allocation118_spill] sm:$0xff]  ;;  %vm7011_vm6 = vcmp.ge.f32.partialorder %v15591_v34, 0.0  ;;  %vm7012_vm7 = vcmp.ge.f32.partialorder %v15597_v60, 0.0 }
 0xc32   :  { %18029 = vst [vmem:[#allocation388_spill] sm:$0xff] %v15699_v49  ;;  %v15711_v54 = vmul.f32 %v15514_v30, %v18034_v23  ;;  %v18039_v49 = vsub.f32 %v18038_v37, %v15381_v24  ;;  %v18044_v23 = vld [vmem:[#allocation280_spill] sm:$0xff]  ;;  %vm7013_vm0 = vcmp.ge.f32.partialorder %v15603_v33, 0.0  ;;  %vm7014_vm1 = vcmp.ge.f32.partialorder %v15609_v5, 0.0 }
 0xc33   :  { %18032 = vst [vmem:[#allocation133_spill] sm:$0xff] %v15705_v48  ;;  %v15717_v19 = vmul.f32 %v15514_v30, %v18037_v15  ;;  %v18042_v48 = vsub.f32 %v18041_v9, %v15381_v24  ;;  %v18046_v15 = vsub.f32 %v17982_v55, %v15381_v24  ;;  %vm7015_vm2 = vcmp.ge.f32.partialorder %v15615_v40, 0.0 }
 0xc34   :  { %18035 = vst [vmem:[#allocation291_spill] sm:$0xff] %v15711_v54  ;;  %v15723_v28 = vmul.f32 %v15514_v30, %v18039_v49  ;;  %v18045_v54 = vsub.f32 %v18044_v23, %v15381_v24  ;;  %v18047_v49 = vld [vmem:[#allocation115_spill] sm:$0xff]  ;;  %vm7016_vm3 = vcmp.ge.f32.partialorder %v15621_v62, 0.0 }
 0xc35   :  { %v15729_v25 = vmul.f32 %v15514_v30, %v18042_v48  ;;  %v15741_v37 = vmul.f32 %v15514_v30, %v18046_v15  ;;  %v18049_v48 = vld [vmem:[#allocation295_spill] sm:$0xff]  ;;  %v18052_v15 = vsub.f32 %v17986_v42, %v15381_v24 }
 0xc36   :  { %18040 = vst [vmem:[#allocation148_spill] sm:$0xff] %v15723_v28  ;;  %v15735_v44 = vmul.f32 %v15514_v30, %v18045_v54  ;;  %v18048_v28 = vsub.f32 %v18047_v49, %v15381_v24  ;;  %v18051_v54 = vsub.f32 %v17985_v57, %v15381_v24 }
 0xc37   :  { %18043 = vst [vmem:[#allocation130_spill] sm:$0xff] %v15729_v25  ;;  %v18050_v25 = vsub.f32 %v18049_v48, %v15381_v24  ;;  %v15765_v49 = vmul.f32 %v15514_v30, %v18052_v15  ;;  %v18056_v15 = vsub.f32 %v17990_v27, %v15381_v24 }
 0xc38   :  { %v15747_v9 = vmul.f32 %v15514_v30, %v18048_v28  ;;  %v15759_v55 = vmul.f32 %v15514_v30, %v18051_v54  ;;  %v18053_v28 = vsub.f32 %v17987_v50, %v15381_v24  ;;  %v18055_v54 = vsub.f32 %v17989_v32, %v15381_v24 }
 0xc39   :  { %v15753_v23 = vmul.f32 %v15514_v30, %v18050_v25  ;;  %v18054_v25 = vsub.f32 %v17988_v51, %v15381_v24  ;;  %v15789_v50 = vmul.f32 %v15514_v30, %v18056_v15  ;;  %v18060_v15 = vsub.f32 %v15008_v58, %v15381_v24 }
 0xc3a   :  { %v15771_v48 = vmul.f32 %v15514_v30, %v18053_v28  ;;  %v15783_v42 = vmul.f32 %v15514_v30, %v18055_v54  ;;  %v18057_v28 = vsub.f32 %v17991_v52, %v15381_v24  ;;  %v18059_v54 = vsub.f32 %v17922_v38, %v15381_v24 }
 0xc3b   :  { %v15777_v57 = vmul.f32 %v15514_v30, %v18054_v25  ;;  %v18058_v25 = vsub.f32 %v17918_v18, %v15381_v24  ;;  %v15813_v52 = vmul.f32 %v15514_v30, %v18060_v15  ;;  %v18064_v15 = vsub.f32 %v15106_v63, %v15381_v24 }
 0xc3c   :  { %v15795_v51 = vmul.f32 %v15514_v30, %v18057_v28  ;;  %v15807_v27 = vmul.f32 %v15514_v30, %v18059_v54  ;;  %v18061_v28 = vsub.f32 %v15033_v43, %v15381_v24  ;;  %v18063_v54 = vsub.f32 %v15081_v10, %v15381_v24 }
 0xc3d   :  { %v15801_v32 = vmul.f32 %v15514_v30, %v18058_v25  ;;  %v18062_v25 = vsub.f32 %v15056_v29, %v15381_v24  ;;  %v15837_v43 = vmul.f32 %v15514_v30, %v18064_v15  ;;  %v18068_v15 = vsub.f32 %v15311_v1, %v15381_v24 }
 0xc3e   :  { %v15819_v18 = vmul.f32 %v15514_v30, %v18061_v28  ;;  %v15831_v58 = vmul.f32 %v15514_v30, %v18063_v54  ;;  %v18065_v28 = vsub.f32 %v15282_v61, %v15381_v24  ;;  %v18067_v54 = vsub.f32 %v15302_v20, %v15381_v24 }
 0xc3f   :  { %v15825_v38 = vmul.f32 %v15514_v30, %v18062_v25  ;;  %v18066_v25 = vsub.f32 %v15293_v47, %v15381_v24  ;;  %v15861_v61 = vmul.f32 %v15514_v30, %v18068_v15  ;;  %v18074_v15 = vsub.f32 %v15344_v0, %v15381_v24 }
 0xc40   :  { %v15843_v29 = vmul.f32 %v15514_v30, %v18065_v28  ;;  %v15855_v63 = vmul.f32 %v15514_v30, %v18067_v54  ;;  %v18069_v28 = vsub.f32 %v15320_v56, %v15381_v24  ;;  %v18072_v54 = vsub.f32 %v15338_v7, %v15381_v24 }
 0xc41   :  { %v15849_v10 = vmul.f32 %v15514_v30, %v18066_v25  ;;  %v18070_v25 = vsub.f32 %v15331_v46, %v15381_v24  ;;  %v15885_v56 = vmul.f32 %v15514_v30, %v18074_v15  ;;  %v7065_v15 = vmul.f32 %v15530_v31, %v18000_v21 }
 0xc42   :  { %v15867_v47 = vmul.f32 %v15514_v30, %v18069_v28  ;;  %v15879_v1 = vmul.f32 %v15514_v30, %v18072_v54  ;;  %v18076_v28 = vsub.f32 %v15350_v17, %v15381_v24  ;;  %v18080_v54 = vld [vmem:[#allocation387_spill] sm:$0xff]  ;;  %v7066_v17 = vmul.f32 %v15536_v14, %v18000_v21 }
 0xc43   :  { %v15873_v20 = vmul.f32 %v15514_v30, %v18070_v25  ;;  %18075 = vst [vmem:[#allocation138_spill] sm:$0xff] %v15885_v56  ;;  %v18078_v25 = vsub.f32 %v15362_v35, %v15381_v24  ;;  %v7068_v35 = vmul.f32 %v15548_v2, %v18000_v21  ;;  %v7073_v56 = vmul.f32 %v15579_v39, %v18000_v21 }
 0xc44   :  { %18073 = vst [vmem:[#allocation389_spill] sm:$0xff] %v15879_v1  ;;  %v15891_v46 = vmul.f32 %v15514_v30, %v18076_v28  ;;  %v18081_v1 = vsub.f32 %v18080_v54, %v15381_v24  ;;  %v7067_v28 = vmul.f32 %v15542_v11, %v18000_v21  ;;  %v7069_v24 = vmul.f32 %v15554_v3, %v18000_v21 }
 0xc45   :  { %18071 = vst [vmem:[#allocation307_spill] sm:$0xff] %v15873_v20  ;;  %v15897_v7 = vmul.f32 %v15514_v30, %v18078_v25  ;;  %v7129_v25 = vsel %vm7001_vm8, %v15530_v31, %v7065_v15  ;;  %v7130_v54 = vsel %vm7002_vm9, %v15536_v14, %v7066_v17  ;;  %v7074_v14 = vmul.f32 %v15585_v45, %v18000_v21 }
 0xc46   :  { %18077 = vst [vmem:[#allocation144_spill] sm:$0xff] %v15891_v46  ;;  %v15903_v0 = vmul.f32 %v15514_v30, %v18081_v1  ;;  %v7070_v30 = vmul.f32 %v15560_v6, %v18000_v21  ;;  %v7071_v1 = vmul.f32 %v15566_v53, %v18000_v21  ;;  %v7132_v46 = vsel %vm7004_vm11, %v15548_v2, %v7068_v35 }
 0xc47   :  { %18079 = vst [vmem:[#allocation157_spill] sm:$0xff] %v15897_v7  ;;  %v7072_v7 = vmul.f32 %v15573_v59, %v18000_v21  ;;  %v7133_v20 = vsel %vm7005_vm12, %v15554_v3, %v7069_v24  ;;  %v7075_v31 = vmul.f32 %v15591_v34, %v18000_v21  ;;  %v7076_v3 = vmul.f32 %v15597_v60, %v18000_v21 }
 0xc48   :  { %18082 = vst [vmem:[#allocation139_spill] sm:$0xff] %v15903_v0  ;;  %v7131_v0 = vsel %vm7003_vm10, %v15542_v11, %v7067_v28  ;;  %v7134_v11 = vsel %vm7006_vm13, %v15560_v6, %v7070_v30  ;;  %v7135_v2 = vsel %vm7007_vm14, %v15566_v53, %v7071_v1  ;;  %v7077_v6 = vmul.f32 %v15603_v33, %v18000_v21 }
 0xc49   :  { %7193 = vst [vmem:[#allocation6] sm:$0xff] %v7129_v25  ;;  %v7136_v15 = vsel %vm7008_vm15, %v15573_v59, %v7072_v7  ;;  %v7078_v53 = vmul.f32 %v15609_v5, %v18000_v21  ;;  %v7079_v59 = vmul.f32 %v15615_v40, %v18000_v21  ;;  %vm7017_vm8 = vcmp.ge.f32.partialorder %v15627_v16, 0.0 }
 0xc4a   :  { %7194 = vst [vmem:[#allocation6 + $0x8] sm:$0xff] %v7130_v54  ;;  %v7141_v7 = vsel %vm7013_vm0, %v15603_v33, %v7077_v6  ;;  %vm7018_vm9 = vcmp.ge.f32.partialorder %v15633_v41, 0.0  ;;  %vm7019_vm10 = vcmp.ge.f32.partialorder %v15639_v13, 0.0  ;;  %v7084_v33 = vmul.f32 %v15645_v12, %v18000_v21 }
 0xc4b   :  { %7195 = vst [vmem:[#allocation6 + $0x10] sm:$0xff] %v7131_v0  ;;  %v7137_v0 = vsel %vm7009_vm4, %v15579_v39, %v7073_v56  ;;  %v7080_v39 = vmul.f32 %v15621_v62, %v18000_v21  ;;  %v7140_v56 = vsel %vm7012_vm7, %v15597_v60, %v7076_v3  ;;  %v7142_v17 = vsel %vm7014_vm1, %v15609_v5, %v7078_v53 }
 0xc4c   :  { %7196 = vst [vmem:[#allocation6 + $0x18] sm:$0xff] %v7132_v46  ;;  %v7138_v46 = vsel %vm7010_vm5, %v15585_v45, %v7074_v14  ;;  %v7081_v45 = vmul.f32 %v15627_v16, %v18000_v21  ;;  %v7083_v60 = vmul.f32 %v15639_v13, %v18000_v21  ;;  %v7143_v28 = vsel %vm7015_vm2, %v15615_v40, %v7079_v59 }
 0xc4d   :  { %7197 = vst [vmem:[#allocation6 + $0x20] sm:$0xff] %v7133_v20  ;;  %v7139_v20 = vsel %vm7011_vm6, %v15591_v34, %v7075_v31  ;;  %v7082_v34 = vmul.f32 %v15633_v41, %v18000_v21  ;;  %v7144_v35 = vsel %vm7016_vm3, %v15621_v62, %v7080_v39  ;;  %vm7020_vm11 = vcmp.ge.f32.partialorder %v15645_v12, 0.0 }
 0xc4e   :  { %7198 = vst [vmem:[#allocation6 + $0x28] sm:$0xff] %v7134_v11  ;;  %v7085_v5 = vmul.f32 %v15651_v36, %v18000_v21  ;;  %v7145_v24 = vsel %vm7017_vm8, %v15627_v16, %v7081_v45  ;;  %vm7021_vm12 = vcmp.ge.f32.partialorder %v15651_v36, 0.0  ;;  %v7086_v40 = vmul.f32 %v15657_v4, %v18000_v21 }
 0xc4f   :  { %7199 = vst [vmem:[#allocation6 + $0x30] sm:$0xff] %v7135_v2  ;;  %v7146_v30 = vsel %vm7018_vm9, %v15633_v41, %v7082_v34  ;;  %vm7022_vm13 = vcmp.ge.f32.partialorder %v15657_v4, 0.0  ;;  %v7087_v62 = vmul.f32 %v15663_v22, %v18000_v21  ;;  %v7147_v1 = vsel %vm7019_vm10, %v15639_v13, %v7083_v60  ;;  %v18083_v13 = vld [vmem:[#allocation131_spill] sm:$0xff]  ;;  %v18090_v34 = vld [vmem:[#allocation130_spill] sm:$0xff] }
 0xc50   :  { %7200 = vst [vmem:[#allocation6 + $0x38] sm:$0xff] %v7136_v15  ;;  %vm7023_vm14 = vcmp.ge.f32.partialorder %v15663_v22, 0.0  ;;  %v7088_v16 = vmul.f32 %v15669_v26, %v18000_v21  ;;  %v7148_v25 = vsel %vm7020_vm11, %v15645_v12, %v7084_v33  ;;  %vm7024_vm15 = vcmp.ge.f32.partialorder %v15669_v26, 0.0  ;;  %v18084_v12 = vld [vmem:[#allocation141_spill] sm:$0xff] }
 0xc51   :  { %7201 = vst [vmem:[#allocation6 + $0x40] sm:$0xff] %v7137_v0  ;;  %v7089_v41 = vmul.f32 %v15675_v8, %v18000_v21  ;;  %v7149_v54 = vsel %vm7021_vm12, %v15651_v36, %v7085_v5  ;;  %vm7025_vm4 = vcmp.ge.f32.partialorder %v15675_v8, 0.0  ;;  %v7090_v14 = vmul.f32 %v18083_v13, %v18000_v21  ;;  %v18085_v36 = vld [vmem:[#allocation36_spill] sm:$0xff] }
 0xc52   :  { %7202 = vst [vmem:[#allocation6 + $0x48] sm:$0xff] %v7138_v46  ;;  %v7150_v11 = vsel %vm7022_vm13, %v15657_v4, %v7086_v40  ;;  %vm7026_vm5 = vcmp.ge.f32.partialorder %v18083_v13, 0.0  ;;  %v7091_v31 = vmul.f32 %v18084_v12, %v18000_v21  ;;  %v7151_v2 = vsel %vm7023_vm14, %v15663_v22, %v7087_v62  ;;  %v18086_v4 = vld [vmem:[#allocation388_spill] sm:$0xff]  ;;  %v18087_v22 = vld [vmem:[#allocation133_spill] sm:$0xff] }
 0xc53   :  { %7203 = vst [vmem:[#allocation6 + $0x50] sm:$0xff] %v7139_v20  ;;  %vm7027_vm6 = vcmp.ge.f32.partialorder %v18084_v12, 0.0  ;;  %v7092_v3 = vmul.f32 %v18085_v36, %v18000_v21  ;;  %v7152_v15 = vsel %vm7024_vm15, %v15669_v26, %v7088_v16  ;;  %vm7028_vm7 = vcmp.ge.f32.partialorder %v18085_v36, 0.0  ;;  %v18088_v26 = vld [vmem:[#allocation291_spill] sm:$0xff] }
 0xc54   :  { %7204 = vst [vmem:[#allocation6 + $0x58] sm:$0xff] %v7140_v56  ;;  %v7093_v6 = vmul.f32 %v18086_v4, %v18000_v21  ;;  %v7153_v0 = vsel %vm7025_vm4, %v15675_v8, %v7089_v41  ;;  %vm7029_vm0 = vcmp.ge.f32.partialorder %v18086_v4, 0.0  ;;  %v7094_v53 = vmul.f32 %v18087_v22, %v18000_v21  ;;  %v18089_v56 = vld [vmem:[#allocation148_spill] sm:$0xff] }
 0xc55   :  { %7205 = vst [vmem:[#allocation6 + $0x60] sm:$0xff] %v7141_v7  ;;  %v7154_v46 = vsel %vm7026_vm5, %v18083_v13, %v7090_v14  ;;  %vm7030_vm1 = vcmp.ge.f32.partialorder %v18087_v22, 0.0  ;;  %v7095_v59 = vmul.f32 %v18088_v26, %v18000_v21  ;;  %v7155_v20 = vsel %vm7027_vm6, %v18084_v12, %v7091_v31 }
 0xc56   :  { %7206 = vst [vmem:[#allocation6 + $0x68] sm:$0xff] %v7142_v17  ;;  %vm7031_vm2 = vcmp.ge.f32.partialorder %v18088_v26, 0.0  ;;  %v7096_v8 = vmul.f32 %v15717_v19, %v18000_v21  ;;  %v7156_v39 = vsel %vm7028_vm7, %v18085_v36, %v7092_v3  ;;  %vm7032_vm3 = vcmp.ge.f32.partialorder %v15717_v19, 0.0 }
 0xc57   :  { %7207 = vst [vmem:[#allocation6 + $0x70] sm:$0xff] %v7143_v28  ;;  %v7097_v45 = vmul.f32 %v18089_v56, %v18000_v21  ;;  %v7157_v7 = vsel %vm7029_vm0, %v18086_v4, %v7093_v6  ;;  %vm7033_vm8 = vcmp.ge.f32.partialorder %v18089_v56, 0.0  ;;  %v7098_v17 = vmul.f32 %v18090_v34, %v18000_v21 }
 0xc58   :  { %7208 = vst [vmem:[#allocation6 + $0x78] sm:$0xff] %v7144_v35  ;;  %v7158_v60 = vsel %vm7030_vm1, %v18087_v22, %v7094_v53  ;;  %vm7034_vm9 = vcmp.ge.f32.partialorder %v18090_v34, 0.0  ;;  %v7099_v28 = vmul.f32 %v15735_v44, %v18000_v21  ;;  %v7159_v33 = vsel %vm7031_vm2, %v18088_v26, %v7095_v59 }
 0xc59   :  { %7209 = vst [vmem:[#allocation6 + $0x80] sm:$0xff] %v7145_v24  ;;  %vm7035_vm10 = vcmp.ge.f32.partialorder %v15735_v44, 0.0  ;;  %v7100_v35 = vmul.f32 %v15741_v37, %v18000_v21  ;;  %v7160_v5 = vsel %vm7032_vm3, %v15717_v19, %v7096_v8  ;;  %vm7036_vm11 = vcmp.ge.f32.partialorder %v15741_v37, 0.0 }
 0xc5a   :  { %7210 = vst [vmem:[#allocation6 + $0x88] sm:$0xff] %v7146_v30  ;;  %v7101_v24 = vmul.f32 %v15747_v9, %v18000_v21  ;;  %v7161_v40 = vsel %vm7033_vm8, %v18089_v56, %v7097_v45  ;;  %vm7037_vm12 = vcmp.ge.f32.partialorder %v15747_v9, 0.0  ;;  %v7102_v30 = vmul.f32 %v15753_v23, %v18000_v21 }
 0xc5b   :  { %7211 = vst [vmem:[#allocation6 + $0x90] sm:$0xff] %v7147_v1  ;;  %v7162_v62 = vsel %vm7034_vm9, %v18090_v34, %v7098_v17  ;;  %vm7038_vm13 = vcmp.ge.f32.partialorder %v15753_v23, 0.0  ;;  %v7103_v19 = vmul.f32 %v15759_v55, %v18000_v21  ;;  %v7163_v1 = vsel %vm7035_vm10, %v15735_v44, %v7099_v28 }
 0xc5c   :  { %7212 = vst [vmem:[#allocation6 + $0x98] sm:$0xff] %v7148_v25  ;;  %vm7039_vm14 = vcmp.ge.f32.partialorder %v15759_v55, 0.0  ;;  %v7104_v16 = vmul.f32 %v15765_v49, %v18000_v21  ;;  %v7164_v25 = vsel %vm7036_vm11, %v15741_v37, %v7100_v35  ;;  %vm7040_vm15 = vcmp.ge.f32.partialorder %v15765_v49, 0.0 }
 0xc5d   :  { %7213 = vst [vmem:[#allocation6 + $0xa0] sm:$0xff] %v7149_v54  ;;  %v7105_v41 = vmul.f32 %v15771_v48, %v18000_v21  ;;  %v7165_v54 = vsel %vm7037_vm12, %v15747_v9, %v7101_v24  ;;  %vm7041_vm4 = vcmp.ge.f32.partialorder %v15771_v48, 0.0  ;;  %v7106_v44 = vmul.f32 %v15777_v57, %v18000_v21 }
 0xc5e   :  { %7214 = vst [vmem:[#allocation6 + $0xa8] sm:$0xff] %v7150_v11  ;;  %v7166_v13 = vsel %vm7038_vm13, %v15753_v23, %v7102_v30  ;;  %vm7042_vm5 = vcmp.ge.f32.partialorder %v15777_v57, 0.0  ;;  %v7107_v37 = vmul.f32 %v15783_v42, %v18000_v21  ;;  %v7167_v14 = vsel %vm7039_vm14, %v15759_v55, %v7103_v19 }
 0xc5f   :  { %7215 = vst [vmem:[#allocation6 + $0xb0] sm:$0xff] %v7151_v2  ;;  %vm7043_vm6 = vcmp.ge.f32.partialorder %v15783_v42, 0.0  ;;  %v7108_v9 = vmul.f32 %v15789_v50, %v18000_v21  ;;  %v7168_v11 = vsel %vm7040_vm15, %v15765_v49, %v7104_v16  ;;  %vm7044_vm7 = vcmp.ge.f32.partialorder %v15789_v50, 0.0 }
 0xc60   :  { %7216 = vst [vmem:[#allocation6 + $0xb8] sm:$0xff] %v7152_v15  ;;  %v7109_v23 = vmul.f32 %v15795_v51, %v18000_v21  ;;  %v7169_v12 = vsel %vm7041_vm4, %v15771_v48, %v7105_v41  ;;  %vm7045_vm0 = vcmp.ge.f32.partialorder %v15795_v51, 0.0  ;;  %v7110_v55 = vmul.f32 %v15801_v32, %v18000_v21 }
 0xc61   :  { %7217 = vst [vmem:[#allocation6 + $0xc0] sm:$0xff] %v7153_v0  ;;  %v7170_v31 = vsel %vm7042_vm5, %v15777_v57, %v7106_v44  ;;  %vm7046_vm1 = vcmp.ge.f32.partialorder %v15801_v32, 0.0  ;;  %v7111_v49 = vmul.f32 %v15807_v27, %v18000_v21  ;;  %v7171_v2 = vsel %vm7043_vm6, %v15783_v42, %v7107_v37 }
 0xc62   :  { %7218 = vst [vmem:[#allocation6 + $0xc8] sm:$0xff] %v7154_v46  ;;  %vm7047_vm2 = vcmp.ge.f32.partialorder %v15807_v27, 0.0  ;;  %v7112_v48 = vmul.f32 %v15813_v52, %v18000_v21  ;;  %v7172_v36 = vsel %vm7044_vm7, %v15789_v50, %v7108_v9  ;;  %vm7048_vm3 = vcmp.ge.f32.partialorder %v15813_v52, 0.0 }
 0xc63   :  { %7219 = vst [vmem:[#allocation6 + $0xd0] sm:$0xff] %v7155_v20  ;;  %v7113_v57 = vmul.f32 %v15819_v18, %v18000_v21  ;;  %v7173_v3 = vsel %vm7045_vm0, %v15795_v51, %v7109_v23  ;;  %vm7049_vm8 = vcmp.ge.f32.partialorder %v15819_v18, 0.0  ;;  %v7114_v42 = vmul.f32 %v15825_v38, %v18000_v21 }
 0xc64   :  { %7220 = vst [vmem:[#allocation6 + $0xd8] sm:$0xff] %v7156_v39  ;;  %v7174_v15 = vsel %vm7046_vm1, %v15801_v32, %v7110_v55  ;;  %vm7050_vm9 = vcmp.ge.f32.partialorder %v15825_v38, 0.0  ;;  %v7115_v50 = vmul.f32 %v15831_v58, %v18000_v21  ;;  %v7175_v4 = vsel %vm7047_vm2, %v15807_v27, %v7111_v49 }
 0xc65   :  { %7221 = vst [vmem:[#allocation6 + $0xe0] sm:$0xff] %v7157_v7  ;;  %vm7051_vm10 = vcmp.ge.f32.partialorder %v15831_v58, 0.0  ;;  %v7116_v51 = vmul.f32 %v15837_v43, %v18000_v21  ;;  %v7176_v6 = vsel %vm7048_vm3, %v15813_v52, %v7112_v48  ;;  %vm7052_vm11 = vcmp.ge.f32.partialorder %v15837_v43, 0.0 }
 0xc66   :  { %7222 = vst [vmem:[#allocation6 + $0xe8] sm:$0xff] %v7158_v60  ;;  %v7117_v32 = vmul.f32 %v15843_v29, %v18000_v21  ;;  %v7177_v0 = vsel %vm7049_vm8, %v15819_v18, %v7113_v57  ;;  %vm7053_vm12 = vcmp.ge.f32.partialorder %v15843_v29, 0.0  ;;  %v7118_v27 = vmul.f32 %v15849_v10, %v18000_v21 }
 0xc67   :  { %7223 = vst [vmem:[#allocation6 + $0xf0] sm:$0xff] %v7159_v33  ;;  %v7178_v22 = vsel %vm7050_vm9, %v15825_v38, %v7114_v42  ;;  %vm7054_vm13 = vcmp.ge.f32.partialorder %v15849_v10, 0.0  ;;  %v7119_v52 = vmul.f32 %v15855_v63, %v18000_v21  ;;  %v7179_v53 = vsel %vm7051_vm10, %v15831_v58, %v7115_v50  ;;  %v18091_v58 = vld [vmem:[#allocation307_spill] sm:$0xff] }
 0xc68   :  { %7224 = vst [vmem:[#allocation6 + $0xf8] sm:$0xff] %v7160_v5  ;;  %vm7055_vm14 = vcmp.ge.f32.partialorder %v15855_v63, 0.0  ;;  %v7120_v18 = vmul.f32 %v15861_v61, %v18000_v21  ;;  %v7180_v46 = vsel %vm7052_vm11, %v15837_v43, %v7116_v51  ;;  %vm7056_vm15 = vcmp.ge.f32.partialorder %v15861_v61, 0.0  ;;  %v18092_v43 = vld [vmem:[#allocation389_spill] sm:$0xff] }
 0xc69   :  { %7225 = vst [vmem:[#allocation6 + $0x100] sm:$0xff] %v7161_v40  ;;  %v7121_v38 = vmul.f32 %v15867_v47, %v18000_v21  ;;  %v7181_v26 = vsel %vm7053_vm12, %v15843_v29, %v7117_v32  ;;  %vm7057_vm4 = vcmp.ge.f32.partialorder %v15867_v47, 0.0  ;;  %v7122_v59 = vmul.f32 %v18091_v58, %v18000_v21  ;;  %v18093_v29 = vld [vmem:[#allocation138_spill] sm:$0xff] }
 0xc6a   :  { %7226 = vst [vmem:[#allocation6 + $0x108] sm:$0xff] %v7162_v62  ;;  %v7182_v20 = vsel %vm7054_vm13, %v15849_v10, %v7118_v27  ;;  %vm7058_vm5 = vcmp.ge.f32.partialorder %v18091_v58, 0.0  ;;  %v7123_v8 = vmul.f32 %v18092_v43, %v18000_v21  ;;  %v7183_v39 = vsel %vm7055_vm14, %v15855_v63, %v7119_v52  ;;  %v18094_v10 = vld [vmem:[#allocation144_spill] sm:$0xff]  ;;  %v18095_v63 = vld [vmem:[#allocation157_spill] sm:$0xff] }
 0xc6b   :  { %7227 = vst [vmem:[#allocation6 + $0x110] sm:$0xff] %v7163_v1  ;;  %vm7059_vm6 = vcmp.ge.f32.partialorder %v18092_v43, 0.0  ;;  %v7124_v56 = vmul.f32 %v18093_v29, %v18000_v21  ;;  %v7184_v45 = vsel %vm7056_vm15, %v15861_v61, %v7120_v18  ;;  %vm7060_vm7 = vcmp.ge.f32.partialorder %v18093_v29, 0.0  ;;  %v18096_v61 = vld [vmem:[#allocation139_spill] sm:$0xff] }
 0xc6c   :  { %7228 = vst [vmem:[#allocation6 + $0x118] sm:$0xff] %v7164_v25  ;;  %v7125_v7 = vmul.f32 %v18094_v10, %v18000_v21  ;;  %v7185_v34 = vsel %vm7057_vm4, %v15867_v47, %v7121_v38  ;;  %vm7061_vm0 = vcmp.ge.f32.partialorder %v18094_v10, 0.0  ;;  %v7126_v17 = vmul.f32 %v18095_v63, %v18000_v21 }
 0xc6d   :  { %7229 = vst [vmem:[#allocation6 + $0x120] sm:$0xff] %v7165_v54  ;;  %v7186_v60 = vsel %vm7058_vm5, %v18091_v58, %v7122_v59  ;;  %vm7062_vm1 = vcmp.ge.f32.partialorder %v18095_v63, 0.0  ;;  %v7127_v28 = vmul.f32 %v18096_v61, %v18000_v21  ;;  %v7187_v33 = vsel %vm7059_vm6, %v18092_v43, %v7123_v8 }
 0xc6e   :  { %7230 = vst [vmem:[#allocation6 + $0x128] sm:$0xff] %v7166_v13  ;;  %vm7063_vm2 = vcmp.ge.f32.partialorder %v18096_v61, 0.0  ;;  %v7188_v47 = vsel %vm7060_vm7, %v18093_v29, %v7124_v56  ;;  %v7189_v35 = vsel %vm7061_vm0, %v18094_v10, %v7125_v7  ;;  %v7190_v5 = vsel %vm7062_vm1, %v18095_v63, %v7126_v17 }
 0xc6f   :  { %7231 = vst [vmem:[#allocation6 + $0x130] sm:$0xff] %v7167_v14  ;;  %v7191_v21 = vsel %vm7063_vm2, %v18096_v61, %v7127_v28 }
 0xc70   :  { %7232 = vst [vmem:[#allocation6 + $0x138] sm:$0xff] %v7168_v11 }
 0xc71   :  { %7233 = vst [vmem:[#allocation6 + $0x140] sm:$0xff] %v7169_v12 }
 0xc72   :  { %7234 = vst [vmem:[#allocation6 + $0x148] sm:$0xff] %v7170_v31 }
 0xc73   :  { %7235 = vst [vmem:[#allocation6 + $0x150] sm:$0xff] %v7171_v2 }
 0xc74   :  { %7236 = vst [vmem:[#allocation6 + $0x158] sm:$0xff] %v7172_v36 }
 0xc75   :  { %7237 = vst [vmem:[#allocation6 + $0x160] sm:$0xff] %v7173_v3 }
 0xc76   :  { %7238 = vst [vmem:[#allocation6 + $0x168] sm:$0xff] %v7174_v15 }
 0xc77   :  { %7239 = vst [vmem:[#allocation6 + $0x170] sm:$0xff] %v7175_v4 }
 0xc78   :  { %7240 = vst [vmem:[#allocation6 + $0x178] sm:$0xff] %v7176_v6 }
 0xc79   :  { %7241 = vst [vmem:[#allocation6 + $0x180] sm:$0xff] %v7177_v0 }
 0xc7a   :  { %7242 = vst [vmem:[#allocation6 + $0x188] sm:$0xff] %v7178_v22 }
 0xc7b   :  { %7243 = vst [vmem:[#allocation6 + $0x190] sm:$0xff] %v7179_v53 }
 0xc7c   :  { %7244 = vst [vmem:[#allocation6 + $0x198] sm:$0xff] %v7180_v46 }
 0xc7d   :  { %7245 = vst [vmem:[#allocation6 + $0x1a0] sm:$0xff] %v7181_v26 }
 0xc7e   :  { %7246 = vst [vmem:[#allocation6 + $0x1a8] sm:$0xff] %v7182_v20 }
 0xc7f   :  { %7247 = vst [vmem:[#allocation6 + $0x1b0] sm:$0xff] %v7183_v39 }
 0xc80   :  { %7248 = vst [vmem:[#allocation6 + $0x1b8] sm:$0xff] %v7184_v45 }
 0xc81   :  { %7249 = vst [vmem:[#allocation6 + $0x1c0] sm:$0xff] %v7185_v34 }
 0xc82   :  { %7250 = vst [vmem:[#allocation6 + $0x1c8] sm:$0xff] %v7186_v60 }
 0xc83   :  { %7251 = vst [vmem:[#allocation6 + $0x1d0] sm:$0xff] %v7187_v33 }
 0xc84   :  { %7252 = vst [vmem:[#allocation6 + $0x1d8] sm:$0xff] %v7188_v47 }
 0xc85   :  { %7253 = vst [vmem:[#allocation6 + $0x1e0] sm:$0xff] %v7189_v35 }
 0xc86   :  { %7254 = vst [vmem:[#allocation6 + $0x1e8] sm:$0xff] %v7190_v5 }
 0xc87   :  { %7255 = vst [vmem:[#allocation6 + $0x1f0] sm:$0xff] %v7191_v21 }
 0xc88   :  { %7269 = dma.vmem_to_hbm [thread:$0]  %s7262_s30, 8192, %s7264_s7, [#allocation5], %s7665_s20, %s7665_s20, %s7666_s21  }
 0xc89   :  { %7662 = dma.done.wait [#allocation5], 8192  }
 0xc8a   :  { %7663 = vsyncadd [#allocation5], 4294959104 }
 0xc8b   :  { %7274 = vsyncpa [#allocation4], 1 }
 0xc8c   :  { %7275 = vsyncpa [#allocation5], 1 }

</bundles_post_ra>
